<compile_context>
chip_gen: v7x
topology: tpu7x:2x2x1
jax: 0.10.0
libtpu: 0.0.40
codegen_flags: <defaults>
</compile_context>

<pallas_src>
import functools
import math

import jax
import jax.numpy as jnp
from jax import lax
from jax.experimental import pallas as pl
from jax.experimental.pallas import tpu as pltpu

# ----------------------------- small config ---------------------------------
BATCH = 2
SEQ = 4                 # input_dim[0]  (Conv3d in_channels)
C_IN = 3                # input_dim[1]
H_IN = 16               # input_dim[2]
W_IN = 16               # input_dim[3]
SPATIAL_CH = 4          # spatial_channels (== transformer sequence length)
FEAT_CH = [4, 8, 8]     # feature_channels (3 Stacks -> spatial /8)
EMBED = 32              # embedding_dim
FF_DIM = 32             # ff_dim
HEADS = 4               # transformer_heads
DH = EMBED // HEADS
N_ACTIONS = 8
IN_FEATURES = FEAT_CH[-1] * (H_IN // 2 ** len(FEAT_CH)) * (W_IN // 2 ** len(FEAT_CH))


# ----------------------------- Pallas kernels --------------------------------
def _mm_bias_kernel(x_ref, w_ref, b_ref, o_ref, *, relu):
    """Single-step matmul + bias (+ReLU); bf16 MXU feed, f32 accumulation."""
    y = jnp.dot(x_ref[...].astype(jnp.bfloat16),
                w_ref[...].astype(jnp.bfloat16),
                preferred_element_type=jnp.float32) + b_ref[...]
    if relu:
        y = jnp.maximum(y, 0.0)
    o_ref[...] = y


def matmul_bias(x, w, b, relu=False):
    """y = (relu)(x @ w + b) in a single grid step (whole operands in VMEM)."""
    M, K = x.shape
    N = w.shape[1]
    return pl.pallas_call(
        functools.partial(_mm_bias_kernel, relu=relu),
        out_shape=jax.ShapeDtypeStruct((M, N), jnp.float32),
        grid=(1,),
        in_specs=[pl.BlockSpec((M, K), lambda i: (0, 0)),
                  pl.BlockSpec((K, N), lambda i: (0, 0)),
                  pl.BlockSpec((1, N), lambda i: (0, 0))],
        out_specs=pl.BlockSpec((M, N), lambda i: (0, 0)),
    )(x, w, b)


def _stack_kernel(p_ref, w_ref, b_ref, o_ref, *, k):
    """Fused Conv3x3(+folded BN)+bias+ReLU+MaxPool2.

    p_ref : (M, k)     4x4/stride-2 input patches, rows ordered (n, ho, wo)
    w_ref : (4*k, Co)  one (k, Co) weight block per 2x2 pool position
    The 2x2 max-pool is an elementwise max over the 4 per-position results.
    """
    x = p_ref[...].astype(jnp.bfloat16)
    b = b_ref[...]
    out = None
    for p in range(4):
        w = w_ref[p * k:(p + 1) * k, :].astype(jnp.bfloat16)
        y = jnp.maximum(
            jnp.dot(x, w, preferred_element_type=jnp.float32) + b, 0.0)
        out = y if out is None else jnp.maximum(out, y)
    o_ref[...] = out


def conv_stack(pats, w_stacked, b):
    M, K = pats.shape
    Co = b.shape[1]
    k = w_stacked.shape[0] // 4
    return pl.pallas_call(
        functools.partial(_stack_kernel, k=k),
        out_shape=jax.ShapeDtypeStruct((M, Co), jnp.float32),
        grid=(1,),
        in_specs=[pl.BlockSpec((M, K), lambda i: (0, 0)),
                  pl.BlockSpec((4 * k, Co), lambda i: (0, 0)),
                  pl.BlockSpec((1, Co), lambda i: (0, 0))],
        out_specs=pl.BlockSpec((M, Co), lambda i: (0, 0)),
    )(pats, w_stacked, b)


def _head_kernel(x_ref, we1, be1, we2, be2, pe_ref,
                 wqkv, bqkv, wo, bo, wf1, bf1, wf2, bf2,
                 aa, am, wcls, bcls,
                 logits_ref, qkv_s, attn_s):
    """Embedder + PE + normalized transformer block + classifier, fully fused."""
    bf16 = jnp.bfloat16
    f32 = jnp.float32

    def mm(x, w_ref):
        return jnp.dot(x.astype(bf16), w_ref[...].astype(bf16),
                       preferred_element_type=f32)

    def l2n(t):
        return t * lax.rsqrt(jnp.sum(t * t, axis=-1, keepdims=True) + 1e-12)

    # ---- embedder: Linear -> ReLU -> Linear, + positional encoding ----
    x = x_ref[...]                                          # (B*S, IN_FEATURES)
    e = jnp.maximum(mm(x, we1) + be1[...], 0.0)
    h = mm(e, we2) + be2[...] + pe_ref[...]                 # (B*S, E)

    # ---- attention block: LayerNorm (no affine) -> fused q/k/v+in_proj ----
    mu = jnp.mean(h, axis=-1, keepdims=True)
    xc = h - mu
    var = jnp.mean(xc * xc, axis=-1, keepdims=True)
    xn = xc * lax.rsqrt(var + 1e-5)
    qkv_s[...] = mm(xn, wqkv) + bqkv[...]                   # (B*S, 3E)

    # ---- all B*HEADS causal attention heads (unrolled, VMEM-resident) ----
    scale = 1.0 / math.sqrt(DH)
    row = lax.broadcasted_iota(jnp.int32, (SPATIAL_CH, SPATIAL_CH), 0)
    col = lax.broadcasted_iota(jnp.int32, (SPATIAL_CH, SPATIAL_CH), 1)
    for b in range(BATCH):
        r0 = b * SPATIAL_CH
        for hd in range(HEADS):
            c0 = hd * DH
            q = qkv_s[r0:r0 + SPATIAL_CH, c0:c0 + DH]
            k = qkv_s[r0:r0 + SPATIAL_CH, EMBED + c0:EMBED + c0 + DH]
            v = qkv_s[r0:r0 + SPATIAL_CH, 2 * EMBED + c0:2 * EMBED + c0 + DH]
            s = lax.dot_general(q, k, (((1,), (1,)), ((), ())),
                                preferred_element_type=f32) * scale
            s = jnp.where(col > row, -jnp.inf, s)           # causal mask
            m = jnp.max(s, axis=-1, keepdims=True)
            p = jnp.exp(s - m)
            p = p * pl.reciprocal(jnp.sum(p, axis=-1, keepdims=True),
                                  approx=True)
            attn_s[r0:r0 + SPATIAL_CH, c0:c0 + DH] = jnp.dot(
                p, v, preferred_element_type=f32)

    ao = mm(attn_s[...], wo) + bo[...]                      # out_proj
    h_A = l2n(ao)
    h1 = l2n(h + aa[...] * (h_A - h))

    # ---- MLP block ----
    m1 = jnp.maximum(mm(h1, wf1) + bf1[...], 0.0)
    m2 = mm(m1, wf2) + bf2[...]
    h_M = l2n(m2)
    h2 = l2n(h1 + am[...] * (h_M - h1))

    # ---- classifier ----
    logits_ref[...] = mm(h2, wcls) + bcls[...]


def transformer_head(flat, hp):
    M = flat.shape[0]
    args = (flat, hp["we1"], hp["be1"], hp["we2"], hp["be2"], hp["pe"],
            hp["wqkv"], hp["bqkv"], hp["wo"], hp["bo"],
            hp["wf1"], hp["bf1"], hp["wf2"], hp["bf2"],
            hp["alpha_a"], hp["alpha_m"], hp["wcls"], hp["bcls"])
    return pl.pallas_call(
        _head_kernel,
        out_shape=jax.ShapeDtypeStruct((M, N_ACTIONS), jnp.float32),
        grid=(1,),
        in_specs=[pl.BlockSpec(a.shape, lambda i: (0, 0)) for a in args],
        out_specs=pl.BlockSpec((M, N_ACTIONS), lambda i: (0, 0)),
        scratch_shapes=[pltpu.VMEM((M, 3 * EMBED), jnp.float32),
                        pltpu.VMEM((M, EMBED), jnp.float32)],
    )(*args)


# ----------------------------- parameter init --------------------------------
def init_params(key):
    keys = iter(jax.random.split(key, 64))

    def nrm(shape, s=0.05):
        return (s * jax.random.normal(next(keys), shape)).astype(jnp.float32)

    p = {}
    # Conv3d(SEQ, SPATIAL_CH, kernel=(1,1,5), pad=(0,0,2)) + BN3d
    p["conv3d_w"] = nrm((SPATIAL_CH, SEQ, 5))
    p["conv3d_b"] = nrm((SPATIAL_CH,))
    p["bn3_g"] = 1.0 + nrm((SPATIAL_CH,), 0.1)
    p["bn3_b"] = nrm((SPATIAL_CH,), 0.1)
    # Stacks: Conv3x3(pad=1) + BN2d + ReLU + MaxPool2
    stacks = []
    cin = C_IN
    for cout in FEAT_CH:
        stacks.append((nrm((cout, cin, 3, 3)), nrm((cout,)),
                       1.0 + nrm((cout,), 0.1), nrm((cout,), 0.1)))
        cin = cout
    p["stacks"] = stacks
    # Embedder
    p["emb_w1"] = nrm((EMBED // 2, IN_FEATURES))
    p["emb_b1"] = nrm((EMBED // 2,))
    p["emb_w2"] = nrm((EMBED, EMBED // 2))
    p["emb_b2"] = nrm((EMBED,))
    # Transformer block
    p["wq"], p["bq"] = nrm((EMBED, EMBED)), nrm((EMBED,))
    p["wk"], p["bk"] = nrm((EMBED, EMBED)), nrm((EMBED,))
    p["wv"], p["bv"] = nrm((EMBED, EMBED)), nrm((EMBED,))
    p["in_proj_w"] = nrm((3 * EMBED, EMBED))
    p["in_proj_b"] = nrm((3 * EMBED,))
    p["out_proj_w"] = nrm((EMBED, EMBED))
    p["out_proj_b"] = nrm((EMBED,))
    p["ff_w1"], p["ff_b1"] = nrm((FF_DIM, EMBED)), nrm((FF_DIM,))
    p["ff_w2"], p["ff_b2"] = nrm((EMBED, FF_DIM)), nrm((EMBED,))
    p["alpha_A"] = 0.1 * jnp.ones((EMBED,), jnp.float32)
    p["alpha_M"] = 0.1 * jnp.ones((EMBED,), jnp.float32)
    # Classifier
    p["cls_w"], p["cls_b"] = nrm((N_ACTIONS, EMBED)), nrm((N_ACTIONS,))
    return p


def positional_encoding(S, d):
    pos = jnp.arange(S, dtype=jnp.float32)[:, None]
    div = jnp.exp(jnp.arange(0, d, 2, dtype=jnp.float32) * (-math.log(10000.0) / d))
    pe = jnp.zeros((S, d), jnp.float32)
    pe = pe.at[:, 0::2].set(jnp.sin(pos * div))
    pe = pe.at[:, 1::2].set(jnp.cos(pos * div))
    return pe


def _expand_stack_weight(cw, cb, gamma, beta, eps=1e-5):
    """Fold eval BN into a (Co,Ci,3,3) conv and expand it for the fused
    conv+ReLU+maxpool2 kernel: one (16*Ci, Co) block per 2x2 pool position,
    defined over the 4x4/stride-2 input patch, stacked on rows."""
    Co, Ci = cw.shape[0], cw.shape[1]
    s = gamma / jnp.sqrt(1.0 + eps)                 # running var=1, mean=0
    wf = cw * s[:, None, None, None]
    bf = cb * s + beta
    wt = jnp.transpose(wf, (2, 3, 1, 0))            # (dy, dx, ci, co)
    blocks = []
    for (py, px) in ((0, 0), (0, 1), (1, 0), (1, 1)):
        wp = jnp.zeros((4, 4, Ci, Co), jnp.float32)
        wp = wp.at[py:py + 3, px:px + 3, :, :].set(wt)
        blocks.append(wp.reshape(16 * Ci, Co))
    return jnp.concatenate(blocks, axis=0), bf.reshape(1, Co)


def prepare_params(p):
    """One-time prep: fold BN, pre-transpose / pre-concatenate / pre-compose
    all weights into the layouts the kernels consume (no per-forward .T)."""
    prep = {}
    # Conv3d + BN3d folded; weight laid out (SEQ*5 taps, SPATIAL_CH)
    s3 = p["bn3_g"] / jnp.sqrt(1.0 + 1e-5)
    prep["w3"] = p["conv3d_w"].reshape(SPATIAL_CH, SEQ * 5).T * s3[None, :]
    prep["b3"] = (p["conv3d_b"] * s3 + p["bn3_b"]).reshape(1, SPATIAL_CH)
    # Stacks
    prep["stacks"] = [_expand_stack_weight(cw, cb, g, bt)
                      for (cw, cb, g, bt) in p["stacks"]]
    # Embedder
    prep["we1"] = p["emb_w1"].T
    prep["be1"] = p["emb_b1"].reshape(1, -1)
    prep["we2"] = p["emb_w2"].T
    prep["be2"] = p["emb_b2"].reshape(1, -1)
    prep["pe"] = jnp.tile(positional_encoding(SPATIAL_CH, EMBED), (BATCH, 1))
    # Compose q/k/v_proj with nn.MultiheadAttention's in_proj, concat to (E,3E)
    E = EMBED
    wi, bi = p["in_proj_w"], p["in_proj_b"]

    def compose(wa, ba, wb, bb):
        # y = (x @ wa.T + ba) @ wb.T + bb  ->  x @ (wa.T @ wb.T) + (ba @ wb.T + bb)
        return wa.T @ wb.T, ba @ wb.T + bb

    wq, bq = compose(p["wq"], p["bq"], wi[:E], bi[:E])
    wk, bk = compose(p["wk"], p["bk"], wi[E:2 * E], bi[E:2 * E])
    wv, bv = compose(p["wv"], p["bv"], wi[2 * E:], bi[2 * E:])
    prep["wqkv"] = jnp.concatenate([wq, wk, wv], axis=1)          # (E, 3E)
    prep["bqkv"] = jnp.concatenate([bq, bk, bv]).reshape(1, 3 * E)
    prep["wo"] = p["out_proj_w"].T
    prep["bo"] = p["out_proj_b"].reshape(1, -1)
    prep["wf1"] = p["ff_w1"].T
    prep["bf1"] = p["ff_b1"].reshape(1, -1)
    prep["wf2"] = p["ff_w2"].T
    prep["bf2"] = p["ff_b2"].reshape(1, -1)
    prep["alpha_a"] = p["alpha_A"].reshape(1, -1)
    prep["alpha_m"] = p["alpha_M"].reshape(1, -1)
    prep["wcls"] = p["cls_w"].T
    prep["bcls"] = p["cls_b"].reshape(1, -1)
    return prep


# ------------------------------ forward pass ---------------------------------
def vpt_forward(x, prep):
    B, S_in, C, H, W = x.shape

    # ---- _3d_convo: permute -> Conv3d(1,1,5)+BN3d+ReLU (eval) -> permute ----
    xp = jnp.transpose(x, (0, 1, 3, 4, 2))                             # (B,S,H,W,C)
    xpad = jnp.pad(xp, ((0, 0), (0, 0), (0, 0), (0, 0), (2, 2)))
    cols = jnp.stack([xpad[..., t:t + C] for t in range(5)], axis=-1)  # (B,S,H,W,C,5)
    cols = jnp.transpose(cols, (0, 2, 3, 4, 1, 5)).reshape(B * H * W * C, S_in * 5)
    y = matmul_bias(cols, prep["w3"], prep["b3"], relu=True)           # (BHWC, SC)
    f = jnp.transpose(y.reshape(B, H, W, C, SPATIAL_CH), (0, 4, 1, 2, 3))
    f = f.reshape(B * SPATIAL_CH, H, W, C)                             # NHWC

    # ---- _2d_convo: fused Conv3x3+BN+ReLU+MaxPool2 Stacks ----
    for (We, be) in prep["stacks"]:
        N_, H_, W_, Ci = f.shape
        fp = jnp.pad(f, ((0, 0), (1, 1), (1, 1), (0, 0)))
        # 4x4 / stride-2 patches covering the 2x2 pool window of 3x3 convs
        pats = jnp.stack([fp[:, uy:uy + H_:2, ux:ux + W_:2, :]
                          for uy in range(4) for ux in range(4)], axis=3)
        pats = pats.reshape(N_ * (H_ // 2) * (W_ // 2), 16 * Ci)
        out = conv_stack(pats, We, be)                                 # pooled
        f = out.reshape(N_, H_ // 2, W_ // 2, be.shape[1])

    # ---- embedder + PE + normalized transformer + classifier (one kernel) ----
    Nf, Hf, Wf, Cf = f.shape
    flat = jnp.transpose(f, (0, 3, 1, 2)).reshape(Nf, Cf * Hf * Wf)    # NCHW flatten
    logits = transformer_head(flat, prep)
    return logits.reshape(B, SPATIAL_CH, N_ACTIONS)


# ----------------------------------- main ------------------------------------
if __name__ == "__main__":
    key = jax.random.PRNGKey(0)
    k_x, k_p = jax.random.split(key)
    x = jax.random.normal(k_x, (BATCH, SEQ, C_IN, H_IN, W_IN), dtype=jnp.float32)
    params = init_params(k_p)
    prep = prepare_params(params)        # one-time weight prep (BN fold, fusion)

    fwd = jax.jit(vpt_forward)
    logits = fwd(x, prep)
    jax.block_until_ready(logits)
    assert logits.shape == (BATCH, SPATIAL_CH, N_ACTIONS)
    assert bool(jnp.all(jnp.isfinite(logits)))
    print("KERNEL_OK")
</pallas_src>

<mosaic_0001>
module attributes {stable_mosaic.version = 11 : i64} {
  func.func @_mm_bias_kernel(%arg0: i32, %arg1: memref<1536x20xf32, #tpu.memory_space<vmem>>, %arg2: memref<20x4xf32, #tpu.memory_space<vmem>>, %arg3: memref<1x4xf32, #tpu.memory_space<vmem>>, %arg4: memref<1536x4xf32, #tpu.memory_space<vmem>>) attributes {dimension_semantics = [#tpu.dimension_semantics<arbitrary>], iteration_bounds = array<i64: 1>, scalar_prefetch = 0 : i64, scratch_operands = 0 : i64, tpu.core_type = #tpu.core_type<tc>, window_params = [{pipeline_mode = #tpu.pipeline_mode<synchronous>, transform_indices = @transform_0, window_bounds = array<i64: 1536, 20>}, {pipeline_mode = #tpu.pipeline_mode<synchronous>, transform_indices = @transform_1, window_bounds = array<i64: 20, 4>}, {pipeline_mode = #tpu.pipeline_mode<synchronous>, transform_indices = @transform_2, window_bounds = array<i64: 1, 4>}, {pipeline_mode = #tpu.pipeline_mode<synchronous>, transform_indices = @transform_3, window_bounds = array<i64: 1536, 4>}]} {
    %c0 = arith.constant 0 : index
    %c0_0 = arith.constant 0 : index
    %0 = vector.load %arg1[%c0, %c0_0] : memref<1536x20xf32, #tpu.memory_space<vmem>>, vector<1536x20xf32>
    %1 = arith.truncf %0 : vector<1536x20xf32> to vector<1536x20xbf16>
    %c0_1 = arith.constant 0 : index
    %c0_2 = arith.constant 0 : index
    %2 = vector.load %arg2[%c0_1, %c0_2] : memref<20x4xf32, #tpu.memory_space<vmem>>, vector<20x4xf32>
    %3 = arith.truncf %2 : vector<20x4xf32> to vector<20x4xbf16>
    %cst = arith.constant dense<0.000000e+00> : vector<1536x4xf32>
    %4 = tpu.matmul %1, %3, %cst {dimension_numbers = #tpu.dot_dimension_numbers<[1], [0], [0], [1], [0, 0, 1, 1], [], []>} : vector<1536x20xbf16>, vector<20x4xbf16>, vector<1536x4xf32> -> vector<1536x4xf32>
    %c0_3 = arith.constant 0 : index
    %c0_4 = arith.constant 0 : index
    %5 = vector.load %arg3[%c0_3, %c0_4] : memref<1x4xf32, #tpu.memory_space<vmem>>, vector<1x4xf32>
    %6 = vector.broadcast %5 : vector<1x4xf32> to vector<1536x4xf32>
    %7 = arith.addf %4, %6 : vector<1536x4xf32>
    %cst_5 = arith.constant 0.000000e+00 : f32
    %8 = vector.broadcast %cst_5 : f32 to vector<1536x4xf32>
    %9 = arith.maximumf %7, %8 : vector<1536x4xf32>
    %c0_6 = arith.constant 0 : index
    %c0_7 = arith.constant 0 : index
    %10 = vector.load %arg4[%c0_6, %c0_7] : memref<1536x4xf32, #tpu.memory_space<vmem>>, vector<1536x4xf32>
    tpu.vector_store %arg4[%c0_6, %c0_7], %9 {strides = array<i32>} : memref<1536x4xf32, #tpu.memory_space<vmem>>, vector<1536x4xf32>,
    return
  }
  func.func @transform_0(%arg0: i32) -> (i32, i32) {
    %c0_i32 = arith.constant 0 : i32
    %c0_i32_0 = arith.constant 0 : i32
    %c0_i32_1 = arith.constant 0 : i32
    return %c0_i32, %c0_i32_0 : i32, i32
  }
  func.func @transform_1(%arg0: i32) -> (i32, i32) {
    %c0_i32 = arith.constant 0 : i32
    %c0_i32_0 = arith.constant 0 : i32
    %c0_i32_1 = arith.constant 0 : i32
    return %c0_i32, %c0_i32_0 : i32, i32
  }
  func.func @transform_2(%arg0: i32) -> (i32, i32) {
    %c0_i32 = arith.constant 0 : i32
    %c0_i32_0 = arith.constant 0 : i32
    %c0_i32_1 = arith.constant 0 : i32
    return %c0_i32, %c0_i32_0 : i32, i32
  }
  func.func @transform_3(%arg0: i32) -> (i32, i32) {
    %c0_i32 = arith.constant 0 : i32
    %c0_i32_0 = arith.constant 0 : i32
    %c0_i32_1 = arith.constant 0 : i32
    return %c0_i32, %c0_i32_0 : i32, i32
  }
}

module attributes {stable_mosaic.version = 11 : i64} {
  func.func @_stack_kernel(%arg0: i32, %arg1: memref<512x48xf32, #tpu.memory_space<vmem>>, %arg2: memref<192x4xf32, #tpu.memory_space<vmem>>, %arg3: memref<1x4xf32, #tpu.memory_space<vmem>>, %arg4: memref<512x4xf32, #tpu.memory_space<vmem>>) attributes {dimension_semantics = [#tpu.dimension_semantics<arbitrary>], iteration_bounds = array<i64: 1>, scalar_prefetch = 0 : i64, scratch_operands = 0 : i64, tpu.core_type = #tpu.core_type<tc>, window_params = [{pipeline_mode = #tpu.pipeline_mode<synchronous>, transform_indices = @transform_0, window_bounds = array<i64: 512, 48>}, {pipeline_mode = #tpu.pipeline_mode<synchronous>, transform_indices = @transform_1, window_bounds = array<i64: 192, 4>}, {pipeline_mode = #tpu.pipeline_mode<synchronous>, transform_indices = @transform_2, window_bounds = array<i64: 1, 4>}, {pipeline_mode = #tpu.pipeline_mode<synchronous>, transform_indices = @transform_3, window_bounds = array<i64: 512, 4>}]} {
    %c0 = arith.constant 0 : index
    %c0_0 = arith.constant 0 : index
    %0 = vector.load %arg1[%c0, %c0_0] : memref<512x48xf32, #tpu.memory_space<vmem>>, vector<512x48xf32>
    %1 = arith.truncf %0 : vector<512x48xf32> to vector<512x48xbf16>
    %c0_1 = arith.constant 0 : index
    %c0_2 = arith.constant 0 : index
    %2 = vector.load %arg3[%c0_1, %c0_2] : memref<1x4xf32, #tpu.memory_space<vmem>>, vector<1x4xf32>
    %c0_3 = arith.constant 0 : index
    %c0_4 = arith.constant 0 : index
    %3 = vector.load %arg2[%c0_3, %c0_4] : memref<192x4xf32, #tpu.memory_space<vmem>>, vector<48x4xf32>
    %4 = arith.truncf %3 : vector<48x4xf32> to vector<48x4xbf16>
    %cst = arith.constant dense<0.000000e+00> : vector<512x4xf32>
    %5 = tpu.matmul %1, %4, %cst {dimension_numbers = #tpu.dot_dimension_numbers<[1], [0], [0], [1], [0, 0, 1, 1], [], []>} : vector<512x48xbf16>, vector<48x4xbf16>, vector<512x4xf32> -> vector<512x4xf32>
    %6 = vector.broadcast %2 : vector<1x4xf32> to vector<512x4xf32>
    %7 = arith.addf %5, %6 : vector<512x4xf32>
    %cst_5 = arith.constant 0.000000e+00 : f32
    %8 = vector.broadcast %cst_5 : f32 to vector<512x4xf32>
    %9 = arith.maximumf %7, %8 : vector<512x4xf32>
    %c48 = arith.constant 48 : index
    %c0_6 = arith.constant 0 : index
    %10 = vector.load %arg2[%c48, %c0_6] : memref<192x4xf32, #tpu.memory_space<vmem>>, vector<48x4xf32>
    %11 = arith.truncf %10 : vector<48x4xf32> to vector<48x4xbf16>
    %cst_7 = arith.constant dense<0.000000e+00> : vector<512x4xf32>
    %12 = tpu.matmul %1, %11, %cst_7 {dimension_numbers = #tpu.dot_dimension_numbers<[1], [0], [0], [1], [0, 0, 1, 1], [], []>} : vector<512x48xbf16>, vector<48x4xbf16>, vector<512x4xf32> -> vector<512x4xf32>
    %13 = vector.broadcast %2 : vector<1x4xf32> to vector<512x4xf32>
    %14 = arith.addf %12, %13 : vector<512x4xf32>
    %cst_8 = arith.constant 0.000000e+00 : f32
    %15 = vector.broadcast %cst_8 : f32 to vector<512x4xf32>
    %16 = arith.maximumf %14, %15 : vector<512x4xf32>
    %17 = arith.maximumf %9, %16 : vector<512x4xf32>
    %c96 = arith.constant 96 : index
    %c0_9 = arith.constant 0 : index
    %18 = vector.load %arg2[%c96, %c0_9] : memref<192x4xf32, #tpu.memory_space<vmem>>, vector<48x4xf32>
    %19 = arith.truncf %18 : vector<48x4xf32> to vector<48x4xbf16>
    %cst_10 = arith.constant dense<0.000000e+00> : vector<512x4xf32>
    %20 = tpu.matmul %1, %19, %cst_10 {dimension_numbers = #tpu.dot_dimension_numbers<[1], [0], [0], [1], [0, 0, 1, 1], [], []>} : vector<512x48xbf16>, vector<48x4xbf16>, vector<512x4xf32> -> vector<512x4xf32>
    %21 = vector.broadcast %2 : vector<1x4xf32> to vector<512x4xf32>
    %22 = arith.addf %20, %21 : vector<512x4xf32>
    %cst_11 = arith.constant 0.000000e+00 : f32
    %23 = vector.broadcast %cst_11 : f32 to vector<512x4xf32>
    %24 = arith.maximumf %22, %23 : vector<512x4xf32>
    %25 = arith.maximumf %17, %24 : vector<512x4xf32>
    %c144 = arith.constant 144 : index
    %c0_12 = arith.constant 0 : index
    %26 = vector.load %arg2[%c144, %c0_12] : memref<192x4xf32, #tpu.memory_space<vmem>>, vector<48x4xf32>
    %27 = arith.truncf %26 : vector<48x4xf32> to vector<48x4xbf16>
    %cst_13 = arith.constant dense<0.000000e+00> : vector<512x4xf32>
    %28 = tpu.matmul %1, %27, %cst_13 {dimension_numbers = #tpu.dot_dimension_numbers<[1], [0], [0], [1], [0, 0, 1, 1], [], []>} : vector<512x48xbf16>, vector<48x4xbf16>, vector<512x4xf32> -> vector<512x4xf32>
    %29 = vector.broadcast %2 : vector<1x4xf32> to vector<512x4xf32>
    %30 = arith.addf %28, %29 : vector<512x4xf32>
    %cst_14 = arith.constant 0.000000e+00 : f32
    %31 = vector.broadcast %cst_14 : f32 to vector<512x4xf32>
    %32 = arith.maximumf %30, %31 : vector<512x4xf32>
    %33 = arith.maximumf %25, %32 : vector<512x4xf32>
    %c0_15 = arith.constant 0 : index
    %c0_16 = arith.constant 0 : index
    %34 = vector.load %arg4[%c0_15, %c0_16] : memref<512x4xf32, #tpu.memory_space<vmem>>, vector<512x4xf32>
    tpu.vector_store %arg4[%c0_15, %c0_16], %33 {strides = array<i32>} : memref<512x4xf32, #tpu.memory_space<vmem>>, vector<512x4xf32>,
    return
  }
  func.func @transform_0(%arg0: i32) -> (i32, i32) {
    %c0_i32 = arith.constant 0 : i32
    %c0_i32_0 = arith.constant 0 : i32
    %c0_i32_1 = arith.constant 0 : i32
    return %c0_i32, %c0_i32_0 : i32, i32
  }
  func.func @transform_1(%arg0: i32) -> (i32, i32) {
    %c0_i32 = arith.constant 0 : i32
    %c0_i32_0 = arith.constant 0 : i32
    %c0_i32_1 = arith.constant 0 : i32
    return %c0_i32, %c0_i32_0 : i32, i32
  }
  func.func @transform_2(%arg0: i32) -> (i32, i32) {
    %c0_i32 = arith.constant 0 : i32
    %c0_i32_0 = arith.constant 0 : i32
    %c0_i32_1 = arith.constant 0 : i32
    return %c0_i32, %c0_i32_0 : i32, i32
  }
  func.func @transform_3(%arg0: i32) -> (i32, i32) {
    %c0_i32 = arith.constant 0 : i32
    %c0_i32_0 = arith.constant 0 : i32
    %c0_i32_1 = arith.constant 0 : i32
    return %c0_i32, %c0_i32_0 : i32, i32
  }
}

module attributes {stable_mosaic.version = 11 : i64} {
  func.func @_stack_kernel(%arg0: i32, %arg1: memref<128x64xf32, #tpu.memory_space<vmem>>, %arg2: memref<256x8xf32, #tpu.memory_space<vmem>>, %arg3: memref<1x8xf32, #tpu.memory_space<vmem>>, %arg4: memref<128x8xf32, #tpu.memory_space<vmem>>) attributes {dimension_semantics = [#tpu.dimension_semantics<arbitrary>], iteration_bounds = array<i64: 1>, scalar_prefetch = 0 : i64, scratch_operands = 0 : i64, tpu.core_type = #tpu.core_type<tc>, window_params = [{pipeline_mode = #tpu.pipeline_mode<synchronous>, transform_indices = @transform_0, window_bounds = array<i64: 128, 64>}, {pipeline_mode = #tpu.pipeline_mode<synchronous>, transform_indices = @transform_1, window_bounds = array<i64: 256, 8>}, {pipeline_mode = #tpu.pipeline_mode<synchronous>, transform_indices = @transform_2, window_bounds = array<i64: 1, 8>}, {pipeline_mode = #tpu.pipeline_mode<synchronous>, transform_indices = @transform_3, window_bounds = array<i64: 128, 8>}]} {
    %c0 = arith.constant 0 : index
    %c0_0 = arith.constant 0 : index
    %0 = vector.load %arg1[%c0, %c0_0] : memref<128x64xf32, #tpu.memory_space<vmem>>, vector<128x64xf32>
    %1 = arith.truncf %0 : vector<128x64xf32> to vector<128x64xbf16>
    %c0_1 = arith.constant 0 : index
    %c0_2 = arith.constant 0 : index
    %2 = vector.load %arg3[%c0_1, %c0_2] : memref<1x8xf32, #tpu.memory_space<vmem>>, vector<1x8xf32>
    %c0_3 = arith.constant 0 : index
    %c0_4 = arith.constant 0 : index
    %3 = vector.load %arg2[%c0_3, %c0_4] : memref<256x8xf32, #tpu.memory_space<vmem>>, vector<64x8xf32>
    %4 = arith.truncf %3 : vector<64x8xf32> to vector<64x8xbf16>
    %cst = arith.constant dense<0.000000e+00> : vector<128x8xf32>
    %5 = tpu.matmul %1, %4, %cst {dimension_numbers = #tpu.dot_dimension_numbers<[1], [0], [0], [1], [0, 0, 1, 1], [], []>} : vector<128x64xbf16>, vector<64x8xbf16>, vector<128x8xf32> -> vector<128x8xf32>
    %6 = vector.broadcast %2 : vector<1x8xf32> to vector<128x8xf32>
    %7 = arith.addf %5, %6 : vector<128x8xf32>
    %cst_5 = arith.constant 0.000000e+00 : f32
    %8 = vector.broadcast %cst_5 : f32 to vector<128x8xf32>
    %9 = arith.maximumf %7, %8 : vector<128x8xf32>
    %c64 = arith.constant 64 : index
    %c0_6 = arith.constant 0 : index
    %10 = vector.load %arg2[%c64, %c0_6] : memref<256x8xf32, #tpu.memory_space<vmem>>, vector<64x8xf32>
    %11 = arith.truncf %10 : vector<64x8xf32> to vector<64x8xbf16>
    %cst_7 = arith.constant dense<0.000000e+00> : vector<128x8xf32>
    %12 = tpu.matmul %1, %11, %cst_7 {dimension_numbers = #tpu.dot_dimension_numbers<[1], [0], [0], [1], [0, 0, 1, 1], [], []>} : vector<128x64xbf16>, vector<64x8xbf16>, vector<128x8xf32> -> vector<128x8xf32>
    %13 = vector.broadcast %2 : vector<1x8xf32> to vector<128x8xf32>
    %14 = arith.addf %12, %13 : vector<128x8xf32>
    %cst_8 = arith.constant 0.000000e+00 : f32
    %15 = vector.broadcast %cst_8 : f32 to vector<128x8xf32>
    %16 = arith.maximumf %14, %15 : vector<128x8xf32>
    %17 = arith.maximumf %9, %16 : vector<128x8xf32>
    %c128 = arith.constant 128 : index
    %c0_9 = arith.constant 0 : index
    %18 = vector.load %arg2[%c128, %c0_9] : memref<256x8xf32, #tpu.memory_space<vmem>>, vector<64x8xf32>
    %19 = arith.truncf %18 : vector<64x8xf32> to vector<64x8xbf16>
    %cst_10 = arith.constant dense<0.000000e+00> : vector<128x8xf32>
    %20 = tpu.matmul %1, %19, %cst_10 {dimension_numbers = #tpu.dot_dimension_numbers<[1], [0], [0], [1], [0, 0, 1, 1], [], []>} : vector<128x64xbf16>, vector<64x8xbf16>, vector<128x8xf32> -> vector<128x8xf32>
    %21 = vector.broadcast %2 : vector<1x8xf32> to vector<128x8xf32>
    %22 = arith.addf %20, %21 : vector<128x8xf32>
    %cst_11 = arith.constant 0.000000e+00 : f32
    %23 = vector.broadcast %cst_11 : f32 to vector<128x8xf32>
    %24 = arith.maximumf %22, %23 : vector<128x8xf32>
    %25 = arith.maximumf %17, %24 : vector<128x8xf32>
    %c192 = arith.constant 192 : index
    %c0_12 = arith.constant 0 : index
    %26 = vector.load %arg2[%c192, %c0_12] : memref<256x8xf32, #tpu.memory_space<vmem>>, vector<64x8xf32>
    %27 = arith.truncf %26 : vector<64x8xf32> to vector<64x8xbf16>
    %cst_13 = arith.constant dense<0.000000e+00> : vector<128x8xf32>
    %28 = tpu.matmul %1, %27, %cst_13 {dimension_numbers = #tpu.dot_dimension_numbers<[1], [0], [0], [1], [0, 0, 1, 1], [], []>} : vector<128x64xbf16>, vector<64x8xbf16>, vector<128x8xf32> -> vector<128x8xf32>
    %29 = vector.broadcast %2 : vector<1x8xf32> to vector<128x8xf32>
    %30 = arith.addf %28, %29 : vector<128x8xf32>
    %cst_14 = arith.constant 0.000000e+00 : f32
    %31 = vector.broadcast %cst_14 : f32 to vector<128x8xf32>
    %32 = arith.maximumf %30, %31 : vector<128x8xf32>
    %33 = arith.maximumf %25, %32 : vector<128x8xf32>
    %c0_15 = arith.constant 0 : index
    %c0_16 = arith.constant 0 : index
    %34 = vector.load %arg4[%c0_15, %c0_16] : memref<128x8xf32, #tpu.memory_space<vmem>>, vector<128x8xf32>
    tpu.vector_store %arg4[%c0_15, %c0_16], %33 {strides = array<i32>} : memref<128x8xf32, #tpu.memory_space<vmem>>, vector<128x8xf32>,
    return
  }
  func.func @transform_0(%arg0: i32) -> (i32, i32) {
    %c0_i32 = arith.constant 0 : i32
    %c0_i32_0 = arith.constant 0 : i32
    %c0_i32_1 = arith.constant 0 : i32
    return %c0_i32, %c0_i32_0 : i32, i32
  }
  func.func @transform_1(%arg0: i32) -> (i32, i32) {
    %c0_i32 = arith.constant 0 : i32
    %c0_i32_0 = arith.constant 0 : i32
    %c0_i32_1 = arith.constant 0 : i32
    return %c0_i32, %c0_i32_0 : i32, i32
  }
  func.func @transform_2(%arg0: i32) -> (i32, i32) {
    %c0_i32 = arith.constant 0 : i32
    %c0_i32_0 = arith.constant 0 : i32
    %c0_i32_1 = arith.constant 0 : i32
    return %c0_i32, %c0_i32_0 : i32, i32
  }
  func.func @transform_3(%arg0: i32) -> (i32, i32) {
    %c0_i32 = arith.constant 0 : i32
    %c0_i32_0 = arith.constant 0 : i32
    %c0_i32_1 = arith.constant 0 : i32
    return %c0_i32, %c0_i32_0 : i32, i32
  }
}

module attributes {stable_mosaic.version = 11 : i64} {
  func.func @_stack_kernel(%arg0: i32, %arg1: memref<32x128xf32, #tpu.memory_space<vmem>>, %arg2: memref<512x8xf32, #tpu.memory_space<vmem>>, %arg3: memref<1x8xf32, #tpu.memory_space<vmem>>, %arg4: memref<32x8xf32, #tpu.memory_space<vmem>>) attributes {dimension_semantics = [#tpu.dimension_semantics<arbitrary>], iteration_bounds = array<i64: 1>, scalar_prefetch = 0 : i64, scratch_operands = 0 : i64, tpu.core_type = #tpu.core_type<tc>, window_params = [{pipeline_mode = #tpu.pipeline_mode<synchronous>, transform_indices = @transform_0, window_bounds = array<i64: 32, 128>}, {pipeline_mode = #tpu.pipeline_mode<synchronous>, transform_indices = @transform_1, window_bounds = array<i64: 512, 8>}, {pipeline_mode = #tpu.pipeline_mode<synchronous>, transform_indices = @transform_2, window_bounds = array<i64: 1, 8>}, {pipeline_mode = #tpu.pipeline_mode<synchronous>, transform_indices = @transform_3, window_bounds = array<i64: 32, 8>}]} {
    %c0 = arith.constant 0 : index
    %c0_0 = arith.constant 0 : index
    %0 = vector.load %arg1[%c0, %c0_0] : memref<32x128xf32, #tpu.memory_space<vmem>>, vector<32x128xf32>
    %1 = arith.truncf %0 : vector<32x128xf32> to vector<32x128xbf16>
    %c0_1 = arith.constant 0 : index
    %c0_2 = arith.constant 0 : index
    %2 = vector.load %arg3[%c0_1, %c0_2] : memref<1x8xf32, #tpu.memory_space<vmem>>, vector<1x8xf32>
    %c0_3 = arith.constant 0 : index
    %c0_4 = arith.constant 0 : index
    %3 = vector.load %arg2[%c0_3, %c0_4] : memref<512x8xf32, #tpu.memory_space<vmem>>, vector<128x8xf32>
    %4 = arith.truncf %3 : vector<128x8xf32> to vector<128x8xbf16>
    %cst = arith.constant dense<0.000000e+00> : vector<32x8xf32>
    %5 = tpu.matmul %1, %4, %cst {dimension_numbers = #tpu.dot_dimension_numbers<[1], [0], [0], [1], [0, 0, 1, 1], [], []>} : vector<32x128xbf16>, vector<128x8xbf16>, vector<32x8xf32> -> vector<32x8xf32>
    %6 = vector.broadcast %2 : vector<1x8xf32> to vector<32x8xf32>
    %7 = arith.addf %5, %6 : vector<32x8xf32>
    %cst_5 = arith.constant 0.000000e+00 : f32
    %8 = vector.broadcast %cst_5 : f32 to vector<32x8xf32>
    %9 = arith.maximumf %7, %8 : vector<32x8xf32>
    %c128 = arith.constant 128 : index
    %c0_6 = arith.constant 0 : index
    %10 = vector.load %arg2[%c128, %c0_6] : memref<512x8xf32, #tpu.memory_space<vmem>>, vector<128x8xf32>
    %11 = arith.truncf %10 : vector<128x8xf32> to vector<128x8xbf16>
    %cst_7 = arith.constant dense<0.000000e+00> : vector<32x8xf32>
    %12 = tpu.matmul %1, %11, %cst_7 {dimension_numbers = #tpu.dot_dimension_numbers<[1], [0], [0], [1], [0, 0, 1, 1], [], []>} : vector<32x128xbf16>, vector<128x8xbf16>, vector<32x8xf32> -> vector<32x8xf32>
    %13 = vector.broadcast %2 : vector<1x8xf32> to vector<32x8xf32>
    %14 = arith.addf %12, %13 : vector<32x8xf32>
    %cst_8 = arith.constant 0.000000e+00 : f32
    %15 = vector.broadcast %cst_8 : f32 to vector<32x8xf32>
    %16 = arith.maximumf %14, %15 : vector<32x8xf32>
    %17 = arith.maximumf %9, %16 : vector<32x8xf32>
    %c256 = arith.constant 256 : index
    %c0_9 = arith.constant 0 : index
    %18 = vector.load %arg2[%c256, %c0_9] : memref<512x8xf32, #tpu.memory_space<vmem>>, vector<128x8xf32>
    %19 = arith.truncf %18 : vector<128x8xf32> to vector<128x8xbf16>
    %cst_10 = arith.constant dense<0.000000e+00> : vector<32x8xf32>
    %20 = tpu.matmul %1, %19, %cst_10 {dimension_numbers = #tpu.dot_dimension_numbers<[1], [0], [0], [1], [0, 0, 1, 1], [], []>} : vector<32x128xbf16>, vector<128x8xbf16>, vector<32x8xf32> -> vector<32x8xf32>
    %21 = vector.broadcast %2 : vector<1x8xf32> to vector<32x8xf32>
    %22 = arith.addf %20, %21 : vector<32x8xf32>
    %cst_11 = arith.constant 0.000000e+00 : f32
    %23 = vector.broadcast %cst_11 : f32 to vector<32x8xf32>
    %24 = arith.maximumf %22, %23 : vector<32x8xf32>
    %25 = arith.maximumf %17, %24 : vector<32x8xf32>
    %c384 = arith.constant 384 : index
    %c0_12 = arith.constant 0 : index
    %26 = vector.load %arg2[%c384, %c0_12] : memref<512x8xf32, #tpu.memory_space<vmem>>, vector<128x8xf32>
    %27 = arith.truncf %26 : vector<128x8xf32> to vector<128x8xbf16>
    %cst_13 = arith.constant dense<0.000000e+00> : vector<32x8xf32>
    %28 = tpu.matmul %1, %27, %cst_13 {dimension_numbers = #tpu.dot_dimension_numbers<[1], [0], [0], [1], [0, 0, 1, 1], [], []>} : vector<32x128xbf16>, vector<128x8xbf16>, vector<32x8xf32> -> vector<32x8xf32>
    %29 = vector.broadcast %2 : vector<1x8xf32> to vector<32x8xf32>
    %30 = arith.addf %28, %29 : vector<32x8xf32>
    %cst_14 = arith.constant 0.000000e+00 : f32
    %31 = vector.broadcast %cst_14 : f32 to vector<32x8xf32>
    %32 = arith.maximumf %30, %31 : vector<32x8xf32>
    %33 = arith.maximumf %25, %32 : vector<32x8xf32>
    %c0_15 = arith.constant 0 : index
    %c0_16 = arith.constant 0 : index
    %34 = vector.load %arg4[%c0_15, %c0_16] : memref<32x8xf32, #tpu.memory_space<vmem>>, vector<32x8xf32>
    tpu.vector_store %arg4[%c0_15, %c0_16], %33 {strides = array<i32>} : memref<32x8xf32, #tpu.memory_space<vmem>>, vector<32x8xf32>,
    return
  }
  func.func @transform_0(%arg0: i32) -> (i32, i32) {
    %c0_i32 = arith.constant 0 : i32
    %c0_i32_0 = arith.constant 0 : i32
    %c0_i32_1 = arith.constant 0 : i32
    return %c0_i32, %c0_i32_0 : i32, i32
  }
  func.func @transform_1(%arg0: i32) -> (i32, i32) {
    %c0_i32 = arith.constant 0 : i32
    %c0_i32_0 = arith.constant 0 : i32
    %c0_i32_1 = arith.constant 0 : i32
    return %c0_i32, %c0_i32_0 : i32, i32
  }
  func.func @transform_2(%arg0: i32) -> (i32, i32) {
    %c0_i32 = arith.constant 0 : i32
    %c0_i32_0 = arith.constant 0 : i32
    %c0_i32_1 = arith.constant 0 : i32
    return %c0_i32, %c0_i32_0 : i32, i32
  }
  func.func @transform_3(%arg0: i32) -> (i32, i32) {
    %c0_i32 = arith.constant 0 : i32
    %c0_i32_0 = arith.constant 0 : i32
    %c0_i32_1 = arith.constant 0 : i32
    return %c0_i32, %c0_i32_0 : i32, i32
  }
}

module attributes {stable_mosaic.version = 11 : i64} {
  func.func @_head_kernel(%arg0: i32, %arg1: memref<8x32xf32, #tpu.memory_space<vmem>>, %arg2: memref<32x16xf32, #tpu.memory_space<vmem>>, %arg3: memref<1x16xf32, #tpu.memory_space<vmem>>, %arg4: memref<16x32xf32, #tpu.memory_space<vmem>>, %arg5: memref<1x32xf32, #tpu.memory_space<vmem>>, %arg6: memref<8x32xf32, #tpu.memory_space<vmem>>, %arg7: memref<32x96xf32, #tpu.memory_space<vmem>>, %arg8: memref<1x96xf32, #tpu.memory_space<vmem>>, %arg9: memref<32x32xf32, #tpu.memory_space<vmem>>, %arg10: memref<1x32xf32, #tpu.memory_space<vmem>>, %arg11: memref<32x32xf32, #tpu.memory_space<vmem>>, %arg12: memref<1x32xf32, #tpu.memory_space<vmem>>, %arg13: memref<32x32xf32, #tpu.memory_space<vmem>>, %arg14: memref<1x32xf32, #tpu.memory_space<vmem>>, %arg15: memref<1x32xf32, #tpu.memory_space<vmem>>, %arg16: memref<1x32xf32, #tpu.memory_space<vmem>>, %arg17: memref<32x8xf32, #tpu.memory_space<vmem>>, %arg18: memref<1x8xf32, #tpu.memory_space<vmem>>, %arg19: memref<8x8xf32, #tpu.memory_space<vmem>>, %arg20: memref<8x96xf32, #tpu.memory_space<vmem>>, %arg21: memref<8x32xf32, #tpu.memory_space<vmem>>) attributes {dimension_semantics = [#tpu.dimension_semantics<arbitrary>], iteration_bounds = array<i64: 1>, scalar_prefetch = 0 : i64, scratch_operands = 2 : i64, tpu.core_type = #tpu.core_type<tc>, window_params = [{pipeline_mode = #tpu.pipeline_mode<synchronous>, transform_indices = @transform_0, window_bounds = array<i64: 8, 32>}, {pipeline_mode = #tpu.pipeline_mode<synchronous>, transform_indices = @transform_1, window_bounds = array<i64: 32, 16>}, {pipeline_mode = #tpu.pipeline_mode<synchronous>, transform_indices = @transform_2, window_bounds = array<i64: 1, 16>}, {pipeline_mode = #tpu.pipeline_mode<synchronous>, transform_indices = @transform_3, window_bounds = array<i64: 16, 32>}, {pipeline_mode = #tpu.pipeline_mode<synchronous>, transform_indices = @transform_4, window_bounds = array<i64: 1, 32>}, {pipeline_mode = #tpu.pipeline_mode<synchronous>, transform_indices = @transform_5, window_bounds = array<i64: 8, 32>}, {pipeline_mode = #tpu.pipeline_mode<synchronous>, transform_indices = @transform_6, window_bounds = array<i64: 32, 96>}, {pipeline_mode = #tpu.pipeline_mode<synchronous>, transform_indices = @transform_7, window_bounds = array<i64: 1, 96>}, {pipeline_mode = #tpu.pipeline_mode<synchronous>, transform_indices = @transform_8, window_bounds = array<i64: 32, 32>}, {pipeline_mode = #tpu.pipeline_mode<synchronous>, transform_indices = @transform_9, window_bounds = array<i64: 1, 32>}, {pipeline_mode = #tpu.pipeline_mode<synchronous>, transform_indices = @transform_10, window_bounds = array<i64: 32, 32>}, {pipeline_mode = #tpu.pipeline_mode<synchronous>, transform_indices = @transform_11, window_bounds = array<i64: 1, 32>}, {pipeline_mode = #tpu.pipeline_mode<synchronous>, transform_indices = @transform_12, window_bounds = array<i64: 32, 32>}, {pipeline_mode = #tpu.pipeline_mode<synchronous>, transform_indices = @transform_13, window_bounds = array<i64: 1, 32>}, {pipeline_mode = #tpu.pipeline_mode<synchronous>, transform_indices = @transform_14, window_bounds = array<i64: 1, 32>}, {pipeline_mode = #tpu.pipeline_mode<synchronous>, transform_indices = @transform_15, window_bounds = array<i64: 1, 32>}, {pipeline_mode = #tpu.pipeline_mode<synchronous>, transform_indices = @transform_16, window_bounds = array<i64: 32, 8>}, {pipeline_mode = #tpu.pipeline_mode<synchronous>, transform_indices = @transform_17, window_bounds = array<i64: 1, 8>}, {pipeline_mode = #tpu.pipeline_mode<synchronous>, transform_indices = @transform_18, window_bounds = array<i64: 8, 8>}]} {
    %c0 = arith.constant 0 : index
    %c0_0 = arith.constant 0 : index
    %0 = vector.load %arg1[%c0, %c0_0] : memref<8x32xf32, #tpu.memory_space<vmem>>, vector<8x32xf32>
    %1 = arith.truncf %0 : vector<8x32xf32> to vector<8x32xbf16>
    %c0_1 = arith.constant 0 : index
    %c0_2 = arith.constant 0 : index
    %2 = vector.load %arg2[%c0_1, %c0_2] : memref<32x16xf32, #tpu.memory_space<vmem>>, vector<32x16xf32>
    %3 = arith.truncf %2 : vector<32x16xf32> to vector<32x16xbf16>
    %cst = arith.constant dense<0.000000e+00> : vector<8x16xf32>
    %4 = tpu.matmul %1, %3, %cst {dimension_numbers = #tpu.dot_dimension_numbers<[1], [0], [0], [1], [0, 0, 1, 1], [], []>} : vector<8x32xbf16>, vector<32x16xbf16>, vector<8x16xf32> -> vector<8x16xf32>
    %c0_3 = arith.constant 0 : index
    %c0_4 = arith.constant 0 : index
    %5 = vector.load %arg3[%c0_3, %c0_4] : memref<1x16xf32, #tpu.memory_space<vmem>>, vector<1x16xf32>
    %6 = vector.broadcast %5 : vector<1x16xf32> to vector<8x16xf32>
    %7 = arith.addf %4, %6 : vector<8x16xf32>
    %cst_5 = arith.constant 0.000000e+00 : f32
    %8 = vector.broadcast %cst_5 : f32 to vector<8x16xf32>
    %9 = arith.maximumf %7, %8 : vector<8x16xf32>
    %10 = arith.truncf %9 : vector<8x16xf32> to vector<8x16xbf16>
    %c0_6 = arith.constant 0 : index
    %c0_7 = arith.constant 0 : index
    %11 = vector.load %arg4[%c0_6, %c0_7] : memref<16x32xf32, #tpu.memory_space<vmem>>, vector<16x32xf32>
    %12 = arith.truncf %11 : vector<16x32xf32> to vector<16x32xbf16>
    %cst_8 = arith.constant dense<0.000000e+00> : vector<8x32xf32>
    %13 = tpu.matmul %10, %12, %cst_8 {dimension_numbers = #tpu.dot_dimension_numbers<[1], [0], [0], [1], [0, 0, 1, 1], [], []>} : vector<8x16xbf16>, vector<16x32xbf16>, vector<8x32xf32> -> vector<8x32xf32>
    %c0_9 = arith.constant 0 : index
    %c0_10 = arith.constant 0 : index
    %14 = vector.load %arg5[%c0_9, %c0_10] : memref<1x32xf32, #tpu.memory_space<vmem>>, vector<1x32xf32>
    %15 = vector.broadcast %14 : vector<1x32xf32> to vector<8x32xf32>
    %16 = arith.addf %13, %15 : vector<8x32xf32>
    %c0_11 = arith.constant 0 : index
    %c0_12 = arith.constant 0 : index
    %17 = vector.load %arg6[%c0_11, %c0_12] : memref<8x32xf32, #tpu.memory_space<vmem>>, vector<8x32xf32>
    %18 = arith.addf %16, %17 : vector<8x32xf32>
    %cst_13 = arith.constant dense<0.000000e+00> : vector<8xf32>
    %19 = vector.multi_reduction <add>, %18, %cst_13 [1] : vector<8x32xf32> to vector<8xf32>
    %20 = vector.shape_cast %19 : vector<8xf32> to vector<8x1xf32>
    %cst_14 = arith.constant 3.200000e+01 : f32
    %21 = vector.broadcast %cst_14 : f32 to vector<8x1xf32>
    %22 = arith.divf %20, %21 : vector<8x1xf32>
    %23 = vector.broadcast %22 : vector<8x1xf32> to vector<8x32xf32>
    %24 = arith.subf %18, %23 : vector<8x32xf32>
    %25 = arith.mulf %24, %24 : vector<8x32xf32>
    %cst_15 = arith.constant dense<0.000000e+00> : vector<8xf32>
    %26 = vector.multi_reduction <add>, %25, %cst_15 [1] : vector<8x32xf32> to vector<8xf32>
    %27 = vector.shape_cast %26 : vector<8xf32> to vector<8x1xf32>
    %cst_16 = arith.constant 3.200000e+01 : f32
    %28 = vector.broadcast %cst_16 : f32 to vector<8x1xf32>
    %29 = arith.divf %27, %28 : vector<8x1xf32>
    %cst_17 = arith.constant 9.99999974E-6 : f32
    %30 = vector.broadcast %cst_17 : f32 to vector<8x1xf32>
    %31 = arith.addf %29, %30 : vector<8x1xf32>
    %32 = math.rsqrt %31 : vector<8x1xf32>
    %33 = vector.broadcast %32 : vector<8x1xf32> to vector<8x32xf32>
    %34 = arith.mulf %24, %33 : vector<8x32xf32>
    %35 = arith.truncf %34 : vector<8x32xf32> to vector<8x32xbf16>
    %c0_18 = arith.constant 0 : index
    %c0_19 = arith.constant 0 : index
    %36 = vector.load %arg7[%c0_18, %c0_19] : memref<32x96xf32, #tpu.memory_space<vmem>>, vector<32x96xf32>
    %37 = arith.truncf %36 : vector<32x96xf32> to vector<32x96xbf16>
    %cst_20 = arith.constant dense<0.000000e+00> : vector<8x96xf32>
    %38 = tpu.matmul %35, %37, %cst_20 {dimension_numbers = #tpu.dot_dimension_numbers<[1], [0], [0], [1], [0, 0, 1, 1], [], []>} : vector<8x32xbf16>, vector<32x96xbf16>, vector<8x96xf32> -> vector<8x96xf32>
    %c0_21 = arith.constant 0 : index
    %c0_22 = arith.constant 0 : index
    %39 = vector.load %arg8[%c0_21, %c0_22] : memref<1x96xf32, #tpu.memory_space<vmem>>, vector<1x96xf32>
    %40 = vector.broadcast %39 : vector<1x96xf32> to vector<8x96xf32>
    %41 = arith.addf %38, %40 : vector<8x96xf32>
    %c0_23 = arith.constant 0 : index
    %c0_24 = arith.constant 0 : index
    %42 = vector.load %arg20[%c0_23, %c0_24] : memref<8x96xf32, #tpu.memory_space<vmem>>, vector<8x96xf32>
    tpu.vector_store %arg20[%c0_23, %c0_24], %41 {strides = array<i32>} : memref<8x96xf32, #tpu.memory_space<vmem>>, vector<8x96xf32>,
    %43 = tpu.iota {dimensions = array<i32: 0>} : vector<4x4xi32>
    %44 = tpu.iota {dimensions = array<i32: 1>} : vector<4x4xi32>
    %c0_25 = arith.constant 0 : index
    %c0_26 = arith.constant 0 : index
    %45 = vector.load %arg20[%c0_25, %c0_26] : memref<8x96xf32, #tpu.memory_space<vmem>>, vector<4x8xf32>
    %c0_27 = arith.constant 0 : index
    %c32 = arith.constant 32 : index
    %46 = vector.load %arg20[%c0_27, %c32] : memref<8x96xf32, #tpu.memory_space<vmem>>, vector<4x8xf32>
    %c0_28 = arith.constant 0 : index
    %c64 = arith.constant 64 : index
    %47 = vector.load %arg20[%c0_28, %c64] : memref<8x96xf32, #tpu.memory_space<vmem>>, vector<4x8xf32>
    %cst_29 = arith.constant dense<0.000000e+00> : vector<4x4xf32>
    %48 = tpu.matmul %45, %46, %cst_29 {dimension_numbers = #tpu.dot_dimension_numbers<[1], [1], [0], [0], [0, 0, 1, 0], [], []>} : vector<4x8xf32>, vector<4x8xf32>, vector<4x4xf32> -> vector<4x4xf32>
    %cst_30 = arith.constant 0.353553385 : f32
    %49 = vector.broadcast %cst_30 : f32 to vector<4x4xf32>
    %50 = arith.mulf %48, %49 : vector<4x4xf32>
    %51 = arith.cmpi sgt, %44, %43 : vector<4x4xi32>
    %cst_31 = arith.constant 0xFF800000 : f32
    %52 = vector.broadcast %cst_31 : f32 to vector<4x4xf32>
    %53 = arith.select %51, %52, %50 : vector<4x4xi1>, vector<4x4xf32>
    %cst_32 = arith.constant dense<0xFF800000> : vector<4xf32>
    %54 = vector.multi_reduction <maximumf>, %53, %cst_32 [1] : vector<4x4xf32> to vector<4xf32>
    %55 = vector.shape_cast %54 : vector<4xf32> to vector<4x1xf32>
    %56 = vector.broadcast %55 : vector<4x1xf32> to vector<4x4xf32>
    %57 = arith.subf %53, %56 : vector<4x4xf32>
    %58 = math.exp %57 : vector<4x4xf32>
    %cst_33 = arith.constant dense<0.000000e+00> : vector<4xf32>
    %59 = vector.multi_reduction <add>, %58, %cst_33 [1] : vector<4x4xf32> to vector<4xf32>
    %60 = vector.shape_cast %59 : vector<4xf32> to vector<4x1xf32>
    %61 = tpu.reciprocal %60 {approx = true} : vector<4x1xf32> -> vector<4x1xf32>
    %62 = vector.broadcast %61 : vector<4x1xf32> to vector<4x4xf32>
    %63 = arith.mulf %58, %62 : vector<4x4xf32>
    %cst_34 = arith.constant dense<0.000000e+00> : vector<4x8xf32>
    %64 = tpu.matmul %63, %47, %cst_34 {dimension_numbers = #tpu.dot_dimension_numbers<[1], [0], [0], [1], [0, 0, 1, 1], [], []>} : vector<4x4xf32>, vector<4x8xf32>, vector<4x8xf32> -> vector<4x8xf32>
    %c0_35 = arith.constant 0 : index
    %c0_36 = arith.constant 0 : index
    %65 = vector.load %arg21[%c0_35, %c0_36] : memref<8x32xf32, #tpu.memory_space<vmem>>, vector<4x8xf32>
    tpu.vector_store %arg21[%c0_35, %c0_36], %64 {strides = array<i32>} : memref<8x32xf32, #tpu.memory_space<vmem>>, vector<4x8xf32>,
    %c0_37 = arith.constant 0 : index
    %c8 = arith.constant 8 : index
    %66 = vector.load %arg20[%c0_37, %c8] : memref<8x96xf32, #tpu.memory_space<vmem>>, vector<4x8xf32>
    %c0_38 = arith.constant 0 : index
    %c40 = arith.constant 40 : index
    %67 = vector.load %arg20[%c0_38, %c40] : memref<8x96xf32, #tpu.memory_space<vmem>>, vector<4x8xf32>
    %c0_39 = arith.constant 0 : index
    %c72 = arith.constant 72 : index
    %68 = vector.load %arg20[%c0_39, %c72] : memref<8x96xf32, #tpu.memory_space<vmem>>, vector<4x8xf32>
    %cst_40 = arith.constant dense<0.000000e+00> : vector<4x4xf32>
    %69 = tpu.matmul %66, %67, %cst_40 {dimension_numbers = #tpu.dot_dimension_numbers<[1], [1], [0], [0], [0, 0, 1, 0], [], []>} : vector<4x8xf32>, vector<4x8xf32>, vector<4x4xf32> -> vector<4x4xf32>
    %cst_41 = arith.constant 0.353553385 : f32
    %70 = vector.broadcast %cst_41 : f32 to vector<4x4xf32>
    %71 = arith.mulf %69, %70 : vector<4x4xf32>
    %72 = arith.cmpi sgt, %44, %43 : vector<4x4xi32>
    %cst_42 = arith.constant 0xFF800000 : f32
    %73 = vector.broadcast %cst_42 : f32 to vector<4x4xf32>
    %74 = arith.select %72, %73, %71 : vector<4x4xi1>, vector<4x4xf32>
    %cst_43 = arith.constant dense<0xFF800000> : vector<4xf32>
    %75 = vector.multi_reduction <maximumf>, %74, %cst_43 [1] : vector<4x4xf32> to vector<4xf32>
    %76 = vector.shape_cast %75 : vector<4xf32> to vector<4x1xf32>
    %77 = vector.broadcast %76 : vector<4x1xf32> to vector<4x4xf32>
    %78 = arith.subf %74, %77 : vector<4x4xf32>
    %79 = math.exp %78 : vector<4x4xf32>
    %cst_44 = arith.constant dense<0.000000e+00> : vector<4xf32>
    %80 = vector.multi_reduction <add>, %79, %cst_44 [1] : vector<4x4xf32> to vector<4xf32>
    %81 = vector.shape_cast %80 : vector<4xf32> to vector<4x1xf32>
    %82 = tpu.reciprocal %81 {approx = true} : vector<4x1xf32> -> vector<4x1xf32>
    %83 = vector.broadcast %82 : vector<4x1xf32> to vector<4x4xf32>
    %84 = arith.mulf %79, %83 : vector<4x4xf32>
    %cst_45 = arith.constant dense<0.000000e+00> : vector<4x8xf32>
    %85 = tpu.matmul %84, %68, %cst_45 {dimension_numbers = #tpu.dot_dimension_numbers<[1], [0], [0], [1], [0, 0, 1, 1], [], []>} : vector<4x4xf32>, vector<4x8xf32>, vector<4x8xf32> -> vector<4x8xf32>
    %c0_46 = arith.constant 0 : index
    %c8_47 = arith.constant 8 : index
    %86 = vector.load %arg21[%c0_46, %c8_47] : memref<8x32xf32, #tpu.memory_space<vmem>>, vector<4x8xf32>
    tpu.vector_store %arg21[%c0_46, %c8_47], %85 {strides = array<i32>} : memref<8x32xf32, #tpu.memory_space<vmem>>, vector<4x8xf32>,
    %c0_48 = arith.constant 0 : index
    %c16 = arith.constant 16 : index
    %87 = vector.load %arg20[%c0_48, %c16] : memref<8x96xf32, #tpu.memory_space<vmem>>, vector<4x8xf32>
    %c0_49 = arith.constant 0 : index
    %c48 = arith.constant 48 : index
    %88 = vector.load %arg20[%c0_49, %c48] : memref<8x96xf32, #tpu.memory_space<vmem>>, vector<4x8xf32>
    %c0_50 = arith.constant 0 : index
    %c80 = arith.constant 80 : index
    %89 = vector.load %arg20[%c0_50, %c80] : memref<8x96xf32, #tpu.memory_space<vmem>>, vector<4x8xf32>
    %cst_51 = arith.constant dense<0.000000e+00> : vector<4x4xf32>
    %90 = tpu.matmul %87, %88, %cst_51 {dimension_numbers = #tpu.dot_dimension_numbers<[1], [1], [0], [0], [0, 0, 1, 0], [], []>} : vector<4x8xf32>, vector<4x8xf32>, vector<4x4xf32> -> vector<4x4xf32>
    %cst_52 = arith.constant 0.353553385 : f32
    %91 = vector.broadcast %cst_52 : f32 to vector<4x4xf32>
    %92 = arith.mulf %90, %91 : vector<4x4xf32>
    %93 = arith.cmpi sgt, %44, %43 : vector<4x4xi32>
    %cst_53 = arith.constant 0xFF800000 : f32
    %94 = vector.broadcast %cst_53 : f32 to vector<4x4xf32>
    %95 = arith.select %93, %94, %92 : vector<4x4xi1>, vector<4x4xf32>
    %cst_54 = arith.constant dense<0xFF800000> : vector<4xf32>
    %96 = vector.multi_reduction <maximumf>, %95, %cst_54 [1] : vector<4x4xf32> to vector<4xf32>
    %97 = vector.shape_cast %96 : vector<4xf32> to vector<4x1xf32>
    %98 = vector.broadcast %97 : vector<4x1xf32> to vector<4x4xf32>
    %99 = arith.subf %95, %98 : vector<4x4xf32>
    %100 = math.exp %99 : vector<4x4xf32>
    %cst_55 = arith.constant dense<0.000000e+00> : vector<4xf32>
    %101 = vector.multi_reduction <add>, %100, %cst_55 [1] : vector<4x4xf32> to vector<4xf32>
    %102 = vector.shape_cast %101 : vector<4xf32> to vector<4x1xf32>
    %103 = tpu.reciprocal %102 {approx = true} : vector<4x1xf32> -> vector<4x1xf32>
    %104 = vector.broadcast %103 : vector<4x1xf32> to vector<4x4xf32>
    %105 = arith.mulf %100, %104 : vector<4x4xf32>
    %cst_56 = arith.constant dense<0.000000e+00> : vector<4x8xf32>
    %106 = tpu.matmul %105, %89, %cst_56 {dimension_numbers = #tpu.dot_dimension_numbers<[1], [0], [0], [1], [0, 0, 1, 1], [], []>} : vector<4x4xf32>, vector<4x8xf32>, vector<4x8xf32> -> vector<4x8xf32>
    %c0_57 = arith.constant 0 : index
    %c16_58 = arith.constant 16 : index
    %107 = vector.load %arg21[%c0_57, %c16_58] : memref<8x32xf32, #tpu.memory_space<vmem>>, vector<4x8xf32>
    tpu.vector_store %arg21[%c0_57, %c16_58], %106 {strides = array<i32>} : memref<8x32xf32, #tpu.memory_space<vmem>>, vector<4x8xf32>,
    %c0_59 = arith.constant 0 : index
    %c24 = arith.constant 24 : index
    %108 = vector.load %arg20[%c0_59, %c24] : memref<8x96xf32, #tpu.memory_space<vmem>>, vector<4x8xf32>
    %c0_60 = arith.constant 0 : index
    %c56 = arith.constant 56 : index
    %109 = vector.load %arg20[%c0_60, %c56] : memref<8x96xf32, #tpu.memory_space<vmem>>, vector<4x8xf32>
    %c0_61 = arith.constant 0 : index
    %c88 = arith.constant 88 : index
    %110 = vector.load %arg20[%c0_61, %c88] : memref<8x96xf32, #tpu.memory_space<vmem>>, vector<4x8xf32>
    %cst_62 = arith.constant dense<0.000000e+00> : vector<4x4xf32>
    %111 = tpu.matmul %108, %109, %cst_62 {dimension_numbers = #tpu.dot_dimension_numbers<[1], [1], [0], [0], [0, 0, 1, 0], [], []>} : vector<4x8xf32>, vector<4x8xf32>, vector<4x4xf32> -> vector<4x4xf32>
    %cst_63 = arith.constant 0.353553385 : f32
    %112 = vector.broadcast %cst_63 : f32 to vector<4x4xf32>
    %113 = arith.mulf %111, %112 : vector<4x4xf32>
    %114 = arith.cmpi sgt, %44, %43 : vector<4x4xi32>
    %cst_64 = arith.constant 0xFF800000 : f32
    %115 = vector.broadcast %cst_64 : f32 to vector<4x4xf32>
    %116 = arith.select %114, %115, %113 : vector<4x4xi1>, vector<4x4xf32>
    %cst_65 = arith.constant dense<0xFF800000> : vector<4xf32>
    %117 = vector.multi_reduction <maximumf>, %116, %cst_65 [1] : vector<4x4xf32> to vector<4xf32>
    %118 = vector.shape_cast %117 : vector<4xf32> to vector<4x1xf32>
    %119 = vector.broadcast %118 : vector<4x1xf32> to vector<4x4xf32>
    %120 = arith.subf %116, %119 : vector<4x4xf32>
    %121 = math.exp %120 : vector<4x4xf32>
    %cst_66 = arith.constant dense<0.000000e+00> : vector<4xf32>
    %122 = vector.multi_reduction <add>, %121, %cst_66 [1] : vector<4x4xf32> to vector<4xf32>
    %123 = vector.shape_cast %122 : vector<4xf32> to vector<4x1xf32>
    %124 = tpu.reciprocal %123 {approx = true} : vector<4x1xf32> -> vector<4x1xf32>
    %125 = vector.broadcast %124 : vector<4x1xf32> to vector<4x4xf32>
    %126 = arith.mulf %121, %125 : vector<4x4xf32>
    %cst_67 = arith.constant dense<0.000000e+00> : vector<4x8xf32>
    %127 = tpu.matmul %126, %110, %cst_67 {dimension_numbers = #tpu.dot_dimension_numbers<[1], [0], [0], [1], [0, 0, 1, 1], [], []>} : vector<4x4xf32>, vector<4x8xf32>, vector<4x8xf32> -> vector<4x8xf32>
    %c0_68 = arith.constant 0 : index
    %c24_69 = arith.constant 24 : index
    %128 = vector.load %arg21[%c0_68, %c24_69] : memref<8x32xf32, #tpu.memory_space<vmem>>, vector<4x8xf32>
    tpu.vector_store %arg21[%c0_68, %c24_69], %127 {strides = array<i32>} : memref<8x32xf32, #tpu.memory_space<vmem>>, vector<4x8xf32>,
    %c4 = arith.constant 4 : index
    %c0_70 = arith.constant 0 : index
    %129 = vector.load %arg20[%c4, %c0_70] : memref<8x96xf32, #tpu.memory_space<vmem>>, vector<4x8xf32>
    %c4_71 = arith.constant 4 : index
    %c32_72 = arith.constant 32 : index
    %130 = vector.load %arg20[%c4_71, %c32_72] : memref<8x96xf32, #tpu.memory_space<vmem>>, vector<4x8xf32>
    %c4_73 = arith.constant 4 : index
    %c64_74 = arith.constant 64 : index
    %131 = vector.load %arg20[%c4_73, %c64_74] : memref<8x96xf32, #tpu.memory_space<vmem>>, vector<4x8xf32>
    %cst_75 = arith.constant dense<0.000000e+00> : vector<4x4xf32>
    %132 = tpu.matmul %129, %130, %cst_75 {dimension_numbers = #tpu.dot_dimension_numbers<[1], [1], [0], [0], [0, 0, 1, 0], [], []>} : vector<4x8xf32>, vector<4x8xf32>, vector<4x4xf32> -> vector<4x4xf32>
    %cst_76 = arith.constant 0.353553385 : f32
    %133 = vector.broadcast %cst_76 : f32 to vector<4x4xf32>
    %134 = arith.mulf %132, %133 : vector<4x4xf32>
    %135 = arith.cmpi sgt, %44, %43 : vector<4x4xi32>
    %cst_77 = arith.constant 0xFF800000 : f32
    %136 = vector.broadcast %cst_77 : f32 to vector<4x4xf32>
    %137 = arith.select %135, %136, %134 : vector<4x4xi1>, vector<4x4xf32>
    %cst_78 = arith.constant dense<0xFF800000> : vector<4xf32>
    %138 = vector.multi_reduction <maximumf>, %137, %cst_78 [1] : vector<4x4xf32> to vector<4xf32>
    %139 = vector.shape_cast %138 : vector<4xf32> to vector<4x1xf32>
    %140 = vector.broadcast %139 : vector<4x1xf32> to vector<4x4xf32>
    %141 = arith.subf %137, %140 : vector<4x4xf32>
    %142 = math.exp %141 : vector<4x4xf32>
    %cst_79 = arith.constant dense<0.000000e+00> : vector<4xf32>
    %143 = vector.multi_reduction <add>, %142, %cst_79 [1] : vector<4x4xf32> to vector<4xf32>
    %144 = vector.shape_cast %143 : vector<4xf32> to vector<4x1xf32>
    %145 = tpu.reciprocal %144 {approx = true} : vector<4x1xf32> -> vector<4x1xf32>
    %146 = vector.broadcast %145 : vector<4x1xf32> to vector<4x4xf32>
    %147 = arith.mulf %142, %146 : vector<4x4xf32>
    %cst_80 = arith.constant dense<0.000000e+00> : vector<4x8xf32>
    %148 = tpu.matmul %147, %131, %cst_80 {dimension_numbers = #tpu.dot_dimension_numbers<[1], [0], [0], [1], [0, 0, 1, 1], [], []>} : vector<4x4xf32>, vector<4x8xf32>, vector<4x8xf32> -> vector<4x8xf32>
    %c4_81 = arith.constant 4 : index
    %c0_82 = arith.constant 0 : index
    %149 = vector.load %arg21[%c4_81, %c0_82] : memref<8x32xf32, #tpu.memory_space<vmem>>, vector<4x8xf32>
    tpu.vector_store %arg21[%c4_81, %c0_82], %148 {strides = array<i32>} : memref<8x32xf32, #tpu.memory_space<vmem>>, vector<4x8xf32>,
    %c4_83 = arith.constant 4 : index
    %c8_84 = arith.constant 8 : index
    %150 = vector.load %arg20[%c4_83, %c8_84] : memref<8x96xf32, #tpu.memory_space<vmem>>, vector<4x8xf32>
    %c4_85 = arith.constant 4 : index
    %c40_86 = arith.constant 40 : index
    %151 = vector.load %arg20[%c4_85, %c40_86] : memref<8x96xf32, #tpu.memory_space<vmem>>, vector<4x8xf32>
    %c4_87 = arith.constant 4 : index
    %c72_88 = arith.constant 72 : index
    %152 = vector.load %arg20[%c4_87, %c72_88] : memref<8x96xf32, #tpu.memory_space<vmem>>, vector<4x8xf32>
    %cst_89 = arith.constant dense<0.000000e+00> : vector<4x4xf32>
    %153 = tpu.matmul %150, %151, %cst_89 {dimension_numbers = #tpu.dot_dimension_numbers<[1], [1], [0], [0], [0, 0, 1, 0], [], []>} : vector<4x8xf32>, vector<4x8xf32>, vector<4x4xf32> -> vector<4x4xf32>
    %cst_90 = arith.constant 0.353553385 : f32
    %154 = vector.broadcast %cst_90 : f32 to vector<4x4xf32>
    %155 = arith.mulf %153, %154 : vector<4x4xf32>
    %156 = arith.cmpi sgt, %44, %43 : vector<4x4xi32>
    %cst_91 = arith.constant 0xFF800000 : f32
    %157 = vector.broadcast %cst_91 : f32 to vector<4x4xf32>
    %158 = arith.select %156, %157, %155 : vector<4x4xi1>, vector<4x4xf32>
    %cst_92 = arith.constant dense<0xFF800000> : vector<4xf32>
    %159 = vector.multi_reduction <maximumf>, %158, %cst_92 [1] : vector<4x4xf32> to vector<4xf32>
    %160 = vector.shape_cast %159 : vector<4xf32> to vector<4x1xf32>
    %161 = vector.broadcast %160 : vector<4x1xf32> to vector<4x4xf32>
    %162 = arith.subf %158, %161 : vector<4x4xf32>
    %163 = math.exp %162 : vector<4x4xf32>
    %cst_93 = arith.constant dense<0.000000e+00> : vector<4xf32>
    %164 = vector.multi_reduction <add>, %163, %cst_93 [1] : vector<4x4xf32> to vector<4xf32>
    %165 = vector.shape_cast %164 : vector<4xf32> to vector<4x1xf32>
    %166 = tpu.reciprocal %165 {approx = true} : vector<4x1xf32> -> vector<4x1xf32>
    %167 = vector.broadcast %166 : vector<4x1xf32> to vector<4x4xf32>
    %168 = arith.mulf %163, %167 : vector<4x4xf32>
    %cst_94 = arith.constant dense<0.000000e+00> : vector<4x8xf32>
    %169 = tpu.matmul %168, %152, %cst_94 {dimension_numbers = #tpu.dot_dimension_numbers<[1], [0], [0], [1], [0, 0, 1, 1], [], []>} : vector<4x4xf32>, vector<4x8xf32>, vector<4x8xf32> -> vector<4x8xf32>
    %c4_95 = arith.constant 4 : index
    %c8_96 = arith.constant 8 : index
    %170 = vector.load %arg21[%c4_95, %c8_96] : memref<8x32xf32, #tpu.memory_space<vmem>>, vector<4x8xf32>
    tpu.vector_store %arg21[%c4_95, %c8_96], %169 {strides = array<i32>} : memref<8x32xf32, #tpu.memory_space<vmem>>, vector<4x8xf32>,
    %c4_97 = arith.constant 4 : index
    %c16_98 = arith.constant 16 : index
    %171 = vector.load %arg20[%c4_97, %c16_98] : memref<8x96xf32, #tpu.memory_space<vmem>>, vector<4x8xf32>
    %c4_99 = arith.constant 4 : index
    %c48_100 = arith.constant 48 : index
    %172 = vector.load %arg20[%c4_99, %c48_100] : memref<8x96xf32, #tpu.memory_space<vmem>>, vector<4x8xf32>
    %c4_101 = arith.constant 4 : index
    %c80_102 = arith.constant 80 : index
    %173 = vector.load %arg20[%c4_101, %c80_102] : memref<8x96xf32, #tpu.memory_space<vmem>>, vector<4x8xf32>
    %cst_103 = arith.constant dense<0.000000e+00> : vector<4x4xf32>
    %174 = tpu.matmul %171, %172, %cst_103 {dimension_numbers = #tpu.dot_dimension_numbers<[1], [1], [0], [0], [0, 0, 1, 0], [], []>} : vector<4x8xf32>, vector<4x8xf32>, vector<4x4xf32> -> vector<4x4xf32>
    %cst_104 = arith.constant 0.353553385 : f32
    %175 = vector.broadcast %cst_104 : f32 to vector<4x4xf32>
    %176 = arith.mulf %174, %175 : vector<4x4xf32>
    %177 = arith.cmpi sgt, %44, %43 : vector<4x4xi32>
    %cst_105 = arith.constant 0xFF800000 : f32
    %178 = vector.broadcast %cst_105 : f32 to vector<4x4xf32>
    %179 = arith.select %177, %178, %176 : vector<4x4xi1>, vector<4x4xf32>
    %cst_106 = arith.constant dense<0xFF800000> : vector<4xf32>
    %180 = vector.multi_reduction <maximumf>, %179, %cst_106 [1] : vector<4x4xf32> to vector<4xf32>
    %181 = vector.shape_cast %180 : vector<4xf32> to vector<4x1xf32>
    %182 = vector.broadcast %181 : vector<4x1xf32> to vector<4x4xf32>
    %183 = arith.subf %179, %182 : vector<4x4xf32>
    %184 = math.exp %183 : vector<4x4xf32>
    %cst_107 = arith.constant dense<0.000000e+00> : vector<4xf32>
    %185 = vector.multi_reduction <add>, %184, %cst_107 [1] : vector<4x4xf32> to vector<4xf32>
    %186 = vector.shape_cast %185 : vector<4xf32> to vector<4x1xf32>
    %187 = tpu.reciprocal %186 {approx = true} : vector<4x1xf32> -> vector<4x1xf32>
    %188 = vector.broadcast %187 : vector<4x1xf32> to vector<4x4xf32>
    %189 = arith.mulf %184, %188 : vector<4x4xf32>
    %cst_108 = arith.constant dense<0.000000e+00> : vector<4x8xf32>
    %190 = tpu.matmul %189, %173, %cst_108 {dimension_numbers = #tpu.dot_dimension_numbers<[1], [0], [0], [1], [0, 0, 1, 1], [], []>} : vector<4x4xf32>, vector<4x8xf32>, vector<4x8xf32> -> vector<4x8xf32>
    %c4_109 = arith.constant 4 : index
    %c16_110 = arith.constant 16 : index
    %191 = vector.load %arg21[%c4_109, %c16_110] : memref<8x32xf32, #tpu.memory_space<vmem>>, vector<4x8xf32>
    tpu.vector_store %arg21[%c4_109, %c16_110], %190 {strides = array<i32>} : memref<8x32xf32, #tpu.memory_space<vmem>>, vector<4x8xf32>,
    %c4_111 = arith.constant 4 : index
    %c24_112 = arith.constant 24 : index
    %192 = vector.load %arg20[%c4_111, %c24_112] : memref<8x96xf32, #tpu.memory_space<vmem>>, vector<4x8xf32>
    %c4_113 = arith.constant 4 : index
    %c56_114 = arith.constant 56 : index
    %193 = vector.load %arg20[%c4_113, %c56_114] : memref<8x96xf32, #tpu.memory_space<vmem>>, vector<4x8xf32>
    %c4_115 = arith.constant 4 : index
    %c88_116 = arith.constant 88 : index
    %194 = vector.load %arg20[%c4_115, %c88_116] : memref<8x96xf32, #tpu.memory_space<vmem>>, vector<4x8xf32>
    %cst_117 = arith.constant dense<0.000000e+00> : vector<4x4xf32>
    %195 = tpu.matmul %192, %193, %cst_117 {dimension_numbers = #tpu.dot_dimension_numbers<[1], [1], [0], [0], [0, 0, 1, 0], [], []>} : vector<4x8xf32>, vector<4x8xf32>, vector<4x4xf32> -> vector<4x4xf32>
    %cst_118 = arith.constant 0.353553385 : f32
    %196 = vector.broadcast %cst_118 : f32 to vector<4x4xf32>
    %197 = arith.mulf %195, %196 : vector<4x4xf32>
    %198 = arith.cmpi sgt, %44, %43 : vector<4x4xi32>
    %cst_119 = arith.constant 0xFF800000 : f32
    %199 = vector.broadcast %cst_119 : f32 to vector<4x4xf32>
    %200 = arith.select %198, %199, %197 : vector<4x4xi1>, vector<4x4xf32>
    %cst_120 = arith.constant dense<0xFF800000> : vector<4xf32>
    %201 = vector.multi_reduction <maximumf>, %200, %cst_120 [1] : vector<4x4xf32> to vector<4xf32>
    %202 = vector.shape_cast %201 : vector<4xf32> to vector<4x1xf32>
    %203 = vector.broadcast %202 : vector<4x1xf32> to vector<4x4xf32>
    %204 = arith.subf %200, %203 : vector<4x4xf32>
    %205 = math.exp %204 : vector<4x4xf32>
    %cst_121 = arith.constant dense<0.000000e+00> : vector<4xf32>
    %206 = vector.multi_reduction <add>, %205, %cst_121 [1] : vector<4x4xf32> to vector<4xf32>
    %207 = vector.shape_cast %206 : vector<4xf32> to vector<4x1xf32>
    %208 = tpu.reciprocal %207 {approx = true} : vector<4x1xf32> -> vector<4x1xf32>
    %209 = vector.broadcast %208 : vector<4x1xf32> to vector<4x4xf32>
    %210 = arith.mulf %205, %209 : vector<4x4xf32>
    %cst_122 = arith.constant dense<0.000000e+00> : vector<4x8xf32>
    %211 = tpu.matmul %210, %194, %cst_122 {dimension_numbers = #tpu.dot_dimension_numbers<[1], [0], [0], [1], [0, 0, 1, 1], [], []>} : vector<4x4xf32>, vector<4x8xf32>, vector<4x8xf32> -> vector<4x8xf32>
    %c4_123 = arith.constant 4 : index
    %c24_124 = arith.constant 24 : index
    %212 = vector.load %arg21[%c4_123, %c24_124] : memref<8x32xf32, #tpu.memory_space<vmem>>, vector<4x8xf32>
    tpu.vector_store %arg21[%c4_123, %c24_124], %211 {strides = array<i32>} : memref<8x32xf32, #tpu.memory_space<vmem>>, vector<4x8xf32>,
    %c0_125 = arith.constant 0 : index
    %c0_126 = arith.constant 0 : index
    %213 = vector.load %arg21[%c0_125, %c0_126] : memref<8x32xf32, #tpu.memory_space<vmem>>, vector<8x32xf32>
    %214 = arith.truncf %213 : vector<8x32xf32> to vector<8x32xbf16>
    %c0_127 = arith.constant 0 : index
    %c0_128 = arith.constant 0 : index
    %215 = vector.load %arg9[%c0_127, %c0_128] : memref<32x32xf32, #tpu.memory_space<vmem>>, vector<32x32xf32>
    %216 = arith.truncf %215 : vector<32x32xf32> to vector<32x32xbf16>
    %cst_129 = arith.constant dense<0.000000e+00> : vector<8x32xf32>
    %217 = tpu.matmul %214, %216, %cst_129 {dimension_numbers = #tpu.dot_dimension_numbers<[1], [0], [0], [1], [0, 0, 1, 1], [], []>} : vector<8x32xbf16>, vector<32x32xbf16>, vector<8x32xf32> -> vector<8x32xf32>
    %c0_130 = arith.constant 0 : index
    %c0_131 = arith.constant 0 : index
    %218 = vector.load %arg10[%c0_130, %c0_131] : memref<1x32xf32, #tpu.memory_space<vmem>>, vector<1x32xf32>
    %219 = vector.broadcast %218 : vector<1x32xf32> to vector<8x32xf32>
    %220 = arith.addf %217, %219 : vector<8x32xf32>
    %221 = arith.mulf %220, %220 : vector<8x32xf32>
    %cst_132 = arith.constant dense<0.000000e+00> : vector<8xf32>
    %222 = vector.multi_reduction <add>, %221, %cst_132 [1] : vector<8x32xf32> to vector<8xf32>
    %223 = vector.shape_cast %222 : vector<8xf32> to vector<8x1xf32>
    %cst_133 = arith.constant 9.99999996E-13 : f32
    %224 = vector.broadcast %cst_133 : f32 to vector<8x1xf32>
    %225 = arith.addf %223, %224 : vector<8x1xf32>
    %226 = math.rsqrt %225 : vector<8x1xf32>
    %227 = vector.broadcast %226 : vector<8x1xf32> to vector<8x32xf32>
    %228 = arith.mulf %220, %227 : vector<8x32xf32>
    %c0_134 = arith.constant 0 : index
    %c0_135 = arith.constant 0 : index
    %229 = vector.load %arg15[%c0_134, %c0_135] : memref<1x32xf32, #tpu.memory_space<vmem>>, vector<1x32xf32>
    %230 = arith.subf %228, %18 : vector<8x32xf32>
    %231 = vector.broadcast %229 : vector<1x32xf32> to vector<8x32xf32>
    %232 = arith.mulf %231, %230 : vector<8x32xf32>
    %233 = arith.addf %18, %232 : vector<8x32xf32>
    %234 = arith.mulf %233, %233 : vector<8x32xf32>
    %cst_136 = arith.constant dense<0.000000e+00> : vector<8xf32>
    %235 = vector.multi_reduction <add>, %234, %cst_136 [1] : vector<8x32xf32> to vector<8xf32>
    %236 = vector.shape_cast %235 : vector<8xf32> to vector<8x1xf32>
    %cst_137 = arith.constant 9.99999996E-13 : f32
    %237 = vector.broadcast %cst_137 : f32 to vector<8x1xf32>
    %238 = arith.addf %236, %237 : vector<8x1xf32>
    %239 = math.rsqrt %238 : vector<8x1xf32>
    %240 = vector.broadcast %239 : vector<8x1xf32> to vector<8x32xf32>
    %241 = arith.mulf %233, %240 : vector<8x32xf32>
    %242 = arith.truncf %241 : vector<8x32xf32> to vector<8x32xbf16>
    %c0_138 = arith.constant 0 : index
    %c0_139 = arith.constant 0 : index
    %243 = vector.load %arg11[%c0_138, %c0_139] : memref<32x32xf32, #tpu.memory_space<vmem>>, vector<32x32xf32>
    %244 = arith.truncf %243 : vector<32x32xf32> to vector<32x32xbf16>
    %cst_140 = arith.constant dense<0.000000e+00> : vector<8x32xf32>
    %245 = tpu.matmul %242, %244, %cst_140 {dimension_numbers = #tpu.dot_dimension_numbers<[1], [0], [0], [1], [0, 0, 1, 1], [], []>} : vector<8x32xbf16>, vector<32x32xbf16>, vector<8x32xf32> -> vector<8x32xf32>
    %c0_141 = arith.constant 0 : index
    %c0_142 = arith.constant 0 : index
    %246 = vector.load %arg12[%c0_141, %c0_142] : memref<1x32xf32, #tpu.memory_space<vmem>>, vector<1x32xf32>
    %247 = vector.broadcast %246 : vector<1x32xf32> to vector<8x32xf32>
    %248 = arith.addf %245, %247 : vector<8x32xf32>
    %cst_143 = arith.constant 0.000000e+00 : f32
    %249 = vector.broadcast %cst_143 : f32 to vector<8x32xf32>
    %250 = arith.maximumf %248, %249 : vector<8x32xf32>
    %251 = arith.truncf %250 : vector<8x32xf32> to vector<8x32xbf16>
    %c0_144 = arith.constant 0 : index
    %c0_145 = arith.constant 0 : index
    %252 = vector.load %arg13[%c0_144, %c0_145] : memref<32x32xf32, #tpu.memory_space<vmem>>, vector<32x32xf32>
    %253 = arith.truncf %252 : vector<32x32xf32> to vector<32x32xbf16>
    %cst_146 = arith.constant dense<0.000000e+00> : vector<8x32xf32>
    %254 = tpu.matmul %251, %253, %cst_146 {dimension_numbers = #tpu.dot_dimension_numbers<[1], [0], [0], [1], [0, 0, 1, 1], [], []>} : vector<8x32xbf16>, vector<32x32xbf16>, vector<8x32xf32> -> vector<8x32xf32>
    %c0_147 = arith.constant 0 : index
    %c0_148 = arith.constant 0 : index
    %255 = vector.load %arg14[%c0_147, %c0_148] : memref<1x32xf32, #tpu.memory_space<vmem>>, vector<1x32xf32>
    %256 = vector.broadcast %255 : vector<1x32xf32> to vector<8x32xf32>
    %257 = arith.addf %254, %256 : vector<8x32xf32>
    %258 = arith.mulf %257, %257 : vector<8x32xf32>
    %cst_149 = arith.constant dense<0.000000e+00> : vector<8xf32>
    %259 = vector.multi_reduction <add>, %258, %cst_149 [1] : vector<8x32xf32> to vector<8xf32>
    %260 = vector.shape_cast %259 : vector<8xf32> to vector<8x1xf32>
    %cst_150 = arith.constant 9.99999996E-13 : f32
    %261 = vector.broadcast %cst_150 : f32 to vector<8x1xf32>
    %262 = arith.addf %260, %261 : vector<8x1xf32>
    %263 = math.rsqrt %262 : vector<8x1xf32>
    %264 = vector.broadcast %263 : vector<8x1xf32> to vector<8x32xf32>
    %265 = arith.mulf %257, %264 : vector<8x32xf32>
    %c0_151 = arith.constant 0 : index
    %c0_152 = arith.constant 0 : index
    %266 = vector.load %arg16[%c0_151, %c0_152] : memref<1x32xf32, #tpu.memory_space<vmem>>, vector<1x32xf32>
    %267 = arith.subf %265, %241 : vector<8x32xf32>
    %268 = vector.broadcast %266 : vector<1x32xf32> to vector<8x32xf32>
    %269 = arith.mulf %268, %267 : vector<8x32xf32>
    %270 = arith.addf %241, %269 : vector<8x32xf32>
    %271 = arith.mulf %270, %270 : vector<8x32xf32>
    %cst_153 = arith.constant dense<0.000000e+00> : vector<8xf32>
    %272 = vector.multi_reduction <add>, %271, %cst_153 [1] : vector<8x32xf32> to vector<8xf32>
    %273 = vector.shape_cast %272 : vector<8xf32> to vector<8x1xf32>
    %cst_154 = arith.constant 9.99999996E-13 : f32
    %274 = vector.broadcast %cst_154 : f32 to vector<8x1xf32>
    %275 = arith.addf %273, %274 : vector<8x1xf32>
    %276 = math.rsqrt %275 : vector<8x1xf32>
    %277 = vector.broadcast %276 : vector<8x1xf32> to vector<8x32xf32>
    %278 = arith.mulf %270, %277 : vector<8x32xf32>
    %279 = arith.truncf %278 : vector<8x32xf32> to vector<8x32xbf16>
    %c0_155 = arith.constant 0 : index
    %c0_156 = arith.constant 0 : index
    %280 = vector.load %arg17[%c0_155, %c0_156] : memref<32x8xf32, #tpu.memory_space<vmem>>, vector<32x8xf32>
    %281 = arith.truncf %280 : vector<32x8xf32> to vector<32x8xbf16>
    %cst_157 = arith.constant dense<0.000000e+00> : vector<8x8xf32>
    %282 = tpu.matmul %279, %281, %cst_157 {dimension_numbers = #tpu.dot_dimension_numbers<[1], [0], [0], [1], [0, 0, 1, 1], [], []>} : vector<8x32xbf16>, vector<32x8xbf16>, vector<8x8xf32> -> vector<8x8xf32>
    %c0_158 = arith.constant 0 : index
    %c0_159 = arith.constant 0 : index
    %283 = vector.load %arg18[%c0_158, %c0_159] : memref<1x8xf32, #tpu.memory_space<vmem>>, vector<1x8xf32>
    %284 = vector.broadcast %283 : vector<1x8xf32> to vector<8x8xf32>
    %285 = arith.addf %282, %284 : vector<8x8xf32>
    %c0_160 = arith.constant 0 : index
    %c0_161 = arith.constant 0 : index
    %286 = vector.load %arg19[%c0_160, %c0_161] : memref<8x8xf32, #tpu.memory_space<vmem>>, vector<8x8xf32>
    tpu.vector_store %arg19[%c0_160, %c0_161], %285 {strides = array<i32>} : memref<8x8xf32, #tpu.memory_space<vmem>>, vector<8x8xf32>,
    return
  }
  func.func @transform_0(%arg0: i32) -> (i32, i32) {
    %c0_i32 = arith.constant 0 : i32
    %c0_i32_0 = arith.constant 0 : i32
    %c0_i32_1 = arith.constant 0 : i32
    return %c0_i32, %c0_i32_0 : i32, i32
  }
  func.func @transform_1(%arg0: i32) -> (i32, i32) {
    %c0_i32 = arith.constant 0 : i32
    %c0_i32_0 = arith.constant 0 : i32
    %c0_i32_1 = arith.constant 0 : i32
    return %c0_i32, %c0_i32_0 : i32, i32
  }
  func.func @transform_2(%arg0: i32) -> (i32, i32) {
    %c0_i32 = arith.constant 0 : i32
    %c0_i32_0 = arith.constant 0 : i32
    %c0_i32_1 = arith.constant 0 : i32
    return %c0_i32, %c0_i32_0 : i32, i32
  }
  func.func @transform_3(%arg0: i32) -> (i32, i32) {
    %c0_i32 = arith.constant 0 : i32
    %c0_i32_0 = arith.constant 0 : i32
    %c0_i32_1 = arith.constant 0 : i32
    return %c0_i32, %c0_i32_0 : i32, i32
  }
  func.func @transform_4(%arg0: i32) -> (i32, i32) {
    %c0_i32 = arith.constant 0 : i32
    %c0_i32_0 = arith.constant 0 : i32
    %c0_i32_1 = arith.constant 0 : i32
    return %c0_i32, %c0_i32_0 : i32, i32
  }
  func.func @transform_5(%arg0: i32) -> (i32, i32) {
    %c0_i32 = arith.constant 0 : i32
    %c0_i32_0 = arith.constant 0 : i32
    %c0_i32_1 = arith.constant 0 : i32
    return %c0_i32, %c0_i32_0 : i32, i32
  }
  func.func @transform_6(%arg0: i32) -> (i32, i32) {
    %c0_i32 = arith.constant 0 : i32
    %c0_i32_0 = arith.constant 0 : i32
    %c0_i32_1 = arith.constant 0 : i32
    return %c0_i32, %c0_i32_0 : i32, i32
  }
  func.func @transform_7(%arg0: i32) -> (i32, i32) {
    %c0_i32 = arith.constant 0 : i32
    %c0_i32_0 = arith.constant 0 : i32
    %c0_i32_1 = arith.constant 0 : i32
    return %c0_i32, %c0_i32_0 : i32, i32
  }
  func.func @transform_8(%arg0: i32) -> (i32, i32) {
    %c0_i32 = arith.constant 0 : i32
    %c0_i32_0 = arith.constant 0 : i32
    %c0_i32_1 = arith.constant 0 : i32
    return %c0_i32, %c0_i32_0 : i32, i32
  }
  func.func @transform_9(%arg0: i32) -> (i32, i32) {
    %c0_i32 = arith.constant 0 : i32
    %c0_i32_0 = arith.constant 0 : i32
    %c0_i32_1 = arith.constant 0 : i32
    return %c0_i32, %c0_i32_0 : i32, i32
  }
  func.func @transform_10(%arg0: i32) -> (i32, i32) {
    %c0_i32 = arith.constant 0 : i32
    %c0_i32_0 = arith.constant 0 : i32
    %c0_i32_1 = arith.constant 0 : i32
    return %c0_i32, %c0_i32_0 : i32, i32
  }
  func.func @transform_11(%arg0: i32) -> (i32, i32) {
    %c0_i32 = arith.constant 0 : i32
    %c0_i32_0 = arith.constant 0 : i32
    %c0_i32_1 = arith.constant 0 : i32
    return %c0_i32, %c0_i32_0 : i32, i32
  }
  func.func @transform_12(%arg0: i32) -> (i32, i32) {
    %c0_i32 = arith.constant 0 : i32
    %c0_i32_0 = arith.constant 0 : i32
    %c0_i32_1 = arith.constant 0 : i32
    return %c0_i32, %c0_i32_0 : i32, i32
  }
  func.func @transform_13(%arg0: i32) -> (i32, i32) {
    %c0_i32 = arith.constant 0 : i32
    %c0_i32_0 = arith.constant 0 : i32
    %c0_i32_1 = arith.constant 0 : i32
    return %c0_i32, %c0_i32_0 : i32, i32
  }
  func.func @transform_14(%arg0: i32) -> (i32, i32) {
    %c0_i32 = arith.constant 0 : i32
    %c0_i32_0 = arith.constant 0 : i32
    %c0_i32_1 = arith.constant 0 : i32
    return %c0_i32, %c0_i32_0 : i32, i32
  }
  func.func @transform_15(%arg0: i32) -> (i32, i32) {
    %c0_i32 = arith.constant 0 : i32
    %c0_i32_0 = arith.constant 0 : i32
    %c0_i32_1 = arith.constant 0 : i32
    return %c0_i32, %c0_i32_0 : i32, i32
  }
  func.func @transform_16(%arg0: i32) -> (i32, i32) {
    %c0_i32 = arith.constant 0 : i32
    %c0_i32_0 = arith.constant 0 : i32
    %c0_i32_1 = arith.constant 0 : i32
    return %c0_i32, %c0_i32_0 : i32, i32
  }
  func.func @transform_17(%arg0: i32) -> (i32, i32) {
    %c0_i32 = arith.constant 0 : i32
    %c0_i32_0 = arith.constant 0 : i32
    %c0_i32_1 = arith.constant 0 : i32
    return %c0_i32, %c0_i32_0 : i32, i32
  }
  func.func @transform_18(%arg0: i32) -> (i32, i32) {
    %c0_i32 = arith.constant 0 : i32
    %c0_i32_0 = arith.constant 0 : i32
    %c0_i32_1 = arith.constant 0 : i32
    return %c0_i32, %c0_i32_0 : i32, i32
  }
}

</mosaic_0001>

<bundles_post_ra>
// kernel: vpt_forward.5
= control target key start
LH: loop header
LB: loop body
LE: loop exit
PB: predicated region body
PF: predicated region fallthrough
CT: control target
= control target key end

     0   :  { %vm604_vm0 = vcmask 1041408   ;;  %vm315_vm1 = vcmask 162816   ;;  %vm1601_vm2 = vcmask 31744   ;;  %s3870_s1 = inlined_call_operand.vmem [shape: f32[20,4], index: 1, kind: input, shape index: {}]   ;;  %s3871_s0 = inlined_call_operand.vmem [shape: f32[1536,20], index: 0, kind: input, shape index: {}]   ;;  %s3872_s2 = inlined_call_operand.vmem [shape: f32[1,4], index: 2, kind: input, shape index: {}]   ;;  %s3873_s3 = inlined_call_operand.vmem [shape: f32[1536,4], index: 3, kind: output, shape index: {}]  }
   0x1   :  { %v303_v0 = vld [vmem:[%s3870_s1] sm:$0xff]  ;;  %v304_v1 = vld [vmem:[%s3870_s1 + $0x8] sm:$0xff]  ;;  %v305_v2 = vld [vmem:[%s3870_s1 + $0x10] sm:$0xf] }
   0x2   :  { %v306_v3 = vpack.c.bf16 %v304_v1, %v303_v0  ;;  %v307_v4 = vpack.c.bf16 %v305_v2, %v305_v2  ;;  %v15_v5 = vld [vmem:[%s3871_s0] sm:$0xff]  ;;  %v16_v6 = vld [vmem:[%s3871_s0 + $0x8] sm:$0xff]  ;;  %v17_v11 = vld [vmem:[%s3871_s0 + $0x10] sm:$0xff] }
   0x3   :  { %v111_v7 = vld [vmem:[%s3871_s0 + $0x300] sm:$0xff]  ;;  %v207_v8 = vpack.c.bf16 %v16_v6, %v15_v5  ;;  %v112_v9 = vld [vmem:[%s3871_s0 + $0x308] sm:$0xff]  ;;  %v18_v12 = vld [vmem:[%s3871_s0 + $0x18] sm:$0xff] }
   0x4   :  { %1993 = vmatprep.subr.bf16.mxu0 %v306_v3  ;;  %2189 = vmatprep.subr.bf16.mxu1 %v306_v3  ;;  %v255_v10 = vpack.c.bf16 %v112_v9, %v111_v7  ;;  %v113_v13 = vld [vmem:[%s3871_s0 + $0x310] sm:$0xff]  ;;  %v114_v14 = vld [vmem:[%s3871_s0 + $0x318] sm:$0xff]  ;;  %v19_v15 = vld [vmem:[%s3871_s0 + $0x20] sm:$0xff]  ;;  %v606_v16 = vsel %vm604_vm0, %v307_v4, 0  ;;  %v208_v20 = vpack.c.bf16 %v18_v12, %v17_v11 }
   0x5   :  { %1994 = vmatpush3.bf16.msra.mxu0 %v306_v3  ;;  %2191 = vmatpush3.bf16.msra.mxu1 %v306_v3  ;;  %v20_v17 = vld [vmem:[%s3871_s0 + $0x28] sm:$0xff]  ;;  %v115_v18 = vld [vmem:[%s3871_s0 + $0x320] sm:$0xff]  ;;  %v256_v21 = vpack.c.bf16 %v114_v14, %v113_v13  ;;  %v21_v24 = vld [vmem:[%s3871_s0 + $0x30] sm:$0xff] }
   0x6   :  { %2193 = vmatprep.subr.msk.bf16.mxu0 %vm604_vm0, %v307_v4  ;;  %2194 = vmatprep.subr.msk.bf16.mxu1 %vm604_vm0, %v307_v4  ;;  %v116_v19 = vld [vmem:[%s3871_s0 + $0x328] sm:$0xff]  ;;  %v209_v22 = vpack.c.bf16 %v20_v17, %v19_v15  ;;  %v22_v25 = vld [vmem:[%s3871_s0 + $0x38] sm:$0xff]  ;;  %v117_v26 = vld [vmem:[%s3871_s0 + $0x330] sm:$0xff] }
   0x7   :  { %1997 = vmatprep.mubr.msk.bf16.mxu0 %vm315_vm1, %v207_v8  ;;  %2093 = vmatprep.mubr.msk.bf16.mxu1 %vm315_vm1, %v255_v10  ;;  %v257_v23 = vpack.c.bf16 %v116_v19, %v115_v18  ;;  %v118_v27 = vld [vmem:[%s3871_s0 + $0x338] sm:$0xff]  ;;  %v23_v28 = vld [vmem:[%s3871_s0 + $0x40] sm:$0xff]  ;;  %v24_v29 = vld [vmem:[%s3871_s0 + $0x48] sm:$0xff]  ;;  %v210_v32 = vpack.c.bf16 %v22_v25, %v21_v24 }
   0x8   :  { %v119_v30 = vld [vmem:[%s3871_s0 + $0x340] sm:$0xff]  ;;  %v120_v31 = vld [vmem:[%s3871_s0 + $0x348] sm:$0xff]  ;;  %v258_v33 = vpack.c.bf16 %v118_v27, %v117_v26  ;;  %v211_v34 = vpack.c.bf16 %v24_v29, %v23_v28  ;;  %v25_v36 = vld [vmem:[%s3871_s0 + $0x50] sm:$0xff] }
   0x9   :  { %1996 = vmatpush3.bf16.msra.mxu0 %v606_v16  ;;  %2192 = vmatpush3.bf16.msra.mxu1 %v606_v16  ;;  %v259_v35 = vpack.c.bf16 %v120_v31, %v119_v30  ;;  %v26_v37 = vld [vmem:[%s3871_s0 + $0x58] sm:$0xff]  ;;  %v121_v38 = vld [vmem:[%s3871_s0 + $0x350] sm:$0xff]  ;;  %v27_v40 = vld [vmem:[%s3871_s0 + $0x60] sm:$0xff] }
   0xa   :  { %v122_v39 = vld [vmem:[%s3871_s0 + $0x358] sm:$0xff]  ;;  %v28_v41 = vld [vmem:[%s3871_s0 + $0x68] sm:$0xff]  ;;  %v123_v42 = vld [vmem:[%s3871_s0 + $0x360] sm:$0xff]  ;;  %v212_v44 = vpack.c.bf16 %v26_v37, %v25_v36 }
   0xb   :  { %v124_v43 = vld [vmem:[%s3871_s0 + $0x368] sm:$0xff]  ;;  %v260_v45 = vpack.c.bf16 %v122_v39, %v121_v38  ;;  %v213_v46 = vpack.c.bf16 %v28_v41, %v27_v40  ;;  %v29_v48 = vld [vmem:[%s3871_s0 + $0x70] sm:$0xff]  ;;  %v30_v49 = vld [vmem:[%s3871_s0 + $0x78] sm:$0xff] }
   0xc   :  { %1998 = vmatmul.mubr.msk.bf16.vlgmr.msra.gmra.mrb[0].mxu0 %vm315_vm1, %v208_v20  ;;  %2094 = vmatmul.mubr.msk.bf16.vlgmr.msra.gmra.mrb[0].mxu1 %vm315_vm1, %v256_v21  ;;  %v261_v47 = vpack.c.bf16 %v124_v43, %v123_v42  ;;  %v125_v50 = vld [vmem:[%s3871_s0 + $0x370] sm:$0xff]  ;;  %v126_v51 = vld [vmem:[%s3871_s0 + $0x378] sm:$0xff]  ;;  %v31_v52 = vld [vmem:[%s3871_s0 + $0x80] sm:$0xff]  ;;  %v214_v56 = vpack.c.bf16 %v30_v49, %v29_v48 }
   0xd   :  { %2001 = vmatprep.mubr.msk.bf16.mxu0 %vm315_vm1, %v209_v22  ;;  %2097 = vmatprep.mubr.msk.bf16.mxu1 %vm315_vm1, %v257_v23  ;;  %v32_v53 = vld [vmem:[%s3871_s0 + $0x88] sm:$0xff]  ;;  %v127_v54 = vld [vmem:[%s3871_s0 + $0x380] sm:$0xff]  ;;  %v262_v57 = vpack.c.bf16 %v126_v51, %v125_v50  ;;  %v33_v60 = vld [vmem:[%s3871_s0 + $0x90] sm:$0xff] }
   0xe   :  { %v128_v55 = vld [vmem:[%s3871_s0 + $0x388] sm:$0xff]  ;;  %v215_v58 = vpack.c.bf16 %v32_v53, %v31_v52  ;;  %v34_v61 = vld [vmem:[%s3871_s0 + $0x98] sm:$0xff]  ;;  %v129_v62 = vld [vmem:[%s3871_s0 + $0x390] sm:$0xff] }
   0xf   :  { %v263_v59 = vpack.c.bf16 %v128_v55, %v127_v54  ;;  %v130_v63 = vld [vmem:[%s3871_s0 + $0x398] sm:$0xff]  ;;  %v35_v0 = vld [vmem:[%s3871_s0 + $0xa0] sm:$0xff]  ;;  %v36_v1 = vld [vmem:[%s3871_s0 + $0xa8] sm:$0xff]  ;;  %v216_v4 = vpack.c.bf16 %v34_v61, %v33_v60 }
  0x10   :  { %v131_v2 = vld [vmem:[%s3871_s0 + $0x3a0] sm:$0xff]  ;;  %v132_v3 = vld [vmem:[%s3871_s0 + $0x3a8] sm:$0xff]  ;;  %v264_v5 = vpack.c.bf16 %v130_v63, %v129_v62  ;;  %v217_v6 = vpack.c.bf16 %v36_v1, %v35_v0  ;;  %v37_v8 = vld [vmem:[%s3871_s0 + $0xb0] sm:$0xff] }
  0x11   :  { %v265_v7 = vpack.c.bf16 %v132_v3, %v131_v2  ;;  %v38_v9 = vld [vmem:[%s3871_s0 + $0xb8] sm:$0xff]  ;;  %v133_v10 = vld [vmem:[%s3871_s0 + $0x3b0] sm:$0xff]  ;;  %v39_v12 = vld [vmem:[%s3871_s0 + $0xc0] sm:$0xff] }
  0x12   :  { %v134_v11 = vld [vmem:[%s3871_s0 + $0x3b8] sm:$0xff]  ;;  %v40_v13 = vld [vmem:[%s3871_s0 + $0xc8] sm:$0xff]  ;;  %v135_v14 = vld [vmem:[%s3871_s0 + $0x3c0] sm:$0xff]  ;;  %v218_v16 = vpack.c.bf16 %v38_v9, %v37_v8 }
  0x13   :  { %v136_v15 = vld [vmem:[%s3871_s0 + $0x3c8] sm:$0xff]  ;;  %v266_v17 = vpack.c.bf16 %v134_v11, %v133_v10  ;;  %v219_v18 = vpack.c.bf16 %v40_v13, %v39_v12  ;;  %v41_v20 = vld [vmem:[%s3871_s0 + $0xd0] sm:$0xff]  ;;  %v42_v21 = vld [vmem:[%s3871_s0 + $0xd8] sm:$0xff] }
  0x14   :  { %2002 = vmatmul.mubr.msk.bf16.gmra.mrb[4].mxu0 %vm315_vm1, %v210_v32  ;;  %2098 = vmatmul.mubr.msk.bf16.gmra.mrb[4].mxu1 %vm315_vm1, %v258_v33  ;;  %v267_v19 = vpack.c.bf16 %v136_v15, %v135_v14  ;;  %v137_v22 = vld [vmem:[%s3871_s0 + $0x3d0] sm:$0xff]  ;;  %v138_v23 = vld [vmem:[%s3871_s0 + $0x3d8] sm:$0xff]  ;;  %v43_v24 = vld [vmem:[%s3871_s0 + $0xe0] sm:$0xff]  ;;  %v220_v28 = vpack.c.bf16 %v42_v21, %v41_v20 }
  0x15   :  { %2005 = vmatprep.mubr.msk.bf16.mxu0 %vm315_vm1, %v211_v34  ;;  %2101 = vmatprep.mubr.msk.bf16.mxu1 %vm315_vm1, %v259_v35  ;;  %v44_v25 = vld [vmem:[%s3871_s0 + $0xe8] sm:$0xff]  ;;  %v139_v26 = vld [vmem:[%s3871_s0 + $0x3e0] sm:$0xff]  ;;  %v268_v29 = vpack.c.bf16 %v138_v23, %v137_v22  ;;  %v45_v32 = vld [vmem:[%s3871_s0 + $0xf0] sm:$0xff] }
  0x16   :  { %v140_v27 = vld [vmem:[%s3871_s0 + $0x3e8] sm:$0xff]  ;;  %v221_v30 = vpack.c.bf16 %v44_v25, %v43_v24  ;;  %v46_v33 = vld [vmem:[%s3871_s0 + $0xf8] sm:$0xff]  ;;  %v141_v34 = vld [vmem:[%s3871_s0 + $0x3f0] sm:$0xff] }
  0x17   :  { %v269_v31 = vpack.c.bf16 %v140_v27, %v139_v26  ;;  %v142_v35 = vld [vmem:[%s3871_s0 + $0x3f8] sm:$0xff]  ;;  %v47_v36 = vld [vmem:[%s3871_s0 + $0x100] sm:$0xff]  ;;  %v48_v37 = vld [vmem:[%s3871_s0 + $0x108] sm:$0xff]  ;;  %v222_v40 = vpack.c.bf16 %v46_v33, %v45_v32 }
  0x18   :  { %v143_v38 = vld [vmem:[%s3871_s0 + $0x400] sm:$0xff]  ;;  %v144_v39 = vld [vmem:[%s3871_s0 + $0x408] sm:$0xff]  ;;  %v270_v41 = vpack.c.bf16 %v142_v35, %v141_v34  ;;  %v223_v42 = vpack.c.bf16 %v48_v37, %v47_v36 }
  0x19   :  { %v271_v43 = vpack.c.bf16 %v144_v39, %v143_v38  ;;  %v51_v48 = vld [vmem:[%s3871_s0 + $0x120] sm:$0xff]  ;;  %v52_v49 = vld [vmem:[%s3871_s0 + $0x128] sm:$0xff] }
  0x1a   :  { %v147_v50 = vld [vmem:[%s3871_s0 + $0x420] sm:$0xff]  ;;  %v148_v51 = vld [vmem:[%s3871_s0 + $0x428] sm:$0xff]  ;;  %v225_v54 = vpack.c.bf16 %v52_v49, %v51_v48 }
  0x1b   :  { %v273_v55 = vpack.c.bf16 %v148_v51, %v147_v50  ;;  %v55_v60 = vld [vmem:[%s3871_s0 + $0x140] sm:$0xff]  ;;  %v56_v61 = vld [vmem:[%s3871_s0 + $0x148] sm:$0xff] }
  0x1c   :  { %2006 = vmatmul.mubr.msk.bf16.gmra.mrb[8].mxu0 %vm315_vm1, %v212_v44  ;;  %2102 = vmatmul.mubr.msk.bf16.gmra.mrb[8].mxu1 %vm315_vm1, %v260_v45  ;;  %v49_v44 = vld [vmem:[%s3871_s0 + $0x110] sm:$0xff]  ;;  %v50_v45 = vld [vmem:[%s3871_s0 + $0x118] sm:$0xff]  ;;  %v151_v62 = vld [vmem:[%s3871_s0 + $0x440] sm:$0xff]  ;;  %v227_v2 = vpack.c.bf16 %v56_v61, %v55_v60 }
  0x1d   :  { %2009 = vmatprep.mubr.msk.bf16.mxu0 %vm315_vm1, %v213_v46  ;;  %2105 = vmatprep.mubr.msk.bf16.mxu1 %vm315_vm1, %v261_v47  ;;  %v145_v46 = vld [vmem:[%s3871_s0 + $0x410] sm:$0xff]  ;;  %v146_v47 = vld [vmem:[%s3871_s0 + $0x418] sm:$0xff]  ;;  %v224_v52 = vpack.c.bf16 %v50_v45, %v49_v44  ;;  %v152_v63 = vld [vmem:[%s3871_s0 + $0x448] sm:$0xff] }
  0x1e   :  { %v272_v53 = vpack.c.bf16 %v146_v47, %v145_v46  ;;  %v275_v3 = vpack.c.bf16 %v152_v63, %v151_v62  ;;  %v59_v8 = vld [vmem:[%s3871_s0 + $0x160] sm:$0xff]  ;;  %v60_v9 = vld [vmem:[%s3871_s0 + $0x168] sm:$0xff] }
  0x1f   :  { %v155_v10 = vld [vmem:[%s3871_s0 + $0x460] sm:$0xff]  ;;  %v156_v11 = vld [vmem:[%s3871_s0 + $0x468] sm:$0xff]  ;;  %v229_v14 = vpack.c.bf16 %v60_v9, %v59_v8 }
  0x20   :  { %v277_v15 = vpack.c.bf16 %v156_v11, %v155_v10  ;;  %v63_v20 = vld [vmem:[%s3871_s0 + $0x180] sm:$0xff]  ;;  %v64_v21 = vld [vmem:[%s3871_s0 + $0x188] sm:$0xff] }
  0x21   :  { %v159_v22 = vld [vmem:[%s3871_s0 + $0x480] sm:$0xff]  ;;  %v160_v23 = vld [vmem:[%s3871_s0 + $0x488] sm:$0xff]  ;;  %v231_v26 = vpack.c.bf16 %v64_v21, %v63_v20 }
  0x22   :  { %v279_v27 = vpack.c.bf16 %v160_v23, %v159_v22  ;;  %v67_v32 = vld [vmem:[%s3871_s0 + $0x1a0] sm:$0xff]  ;;  %v68_v33 = vld [vmem:[%s3871_s0 + $0x1a8] sm:$0xff] }
  0x23   :  { %v163_v34 = vld [vmem:[%s3871_s0 + $0x4a0] sm:$0xff]  ;;  %v164_v35 = vld [vmem:[%s3871_s0 + $0x4a8] sm:$0xff]  ;;  %v233_v38 = vpack.c.bf16 %v68_v33, %v67_v32 }
  0x24   :  { %2010 = vmatmul.mubr.msk.bf16.gmra.mrb[12].mxu0 %vm315_vm1, %v214_v56  ;;  %2106 = vmatmul.mubr.msk.bf16.gmra.mrb[12].mxu1 %vm315_vm1, %v262_v57  ;;  %v53_v56 = vld [vmem:[%s3871_s0 + $0x130] sm:$0xff]  ;;  %v54_v57 = vld [vmem:[%s3871_s0 + $0x138] sm:$0xff]  ;;  %v281_v39 = vpack.c.bf16 %v164_v35, %v163_v34  ;;  %v71_v44 = vld [vmem:[%s3871_s0 + $0x1c0] sm:$0xff] }
  0x25   :  { %2013 = vmatprep.mubr.msk.bf16.mxu0 %vm315_vm1, %v215_v58  ;;  %2109 = vmatprep.mubr.msk.bf16.mxu1 %vm315_vm1, %v263_v59  ;;  %v149_v58 = vld [vmem:[%s3871_s0 + $0x430] sm:$0xff]  ;;  %v150_v59 = vld [vmem:[%s3871_s0 + $0x438] sm:$0xff]  ;;  %v226_v0 = vpack.c.bf16 %v54_v57, %v53_v56  ;;  %v72_v45 = vld [vmem:[%s3871_s0 + $0x1c8] sm:$0xff] }
  0x26   :  { %v274_v1 = vpack.c.bf16 %v150_v59, %v149_v58  ;;  %v167_v46 = vld [vmem:[%s3871_s0 + $0x4c0] sm:$0xff]  ;;  %v168_v47 = vld [vmem:[%s3871_s0 + $0x4c8] sm:$0xff]  ;;  %v235_v50 = vpack.c.bf16 %v72_v45, %v71_v44 }
  0x27   :  { %v283_v51 = vpack.c.bf16 %v168_v47, %v167_v46  ;;  %v75_v56 = vld [vmem:[%s3871_s0 + $0x1e0] sm:$0xff]  ;;  %v76_v57 = vld [vmem:[%s3871_s0 + $0x1e8] sm:$0xff] }
  0x28   :  { %v171_v58 = vld [vmem:[%s3871_s0 + $0x4e0] sm:$0xff]  ;;  %v172_v59 = vld [vmem:[%s3871_s0 + $0x4e8] sm:$0xff]  ;;  %v237_v62 = vpack.c.bf16 %v76_v57, %v75_v56 }
  0x29   :  { %v285_v63 = vpack.c.bf16 %v172_v59, %v171_v58 }
  0x2c   :  { %2014 = vmatmul.mubr.msk.bf16.gmra.mrb[16].mxu0 %vm315_vm1, %v216_v4  ;;  %2110 = vmatmul.mubr.msk.bf16.gmra.mrb[16].mxu1 %vm315_vm1, %v264_v5  ;;  %v57_v4 = vld [vmem:[%s3871_s0 + $0x150] sm:$0xff]  ;;  %v58_v5 = vld [vmem:[%s3871_s0 + $0x158] sm:$0xff] }
  0x2d   :  { %2017 = vmatprep.mubr.msk.bf16.mxu0 %vm315_vm1, %v217_v6  ;;  %2113 = vmatprep.mubr.msk.bf16.mxu1 %vm315_vm1, %v265_v7  ;;  %v153_v6 = vld [vmem:[%s3871_s0 + $0x450] sm:$0xff]  ;;  %v154_v7 = vld [vmem:[%s3871_s0 + $0x458] sm:$0xff]  ;;  %v228_v12 = vpack.c.bf16 %v58_v5, %v57_v4  ;;  %v79_v4 = vld [vmem:[%s3871_s0 + $0x200] sm:$0xff] }
  0x2e   :  { %v276_v13 = vpack.c.bf16 %v154_v7, %v153_v6  ;;  %v80_v5 = vld [vmem:[%s3871_s0 + $0x208] sm:$0xff]  ;;  %v175_v6 = vld [vmem:[%s3871_s0 + $0x500] sm:$0xff] }
  0x2f   :  { %v176_v7 = vld [vmem:[%s3871_s0 + $0x508] sm:$0xff]  ;;  %v239_v10 = vpack.c.bf16 %v80_v5, %v79_v4 }
  0x30   :  { %v287_v11 = vpack.c.bf16 %v176_v7, %v175_v6 }
  0x34   :  { %2018 = vmatmul.mubr.msk.bf16.gmra.mrb[20].mxu0 %vm315_vm1, %v218_v16  ;;  %2114 = vmatmul.mubr.msk.bf16.gmra.mrb[20].mxu1 %vm315_vm1, %v266_v17  ;;  %v61_v16 = vld [vmem:[%s3871_s0 + $0x170] sm:$0xff]  ;;  %v62_v17 = vld [vmem:[%s3871_s0 + $0x178] sm:$0xff] }
  0x35   :  { %2021 = vmatprep.mubr.msk.bf16.mxu0 %vm315_vm1, %v219_v18  ;;  %2117 = vmatprep.mubr.msk.bf16.mxu1 %vm315_vm1, %v267_v19  ;;  %v157_v18 = vld [vmem:[%s3871_s0 + $0x470] sm:$0xff]  ;;  %v158_v19 = vld [vmem:[%s3871_s0 + $0x478] sm:$0xff]  ;;  %v230_v24 = vpack.c.bf16 %v62_v17, %v61_v16  ;;  %v83_v16 = vld [vmem:[%s3871_s0 + $0x220] sm:$0xff] }
  0x36   :  { %v278_v25 = vpack.c.bf16 %v158_v19, %v157_v18  ;;  %v84_v17 = vld [vmem:[%s3871_s0 + $0x228] sm:$0xff]  ;;  %v179_v18 = vld [vmem:[%s3871_s0 + $0x520] sm:$0xff] }
  0x37   :  { %v180_v19 = vld [vmem:[%s3871_s0 + $0x528] sm:$0xff]  ;;  %v241_v22 = vpack.c.bf16 %v84_v17, %v83_v16 }
  0x38   :  { %v289_v23 = vpack.c.bf16 %v180_v19, %v179_v18 }
  0x3c   :  { %2022 = vmatmul.mubr.msk.bf16.gmra.mrb[24].mxu0 %vm315_vm1, %v220_v28  ;;  %2118 = vmatmul.mubr.msk.bf16.gmra.mrb[24].mxu1 %vm315_vm1, %v268_v29  ;;  %v65_v28 = vld [vmem:[%s3871_s0 + $0x190] sm:$0xff]  ;;  %v66_v29 = vld [vmem:[%s3871_s0 + $0x198] sm:$0xff] }
  0x3d   :  { %2025 = vmatprep.mubr.msk.bf16.mxu0 %vm315_vm1, %v221_v30  ;;  %2121 = vmatprep.mubr.msk.bf16.mxu1 %vm315_vm1, %v269_v31  ;;  %v161_v30 = vld [vmem:[%s3871_s0 + $0x490] sm:$0xff]  ;;  %v162_v31 = vld [vmem:[%s3871_s0 + $0x498] sm:$0xff]  ;;  %v232_v36 = vpack.c.bf16 %v66_v29, %v65_v28  ;;  %v87_v28 = vld [vmem:[%s3871_s0 + $0x240] sm:$0xff] }
  0x3e   :  { %v280_v37 = vpack.c.bf16 %v162_v31, %v161_v30  ;;  %v88_v29 = vld [vmem:[%s3871_s0 + $0x248] sm:$0xff]  ;;  %v183_v30 = vld [vmem:[%s3871_s0 + $0x540] sm:$0xff] }
  0x3f   :  { %v184_v31 = vld [vmem:[%s3871_s0 + $0x548] sm:$0xff]  ;;  %v243_v34 = vpack.c.bf16 %v88_v29, %v87_v28 }
  0x40   :  { %v291_v35 = vpack.c.bf16 %v184_v31, %v183_v30 }
  0x44   :  { %2026 = vmatmul.mubr.msk.bf16.gmra.mrb[28].mxu0 %vm315_vm1, %v222_v40  ;;  %2122 = vmatmul.mubr.msk.bf16.gmra.mrb[28].mxu1 %vm315_vm1, %v270_v41  ;;  %v69_v40 = vld [vmem:[%s3871_s0 + $0x1b0] sm:$0xff]  ;;  %v70_v41 = vld [vmem:[%s3871_s0 + $0x1b8] sm:$0xff] }
  0x45   :  { %2029 = vmatprep.mubr.msk.bf16.mxu0 %vm315_vm1, %v223_v42  ;;  %2125 = vmatprep.mubr.msk.bf16.mxu1 %vm315_vm1, %v271_v43  ;;  %v165_v42 = vld [vmem:[%s3871_s0 + $0x4b0] sm:$0xff]  ;;  %v166_v43 = vld [vmem:[%s3871_s0 + $0x4b8] sm:$0xff]  ;;  %v234_v48 = vpack.c.bf16 %v70_v41, %v69_v40  ;;  %v91_v40 = vld [vmem:[%s3871_s0 + $0x260] sm:$0xff] }
  0x46   :  { %v282_v49 = vpack.c.bf16 %v166_v43, %v165_v42  ;;  %v92_v41 = vld [vmem:[%s3871_s0 + $0x268] sm:$0xff]  ;;  %v187_v42 = vld [vmem:[%s3871_s0 + $0x560] sm:$0xff] }
  0x47   :  { %v188_v43 = vld [vmem:[%s3871_s0 + $0x568] sm:$0xff]  ;;  %v245_v46 = vpack.c.bf16 %v92_v41, %v91_v40 }
  0x48   :  { %v293_v47 = vpack.c.bf16 %v188_v43, %v187_v42 }
  0x4c   :  { %2030 = vmatmul.mubr.msk.bf16.gmra.mrb[32].mxu0 %vm315_vm1, %v224_v52  ;;  %2126 = vmatmul.mubr.msk.bf16.gmra.mrb[32].mxu1 %vm315_vm1, %v272_v53  ;;  %v73_v52 = vld [vmem:[%s3871_s0 + $0x1d0] sm:$0xff]  ;;  %v74_v53 = vld [vmem:[%s3871_s0 + $0x1d8] sm:$0xff] }
  0x4d   :  { %2033 = vmatprep.mubr.msk.bf16.mxu0 %vm315_vm1, %v225_v54  ;;  %2129 = vmatprep.mubr.msk.bf16.mxu1 %vm315_vm1, %v273_v55  ;;  %v169_v54 = vld [vmem:[%s3871_s0 + $0x4d0] sm:$0xff]  ;;  %v170_v55 = vld [vmem:[%s3871_s0 + $0x4d8] sm:$0xff]  ;;  %v236_v60 = vpack.c.bf16 %v74_v53, %v73_v52  ;;  %v95_v52 = vld [vmem:[%s3871_s0 + $0x280] sm:$0xff] }
  0x4e   :  { %v284_v61 = vpack.c.bf16 %v170_v55, %v169_v54  ;;  %v96_v53 = vld [vmem:[%s3871_s0 + $0x288] sm:$0xff]  ;;  %v191_v54 = vld [vmem:[%s3871_s0 + $0x580] sm:$0xff] }
  0x4f   :  { %v192_v55 = vld [vmem:[%s3871_s0 + $0x588] sm:$0xff]  ;;  %v247_v58 = vpack.c.bf16 %v96_v53, %v95_v52 }
  0x50   :  { %v295_v59 = vpack.c.bf16 %v192_v55, %v191_v54 }
  0x54   :  { %2034 = vmatmul.mubr.msk.bf16.gmra.mrb[36].mxu0 %vm315_vm1, %v226_v0  ;;  %2130 = vmatmul.mubr.msk.bf16.gmra.mrb[36].mxu1 %vm315_vm1, %v274_v1  ;;  %v77_v0 = vld [vmem:[%s3871_s0 + $0x1f0] sm:$0xff]  ;;  %v78_v1 = vld [vmem:[%s3871_s0 + $0x1f8] sm:$0xff] }
  0x55   :  { %2037 = vmatprep.mubr.msk.bf16.mxu0 %vm315_vm1, %v227_v2  ;;  %2133 = vmatprep.mubr.msk.bf16.mxu1 %vm315_vm1, %v275_v3  ;;  %v173_v2 = vld [vmem:[%s3871_s0 + $0x4f0] sm:$0xff]  ;;  %v174_v3 = vld [vmem:[%s3871_s0 + $0x4f8] sm:$0xff]  ;;  %v238_v8 = vpack.c.bf16 %v78_v1, %v77_v0  ;;  %v99_v0 = vld [vmem:[%s3871_s0 + $0x2a0] sm:$0xff] }
  0x56   :  { %v286_v9 = vpack.c.bf16 %v174_v3, %v173_v2  ;;  %v100_v1 = vld [vmem:[%s3871_s0 + $0x2a8] sm:$0xff]  ;;  %v195_v2 = vld [vmem:[%s3871_s0 + $0x5a0] sm:$0xff] }
  0x57   :  { %v196_v3 = vld [vmem:[%s3871_s0 + $0x5a8] sm:$0xff]  ;;  %v249_v6 = vpack.c.bf16 %v100_v1, %v99_v0 }
  0x58   :  { %v297_v7 = vpack.c.bf16 %v196_v3, %v195_v2 }
  0x5c   :  { %2038 = vmatmul.mubr.msk.bf16.gmra.mrb[40].mxu0 %vm315_vm1, %v228_v12  ;;  %2134 = vmatmul.mubr.msk.bf16.gmra.mrb[40].mxu1 %vm315_vm1, %v276_v13  ;;  %v81_v12 = vld [vmem:[%s3871_s0 + $0x210] sm:$0xff]  ;;  %v82_v13 = vld [vmem:[%s3871_s0 + $0x218] sm:$0xff] }
  0x5d   :  { %2041 = vmatprep.mubr.msk.bf16.mxu0 %vm315_vm1, %v229_v14  ;;  %2137 = vmatprep.mubr.msk.bf16.mxu1 %vm315_vm1, %v277_v15  ;;  %v177_v14 = vld [vmem:[%s3871_s0 + $0x510] sm:$0xff]  ;;  %v178_v15 = vld [vmem:[%s3871_s0 + $0x518] sm:$0xff]  ;;  %v240_v20 = vpack.c.bf16 %v82_v13, %v81_v12  ;;  %v103_v12 = vld [vmem:[%s3871_s0 + $0x2c0] sm:$0xff] }
  0x5e   :  { %v288_v21 = vpack.c.bf16 %v178_v15, %v177_v14  ;;  %v104_v13 = vld [vmem:[%s3871_s0 + $0x2c8] sm:$0xff]  ;;  %v199_v14 = vld [vmem:[%s3871_s0 + $0x5c0] sm:$0xff] }
  0x5f   :  { %v200_v15 = vld [vmem:[%s3871_s0 + $0x5c8] sm:$0xff]  ;;  %v251_v18 = vpack.c.bf16 %v104_v13, %v103_v12 }
  0x60   :  { %v299_v19 = vpack.c.bf16 %v200_v15, %v199_v14 }
  0x64   :  { %2042 = vmatmul.mubr.msk.bf16.gmra.mrb[44].mxu0 %vm315_vm1, %v230_v24  ;;  %2138 = vmatmul.mubr.msk.bf16.gmra.mrb[44].mxu1 %vm315_vm1, %v278_v25  ;;  %v85_v24 = vld [vmem:[%s3871_s0 + $0x230] sm:$0xff]  ;;  %v86_v25 = vld [vmem:[%s3871_s0 + $0x238] sm:$0xff] }
  0x65   :  { %2045 = vmatprep.mubr.msk.bf16.mxu0 %vm315_vm1, %v231_v26  ;;  %2141 = vmatprep.mubr.msk.bf16.mxu1 %vm315_vm1, %v279_v27  ;;  %v181_v26 = vld [vmem:[%s3871_s0 + $0x530] sm:$0xff]  ;;  %v182_v27 = vld [vmem:[%s3871_s0 + $0x538] sm:$0xff]  ;;  %v242_v32 = vpack.c.bf16 %v86_v25, %v85_v24  ;;  %v107_v24 = vld [vmem:[%s3871_s0 + $0x2e0] sm:$0xff] }
  0x66   :  { %v290_v33 = vpack.c.bf16 %v182_v27, %v181_v26  ;;  %v108_v25 = vld [vmem:[%s3871_s0 + $0x2e8] sm:$0xff]  ;;  %v203_v26 = vld [vmem:[%s3871_s0 + $0x5e0] sm:$0xff] }
  0x67   :  { %v204_v27 = vld [vmem:[%s3871_s0 + $0x5e8] sm:$0xff]  ;;  %v253_v30 = vpack.c.bf16 %v108_v25, %v107_v24 }
  0x68   :  { %v301_v31 = vpack.c.bf16 %v204_v27, %v203_v26 }
  0x6c   :  { %2046 = vmatmul.mubr.msk.bf16.gmra.mrb[48].mxu0 %vm315_vm1, %v232_v36  ;;  %2142 = vmatmul.mubr.msk.bf16.gmra.mrb[48].mxu1 %vm315_vm1, %v280_v37  ;;  %v89_v36 = vld [vmem:[%s3871_s0 + $0x250] sm:$0xff]  ;;  %v90_v37 = vld [vmem:[%s3871_s0 + $0x258] sm:$0xff] }
  0x6d   :  { %2049 = vmatprep.mubr.msk.bf16.mxu0 %vm315_vm1, %v233_v38  ;;  %2145 = vmatprep.mubr.msk.bf16.mxu1 %vm315_vm1, %v281_v39  ;;  %v185_v38 = vld [vmem:[%s3871_s0 + $0x550] sm:$0xff]  ;;  %v186_v39 = vld [vmem:[%s3871_s0 + $0x558] sm:$0xff]  ;;  %v244_v44 = vpack.c.bf16 %v90_v37, %v89_v36 }
  0x6e   :  { %v292_v45 = vpack.c.bf16 %v186_v39, %v185_v38  ;;  %v2903_v38 = vld [vmem:[%s3872_s2] ss:$0 sm:$0xff] }
  0x74   :  { %2050 = vmatmul.mubr.msk.bf16.gmra.mrb[52].mxu0 %vm315_vm1, %v234_v48  ;;  %2146 = vmatmul.mubr.msk.bf16.gmra.mrb[52].mxu1 %vm315_vm1, %v282_v49  ;;  %v93_v48 = vld [vmem:[%s3871_s0 + $0x270] sm:$0xff]  ;;  %v94_v49 = vld [vmem:[%s3871_s0 + $0x278] sm:$0xff] }
  0x75   :  { %2053 = vmatprep.mubr.msk.bf16.mxu0 %vm315_vm1, %v235_v50  ;;  %2149 = vmatprep.mubr.msk.bf16.mxu1 %vm315_vm1, %v283_v51  ;;  %v189_v50 = vld [vmem:[%s3871_s0 + $0x570] sm:$0xff]  ;;  %v190_v51 = vld [vmem:[%s3871_s0 + $0x578] sm:$0xff]  ;;  %v246_v56 = vpack.c.bf16 %v94_v49, %v93_v48 }
  0x76   :  { %v294_v57 = vpack.c.bf16 %v190_v51, %v189_v50 }
  0x7c   :  { %2054 = vmatmul.mubr.msk.bf16.gmra.mrb[56].mxu0 %vm315_vm1, %v236_v60  ;;  %2150 = vmatmul.mubr.msk.bf16.gmra.mrb[56].mxu1 %vm315_vm1, %v284_v61  ;;  %v97_v60 = vld [vmem:[%s3871_s0 + $0x290] sm:$0xff]  ;;  %v98_v61 = vld [vmem:[%s3871_s0 + $0x298] sm:$0xff] }
  0x7d   :  { %2057 = vmatprep.mubr.msk.bf16.mxu0 %vm315_vm1, %v237_v62  ;;  %2153 = vmatprep.mubr.msk.bf16.mxu1 %vm315_vm1, %v285_v63  ;;  %v193_v62 = vld [vmem:[%s3871_s0 + $0x590] sm:$0xff]  ;;  %v194_v63 = vld [vmem:[%s3871_s0 + $0x598] sm:$0xff]  ;;  %v248_v4 = vpack.c.bf16 %v98_v61, %v97_v60 }
  0x7e   :  { %v296_v5 = vpack.c.bf16 %v194_v63, %v193_v62 }
  0x84   :  { %2058 = vmatmul.mubr.msk.bf16.gmra.mrb[60].mxu0 %vm315_vm1, %v238_v8  ;;  %2154 = vmatmul.mubr.msk.bf16.gmra.mrb[60].mxu1 %vm315_vm1, %v286_v9  ;;  %v101_v8 = vld [vmem:[%s3871_s0 + $0x2b0] sm:$0xff]  ;;  %v102_v9 = vld [vmem:[%s3871_s0 + $0x2b8] sm:$0xff] }
  0x85   :  { %2061 = vmatprep.mubr.msk.bf16.mxu0 %vm315_vm1, %v239_v10  ;;  %2157 = vmatprep.mubr.msk.bf16.mxu1 %vm315_vm1, %v287_v11  ;;  %v197_v10 = vld [vmem:[%s3871_s0 + $0x5b0] sm:$0xff]  ;;  %v198_v11 = vld [vmem:[%s3871_s0 + $0x5b8] sm:$0xff]  ;;  %v250_v16 = vpack.c.bf16 %v102_v9, %v101_v8 }
  0x86   :  { %v298_v17 = vpack.c.bf16 %v198_v11, %v197_v10 }
  0x8c   :  { %2062 = vmatmul.mubr.msk.bf16.gmra.mrb[64].mxu0 %vm315_vm1, %v240_v20  ;;  %2158 = vmatmul.mubr.msk.bf16.gmra.mrb[64].mxu1 %vm315_vm1, %v288_v21  ;;  %v105_v20 = vld [vmem:[%s3871_s0 + $0x2d0] sm:$0xff]  ;;  %v106_v21 = vld [vmem:[%s3871_s0 + $0x2d8] sm:$0xff] }
  0x8d   :  { %2065 = vmatprep.mubr.msk.bf16.mxu0 %vm315_vm1, %v241_v22  ;;  %2161 = vmatprep.mubr.msk.bf16.mxu1 %vm315_vm1, %v289_v23  ;;  %v201_v22 = vld [vmem:[%s3871_s0 + $0x5d0] sm:$0xff]  ;;  %v202_v23 = vld [vmem:[%s3871_s0 + $0x5d8] sm:$0xff]  ;;  %v252_v28 = vpack.c.bf16 %v106_v21, %v105_v20 }
  0x8e   :  { %v300_v29 = vpack.c.bf16 %v202_v23, %v201_v22 }
  0x94   :  { %2066 = vmatmul.mubr.msk.bf16.gmra.mrb[68].mxu0 %vm315_vm1, %v242_v32  ;;  %2162 = vmatmul.mubr.msk.bf16.gmra.mrb[68].mxu1 %vm315_vm1, %v290_v33  ;;  %v109_v32 = vld [vmem:[%s3871_s0 + $0x2f0] sm:$0xff]  ;;  %v110_v33 = vld [vmem:[%s3871_s0 + $0x2f8] sm:$0xff] }
  0x95   :  { %2069 = vmatprep.mubr.msk.bf16.mxu0 %vm315_vm1, %v243_v34  ;;  %2165 = vmatprep.mubr.msk.bf16.mxu1 %vm315_vm1, %v291_v35  ;;  %v205_v34 = vld [vmem:[%s3871_s0 + $0x5f0] sm:$0xff]  ;;  %v206_v35 = vld [vmem:[%s3871_s0 + $0x5f8] sm:$0xff]  ;;  %v254_v36 = vpack.c.bf16 %v110_v33, %v109_v32 }
  0x96   :  { %v302_v37 = vpack.c.bf16 %v206_v35, %v205_v34 }
  0x9c   :  { %2070 = vmatmul.mubr.msk.bf16.gmra.mrb[72].mxu0 %vm315_vm1, %v244_v44  ;;  %2166 = vmatmul.mubr.msk.bf16.gmra.mrb[72].mxu1 %vm315_vm1, %v292_v45 }
  0x9d   :  { %2073 = vmatprep.mubr.msk.bf16.mxu0 %vm315_vm1, %v245_v46  ;;  %2169 = vmatprep.mubr.msk.bf16.mxu1 %vm315_vm1, %v293_v47 }
  0xa4   :  { %2074 = vmatmul.mubr.msk.bf16.gmra.mrb[76].mxu0 %vm315_vm1, %v246_v56  ;;  %2170 = vmatmul.mubr.msk.bf16.gmra.mrb[76].mxu1 %vm315_vm1, %v294_v57 }
  0xa5   :  { %2077 = vmatprep.mubr.msk.bf16.mxu0 %vm315_vm1, %v247_v58  ;;  %2173 = vmatprep.mubr.msk.bf16.mxu1 %vm315_vm1, %v295_v59 }
  0xac   :  { %2078 = vmatmul.mubr.msk.bf16.gmra.mrb[80].mxu0 %vm315_vm1, %v248_v4  ;;  %2174 = vmatmul.mubr.msk.bf16.gmra.mrb[80].mxu1 %vm315_vm1, %v296_v5 }
  0xad   :  { %2081 = vmatprep.mubr.msk.bf16.mxu0 %vm315_vm1, %v249_v6  ;;  %2177 = vmatprep.mubr.msk.bf16.mxu1 %vm315_vm1, %v297_v7 }
  0xb4   :  { %2082 = vmatmul.mubr.msk.bf16.gmra.mrb[84].mxu0 %vm315_vm1, %v250_v16  ;;  %2178 = vmatmul.mubr.msk.bf16.gmra.mrb[84].mxu1 %vm315_vm1, %v298_v17 }
  0xb5   :  { %2085 = vmatprep.mubr.msk.bf16.mxu0 %vm315_vm1, %v251_v18  ;;  %2181 = vmatprep.mubr.msk.bf16.mxu1 %vm315_vm1, %v299_v19 }
  0xbc   :  { %2086 = vmatmul.mubr.msk.bf16.gmra.mrb[88].mxu0 %vm315_vm1, %v252_v28  ;;  %2182 = vmatmul.mubr.msk.bf16.gmra.mrb[88].mxu1 %vm315_vm1, %v300_v29 }
  0xbd   :  { %2089 = vmatprep.mubr.msk.bf16.mxu0 %vm315_vm1, %v253_v30  ;;  %2185 = vmatprep.mubr.msk.bf16.mxu1 %vm315_vm1, %v301_v31 }
  0xc4   :  { %2090 = vmatmul.mubr.msk.bf16.gmra.mrb[92].mxu0 %vm315_vm1, %v254_v36  ;;  %2186 = vmatmul.mubr.msk.bf16.gmra.mrb[92].mxu1 %vm315_vm1, %v302_v37 }
  0xdf   :  { %v1999_v39 = vpop.f32.mrb[0].mxu0  ;;  %v2095_v40 = vpop.f32.mrb[0].mxu1 }
  0xe0   :  { %v651_v41 = vadd.f32 %v1999_v39, %v2903_v38  ;;  %v1035_v42 = vadd.f32 %v2095_v40, %v2903_v38  ;;  %v642_v43 = vpop.f32.mrb[1].mxu0  ;;  %v1026_v44 = vpop.f32.mrb[1].mxu1 }
  0xe1   :  { %v643_v45 = vadd.f32 %v2903_v38, %v642_v43  ;;  %v1027_v46 = vadd.f32 %v2903_v38, %v1026_v44  ;;  %v2000_v47 = vpop.f32.mrb[2].mxu0  ;;  %v2096_v48 = vpop.f32.mrb[2].mxu1 }
  0xe2   :  { %v1411_v49 = vmax.f32 %v651_v41, 0.0  ;;  %v1507_v50 = vmax.f32 %v1035_v42, 0.0  ;;  %v654_v51 = vadd.f32 %v2000_v47, %v2903_v38  ;;  %v1038_v52 = vadd.f32 %v2096_v48, %v2903_v38  ;;  %v645_v53 = vpop.f32.mrb[3].mxu0  ;;  %v1029_v54 = vpop.f32.mrb[3].mxu1 }
  0xe3   :  { %v1409_v55 = vmax.f32 %v643_v45, 0.0  ;;  %v1505_v56 = vmax.f32 %v1027_v46, 0.0  ;;  %v646_v57 = vadd.f32 %v2903_v38, %v645_v53  ;;  %v1030_v58 = vadd.f32 %v2903_v38, %v1029_v54 }
  0xe4   :  { %1604 = vst.msk [vmem:[%s3873_s3 + $0x10] sm:$0xff] %vm1601_vm2, %v1411_v49  ;;  %1700 = vst.msk [vmem:[%s3873_s3 + $0x310] sm:$0xff] %vm1601_vm2, %v1507_v50  ;;  %v1412_v59 = vmax.f32 %v654_v51, 0.0  ;;  %v1508_v60 = vmax.f32 %v1038_v52, 0.0 }
  0xe5   :  { %1602 = vst.msk [vmem:[%s3873_s3] sm:$0xff] %vm1601_vm2, %v1409_v55  ;;  %1698 = vst.msk [vmem:[%s3873_s3 + $0x300] sm:$0xff] %vm1601_vm2, %v1505_v56  ;;  %v1410_v61 = vmax.f32 %v646_v57, 0.0  ;;  %v1506_v62 = vmax.f32 %v1030_v58, 0.0 }
  0xe6   :  { %1605 = vst.msk [vmem:[%s3873_s3 + $0x18] sm:$0xff] %vm1601_vm2, %v1412_v59  ;;  %1701 = vst.msk [vmem:[%s3873_s3 + $0x318] sm:$0xff] %vm1601_vm2, %v1508_v60 }
  0xe7   :  { %1603 = vst.msk [vmem:[%s3873_s3 + $0x8] sm:$0xff] %vm1601_vm2, %v1410_v61  ;;  %1699 = vst.msk [vmem:[%s3873_s3 + $0x308] sm:$0xff] %vm1601_vm2, %v1506_v62  ;;  %v2003_v63 = vpop.f32.mrb[4].mxu0  ;;  %v2099_v0 = vpop.f32.mrb[4].mxu1 }
  0xe8   :  { %v667_v1 = vadd.f32 %v2003_v63, %v2903_v38  ;;  %v1051_v2 = vadd.f32 %v2099_v0, %v2903_v38  ;;  %v658_v3 = vpop.f32.mrb[5].mxu0  ;;  %v1042_v4 = vpop.f32.mrb[5].mxu1 }
  0xe9   :  { %v659_v5 = vadd.f32 %v2903_v38, %v658_v3  ;;  %v1043_v6 = vadd.f32 %v2903_v38, %v1042_v4  ;;  %v2004_v7 = vpop.f32.mrb[6].mxu0  ;;  %v2100_v8 = vpop.f32.mrb[6].mxu1 }
  0xea   :  { %v1415_v9 = vmax.f32 %v667_v1, 0.0  ;;  %v1511_v10 = vmax.f32 %v1051_v2, 0.0  ;;  %v670_v11 = vadd.f32 %v2004_v7, %v2903_v38  ;;  %v1054_v12 = vadd.f32 %v2100_v8, %v2903_v38  ;;  %v661_v13 = vpop.f32.mrb[7].mxu0  ;;  %v1045_v14 = vpop.f32.mrb[7].mxu1 }
  0xeb   :  { %v1413_v15 = vmax.f32 %v659_v5, 0.0  ;;  %v1509_v16 = vmax.f32 %v1043_v6, 0.0  ;;  %v662_v17 = vadd.f32 %v2903_v38, %v661_v13  ;;  %v1046_v18 = vadd.f32 %v2903_v38, %v1045_v14 }
  0xec   :  { %1608 = vst.msk [vmem:[%s3873_s3 + $0x30] sm:$0xff] %vm1601_vm2, %v1415_v9  ;;  %1704 = vst.msk [vmem:[%s3873_s3 + $0x330] sm:$0xff] %vm1601_vm2, %v1511_v10  ;;  %v1416_v19 = vmax.f32 %v670_v11, 0.0  ;;  %v1512_v20 = vmax.f32 %v1054_v12, 0.0 }
  0xed   :  { %1606 = vst.msk [vmem:[%s3873_s3 + $0x20] sm:$0xff] %vm1601_vm2, %v1413_v15  ;;  %1702 = vst.msk [vmem:[%s3873_s3 + $0x320] sm:$0xff] %vm1601_vm2, %v1509_v16  ;;  %v1414_v21 = vmax.f32 %v662_v17, 0.0  ;;  %v1510_v22 = vmax.f32 %v1046_v18, 0.0 }
  0xee   :  { %1609 = vst.msk [vmem:[%s3873_s3 + $0x38] sm:$0xff] %vm1601_vm2, %v1416_v19  ;;  %1705 = vst.msk [vmem:[%s3873_s3 + $0x338] sm:$0xff] %vm1601_vm2, %v1512_v20 }
  0xef   :  { %1607 = vst.msk [vmem:[%s3873_s3 + $0x28] sm:$0xff] %vm1601_vm2, %v1414_v21  ;;  %1703 = vst.msk [vmem:[%s3873_s3 + $0x328] sm:$0xff] %vm1601_vm2, %v1510_v22  ;;  %v2007_v23 = vpop.f32.mrb[8].mxu0  ;;  %v2103_v24 = vpop.f32.mrb[8].mxu1 }
  0xf0   :  { %v683_v25 = vadd.f32 %v2007_v23, %v2903_v38  ;;  %v1067_v26 = vadd.f32 %v2103_v24, %v2903_v38  ;;  %v674_v27 = vpop.f32.mrb[9].mxu0  ;;  %v1058_v28 = vpop.f32.mrb[9].mxu1 }
  0xf1   :  { %v675_v29 = vadd.f32 %v2903_v38, %v674_v27  ;;  %v1059_v30 = vadd.f32 %v2903_v38, %v1058_v28  ;;  %v2008_v31 = vpop.f32.mrb[10].mxu0  ;;  %v2104_v32 = vpop.f32.mrb[10].mxu1 }
  0xf2   :  { %v1419_v33 = vmax.f32 %v683_v25, 0.0  ;;  %v1515_v34 = vmax.f32 %v1067_v26, 0.0  ;;  %v686_v35 = vadd.f32 %v2008_v31, %v2903_v38  ;;  %v1070_v36 = vadd.f32 %v2104_v32, %v2903_v38  ;;  %v677_v37 = vpop.f32.mrb[11].mxu0  ;;  %v1061_v39 = vpop.f32.mrb[11].mxu1 }
  0xf3   :  { %v1417_v40 = vmax.f32 %v675_v29, 0.0  ;;  %v1513_v41 = vmax.f32 %v1059_v30, 0.0  ;;  %v678_v42 = vadd.f32 %v2903_v38, %v677_v37  ;;  %v1062_v43 = vadd.f32 %v2903_v38, %v1061_v39 }
  0xf4   :  { %1612 = vst.msk [vmem:[%s3873_s3 + $0x50] sm:$0xff] %vm1601_vm2, %v1419_v33  ;;  %1708 = vst.msk [vmem:[%s3873_s3 + $0x350] sm:$0xff] %vm1601_vm2, %v1515_v34  ;;  %v1420_v44 = vmax.f32 %v686_v35, 0.0  ;;  %v1516_v45 = vmax.f32 %v1070_v36, 0.0 }
  0xf5   :  { %1610 = vst.msk [vmem:[%s3873_s3 + $0x40] sm:$0xff] %vm1601_vm2, %v1417_v40  ;;  %1706 = vst.msk [vmem:[%s3873_s3 + $0x340] sm:$0xff] %vm1601_vm2, %v1513_v41  ;;  %v1418_v46 = vmax.f32 %v678_v42, 0.0  ;;  %v1514_v47 = vmax.f32 %v1062_v43, 0.0 }
  0xf6   :  { %1613 = vst.msk [vmem:[%s3873_s3 + $0x58] sm:$0xff] %vm1601_vm2, %v1420_v44  ;;  %1709 = vst.msk [vmem:[%s3873_s3 + $0x358] sm:$0xff] %vm1601_vm2, %v1516_v45 }
  0xf7   :  { %1611 = vst.msk [vmem:[%s3873_s3 + $0x48] sm:$0xff] %vm1601_vm2, %v1418_v46  ;;  %1707 = vst.msk [vmem:[%s3873_s3 + $0x348] sm:$0xff] %vm1601_vm2, %v1514_v47  ;;  %v2011_v48 = vpop.f32.mrb[12].mxu0  ;;  %v2107_v49 = vpop.f32.mrb[12].mxu1 }
  0xf8   :  { %v699_v50 = vadd.f32 %v2011_v48, %v2903_v38  ;;  %v1083_v51 = vadd.f32 %v2107_v49, %v2903_v38  ;;  %v690_v52 = vpop.f32.mrb[13].mxu0  ;;  %v1074_v53 = vpop.f32.mrb[13].mxu1 }
  0xf9   :  { %v691_v54 = vadd.f32 %v2903_v38, %v690_v52  ;;  %v1075_v55 = vadd.f32 %v2903_v38, %v1074_v53  ;;  %v2012_v56 = vpop.f32.mrb[14].mxu0  ;;  %v2108_v57 = vpop.f32.mrb[14].mxu1 }
  0xfa   :  { %v1423_v58 = vmax.f32 %v699_v50, 0.0  ;;  %v1519_v59 = vmax.f32 %v1083_v51, 0.0  ;;  %v702_v60 = vadd.f32 %v2012_v56, %v2903_v38  ;;  %v1086_v61 = vadd.f32 %v2108_v57, %v2903_v38  ;;  %v693_v62 = vpop.f32.mrb[15].mxu0  ;;  %v1077_v63 = vpop.f32.mrb[15].mxu1 }
  0xfb   :  { %v1421_v0 = vmax.f32 %v691_v54, 0.0  ;;  %v1517_v1 = vmax.f32 %v1075_v55, 0.0  ;;  %v694_v2 = vadd.f32 %v2903_v38, %v693_v62  ;;  %v1078_v3 = vadd.f32 %v2903_v38, %v1077_v63 }
  0xfc   :  { %1616 = vst.msk [vmem:[%s3873_s3 + $0x70] sm:$0xff] %vm1601_vm2, %v1423_v58  ;;  %1712 = vst.msk [vmem:[%s3873_s3 + $0x370] sm:$0xff] %vm1601_vm2, %v1519_v59  ;;  %v1424_v4 = vmax.f32 %v702_v60, 0.0  ;;  %v1520_v5 = vmax.f32 %v1086_v61, 0.0 }
  0xfd   :  { %1614 = vst.msk [vmem:[%s3873_s3 + $0x60] sm:$0xff] %vm1601_vm2, %v1421_v0  ;;  %1710 = vst.msk [vmem:[%s3873_s3 + $0x360] sm:$0xff] %vm1601_vm2, %v1517_v1  ;;  %v1422_v6 = vmax.f32 %v694_v2, 0.0  ;;  %v1518_v7 = vmax.f32 %v1078_v3, 0.0 }
  0xfe   :  { %1617 = vst.msk [vmem:[%s3873_s3 + $0x78] sm:$0xff] %vm1601_vm2, %v1424_v4  ;;  %1713 = vst.msk [vmem:[%s3873_s3 + $0x378] sm:$0xff] %vm1601_vm2, %v1520_v5 }
  0xff   :  { %1615 = vst.msk [vmem:[%s3873_s3 + $0x68] sm:$0xff] %vm1601_vm2, %v1422_v6  ;;  %1711 = vst.msk [vmem:[%s3873_s3 + $0x368] sm:$0xff] %vm1601_vm2, %v1518_v7  ;;  %v2015_v8 = vpop.f32.mrb[16].mxu0  ;;  %v2111_v9 = vpop.f32.mrb[16].mxu1 }
 0x100   :  { %v715_v10 = vadd.f32 %v2015_v8, %v2903_v38  ;;  %v1099_v11 = vadd.f32 %v2111_v9, %v2903_v38  ;;  %v706_v12 = vpop.f32.mrb[17].mxu0  ;;  %v1090_v13 = vpop.f32.mrb[17].mxu1 }
 0x101   :  { %v707_v14 = vadd.f32 %v2903_v38, %v706_v12  ;;  %v1091_v15 = vadd.f32 %v2903_v38, %v1090_v13  ;;  %v2016_v16 = vpop.f32.mrb[18].mxu0  ;;  %v2112_v17 = vpop.f32.mrb[18].mxu1 }
 0x102   :  { %v1427_v18 = vmax.f32 %v715_v10, 0.0  ;;  %v1523_v19 = vmax.f32 %v1099_v11, 0.0  ;;  %v718_v20 = vadd.f32 %v2016_v16, %v2903_v38  ;;  %v1102_v21 = vadd.f32 %v2112_v17, %v2903_v38  ;;  %v709_v22 = vpop.f32.mrb[19].mxu0  ;;  %v1093_v23 = vpop.f32.mrb[19].mxu1 }
 0x103   :  { %v1425_v24 = vmax.f32 %v707_v14, 0.0  ;;  %v1521_v25 = vmax.f32 %v1091_v15, 0.0  ;;  %v710_v26 = vadd.f32 %v2903_v38, %v709_v22  ;;  %v1094_v27 = vadd.f32 %v2903_v38, %v1093_v23 }
 0x104   :  { %1620 = vst.msk [vmem:[%s3873_s3 + $0x90] sm:$0xff] %vm1601_vm2, %v1427_v18  ;;  %1716 = vst.msk [vmem:[%s3873_s3 + $0x390] sm:$0xff] %vm1601_vm2, %v1523_v19  ;;  %v1428_v28 = vmax.f32 %v718_v20, 0.0  ;;  %v1524_v29 = vmax.f32 %v1102_v21, 0.0 }
 0x105   :  { %1618 = vst.msk [vmem:[%s3873_s3 + $0x80] sm:$0xff] %vm1601_vm2, %v1425_v24  ;;  %1714 = vst.msk [vmem:[%s3873_s3 + $0x380] sm:$0xff] %vm1601_vm2, %v1521_v25  ;;  %v1426_v30 = vmax.f32 %v710_v26, 0.0  ;;  %v1522_v31 = vmax.f32 %v1094_v27, 0.0 }
 0x106   :  { %1621 = vst.msk [vmem:[%s3873_s3 + $0x98] sm:$0xff] %vm1601_vm2, %v1428_v28  ;;  %1717 = vst.msk [vmem:[%s3873_s3 + $0x398] sm:$0xff] %vm1601_vm2, %v1524_v29 }
 0x107   :  { %1619 = vst.msk [vmem:[%s3873_s3 + $0x88] sm:$0xff] %vm1601_vm2, %v1426_v30  ;;  %1715 = vst.msk [vmem:[%s3873_s3 + $0x388] sm:$0xff] %vm1601_vm2, %v1522_v31  ;;  %v2019_v32 = vpop.f32.mrb[20].mxu0  ;;  %v2115_v33 = vpop.f32.mrb[20].mxu1 }
 0x108   :  { %v731_v34 = vadd.f32 %v2019_v32, %v2903_v38  ;;  %v1115_v35 = vadd.f32 %v2115_v33, %v2903_v38  ;;  %v722_v36 = vpop.f32.mrb[21].mxu0  ;;  %v1106_v37 = vpop.f32.mrb[21].mxu1 }
 0x109   :  { %v723_v39 = vadd.f32 %v2903_v38, %v722_v36  ;;  %v1107_v40 = vadd.f32 %v2903_v38, %v1106_v37  ;;  %v2020_v41 = vpop.f32.mrb[22].mxu0  ;;  %v2116_v42 = vpop.f32.mrb[22].mxu1 }
 0x10a   :  { %v1431_v43 = vmax.f32 %v731_v34, 0.0  ;;  %v1527_v44 = vmax.f32 %v1115_v35, 0.0  ;;  %v734_v45 = vadd.f32 %v2020_v41, %v2903_v38  ;;  %v1118_v46 = vadd.f32 %v2116_v42, %v2903_v38  ;;  %v725_v47 = vpop.f32.mrb[23].mxu0  ;;  %v1109_v48 = vpop.f32.mrb[23].mxu1 }
 0x10b   :  { %v1429_v49 = vmax.f32 %v723_v39, 0.0  ;;  %v1525_v50 = vmax.f32 %v1107_v40, 0.0  ;;  %v726_v51 = vadd.f32 %v2903_v38, %v725_v47  ;;  %v1110_v52 = vadd.f32 %v2903_v38, %v1109_v48 }
 0x10c   :  { %1624 = vst.msk [vmem:[%s3873_s3 + $0xb0] sm:$0xff] %vm1601_vm2, %v1431_v43  ;;  %1720 = vst.msk [vmem:[%s3873_s3 + $0x3b0] sm:$0xff] %vm1601_vm2, %v1527_v44  ;;  %v1432_v53 = vmax.f32 %v734_v45, 0.0  ;;  %v1528_v54 = vmax.f32 %v1118_v46, 0.0 }
 0x10d   :  { %1622 = vst.msk [vmem:[%s3873_s3 + $0xa0] sm:$0xff] %vm1601_vm2, %v1429_v49  ;;  %1718 = vst.msk [vmem:[%s3873_s3 + $0x3a0] sm:$0xff] %vm1601_vm2, %v1525_v50  ;;  %v1430_v55 = vmax.f32 %v726_v51, 0.0  ;;  %v1526_v56 = vmax.f32 %v1110_v52, 0.0 }
 0x10e   :  { %1625 = vst.msk [vmem:[%s3873_s3 + $0xb8] sm:$0xff] %vm1601_vm2, %v1432_v53  ;;  %1721 = vst.msk [vmem:[%s3873_s3 + $0x3b8] sm:$0xff] %vm1601_vm2, %v1528_v54 }
 0x10f   :  { %1623 = vst.msk [vmem:[%s3873_s3 + $0xa8] sm:$0xff] %vm1601_vm2, %v1430_v55  ;;  %1719 = vst.msk [vmem:[%s3873_s3 + $0x3a8] sm:$0xff] %vm1601_vm2, %v1526_v56  ;;  %v2023_v57 = vpop.f32.mrb[24].mxu0  ;;  %v2119_v58 = vpop.f32.mrb[24].mxu1 }
 0x110   :  { %v747_v59 = vadd.f32 %v2023_v57, %v2903_v38  ;;  %v1131_v60 = vadd.f32 %v2119_v58, %v2903_v38  ;;  %v738_v61 = vpop.f32.mrb[25].mxu0  ;;  %v1122_v62 = vpop.f32.mrb[25].mxu1 }
 0x111   :  { %v739_v63 = vadd.f32 %v2903_v38, %v738_v61  ;;  %v1123_v0 = vadd.f32 %v2903_v38, %v1122_v62  ;;  %v2024_v1 = vpop.f32.mrb[26].mxu0  ;;  %v2120_v2 = vpop.f32.mrb[26].mxu1 }
 0x112   :  { %v1435_v3 = vmax.f32 %v747_v59, 0.0  ;;  %v1531_v4 = vmax.f32 %v1131_v60, 0.0  ;;  %v750_v5 = vadd.f32 %v2024_v1, %v2903_v38  ;;  %v1134_v6 = vadd.f32 %v2120_v2, %v2903_v38  ;;  %v741_v7 = vpop.f32.mrb[27].mxu0  ;;  %v1125_v8 = vpop.f32.mrb[27].mxu1 }
 0x113   :  { %v1433_v9 = vmax.f32 %v739_v63, 0.0  ;;  %v1529_v10 = vmax.f32 %v1123_v0, 0.0  ;;  %v742_v11 = vadd.f32 %v2903_v38, %v741_v7  ;;  %v1126_v12 = vadd.f32 %v2903_v38, %v1125_v8 }
 0x114   :  { %1628 = vst.msk [vmem:[%s3873_s3 + $0xd0] sm:$0xff] %vm1601_vm2, %v1435_v3  ;;  %1724 = vst.msk [vmem:[%s3873_s3 + $0x3d0] sm:$0xff] %vm1601_vm2, %v1531_v4  ;;  %v1436_v13 = vmax.f32 %v750_v5, 0.0  ;;  %v1532_v14 = vmax.f32 %v1134_v6, 0.0 }
 0x115   :  { %1626 = vst.msk [vmem:[%s3873_s3 + $0xc0] sm:$0xff] %vm1601_vm2, %v1433_v9  ;;  %1722 = vst.msk [vmem:[%s3873_s3 + $0x3c0] sm:$0xff] %vm1601_vm2, %v1529_v10  ;;  %v1434_v15 = vmax.f32 %v742_v11, 0.0  ;;  %v1530_v16 = vmax.f32 %v1126_v12, 0.0 }
 0x116   :  { %1629 = vst.msk [vmem:[%s3873_s3 + $0xd8] sm:$0xff] %vm1601_vm2, %v1436_v13  ;;  %1725 = vst.msk [vmem:[%s3873_s3 + $0x3d8] sm:$0xff] %vm1601_vm2, %v1532_v14 }
 0x117   :  { %1627 = vst.msk [vmem:[%s3873_s3 + $0xc8] sm:$0xff] %vm1601_vm2, %v1434_v15  ;;  %1723 = vst.msk [vmem:[%s3873_s3 + $0x3c8] sm:$0xff] %vm1601_vm2, %v1530_v16  ;;  %v2027_v17 = vpop.f32.mrb[28].mxu0  ;;  %v2123_v18 = vpop.f32.mrb[28].mxu1 }
 0x118   :  { %v763_v19 = vadd.f32 %v2027_v17, %v2903_v38  ;;  %v1147_v20 = vadd.f32 %v2123_v18, %v2903_v38  ;;  %v754_v21 = vpop.f32.mrb[29].mxu0  ;;  %v1138_v22 = vpop.f32.mrb[29].mxu1 }
 0x119   :  { %v755_v23 = vadd.f32 %v2903_v38, %v754_v21  ;;  %v1139_v24 = vadd.f32 %v2903_v38, %v1138_v22  ;;  %v2028_v25 = vpop.f32.mrb[30].mxu0  ;;  %v2124_v26 = vpop.f32.mrb[30].mxu1 }
 0x11a   :  { %v1439_v27 = vmax.f32 %v763_v19, 0.0  ;;  %v1535_v28 = vmax.f32 %v1147_v20, 0.0  ;;  %v766_v29 = vadd.f32 %v2028_v25, %v2903_v38  ;;  %v1150_v30 = vadd.f32 %v2124_v26, %v2903_v38  ;;  %v757_v31 = vpop.f32.mrb[31].mxu0  ;;  %v1141_v32 = vpop.f32.mrb[31].mxu1 }
 0x11b   :  { %v1437_v33 = vmax.f32 %v755_v23, 0.0  ;;  %v1533_v34 = vmax.f32 %v1139_v24, 0.0  ;;  %v758_v35 = vadd.f32 %v2903_v38, %v757_v31  ;;  %v1142_v36 = vadd.f32 %v2903_v38, %v1141_v32 }
 0x11c   :  { %1632 = vst.msk [vmem:[%s3873_s3 + $0xf0] sm:$0xff] %vm1601_vm2, %v1439_v27  ;;  %1728 = vst.msk [vmem:[%s3873_s3 + $0x3f0] sm:$0xff] %vm1601_vm2, %v1535_v28  ;;  %v1440_v37 = vmax.f32 %v766_v29, 0.0  ;;  %v1536_v39 = vmax.f32 %v1150_v30, 0.0 }
 0x11d   :  { %1630 = vst.msk [vmem:[%s3873_s3 + $0xe0] sm:$0xff] %vm1601_vm2, %v1437_v33  ;;  %1726 = vst.msk [vmem:[%s3873_s3 + $0x3e0] sm:$0xff] %vm1601_vm2, %v1533_v34  ;;  %v1438_v40 = vmax.f32 %v758_v35, 0.0  ;;  %v1534_v41 = vmax.f32 %v1142_v36, 0.0 }
 0x11e   :  { %1633 = vst.msk [vmem:[%s3873_s3 + $0xf8] sm:$0xff] %vm1601_vm2, %v1440_v37  ;;  %1729 = vst.msk [vmem:[%s3873_s3 + $0x3f8] sm:$0xff] %vm1601_vm2, %v1536_v39 }
 0x11f   :  { %1631 = vst.msk [vmem:[%s3873_s3 + $0xe8] sm:$0xff] %vm1601_vm2, %v1438_v40  ;;  %1727 = vst.msk [vmem:[%s3873_s3 + $0x3e8] sm:$0xff] %vm1601_vm2, %v1534_v41  ;;  %v2031_v42 = vpop.f32.mrb[32].mxu0  ;;  %v2127_v43 = vpop.f32.mrb[32].mxu1 }
 0x120   :  { %v779_v44 = vadd.f32 %v2031_v42, %v2903_v38  ;;  %v1163_v45 = vadd.f32 %v2127_v43, %v2903_v38  ;;  %v770_v46 = vpop.f32.mrb[33].mxu0  ;;  %v1154_v47 = vpop.f32.mrb[33].mxu1 }
 0x121   :  { %v771_v48 = vadd.f32 %v2903_v38, %v770_v46  ;;  %v1155_v49 = vadd.f32 %v2903_v38, %v1154_v47  ;;  %v2032_v50 = vpop.f32.mrb[34].mxu0  ;;  %v2128_v51 = vpop.f32.mrb[34].mxu1 }
 0x122   :  { %v1443_v52 = vmax.f32 %v779_v44, 0.0  ;;  %v1539_v53 = vmax.f32 %v1163_v45, 0.0  ;;  %v782_v54 = vadd.f32 %v2032_v50, %v2903_v38  ;;  %v1166_v55 = vadd.f32 %v2128_v51, %v2903_v38  ;;  %v773_v56 = vpop.f32.mrb[35].mxu0  ;;  %v1157_v57 = vpop.f32.mrb[35].mxu1 }
 0x123   :  { %v1441_v58 = vmax.f32 %v771_v48, 0.0  ;;  %v1537_v59 = vmax.f32 %v1155_v49, 0.0  ;;  %v774_v60 = vadd.f32 %v2903_v38, %v773_v56  ;;  %v1158_v61 = vadd.f32 %v2903_v38, %v1157_v57 }
 0x124   :  { %1636 = vst.msk [vmem:[%s3873_s3 + $0x110] sm:$0xff] %vm1601_vm2, %v1443_v52  ;;  %1732 = vst.msk [vmem:[%s3873_s3 + $0x410] sm:$0xff] %vm1601_vm2, %v1539_v53  ;;  %v1444_v62 = vmax.f32 %v782_v54, 0.0  ;;  %v1540_v63 = vmax.f32 %v1166_v55, 0.0 }
 0x125   :  { %1634 = vst.msk [vmem:[%s3873_s3 + $0x100] sm:$0xff] %vm1601_vm2, %v1441_v58  ;;  %1730 = vst.msk [vmem:[%s3873_s3 + $0x400] sm:$0xff] %vm1601_vm2, %v1537_v59  ;;  %v1442_v0 = vmax.f32 %v774_v60, 0.0  ;;  %v1538_v1 = vmax.f32 %v1158_v61, 0.0 }
 0x126   :  { %1637 = vst.msk [vmem:[%s3873_s3 + $0x118] sm:$0xff] %vm1601_vm2, %v1444_v62  ;;  %1733 = vst.msk [vmem:[%s3873_s3 + $0x418] sm:$0xff] %vm1601_vm2, %v1540_v63 }
 0x127   :  { %1635 = vst.msk [vmem:[%s3873_s3 + $0x108] sm:$0xff] %vm1601_vm2, %v1442_v0  ;;  %1731 = vst.msk [vmem:[%s3873_s3 + $0x408] sm:$0xff] %vm1601_vm2, %v1538_v1  ;;  %v2035_v2 = vpop.f32.mrb[36].mxu0  ;;  %v2131_v3 = vpop.f32.mrb[36].mxu1 }
 0x128   :  { %v795_v4 = vadd.f32 %v2035_v2, %v2903_v38  ;;  %v1179_v5 = vadd.f32 %v2131_v3, %v2903_v38  ;;  %v786_v6 = vpop.f32.mrb[37].mxu0  ;;  %v1170_v7 = vpop.f32.mrb[37].mxu1 }
 0x129   :  { %v787_v8 = vadd.f32 %v2903_v38, %v786_v6  ;;  %v1171_v9 = vadd.f32 %v2903_v38, %v1170_v7  ;;  %v2036_v10 = vpop.f32.mrb[38].mxu0  ;;  %v2132_v11 = vpop.f32.mrb[38].mxu1 }
 0x12a   :  { %v1447_v12 = vmax.f32 %v795_v4, 0.0  ;;  %v1543_v13 = vmax.f32 %v1179_v5, 0.0  ;;  %v798_v14 = vadd.f32 %v2036_v10, %v2903_v38  ;;  %v1182_v15 = vadd.f32 %v2132_v11, %v2903_v38  ;;  %v789_v16 = vpop.f32.mrb[39].mxu0  ;;  %v1173_v17 = vpop.f32.mrb[39].mxu1 }
 0x12b   :  { %v1445_v18 = vmax.f32 %v787_v8, 0.0  ;;  %v1541_v19 = vmax.f32 %v1171_v9, 0.0  ;;  %v790_v20 = vadd.f32 %v2903_v38, %v789_v16  ;;  %v1174_v21 = vadd.f32 %v2903_v38, %v1173_v17 }
 0x12c   :  { %1640 = vst.msk [vmem:[%s3873_s3 + $0x130] sm:$0xff] %vm1601_vm2, %v1447_v12  ;;  %1736 = vst.msk [vmem:[%s3873_s3 + $0x430] sm:$0xff] %vm1601_vm2, %v1543_v13  ;;  %v1448_v22 = vmax.f32 %v798_v14, 0.0  ;;  %v1544_v23 = vmax.f32 %v1182_v15, 0.0 }
 0x12d   :  { %1638 = vst.msk [vmem:[%s3873_s3 + $0x120] sm:$0xff] %vm1601_vm2, %v1445_v18  ;;  %1734 = vst.msk [vmem:[%s3873_s3 + $0x420] sm:$0xff] %vm1601_vm2, %v1541_v19  ;;  %v1446_v24 = vmax.f32 %v790_v20, 0.0  ;;  %v1542_v25 = vmax.f32 %v1174_v21, 0.0 }
 0x12e   :  { %1641 = vst.msk [vmem:[%s3873_s3 + $0x138] sm:$0xff] %vm1601_vm2, %v1448_v22  ;;  %1737 = vst.msk [vmem:[%s3873_s3 + $0x438] sm:$0xff] %vm1601_vm2, %v1544_v23 }
 0x12f   :  { %1639 = vst.msk [vmem:[%s3873_s3 + $0x128] sm:$0xff] %vm1601_vm2, %v1446_v24  ;;  %1735 = vst.msk [vmem:[%s3873_s3 + $0x428] sm:$0xff] %vm1601_vm2, %v1542_v25  ;;  %v2039_v26 = vpop.f32.mrb[40].mxu0  ;;  %v2135_v27 = vpop.f32.mrb[40].mxu1 }
 0x130   :  { %v811_v28 = vadd.f32 %v2039_v26, %v2903_v38  ;;  %v1195_v29 = vadd.f32 %v2135_v27, %v2903_v38  ;;  %v802_v30 = vpop.f32.mrb[41].mxu0  ;;  %v1186_v31 = vpop.f32.mrb[41].mxu1 }
 0x131   :  { %v803_v32 = vadd.f32 %v2903_v38, %v802_v30  ;;  %v1187_v33 = vadd.f32 %v2903_v38, %v1186_v31  ;;  %v2040_v34 = vpop.f32.mrb[42].mxu0  ;;  %v2136_v35 = vpop.f32.mrb[42].mxu1 }
 0x132   :  { %v1451_v36 = vmax.f32 %v811_v28, 0.0  ;;  %v1547_v37 = vmax.f32 %v1195_v29, 0.0  ;;  %v814_v39 = vadd.f32 %v2040_v34, %v2903_v38  ;;  %v1198_v40 = vadd.f32 %v2136_v35, %v2903_v38  ;;  %v805_v41 = vpop.f32.mrb[43].mxu0  ;;  %v1189_v42 = vpop.f32.mrb[43].mxu1 }
 0x133   :  { %v1449_v43 = vmax.f32 %v803_v32, 0.0  ;;  %v1545_v44 = vmax.f32 %v1187_v33, 0.0  ;;  %v806_v45 = vadd.f32 %v2903_v38, %v805_v41  ;;  %v1190_v46 = vadd.f32 %v2903_v38, %v1189_v42 }
 0x134   :  { %1644 = vst.msk [vmem:[%s3873_s3 + $0x150] sm:$0xff] %vm1601_vm2, %v1451_v36  ;;  %1740 = vst.msk [vmem:[%s3873_s3 + $0x450] sm:$0xff] %vm1601_vm2, %v1547_v37  ;;  %v1452_v47 = vmax.f32 %v814_v39, 0.0  ;;  %v1548_v48 = vmax.f32 %v1198_v40, 0.0 }
 0x135   :  { %1642 = vst.msk [vmem:[%s3873_s3 + $0x140] sm:$0xff] %vm1601_vm2, %v1449_v43  ;;  %1738 = vst.msk [vmem:[%s3873_s3 + $0x440] sm:$0xff] %vm1601_vm2, %v1545_v44  ;;  %v1450_v49 = vmax.f32 %v806_v45, 0.0  ;;  %v1546_v50 = vmax.f32 %v1190_v46, 0.0 }
 0x136   :  { %1645 = vst.msk [vmem:[%s3873_s3 + $0x158] sm:$0xff] %vm1601_vm2, %v1452_v47  ;;  %1741 = vst.msk [vmem:[%s3873_s3 + $0x458] sm:$0xff] %vm1601_vm2, %v1548_v48 }
 0x137   :  { %1643 = vst.msk [vmem:[%s3873_s3 + $0x148] sm:$0xff] %vm1601_vm2, %v1450_v49  ;;  %1739 = vst.msk [vmem:[%s3873_s3 + $0x448] sm:$0xff] %vm1601_vm2, %v1546_v50  ;;  %v2043_v51 = vpop.f32.mrb[44].mxu0  ;;  %v2139_v52 = vpop.f32.mrb[44].mxu1 }
 0x138   :  { %v827_v53 = vadd.f32 %v2043_v51, %v2903_v38  ;;  %v1211_v54 = vadd.f32 %v2139_v52, %v2903_v38  ;;  %v818_v55 = vpop.f32.mrb[45].mxu0  ;;  %v1202_v56 = vpop.f32.mrb[45].mxu1 }
 0x139   :  { %v819_v57 = vadd.f32 %v2903_v38, %v818_v55  ;;  %v1203_v58 = vadd.f32 %v2903_v38, %v1202_v56  ;;  %v2044_v59 = vpop.f32.mrb[46].mxu0  ;;  %v2140_v60 = vpop.f32.mrb[46].mxu1 }
 0x13a   :  { %v1455_v61 = vmax.f32 %v827_v53, 0.0  ;;  %v1551_v62 = vmax.f32 %v1211_v54, 0.0  ;;  %v830_v63 = vadd.f32 %v2044_v59, %v2903_v38  ;;  %v1214_v0 = vadd.f32 %v2140_v60, %v2903_v38  ;;  %v821_v1 = vpop.f32.mrb[47].mxu0  ;;  %v1205_v2 = vpop.f32.mrb[47].mxu1 }
 0x13b   :  { %v1453_v3 = vmax.f32 %v819_v57, 0.0  ;;  %v1549_v4 = vmax.f32 %v1203_v58, 0.0  ;;  %v822_v5 = vadd.f32 %v2903_v38, %v821_v1  ;;  %v1206_v6 = vadd.f32 %v2903_v38, %v1205_v2 }
 0x13c   :  { %1648 = vst.msk [vmem:[%s3873_s3 + $0x170] sm:$0xff] %vm1601_vm2, %v1455_v61  ;;  %1744 = vst.msk [vmem:[%s3873_s3 + $0x470] sm:$0xff] %vm1601_vm2, %v1551_v62  ;;  %v1456_v7 = vmax.f32 %v830_v63, 0.0  ;;  %v1552_v8 = vmax.f32 %v1214_v0, 0.0 }
 0x13d   :  { %1646 = vst.msk [vmem:[%s3873_s3 + $0x160] sm:$0xff] %vm1601_vm2, %v1453_v3  ;;  %1742 = vst.msk [vmem:[%s3873_s3 + $0x460] sm:$0xff] %vm1601_vm2, %v1549_v4  ;;  %v1454_v9 = vmax.f32 %v822_v5, 0.0  ;;  %v1550_v10 = vmax.f32 %v1206_v6, 0.0 }
 0x13e   :  { %1649 = vst.msk [vmem:[%s3873_s3 + $0x178] sm:$0xff] %vm1601_vm2, %v1456_v7  ;;  %1745 = vst.msk [vmem:[%s3873_s3 + $0x478] sm:$0xff] %vm1601_vm2, %v1552_v8 }
 0x13f   :  { %1647 = vst.msk [vmem:[%s3873_s3 + $0x168] sm:$0xff] %vm1601_vm2, %v1454_v9  ;;  %1743 = vst.msk [vmem:[%s3873_s3 + $0x468] sm:$0xff] %vm1601_vm2, %v1550_v10  ;;  %v2047_v11 = vpop.f32.mrb[48].mxu0  ;;  %v2143_v12 = vpop.f32.mrb[48].mxu1 }
 0x140   :  { %v843_v13 = vadd.f32 %v2047_v11, %v2903_v38  ;;  %v1227_v14 = vadd.f32 %v2143_v12, %v2903_v38  ;;  %v834_v15 = vpop.f32.mrb[49].mxu0  ;;  %v1218_v16 = vpop.f32.mrb[49].mxu1 }
 0x141   :  { %v835_v17 = vadd.f32 %v2903_v38, %v834_v15  ;;  %v1219_v18 = vadd.f32 %v2903_v38, %v1218_v16  ;;  %v2048_v19 = vpop.f32.mrb[50].mxu0  ;;  %v2144_v20 = vpop.f32.mrb[50].mxu1 }
 0x142   :  { %v1459_v21 = vmax.f32 %v843_v13, 0.0  ;;  %v1555_v22 = vmax.f32 %v1227_v14, 0.0  ;;  %v846_v23 = vadd.f32 %v2048_v19, %v2903_v38  ;;  %v1230_v24 = vadd.f32 %v2144_v20, %v2903_v38  ;;  %v837_v25 = vpop.f32.mrb[51].mxu0  ;;  %v1221_v26 = vpop.f32.mrb[51].mxu1 }
 0x143   :  { %v1457_v27 = vmax.f32 %v835_v17, 0.0  ;;  %v1553_v28 = vmax.f32 %v1219_v18, 0.0  ;;  %v838_v29 = vadd.f32 %v2903_v38, %v837_v25  ;;  %v1222_v30 = vadd.f32 %v2903_v38, %v1221_v26 }
 0x144   :  { %1652 = vst.msk [vmem:[%s3873_s3 + $0x190] sm:$0xff] %vm1601_vm2, %v1459_v21  ;;  %1748 = vst.msk [vmem:[%s3873_s3 + $0x490] sm:$0xff] %vm1601_vm2, %v1555_v22  ;;  %v1460_v31 = vmax.f32 %v846_v23, 0.0  ;;  %v1556_v32 = vmax.f32 %v1230_v24, 0.0 }
 0x145   :  { %1650 = vst.msk [vmem:[%s3873_s3 + $0x180] sm:$0xff] %vm1601_vm2, %v1457_v27  ;;  %1746 = vst.msk [vmem:[%s3873_s3 + $0x480] sm:$0xff] %vm1601_vm2, %v1553_v28  ;;  %v1458_v33 = vmax.f32 %v838_v29, 0.0  ;;  %v1554_v34 = vmax.f32 %v1222_v30, 0.0 }
 0x146   :  { %1653 = vst.msk [vmem:[%s3873_s3 + $0x198] sm:$0xff] %vm1601_vm2, %v1460_v31  ;;  %1749 = vst.msk [vmem:[%s3873_s3 + $0x498] sm:$0xff] %vm1601_vm2, %v1556_v32 }
 0x147   :  { %1651 = vst.msk [vmem:[%s3873_s3 + $0x188] sm:$0xff] %vm1601_vm2, %v1458_v33  ;;  %1747 = vst.msk [vmem:[%s3873_s3 + $0x488] sm:$0xff] %vm1601_vm2, %v1554_v34  ;;  %v2051_v35 = vpop.f32.mrb[52].mxu0  ;;  %v2147_v36 = vpop.f32.mrb[52].mxu1 }
 0x148   :  { %v859_v37 = vadd.f32 %v2051_v35, %v2903_v38  ;;  %v1243_v39 = vadd.f32 %v2147_v36, %v2903_v38  ;;  %v850_v40 = vpop.f32.mrb[53].mxu0  ;;  %v1234_v41 = vpop.f32.mrb[53].mxu1 }
 0x149   :  { %v851_v42 = vadd.f32 %v2903_v38, %v850_v40  ;;  %v1235_v43 = vadd.f32 %v2903_v38, %v1234_v41  ;;  %v2052_v44 = vpop.f32.mrb[54].mxu0  ;;  %v2148_v45 = vpop.f32.mrb[54].mxu1 }
 0x14a   :  { %v1463_v46 = vmax.f32 %v859_v37, 0.0  ;;  %v1559_v47 = vmax.f32 %v1243_v39, 0.0  ;;  %v862_v48 = vadd.f32 %v2052_v44, %v2903_v38  ;;  %v1246_v49 = vadd.f32 %v2148_v45, %v2903_v38  ;;  %v853_v50 = vpop.f32.mrb[55].mxu0  ;;  %v1237_v51 = vpop.f32.mrb[55].mxu1 }
 0x14b   :  { %v1461_v52 = vmax.f32 %v851_v42, 0.0  ;;  %v1557_v53 = vmax.f32 %v1235_v43, 0.0  ;;  %v854_v54 = vadd.f32 %v2903_v38, %v853_v50  ;;  %v1238_v55 = vadd.f32 %v2903_v38, %v1237_v51 }
 0x14c   :  { %1656 = vst.msk [vmem:[%s3873_s3 + $0x1b0] sm:$0xff] %vm1601_vm2, %v1463_v46  ;;  %1752 = vst.msk [vmem:[%s3873_s3 + $0x4b0] sm:$0xff] %vm1601_vm2, %v1559_v47  ;;  %v1464_v56 = vmax.f32 %v862_v48, 0.0  ;;  %v1560_v57 = vmax.f32 %v1246_v49, 0.0  ;;  %v3548_v46 = vld [vmem:[%s3872_s2] ss:$0 sm:$0xff] }
 0x14d   :  { %1654 = vst.msk [vmem:[%s3873_s3 + $0x1a0] sm:$0xff] %vm1601_vm2, %v1461_v52  ;;  %1750 = vst.msk [vmem:[%s3873_s3 + $0x4a0] sm:$0xff] %vm1601_vm2, %v1557_v53  ;;  %v1462_v58 = vmax.f32 %v854_v54, 0.0  ;;  %v1558_v59 = vmax.f32 %v1238_v55, 0.0 }
 0x14e   :  { %1657 = vst.msk [vmem:[%s3873_s3 + $0x1b8] sm:$0xff] %vm1601_vm2, %v1464_v56  ;;  %1753 = vst.msk [vmem:[%s3873_s3 + $0x4b8] sm:$0xff] %vm1601_vm2, %v1560_v57 }
 0x14f   :  { %1655 = vst.msk [vmem:[%s3873_s3 + $0x1a8] sm:$0xff] %vm1601_vm2, %v1462_v58  ;;  %1751 = vst.msk [vmem:[%s3873_s3 + $0x4a8] sm:$0xff] %vm1601_vm2, %v1558_v59  ;;  %v2055_v60 = vpop.f32.mrb[56].mxu0  ;;  %v2151_v61 = vpop.f32.mrb[56].mxu1 }
 0x150   :  { %v875_v62 = vadd.f32 %v2055_v60, %v2903_v38  ;;  %v1259_v63 = vadd.f32 %v2151_v61, %v2903_v38  ;;  %v866_v0 = vpop.f32.mrb[57].mxu0  ;;  %v1250_v1 = vpop.f32.mrb[57].mxu1 }
 0x151   :  { %v867_v2 = vadd.f32 %v2903_v38, %v866_v0  ;;  %v1251_v3 = vadd.f32 %v2903_v38, %v1250_v1  ;;  %v2056_v4 = vpop.f32.mrb[58].mxu0  ;;  %v2152_v5 = vpop.f32.mrb[58].mxu1 }
 0x152   :  { %v1467_v6 = vmax.f32 %v875_v62, 0.0  ;;  %v1563_v7 = vmax.f32 %v1259_v63, 0.0  ;;  %v878_v8 = vadd.f32 %v2056_v4, %v2903_v38  ;;  %v1262_v9 = vadd.f32 %v2152_v5, %v2903_v38  ;;  %v869_v10 = vpop.f32.mrb[59].mxu0  ;;  %v1253_v11 = vpop.f32.mrb[59].mxu1 }
 0x153   :  { %v1465_v12 = vmax.f32 %v867_v2, 0.0  ;;  %v1561_v13 = vmax.f32 %v1251_v3, 0.0  ;;  %v870_v14 = vadd.f32 %v2903_v38, %v869_v10  ;;  %v1254_v15 = vadd.f32 %v2903_v38, %v1253_v11 }
 0x154   :  { %1660 = vst.msk [vmem:[%s3873_s3 + $0x1d0] sm:$0xff] %vm1601_vm2, %v1467_v6  ;;  %1756 = vst.msk [vmem:[%s3873_s3 + $0x4d0] sm:$0xff] %vm1601_vm2, %v1563_v7  ;;  %v1468_v16 = vmax.f32 %v878_v8, 0.0  ;;  %v1564_v17 = vmax.f32 %v1262_v9, 0.0 }
 0x155   :  { %1658 = vst.msk [vmem:[%s3873_s3 + $0x1c0] sm:$0xff] %vm1601_vm2, %v1465_v12  ;;  %1754 = vst.msk [vmem:[%s3873_s3 + $0x4c0] sm:$0xff] %vm1601_vm2, %v1561_v13  ;;  %v1466_v18 = vmax.f32 %v870_v14, 0.0  ;;  %v1562_v19 = vmax.f32 %v1254_v15, 0.0 }
 0x156   :  { %1661 = vst.msk [vmem:[%s3873_s3 + $0x1d8] sm:$0xff] %vm1601_vm2, %v1468_v16  ;;  %1757 = vst.msk [vmem:[%s3873_s3 + $0x4d8] sm:$0xff] %vm1601_vm2, %v1564_v17 }
 0x157   :  { %1659 = vst.msk [vmem:[%s3873_s3 + $0x1c8] sm:$0xff] %vm1601_vm2, %v1466_v18  ;;  %1755 = vst.msk [vmem:[%s3873_s3 + $0x4c8] sm:$0xff] %vm1601_vm2, %v1562_v19  ;;  %v2059_v20 = vpop.f32.mrb[60].mxu0  ;;  %v2155_v21 = vpop.f32.mrb[60].mxu1 }
 0x158   :  { %v891_v22 = vadd.f32 %v2059_v20, %v2903_v38  ;;  %v1275_v23 = vadd.f32 %v2155_v21, %v2903_v38  ;;  %v882_v24 = vpop.f32.mrb[61].mxu0  ;;  %v1266_v25 = vpop.f32.mrb[61].mxu1 }
 0x159   :  { %v883_v26 = vadd.f32 %v2903_v38, %v882_v24  ;;  %v1267_v27 = vadd.f32 %v2903_v38, %v1266_v25  ;;  %v2060_v28 = vpop.f32.mrb[62].mxu0  ;;  %v2156_v29 = vpop.f32.mrb[62].mxu1 }
 0x15a   :  { %v1471_v30 = vmax.f32 %v891_v22, 0.0  ;;  %v1567_v31 = vmax.f32 %v1275_v23, 0.0  ;;  %v894_v32 = vadd.f32 %v2060_v28, %v2903_v38  ;;  %v1278_v33 = vadd.f32 %v2156_v29, %v2903_v38  ;;  %v885_v34 = vpop.f32.mrb[63].mxu0  ;;  %v1269_v35 = vpop.f32.mrb[63].mxu1 }
 0x15b   :  { %v1469_v36 = vmax.f32 %v883_v26, 0.0  ;;  %v1565_v37 = vmax.f32 %v1267_v27, 0.0  ;;  %v886_v39 = vadd.f32 %v2903_v38, %v885_v34  ;;  %v1270_v40 = vadd.f32 %v2903_v38, %v1269_v35 }
 0x15c   :  { %1664 = vst.msk [vmem:[%s3873_s3 + $0x1f0] sm:$0xff] %vm1601_vm2, %v1471_v30  ;;  %1760 = vst.msk [vmem:[%s3873_s3 + $0x4f0] sm:$0xff] %vm1601_vm2, %v1567_v31  ;;  %v1472_v41 = vmax.f32 %v894_v32, 0.0  ;;  %v1568_v42 = vmax.f32 %v1278_v33, 0.0 }
 0x15d   :  { %1662 = vst.msk [vmem:[%s3873_s3 + $0x1e0] sm:$0xff] %vm1601_vm2, %v1469_v36  ;;  %1758 = vst.msk [vmem:[%s3873_s3 + $0x4e0] sm:$0xff] %vm1601_vm2, %v1565_v37  ;;  %v1470_v38 = vmax.f32 %v886_v39, 0.0  ;;  %v1566_v43 = vmax.f32 %v1270_v40, 0.0 }
 0x15e   :  { %1665 = vst.msk [vmem:[%s3873_s3 + $0x1f8] sm:$0xff] %vm1601_vm2, %v1472_v41  ;;  %1761 = vst.msk [vmem:[%s3873_s3 + $0x4f8] sm:$0xff] %vm1601_vm2, %v1568_v42 }
 0x15f   :  { %1663 = vst.msk [vmem:[%s3873_s3 + $0x1e8] sm:$0xff] %vm1601_vm2, %v1470_v38  ;;  %1759 = vst.msk [vmem:[%s3873_s3 + $0x4e8] sm:$0xff] %vm1601_vm2, %v1566_v43  ;;  %v2063_v44 = vpop.f32.mrb[64].mxu0  ;;  %v2159_v45 = vpop.f32.mrb[64].mxu1 }
 0x160   :  { %v907_v47 = vadd.f32 %v3548_v46, %v2063_v44  ;;  %v1291_v48 = vadd.f32 %v3548_v46, %v2159_v45  ;;  %v898_v49 = vpop.f32.mrb[65].mxu0  ;;  %v1282_v50 = vpop.f32.mrb[65].mxu1 }
 0x161   :  { %v899_v51 = vadd.f32 %v3548_v46, %v898_v49  ;;  %v1283_v52 = vadd.f32 %v3548_v46, %v1282_v50  ;;  %v2064_v53 = vpop.f32.mrb[66].mxu0  ;;  %v2160_v54 = vpop.f32.mrb[66].mxu1 }
 0x162   :  { %v1475_v55 = vmax.f32 %v907_v47, 0.0  ;;  %v1571_v56 = vmax.f32 %v1291_v48, 0.0  ;;  %v910_v57 = vadd.f32 %v3548_v46, %v2064_v53  ;;  %v1294_v58 = vadd.f32 %v3548_v46, %v2160_v54  ;;  %v901_v59 = vpop.f32.mrb[67].mxu0  ;;  %v1285_v60 = vpop.f32.mrb[67].mxu1 }
 0x163   :  { %v1473_v61 = vmax.f32 %v899_v51, 0.0  ;;  %v1569_v62 = vmax.f32 %v1283_v52, 0.0  ;;  %v902_v63 = vadd.f32 %v3548_v46, %v901_v59  ;;  %v1286_v0 = vadd.f32 %v3548_v46, %v1285_v60 }
 0x164   :  { %1668 = vst.msk [vmem:[%s3873_s3 + $0x210] sm:$0xff] %vm1601_vm2, %v1475_v55  ;;  %1764 = vst.msk [vmem:[%s3873_s3 + $0x510] sm:$0xff] %vm1601_vm2, %v1571_v56  ;;  %v1476_v1 = vmax.f32 %v910_v57, 0.0  ;;  %v1572_v2 = vmax.f32 %v1294_v58, 0.0 }
 0x165   :  { %1666 = vst.msk [vmem:[%s3873_s3 + $0x200] sm:$0xff] %vm1601_vm2, %v1473_v61  ;;  %1762 = vst.msk [vmem:[%s3873_s3 + $0x500] sm:$0xff] %vm1601_vm2, %v1569_v62  ;;  %v1474_v3 = vmax.f32 %v902_v63, 0.0  ;;  %v1570_v4 = vmax.f32 %v1286_v0, 0.0 }
 0x166   :  { %1669 = vst.msk [vmem:[%s3873_s3 + $0x218] sm:$0xff] %vm1601_vm2, %v1476_v1  ;;  %1765 = vst.msk [vmem:[%s3873_s3 + $0x518] sm:$0xff] %vm1601_vm2, %v1572_v2 }
 0x167   :  { %1667 = vst.msk [vmem:[%s3873_s3 + $0x208] sm:$0xff] %vm1601_vm2, %v1474_v3  ;;  %1763 = vst.msk [vmem:[%s3873_s3 + $0x508] sm:$0xff] %vm1601_vm2, %v1570_v4  ;;  %v2067_v5 = vpop.f32.mrb[68].mxu0  ;;  %v2163_v6 = vpop.f32.mrb[68].mxu1 }
 0x168   :  { %v923_v7 = vadd.f32 %v3548_v46, %v2067_v5  ;;  %v1307_v8 = vadd.f32 %v3548_v46, %v2163_v6  ;;  %v914_v9 = vpop.f32.mrb[69].mxu0  ;;  %v1298_v10 = vpop.f32.mrb[69].mxu1 }
 0x169   :  { %v915_v11 = vadd.f32 %v3548_v46, %v914_v9  ;;  %v1299_v12 = vadd.f32 %v3548_v46, %v1298_v10  ;;  %v2068_v13 = vpop.f32.mrb[70].mxu0  ;;  %v2164_v14 = vpop.f32.mrb[70].mxu1 }
 0x16a   :  { %v1479_v15 = vmax.f32 %v923_v7, 0.0  ;;  %v1575_v16 = vmax.f32 %v1307_v8, 0.0  ;;  %v926_v17 = vadd.f32 %v3548_v46, %v2068_v13  ;;  %v1310_v18 = vadd.f32 %v3548_v46, %v2164_v14  ;;  %v917_v19 = vpop.f32.mrb[71].mxu0  ;;  %v1301_v20 = vpop.f32.mrb[71].mxu1 }
 0x16b   :  { %v1477_v21 = vmax.f32 %v915_v11, 0.0  ;;  %v1573_v22 = vmax.f32 %v1299_v12, 0.0  ;;  %v918_v23 = vadd.f32 %v3548_v46, %v917_v19  ;;  %v1302_v24 = vadd.f32 %v3548_v46, %v1301_v20 }
 0x16c   :  { %1672 = vst.msk [vmem:[%s3873_s3 + $0x230] sm:$0xff] %vm1601_vm2, %v1479_v15  ;;  %1768 = vst.msk [vmem:[%s3873_s3 + $0x530] sm:$0xff] %vm1601_vm2, %v1575_v16  ;;  %v1480_v25 = vmax.f32 %v926_v17, 0.0  ;;  %v1576_v26 = vmax.f32 %v1310_v18, 0.0 }
 0x16d   :  { %1670 = vst.msk [vmem:[%s3873_s3 + $0x220] sm:$0xff] %vm1601_vm2, %v1477_v21  ;;  %1766 = vst.msk [vmem:[%s3873_s3 + $0x520] sm:$0xff] %vm1601_vm2, %v1573_v22  ;;  %v1478_v27 = vmax.f32 %v918_v23, 0.0  ;;  %v1574_v28 = vmax.f32 %v1302_v24, 0.0 }
 0x16e   :  { %1673 = vst.msk [vmem:[%s3873_s3 + $0x238] sm:$0xff] %vm1601_vm2, %v1480_v25  ;;  %1769 = vst.msk [vmem:[%s3873_s3 + $0x538] sm:$0xff] %vm1601_vm2, %v1576_v26 }
 0x16f   :  { %1671 = vst.msk [vmem:[%s3873_s3 + $0x228] sm:$0xff] %vm1601_vm2, %v1478_v27  ;;  %1767 = vst.msk [vmem:[%s3873_s3 + $0x528] sm:$0xff] %vm1601_vm2, %v1574_v28  ;;  %v2071_v29 = vpop.f32.mrb[72].mxu0  ;;  %v2167_v30 = vpop.f32.mrb[72].mxu1 }
 0x170   :  { %v939_v31 = vadd.f32 %v3548_v46, %v2071_v29  ;;  %v1323_v32 = vadd.f32 %v3548_v46, %v2167_v30  ;;  %v930_v33 = vpop.f32.mrb[73].mxu0  ;;  %v1314_v34 = vpop.f32.mrb[73].mxu1 }
 0x171   :  { %v931_v35 = vadd.f32 %v3548_v46, %v930_v33  ;;  %v1315_v36 = vadd.f32 %v3548_v46, %v1314_v34  ;;  %v2072_v37 = vpop.f32.mrb[74].mxu0  ;;  %v2168_v39 = vpop.f32.mrb[74].mxu1 }
 0x172   :  { %v1483_v40 = vmax.f32 %v939_v31, 0.0  ;;  %v1579_v41 = vmax.f32 %v1323_v32, 0.0  ;;  %v942_v42 = vadd.f32 %v3548_v46, %v2072_v37  ;;  %v1326_v38 = vadd.f32 %v3548_v46, %v2168_v39  ;;  %v933_v43 = vpop.f32.mrb[75].mxu0  ;;  %v1317_v44 = vpop.f32.mrb[75].mxu1 }
 0x173   :  { %v1481_v45 = vmax.f32 %v931_v35, 0.0  ;;  %v1577_v47 = vmax.f32 %v1315_v36, 0.0  ;;  %v934_v48 = vadd.f32 %v3548_v46, %v933_v43  ;;  %v1318_v49 = vadd.f32 %v3548_v46, %v1317_v44 }
 0x174   :  { %1676 = vst.msk [vmem:[%s3873_s3 + $0x250] sm:$0xff] %vm1601_vm2, %v1483_v40  ;;  %1772 = vst.msk [vmem:[%s3873_s3 + $0x550] sm:$0xff] %vm1601_vm2, %v1579_v41  ;;  %v1484_v50 = vmax.f32 %v942_v42, 0.0  ;;  %v1580_v51 = vmax.f32 %v1326_v38, 0.0 }
 0x175   :  { %1674 = vst.msk [vmem:[%s3873_s3 + $0x240] sm:$0xff] %vm1601_vm2, %v1481_v45  ;;  %1770 = vst.msk [vmem:[%s3873_s3 + $0x540] sm:$0xff] %vm1601_vm2, %v1577_v47  ;;  %v1482_v52 = vmax.f32 %v934_v48, 0.0  ;;  %v1578_v53 = vmax.f32 %v1318_v49, 0.0 }
 0x176   :  { %1677 = vst.msk [vmem:[%s3873_s3 + $0x258] sm:$0xff] %vm1601_vm2, %v1484_v50  ;;  %1773 = vst.msk [vmem:[%s3873_s3 + $0x558] sm:$0xff] %vm1601_vm2, %v1580_v51 }
 0x177   :  { %1675 = vst.msk [vmem:[%s3873_s3 + $0x248] sm:$0xff] %vm1601_vm2, %v1482_v52  ;;  %1771 = vst.msk [vmem:[%s3873_s3 + $0x548] sm:$0xff] %vm1601_vm2, %v1578_v53  ;;  %v2075_v54 = vpop.f32.mrb[76].mxu0  ;;  %v2171_v55 = vpop.f32.mrb[76].mxu1 }
 0x178   :  { %v955_v56 = vadd.f32 %v3548_v46, %v2075_v54  ;;  %v1339_v57 = vadd.f32 %v3548_v46, %v2171_v55  ;;  %v946_v58 = vpop.f32.mrb[77].mxu0  ;;  %v1330_v59 = vpop.f32.mrb[77].mxu1 }
 0x179   :  { %v947_v60 = vadd.f32 %v3548_v46, %v946_v58  ;;  %v1331_v61 = vadd.f32 %v3548_v46, %v1330_v59  ;;  %v2076_v62 = vpop.f32.mrb[78].mxu0  ;;  %v2172_v63 = vpop.f32.mrb[78].mxu1 }
 0x17a   :  { %v1487_v0 = vmax.f32 %v955_v56, 0.0  ;;  %v1583_v1 = vmax.f32 %v1339_v57, 0.0  ;;  %v958_v2 = vadd.f32 %v3548_v46, %v2076_v62  ;;  %v1342_v3 = vadd.f32 %v3548_v46, %v2172_v63  ;;  %v949_v4 = vpop.f32.mrb[79].mxu0  ;;  %v1333_v5 = vpop.f32.mrb[79].mxu1 }
 0x17b   :  { %v1485_v6 = vmax.f32 %v947_v60, 0.0  ;;  %v1581_v7 = vmax.f32 %v1331_v61, 0.0  ;;  %v950_v8 = vadd.f32 %v3548_v46, %v949_v4  ;;  %v1334_v9 = vadd.f32 %v3548_v46, %v1333_v5 }
 0x17c   :  { %1680 = vst.msk [vmem:[%s3873_s3 + $0x270] sm:$0xff] %vm1601_vm2, %v1487_v0  ;;  %1776 = vst.msk [vmem:[%s3873_s3 + $0x570] sm:$0xff] %vm1601_vm2, %v1583_v1  ;;  %v1488_v10 = vmax.f32 %v958_v2, 0.0  ;;  %v1584_v11 = vmax.f32 %v1342_v3, 0.0 }
 0x17d   :  { %1678 = vst.msk [vmem:[%s3873_s3 + $0x260] sm:$0xff] %vm1601_vm2, %v1485_v6  ;;  %1774 = vst.msk [vmem:[%s3873_s3 + $0x560] sm:$0xff] %vm1601_vm2, %v1581_v7  ;;  %v1486_v12 = vmax.f32 %v950_v8, 0.0  ;;  %v1582_v13 = vmax.f32 %v1334_v9, 0.0 }
 0x17e   :  { %1681 = vst.msk [vmem:[%s3873_s3 + $0x278] sm:$0xff] %vm1601_vm2, %v1488_v10  ;;  %1777 = vst.msk [vmem:[%s3873_s3 + $0x578] sm:$0xff] %vm1601_vm2, %v1584_v11 }
 0x17f   :  { %1679 = vst.msk [vmem:[%s3873_s3 + $0x268] sm:$0xff] %vm1601_vm2, %v1486_v12  ;;  %1775 = vst.msk [vmem:[%s3873_s3 + $0x568] sm:$0xff] %vm1601_vm2, %v1582_v13  ;;  %v2079_v14 = vpop.f32.mrb[80].mxu0  ;;  %v2175_v15 = vpop.f32.mrb[80].mxu1 }
 0x180   :  { %v971_v16 = vadd.f32 %v3548_v46, %v2079_v14  ;;  %v1355_v17 = vadd.f32 %v3548_v46, %v2175_v15  ;;  %v962_v18 = vpop.f32.mrb[81].mxu0  ;;  %v1346_v19 = vpop.f32.mrb[81].mxu1 }
 0x181   :  { %v963_v20 = vadd.f32 %v3548_v46, %v962_v18  ;;  %v1347_v21 = vadd.f32 %v3548_v46, %v1346_v19  ;;  %v2080_v22 = vpop.f32.mrb[82].mxu0  ;;  %v2176_v23 = vpop.f32.mrb[82].mxu1 }
 0x182   :  { %v1491_v24 = vmax.f32 %v971_v16, 0.0  ;;  %v1587_v25 = vmax.f32 %v1355_v17, 0.0  ;;  %v974_v26 = vadd.f32 %v3548_v46, %v2080_v22  ;;  %v1358_v27 = vadd.f32 %v3548_v46, %v2176_v23  ;;  %v965_v28 = vpop.f32.mrb[83].mxu0  ;;  %v1349_v29 = vpop.f32.mrb[83].mxu1 }
 0x183   :  { %v1489_v30 = vmax.f32 %v963_v20, 0.0  ;;  %v1585_v31 = vmax.f32 %v1347_v21, 0.0  ;;  %v966_v32 = vadd.f32 %v3548_v46, %v965_v28  ;;  %v1350_v33 = vadd.f32 %v3548_v46, %v1349_v29 }
 0x184   :  { %1684 = vst.msk [vmem:[%s3873_s3 + $0x290] sm:$0xff] %vm1601_vm2, %v1491_v24  ;;  %1780 = vst.msk [vmem:[%s3873_s3 + $0x590] sm:$0xff] %vm1601_vm2, %v1587_v25  ;;  %v1492_v34 = vmax.f32 %v974_v26, 0.0  ;;  %v1588_v35 = vmax.f32 %v1358_v27, 0.0 }
 0x185   :  { %1682 = vst.msk [vmem:[%s3873_s3 + $0x280] sm:$0xff] %vm1601_vm2, %v1489_v30  ;;  %1778 = vst.msk [vmem:[%s3873_s3 + $0x580] sm:$0xff] %vm1601_vm2, %v1585_v31  ;;  %v1490_v36 = vmax.f32 %v966_v32, 0.0  ;;  %v1586_v37 = vmax.f32 %v1350_v33, 0.0 }
 0x186   :  { %1685 = vst.msk [vmem:[%s3873_s3 + $0x298] sm:$0xff] %vm1601_vm2, %v1492_v34  ;;  %1781 = vst.msk [vmem:[%s3873_s3 + $0x598] sm:$0xff] %vm1601_vm2, %v1588_v35 }
 0x187   :  { %1683 = vst.msk [vmem:[%s3873_s3 + $0x288] sm:$0xff] %vm1601_vm2, %v1490_v36  ;;  %1779 = vst.msk [vmem:[%s3873_s3 + $0x588] sm:$0xff] %vm1601_vm2, %v1586_v37  ;;  %v2083_v39 = vpop.f32.mrb[84].mxu0  ;;  %v2179_v40 = vpop.f32.mrb[84].mxu1 }
 0x188   :  { %v987_v41 = vadd.f32 %v3548_v46, %v2083_v39  ;;  %v1371_v42 = vadd.f32 %v3548_v46, %v2179_v40  ;;  %v978_v38 = vpop.f32.mrb[85].mxu0  ;;  %v1362_v43 = vpop.f32.mrb[85].mxu1 }
 0x189   :  { %v979_v44 = vadd.f32 %v3548_v46, %v978_v38  ;;  %v1363_v45 = vadd.f32 %v3548_v46, %v1362_v43  ;;  %v2084_v47 = vpop.f32.mrb[86].mxu0  ;;  %v2180_v48 = vpop.f32.mrb[86].mxu1 }
 0x18a   :  { %v1495_v49 = vmax.f32 %v987_v41, 0.0  ;;  %v1591_v50 = vmax.f32 %v1371_v42, 0.0  ;;  %v990_v51 = vadd.f32 %v3548_v46, %v2084_v47  ;;  %v1374_v52 = vadd.f32 %v3548_v46, %v2180_v48  ;;  %v981_v53 = vpop.f32.mrb[87].mxu0  ;;  %v1365_v54 = vpop.f32.mrb[87].mxu1 }
 0x18b   :  { %v1493_v55 = vmax.f32 %v979_v44, 0.0  ;;  %v1589_v56 = vmax.f32 %v1363_v45, 0.0  ;;  %v982_v57 = vadd.f32 %v3548_v46, %v981_v53  ;;  %v1366_v58 = vadd.f32 %v3548_v46, %v1365_v54 }
 0x18c   :  { %1688 = vst.msk [vmem:[%s3873_s3 + $0x2b0] sm:$0xff] %vm1601_vm2, %v1495_v49  ;;  %1784 = vst.msk [vmem:[%s3873_s3 + $0x5b0] sm:$0xff] %vm1601_vm2, %v1591_v50  ;;  %v1496_v59 = vmax.f32 %v990_v51, 0.0  ;;  %v1592_v60 = vmax.f32 %v1374_v52, 0.0 }
 0x18d   :  { %1686 = vst.msk [vmem:[%s3873_s3 + $0x2a0] sm:$0xff] %vm1601_vm2, %v1493_v55  ;;  %1782 = vst.msk [vmem:[%s3873_s3 + $0x5a0] sm:$0xff] %vm1601_vm2, %v1589_v56  ;;  %v1494_v61 = vmax.f32 %v982_v57, 0.0  ;;  %v1590_v62 = vmax.f32 %v1366_v58, 0.0 }
 0x18e   :  { %1689 = vst.msk [vmem:[%s3873_s3 + $0x2b8] sm:$0xff] %vm1601_vm2, %v1496_v59  ;;  %1785 = vst.msk [vmem:[%s3873_s3 + $0x5b8] sm:$0xff] %vm1601_vm2, %v1592_v60 }
 0x18f   :  { %1687 = vst.msk [vmem:[%s3873_s3 + $0x2a8] sm:$0xff] %vm1601_vm2, %v1494_v61  ;;  %1783 = vst.msk [vmem:[%s3873_s3 + $0x5a8] sm:$0xff] %vm1601_vm2, %v1590_v62  ;;  %v2087_v63 = vpop.f32.mrb[88].mxu0  ;;  %v2183_v0 = vpop.f32.mrb[88].mxu1 }
 0x190   :  { %v1003_v1 = vadd.f32 %v3548_v46, %v2087_v63  ;;  %v1387_v2 = vadd.f32 %v3548_v46, %v2183_v0  ;;  %v994_v3 = vpop.f32.mrb[89].mxu0  ;;  %v1378_v4 = vpop.f32.mrb[89].mxu1 }
 0x191   :  { %v995_v5 = vadd.f32 %v3548_v46, %v994_v3  ;;  %v1379_v6 = vadd.f32 %v3548_v46, %v1378_v4  ;;  %v2088_v7 = vpop.f32.mrb[90].mxu0  ;;  %v2184_v8 = vpop.f32.mrb[90].mxu1 }
 0x192   :  { %v1499_v9 = vmax.f32 %v1003_v1, 0.0  ;;  %v1595_v10 = vmax.f32 %v1387_v2, 0.0  ;;  %v1006_v11 = vadd.f32 %v3548_v46, %v2088_v7  ;;  %v1390_v12 = vadd.f32 %v3548_v46, %v2184_v8  ;;  %v997_v13 = vpop.f32.mrb[91].mxu0  ;;  %v1381_v14 = vpop.f32.mrb[91].mxu1 }
 0x193   :  { %v1497_v15 = vmax.f32 %v995_v5, 0.0  ;;  %v1593_v16 = vmax.f32 %v1379_v6, 0.0  ;;  %v998_v17 = vadd.f32 %v3548_v46, %v997_v13  ;;  %v1382_v18 = vadd.f32 %v3548_v46, %v1381_v14 }
 0x194   :  { %1692 = vst.msk [vmem:[%s3873_s3 + $0x2d0] sm:$0xff] %vm1601_vm2, %v1499_v9  ;;  %1788 = vst.msk [vmem:[%s3873_s3 + $0x5d0] sm:$0xff] %vm1601_vm2, %v1595_v10  ;;  %v1500_v19 = vmax.f32 %v1006_v11, 0.0  ;;  %v1596_v20 = vmax.f32 %v1390_v12, 0.0 }
 0x195   :  { %1690 = vst.msk [vmem:[%s3873_s3 + $0x2c0] sm:$0xff] %vm1601_vm2, %v1497_v15  ;;  %1786 = vst.msk [vmem:[%s3873_s3 + $0x5c0] sm:$0xff] %vm1601_vm2, %v1593_v16  ;;  %v1498_v21 = vmax.f32 %v998_v17, 0.0  ;;  %v1594_v22 = vmax.f32 %v1382_v18, 0.0 }
 0x196   :  { %1693 = vst.msk [vmem:[%s3873_s3 + $0x2d8] sm:$0xff] %vm1601_vm2, %v1500_v19  ;;  %1789 = vst.msk [vmem:[%s3873_s3 + $0x5d8] sm:$0xff] %vm1601_vm2, %v1596_v20 }
 0x197   :  { %1691 = vst.msk [vmem:[%s3873_s3 + $0x2c8] sm:$0xff] %vm1601_vm2, %v1498_v21  ;;  %1787 = vst.msk [vmem:[%s3873_s3 + $0x5c8] sm:$0xff] %vm1601_vm2, %v1594_v22  ;;  %v2091_v23 = vpop.f32.mrb[92].mxu0  ;;  %v2187_v24 = vpop.f32.mrb[92].mxu1 }
 0x198   :  { %v1019_v25 = vadd.f32 %v3548_v46, %v2091_v23  ;;  %v1403_v26 = vadd.f32 %v3548_v46, %v2187_v24  ;;  %v1010_v27 = vpop.f32.mrb[93].mxu0  ;;  %v1394_v28 = vpop.f32.mrb[93].mxu1 }
 0x199   :  { %v1011_v29 = vadd.f32 %v3548_v46, %v1010_v27  ;;  %v1395_v30 = vadd.f32 %v3548_v46, %v1394_v28  ;;  %v2092_v31 = vpop.f32.mrb[94].mxu0  ;;  %v2188_v32 = vpop.f32.mrb[94].mxu1 }
 0x19a   :  { %v1503_v33 = vmax.f32 %v1019_v25, 0.0  ;;  %v1599_v34 = vmax.f32 %v1403_v26, 0.0  ;;  %v1022_v35 = vadd.f32 %v3548_v46, %v2092_v31  ;;  %v1406_v36 = vadd.f32 %v3548_v46, %v2188_v32  ;;  %v1013_v37 = vpop.f32.mrb[95].mxu0  ;;  %v1397_v39 = vpop.f32.mrb[95].mxu1 }
 0x19b   :  { %v1501_v40 = vmax.f32 %v1011_v29, 0.0  ;;  %v1597_v41 = vmax.f32 %v1395_v30, 0.0  ;;  %v1014_v42 = vadd.f32 %v3548_v46, %v1013_v37  ;;  %v1398_v38 = vadd.f32 %v3548_v46, %v1397_v39 }
 0x19c   :  { %1696 = vst.msk [vmem:[%s3873_s3 + $0x2f0] sm:$0xff] %vm1601_vm2, %v1503_v33  ;;  %1792 = vst.msk [vmem:[%s3873_s3 + $0x5f0] sm:$0xff] %vm1601_vm2, %v1599_v34  ;;  %v1504_v43 = vmax.f32 %v1022_v35, 0.0  ;;  %v1600_v44 = vmax.f32 %v1406_v36, 0.0 }
 0x19d   :  { %1694 = vst.msk [vmem:[%s3873_s3 + $0x2e0] sm:$0xff] %vm1601_vm2, %v1501_v40  ;;  %1790 = vst.msk [vmem:[%s3873_s3 + $0x5e0] sm:$0xff] %vm1601_vm2, %v1597_v41  ;;  %v1502_v46 = vmax.f32 %v1014_v42, 0.0  ;;  %v1598_v45 = vmax.f32 %v1398_v38, 0.0 }
 0x19e   :  { %1697 = vst.msk [vmem:[%s3873_s3 + $0x2f8] sm:$0xff] %vm1601_vm2, %v1504_v43  ;;  %1793 = vst.msk [vmem:[%s3873_s3 + $0x5f8] sm:$0xff] %vm1601_vm2, %v1600_v44 }
 0x19f   :  { %1695 = vst.msk [vmem:[%s3873_s3 + $0x2e8] sm:$0xff] %vm1601_vm2, %v1502_v46  ;;  %1791 = vst.msk [vmem:[%s3873_s3 + $0x5e8] sm:$0xff] %vm1601_vm2, %v1598_v45 }

// kernel: vpt_forward.6
= control target key start
LH: loop header
LB: loop body
LE: loop exit
PB: predicated region body
PF: predicated region fallthrough
CT: control target
= control target key end

     0   :  { %vm127_vm0 = vcmask 392192   ;;  %vm1855_vm1 = vcmask 31744   ;;  %s3794_s1 = inlined_call_operand.vmem [shape: f32[192,4], index: 1, kind: input, shape index: {}]   ;;  %s3795_s0 = inlined_call_operand.vmem [shape: f32[512,48], index: 0, kind: input, shape index: {}]   ;;  %s3796_s2 = inlined_call_operand.vmem [shape: f32[1,4], index: 2, kind: input, shape index: {}]   ;;  %s3797_s3 = inlined_call_operand.vmem [shape: f32[512,4], index: 3, kind: output, shape index: {}]  }
   0x1   :  { %v112_v0 = vld [vmem:[%s3794_s1] sm:$0xff]  ;;  %v113_v1 = vld [vmem:[%s3794_s1 + $0x8] sm:$0xff]  ;;  %v577_v2 = vld [vmem:[%s3794_s1 + $0x30] sm:$0xff] }
   0x2   :  { %v118_v3 = vpack.c.bf16 %v113_v1, %v112_v0  ;;  %v578_v4 = vld [vmem:[%s3794_s1 + $0x38] sm:$0xff]  ;;  %v114_v5 = vld [vmem:[%s3794_s1 + $0x10] sm:$0xff]  ;;  %v579_v9 = vld [vmem:[%s3794_s1 + $0x40] sm:$0xff] }
   0x3   :  { %v115_v6 = vld [vmem:[%s3794_s1 + $0x18] sm:$0xff]  ;;  %v583_v7 = vpack.c.bf16 %v578_v4, %v577_v2  ;;  %v580_v10 = vld [vmem:[%s3794_s1 + $0x48] sm:$0xff]  ;;  %v116_v11 = vld [vmem:[%s3794_s1 + $0x20] sm:$0xff] }
   0x4   :  { %v119_v8 = vpack.c.bf16 %v115_v6, %v114_v5  ;;  %2193 = vmatprep.subr.bf16.mxu0 %v118_v3  ;;  %v584_v12 = vpack.c.bf16 %v580_v10, %v579_v9  ;;  %v117_v13 = vld [vmem:[%s3794_s1 + $0x28] sm:$0xff]  ;;  %v581_v14 = vld [vmem:[%s3794_s1 + $0x50] sm:$0xff]  ;;  %v582_v15 = vld [vmem:[%s3794_s1 + $0x58] sm:$0xff] }
   0x5   :  { %2263 = vmatprep.subr.bf16.mxu1 %v583_v7  ;;  %2194 = vmatpush3.bf16.msra.mxu0 %v118_v3  ;;  %v15_v16 = vld [vmem:[%s3795_s0] sm:$0xff]  ;;  %v16_v17 = vld [vmem:[%s3795_s0 + $0x8] sm:$0xff]  ;;  %v120_v18 = vpack.c.bf16 %v117_v13, %v116_v11  ;;  %v585_v20 = vpack.c.bf16 %v582_v15, %v581_v14  ;;  %v1429_v23 = vld [vmem:[%s3794_s1 + $0x90] sm:$0xff] }
   0x6   :  { %2264 = vmatpush3.bf16.msra.mxu1 %v583_v7  ;;  %2195 = vmatprep.subr.bf16.mxu0 %v119_v8  ;;  %v2537_v19 = vpack.c.bf16 %v16_v17, %v15_v16  ;;  %v1003_v21 = vld [vmem:[%s3794_s1 + $0x60] sm:$0xff]  ;;  %v1004_v22 = vld [vmem:[%s3794_s1 + $0x68] sm:$0xff]  ;;  %v1430_v24 = vld [vmem:[%s3794_s1 + $0x98] sm:$0xff] }
   0x7   :  { %2265 = vmatprep.subr.bf16.mxu1 %v584_v12  ;;  %v17_v25 = vld [vmem:[%s3795_s0 + $0x10] sm:$0xff]  ;;  %v18_v26 = vld [vmem:[%s3795_s0 + $0x18] sm:$0xff]  ;;  %v1009_v27 = vpack.c.bf16 %v1004_v22, %v1003_v21  ;;  %v1435_v28 = vpack.c.bf16 %v1430_v24, %v1429_v23  ;;  %v19_v29 = vld [vmem:[%s3795_s0 + $0x20] sm:$0xff] }
   0x8   :  { %2199 = vmatprep.mubr.msk.bf16.mxu0 %vm127_vm0, %v2537_v19  ;;  %2269 = vmatprep.mubr.msk.bf16.mxu1 %vm127_vm0, %v2537_v19  ;;  %v20_v30 = vld [vmem:[%s3795_s0 + $0x28] sm:$0xff]  ;;  %v2567_v31 = vpack.c.bf16 %v18_v26, %v17_v25  ;;  %v1005_v33 = vld [vmem:[%s3794_s1 + $0x70] sm:$0xff]  ;;  %v1006_v34 = vld [vmem:[%s3794_s1 + $0x78] sm:$0xff] }
   0x9   :  { %2196 = vmatpush3.bf16.msra.mxu0 %v119_v8  ;;  %v2569_v32 = vpack.c.bf16 %v20_v30, %v19_v29  ;;  %v1010_v35 = vpack.c.bf16 %v1006_v34, %v1005_v33  ;;  %v1431_v36 = vld [vmem:[%s3794_s1 + $0xa0] sm:$0xff]  ;;  %v1432_v37 = vld [vmem:[%s3794_s1 + $0xa8] sm:$0xff]  ;;  %v21_v39 = vld [vmem:[%s3795_s0 + $0x30] sm:$0xff] }
   0xa   :  { %2266 = vmatpush3.bf16.msra.mxu1 %v584_v12  ;;  %2197 = vmatprep.subr.bf16.mxu0 %v120_v18  ;;  %v1436_v38 = vpack.c.bf16 %v1432_v37, %v1431_v36  ;;  %v22_v40 = vld [vmem:[%s3795_s0 + $0x38] sm:$0xff]  ;;  %v23_v41 = vld [vmem:[%s3795_s0 + $0x40] sm:$0xff]  ;;  %v24_v42 = vld [vmem:[%s3795_s0 + $0x48] sm:$0xff] }
   0xb   :  { %2267 = vmatprep.subr.bf16.mxu1 %v585_v20  ;;  %v2603_v43 = vpack.c.bf16 %v22_v40, %v21_v39  ;;  %v2605_v44 = vpack.c.bf16 %v24_v42, %v23_v41  ;;  %v1007_v45 = vld [vmem:[%s3794_s1 + $0x80] sm:$0xff]  ;;  %v1008_v46 = vld [vmem:[%s3794_s1 + $0x88] sm:$0xff]  ;;  %v1433_v48 = vld [vmem:[%s3794_s1 + $0xb0] sm:$0xff] }
   0xc   :  { %v1011_v47 = vpack.c.bf16 %v1008_v46, %v1007_v45  ;;  %v1434_v49 = vld [vmem:[%s3794_s1 + $0xb8] sm:$0xff]  ;;  %v25_v50 = vld [vmem:[%s3795_s0 + $0x50] sm:$0xff]  ;;  %v27_v53 = vld [vmem:[%s3795_s0 + $0x60] sm:$0xff] }
   0xd   :  { %2198 = vmatpush3.bf16.msra.mxu0 %v120_v18  ;;  %v26_v51 = vld [vmem:[%s3795_s0 + $0x58] sm:$0xff]  ;;  %v1437_v52 = vpack.c.bf16 %v1434_v49, %v1433_v48  ;;  %v28_v54 = vld [vmem:[%s3795_s0 + $0x68] sm:$0xff]  ;;  %v29_v57 = vld [vmem:[%s3795_s0 + $0x70] sm:$0xff] }
   0xe   :  { %2268 = vmatpush3.bf16.msra.mxu1 %v585_v20  ;;  %2333 = vmatprep.subr.bf16.mxu0 %v1009_v27  ;;  %v2639_v55 = vpack.c.bf16 %v26_v51, %v25_v50  ;;  %v2641_v56 = vpack.c.bf16 %v28_v54, %v27_v53  ;;  %v30_v58 = vld [vmem:[%s3795_s0 + $0x78] sm:$0xff]  ;;  %v31_v59 = vld [vmem:[%s3795_s0 + $0x80] sm:$0xff]  ;;  %v32_v60 = vld [vmem:[%s3795_s0 + $0x88] sm:$0xff] }
   0xf   :  { %2403 = vmatprep.subr.bf16.mxu1 %v1435_v28  ;;  %v2663_v61 = vpack.c.bf16 %v30_v58, %v29_v57  ;;  %v2665_v62 = vpack.c.bf16 %v32_v60, %v31_v59  ;;  %v33_v63 = vld [vmem:[%s3795_s0 + $0x90] sm:$0xff]  ;;  %v34_v0 = vld [vmem:[%s3795_s0 + $0x98] sm:$0xff]  ;;  %v35_v1 = vld [vmem:[%s3795_s0 + $0xa0] sm:$0xff] }
  0x10   :  { %2200 = vmatmul.mubr.msk.bf16.vlgmr.msra.gmra.mrb[0].mxu0 %vm127_vm0, %v2567_v31  ;;  %v36_v2 = vld [vmem:[%s3795_s0 + $0xa8] sm:$0xff]  ;;  %v2687_v3 = vpack.c.bf16 %v34_v0, %v33_v63  ;;  %v37_v5 = vld [vmem:[%s3795_s0 + $0xb0] sm:$0xff]  ;;  %v38_v6 = vld [vmem:[%s3795_s0 + $0xb8] sm:$0xff] }
  0x11   :  { %2270 = vmatmul.mubr.msk.bf16.vlgmr.msra.gmra.mrb[0].mxu1 %vm127_vm0, %v2567_v31  ;;  %2334 = vmatpush3.bf16.msra.mxu0 %v1009_v27  ;;  %v2689_v4 = vpack.c.bf16 %v36_v2, %v35_v1  ;;  %v39_v7 = vld [vmem:[%s3795_s0 + $0xc0] sm:$0xff]  ;;  %v40_v8 = vld [vmem:[%s3795_s0 + $0xc8] sm:$0xff]  ;;  %v2711_v9 = vpack.c.bf16 %v38_v6, %v37_v5  ;;  %v41_v11 = vld [vmem:[%s3795_s0 + $0xd0] sm:$0xff] }
  0x12   :  { %2404 = vmatpush3.bf16.msra.mxu1 %v1435_v28  ;;  %2203 = vmatprep.mubr.msk.bf16.mxu0 %vm127_vm0, %v2569_v32  ;;  %v2713_v10 = vpack.c.bf16 %v40_v8, %v39_v7  ;;  %v42_v12 = vld [vmem:[%s3795_s0 + $0xd8] sm:$0xff]  ;;  %v43_v13 = vld [vmem:[%s3795_s0 + $0xe0] sm:$0xff]  ;;  %v44_v14 = vld [vmem:[%s3795_s0 + $0xe8] sm:$0xff] }
  0x13   :  { %2273 = vmatprep.mubr.msk.bf16.mxu1 %vm127_vm0, %v2569_v32  ;;  %2335 = vmatprep.subr.bf16.mxu0 %v1010_v35  ;;  %v2735_v15 = vpack.c.bf16 %v42_v12, %v41_v11  ;;  %v2737_v16 = vpack.c.bf16 %v44_v14, %v43_v13  ;;  %v45_v17 = vld [vmem:[%s3795_s0 + $0xf0] sm:$0xff]  ;;  %v46_v18 = vld [vmem:[%s3795_s0 + $0xf8] sm:$0xff]  ;;  %v47_v20 = vld [vmem:[%s3795_s0 + $0x100] sm:$0xff] }
  0x14   :  { %2405 = vmatprep.subr.bf16.mxu1 %v1436_v38  ;;  %v48_v21 = vld [vmem:[%s3795_s0 + $0x108] sm:$0xff]  ;;  %v2759_v22 = vpack.c.bf16 %v46_v18, %v45_v17  ;;  %v49_v24 = vld [vmem:[%s3795_s0 + $0x110] sm:$0xff]  ;;  %v50_v25 = vld [vmem:[%s3795_s0 + $0x118] sm:$0xff] }
  0x15   :  { %2336 = vmatpush3.bf16.msra.mxu0 %v1010_v35  ;;  %v2761_v23 = vpack.c.bf16 %v48_v21, %v47_v20  ;;  %v51_v26 = vld [vmem:[%s3795_s0 + $0x120] sm:$0xff]  ;;  %v52_v27 = vld [vmem:[%s3795_s0 + $0x128] sm:$0xff]  ;;  %v2783_v28 = vpack.c.bf16 %v50_v25, %v49_v24  ;;  %v53_v30 = vld [vmem:[%s3795_s0 + $0x130] sm:$0xff] }
  0x16   :  { %2406 = vmatpush3.bf16.msra.mxu1 %v1436_v38  ;;  %2337 = vmatprep.subr.bf16.mxu0 %v1011_v47  ;;  %v2785_v29 = vpack.c.bf16 %v52_v27, %v51_v26  ;;  %v54_v33 = vld [vmem:[%s3795_s0 + $0x138] sm:$0xff]  ;;  %v55_v34 = vld [vmem:[%s3795_s0 + $0x140] sm:$0xff]  ;;  %v56_v35 = vld [vmem:[%s3795_s0 + $0x148] sm:$0xff] }
  0x17   :  { %2407 = vmatprep.subr.bf16.mxu1 %v1437_v52  ;;  %v2807_v36 = vpack.c.bf16 %v54_v33, %v53_v30  ;;  %v2809_v37 = vpack.c.bf16 %v56_v35, %v55_v34  ;;  %v57_v38 = vld [vmem:[%s3795_s0 + $0x150] sm:$0xff]  ;;  %v58_v39 = vld [vmem:[%s3795_s0 + $0x158] sm:$0xff]  ;;  %v59_v40 = vld [vmem:[%s3795_s0 + $0x160] sm:$0xff] }
  0x18   :  { %2204 = vmatmul.mubr.msk.bf16.gmra.mrb[4].mxu0 %vm127_vm0, %v2603_v43  ;;  %v60_v41 = vld [vmem:[%s3795_s0 + $0x168] sm:$0xff]  ;;  %v2831_v42 = vpack.c.bf16 %v58_v39, %v57_v38  ;;  %v61_v46 = vld [vmem:[%s3795_s0 + $0x170] sm:$0xff]  ;;  %v63_v48 = vld [vmem:[%s3795_s0 + $0x180] sm:$0xff] }
  0x19   :  { %2274 = vmatmul.mubr.msk.bf16.gmra.mrb[4].mxu1 %vm127_vm0, %v2603_v43  ;;  %2207 = vmatprep.mubr.msk.bf16.mxu0 %vm127_vm0, %v2605_v44  ;;  %v2833_v45 = vpack.c.bf16 %v60_v41, %v59_v40  ;;  %v64_v49 = vld [vmem:[%s3795_s0 + $0x188] sm:$0xff]  ;;  %v66_v53 = vld [vmem:[%s3795_s0 + $0x198] sm:$0xff]  ;;  %v67_v54 = vld [vmem:[%s3795_s0 + $0x1a0] sm:$0xff] }
  0x1a   :  { %2277 = vmatprep.mubr.msk.bf16.mxu1 %vm127_vm0, %v2605_v44  ;;  %2338 = vmatpush3.bf16.msra.mxu0 %v1011_v47  ;;  %v62_v47 = vld [vmem:[%s3795_s0 + $0x178] sm:$0xff]  ;;  %v2857_v51 = vpack.c.bf16 %v64_v49, %v63_v48  ;;  %v68_v57 = vld [vmem:[%s3795_s0 + $0x1a8] sm:$0xff]  ;;  %v69_v60 = vld [vmem:[%s3795_s0 + $0x1b0] sm:$0xff] }
  0x1b   :  { %2408 = vmatpush3.bf16.msra.mxu1 %v1437_v52  ;;  %v2855_v50 = vpack.c.bf16 %v62_v47, %v61_v46  ;;  %v65_v52 = vld [vmem:[%s3795_s0 + $0x190] sm:$0xff]  ;;  %v2881_v59 = vpack.c.bf16 %v68_v57, %v67_v54  ;;  %v70_v63 = vld [vmem:[%s3795_s0 + $0x1b8] sm:$0xff]  ;;  %v71_v0 = vld [vmem:[%s3795_s0 + $0x1c0] sm:$0xff] }
  0x1c   :  { %v2879_v58 = vpack.c.bf16 %v66_v53, %v65_v52  ;;  %v72_v1 = vld [vmem:[%s3795_s0 + $0x1c8] sm:$0xff]  ;;  %v2903_v2 = vpack.c.bf16 %v70_v63, %v69_v60  ;;  %v73_v6 = vld [vmem:[%s3795_s0 + $0x1d0] sm:$0xff]  ;;  %v74_v7 = vld [vmem:[%s3795_s0 + $0x1d8] sm:$0xff] }
  0x1d   :  { %v2905_v5 = vpack.c.bf16 %v72_v1, %v71_v0  ;;  %v75_v8 = vld [vmem:[%s3795_s0 + $0x1e0] sm:$0xff]  ;;  %v76_v11 = vld [vmem:[%s3795_s0 + $0x1e8] sm:$0xff]  ;;  %v2927_v12 = vpack.c.bf16 %v74_v7, %v73_v6  ;;  %v77_v14 = vld [vmem:[%s3795_s0 + $0x1f0] sm:$0xff] }
  0x1e   :  { %v2929_v13 = vpack.c.bf16 %v76_v11, %v75_v8  ;;  %v78_v17 = vld [vmem:[%s3795_s0 + $0x1f8] sm:$0xff] }
  0x1f   :  { %v2945_v18 = vpack.c.bf16 %v78_v17, %v77_v14 }
  0x20   :  { %2208 = vmatmul.mubr.msk.bf16.gmra.mrb[8].mxu0 %vm127_vm0, %v2639_v55 }
  0x21   :  { %2278 = vmatmul.mubr.msk.bf16.gmra.mrb[8].mxu1 %vm127_vm0, %v2639_v55  ;;  %2211 = vmatprep.mubr.msk.bf16.mxu0 %vm127_vm0, %v2641_v56 }
  0x22   :  { %2281 = vmatprep.mubr.msk.bf16.mxu1 %vm127_vm0, %v2641_v56 }
  0x28   :  { %2212 = vmatmul.mubr.msk.bf16.gmra.mrb[12].mxu0 %vm127_vm0, %v2663_v61 }
  0x29   :  { %2282 = vmatmul.mubr.msk.bf16.gmra.mrb[12].mxu1 %vm127_vm0, %v2663_v61  ;;  %2215 = vmatprep.mubr.msk.bf16.mxu0 %vm127_vm0, %v2665_v62 }
  0x2a   :  { %2285 = vmatprep.mubr.msk.bf16.mxu1 %vm127_vm0, %v2665_v62 }
  0x30   :  { %2216 = vmatmul.mubr.msk.bf16.gmra.mrb[16].mxu0 %vm127_vm0, %v2687_v3 }
  0x31   :  { %2286 = vmatmul.mubr.msk.bf16.gmra.mrb[16].mxu1 %vm127_vm0, %v2687_v3  ;;  %2219 = vmatprep.mubr.msk.bf16.mxu0 %vm127_vm0, %v2689_v4 }
  0x32   :  { %2289 = vmatprep.mubr.msk.bf16.mxu1 %vm127_vm0, %v2689_v4 }
  0x38   :  { %2220 = vmatmul.mubr.msk.bf16.gmra.mrb[20].mxu0 %vm127_vm0, %v2711_v9 }
  0x39   :  { %2290 = vmatmul.mubr.msk.bf16.gmra.mrb[20].mxu1 %vm127_vm0, %v2711_v9  ;;  %2223 = vmatprep.mubr.msk.bf16.mxu0 %vm127_vm0, %v2713_v10 }
  0x3a   :  { %2293 = vmatprep.mubr.msk.bf16.mxu1 %vm127_vm0, %v2713_v10 }
  0x40   :  { %2224 = vmatmul.mubr.msk.bf16.gmra.mrb[24].mxu0 %vm127_vm0, %v2735_v15 }
  0x41   :  { %2294 = vmatmul.mubr.msk.bf16.gmra.mrb[24].mxu1 %vm127_vm0, %v2735_v15  ;;  %2227 = vmatprep.mubr.msk.bf16.mxu0 %vm127_vm0, %v2737_v16 }
  0x42   :  { %2297 = vmatprep.mubr.msk.bf16.mxu1 %vm127_vm0, %v2737_v16 }
  0x48   :  { %2228 = vmatmul.mubr.msk.bf16.gmra.mrb[28].mxu0 %vm127_vm0, %v2759_v22 }
  0x49   :  { %2298 = vmatmul.mubr.msk.bf16.gmra.mrb[28].mxu1 %vm127_vm0, %v2759_v22  ;;  %2231 = vmatprep.mubr.msk.bf16.mxu0 %vm127_vm0, %v2761_v23 }
  0x4a   :  { %2301 = vmatprep.mubr.msk.bf16.mxu1 %vm127_vm0, %v2761_v23 }
  0x50   :  { %2232 = vmatmul.mubr.msk.bf16.gmra.mrb[32].mxu0 %vm127_vm0, %v2783_v28 }
  0x51   :  { %2302 = vmatmul.mubr.msk.bf16.gmra.mrb[32].mxu1 %vm127_vm0, %v2783_v28  ;;  %2235 = vmatprep.mubr.msk.bf16.mxu0 %vm127_vm0, %v2785_v29 }
  0x52   :  { %2305 = vmatprep.mubr.msk.bf16.mxu1 %vm127_vm0, %v2785_v29 }
  0x58   :  { %2236 = vmatmul.mubr.msk.bf16.gmra.mrb[36].mxu0 %vm127_vm0, %v2807_v36 }
  0x59   :  { %2306 = vmatmul.mubr.msk.bf16.gmra.mrb[36].mxu1 %vm127_vm0, %v2807_v36  ;;  %2239 = vmatprep.mubr.msk.bf16.mxu0 %vm127_vm0, %v2809_v37 }
  0x5a   :  { %2309 = vmatprep.mubr.msk.bf16.mxu1 %vm127_vm0, %v2809_v37 }
  0x60   :  { %2240 = vmatmul.mubr.msk.bf16.gmra.mrb[40].mxu0 %vm127_vm0, %v2831_v42 }
  0x61   :  { %2310 = vmatmul.mubr.msk.bf16.gmra.mrb[40].mxu1 %vm127_vm0, %v2831_v42  ;;  %2243 = vmatprep.mubr.msk.bf16.mxu0 %vm127_vm0, %v2833_v45 }
  0x62   :  { %2313 = vmatprep.mubr.msk.bf16.mxu1 %vm127_vm0, %v2833_v45 }
  0x68   :  { %2244 = vmatmul.mubr.msk.bf16.gmra.mrb[44].mxu0 %vm127_vm0, %v2855_v50 }
  0x69   :  { %2314 = vmatmul.mubr.msk.bf16.gmra.mrb[44].mxu1 %vm127_vm0, %v2855_v50  ;;  %2247 = vmatprep.mubr.msk.bf16.mxu0 %vm127_vm0, %v2857_v51 }
  0x6a   :  { %2317 = vmatprep.mubr.msk.bf16.mxu1 %vm127_vm0, %v2857_v51 }
  0x70   :  { %2248 = vmatmul.mubr.msk.bf16.gmra.mrb[48].mxu0 %vm127_vm0, %v2879_v58 }
  0x71   :  { %2318 = vmatmul.mubr.msk.bf16.gmra.mrb[48].mxu1 %vm127_vm0, %v2879_v58  ;;  %2251 = vmatprep.mubr.msk.bf16.mxu0 %vm127_vm0, %v2881_v59 }
  0x72   :  { %2321 = vmatprep.mubr.msk.bf16.mxu1 %vm127_vm0, %v2881_v59 }
  0x78   :  { %2252 = vmatmul.mubr.msk.bf16.gmra.mrb[52].mxu0 %vm127_vm0, %v2903_v2 }
  0x79   :  { %2322 = vmatmul.mubr.msk.bf16.gmra.mrb[52].mxu1 %vm127_vm0, %v2903_v2  ;;  %2255 = vmatprep.mubr.msk.bf16.mxu0 %vm127_vm0, %v2905_v5 }
  0x7a   :  { %2325 = vmatprep.mubr.msk.bf16.mxu1 %vm127_vm0, %v2905_v5 }
  0x80   :  { %2256 = vmatmul.mubr.msk.bf16.gmra.mrb[56].mxu0 %vm127_vm0, %v2927_v12 }
  0x81   :  { %2326 = vmatmul.mubr.msk.bf16.gmra.mrb[56].mxu1 %vm127_vm0, %v2927_v12  ;;  %2259 = vmatprep.mubr.msk.bf16.mxu0 %vm127_vm0, %v2929_v13 }
  0x82   :  { %2329 = vmatprep.mubr.msk.bf16.mxu1 %vm127_vm0, %v2929_v13 }
  0x88   :  { %2260 = vmatmul.mubr.msk.bf16.gmra.mrb[60].mxu0 %vm127_vm0, %v2945_v18 }
  0x89   :  { %2330 = vmatmul.mubr.msk.bf16.gmra.mrb[60].mxu1 %vm127_vm0, %v2945_v18  ;;  %2339 = vmatprep.mubr.msk.bf16.mxu0 %vm127_vm0, %v2537_v19 }
  0x8a   :  { %2409 = vmatprep.mubr.msk.bf16.mxu1 %vm127_vm0, %v2537_v19  ;;  %v3042_v19 = vld [vmem:[%s3796_s2] ss:$0 sm:$0xff] }
  0x90   :  { %2340 = vmatmul.mubr.msk.bf16.vlgmr.msra.gmra.mrb[64].mxu0 %vm127_vm0, %v2567_v31 }
  0x91   :  { %2410 = vmatmul.mubr.msk.bf16.vlgmr.msra.gmra.mrb[64].mxu1 %vm127_vm0, %v2567_v31  ;;  %2343 = vmatprep.mubr.msk.bf16.mxu0 %vm127_vm0, %v2569_v32 }
  0x92   :  { %2413 = vmatprep.mubr.msk.bf16.mxu1 %vm127_vm0, %v2569_v32 }
  0x98   :  { %2344 = vmatmul.mubr.msk.bf16.gmra.mrb[68].mxu0 %vm127_vm0, %v2603_v43 }
  0x99   :  { %2414 = vmatmul.mubr.msk.bf16.gmra.mrb[68].mxu1 %vm127_vm0, %v2603_v43  ;;  %2347 = vmatprep.mubr.msk.bf16.mxu0 %vm127_vm0, %v2605_v44 }
  0x9a   :  { %2417 = vmatprep.mubr.msk.bf16.mxu1 %vm127_vm0, %v2605_v44 }
  0xa0   :  { %2348 = vmatmul.mubr.msk.bf16.gmra.mrb[72].mxu0 %vm127_vm0, %v2639_v55 }
  0xa1   :  { %2418 = vmatmul.mubr.msk.bf16.gmra.mrb[72].mxu1 %vm127_vm0, %v2639_v55  ;;  %2351 = vmatprep.mubr.msk.bf16.mxu0 %vm127_vm0, %v2641_v56 }
  0xa2   :  { %2421 = vmatprep.mubr.msk.bf16.mxu1 %vm127_vm0, %v2641_v56 }
  0xa8   :  { %2352 = vmatmul.mubr.msk.bf16.gmra.mrb[76].mxu0 %vm127_vm0, %v2663_v61 }
  0xa9   :  { %2422 = vmatmul.mubr.msk.bf16.gmra.mrb[76].mxu1 %vm127_vm0, %v2663_v61  ;;  %2355 = vmatprep.mubr.msk.bf16.mxu0 %vm127_vm0, %v2665_v62 }
  0xaa   :  { %2425 = vmatprep.mubr.msk.bf16.mxu1 %vm127_vm0, %v2665_v62 }
  0xb0   :  { %2356 = vmatmul.mubr.msk.bf16.gmra.mrb[80].mxu0 %vm127_vm0, %v2687_v3 }
  0xb1   :  { %2426 = vmatmul.mubr.msk.bf16.gmra.mrb[80].mxu1 %vm127_vm0, %v2687_v3  ;;  %2359 = vmatprep.mubr.msk.bf16.mxu0 %vm127_vm0, %v2689_v4 }
  0xb2   :  { %2429 = vmatprep.mubr.msk.bf16.mxu1 %vm127_vm0, %v2689_v4 }
  0xb8   :  { %2360 = vmatmul.mubr.msk.bf16.gmra.mrb[84].mxu0 %vm127_vm0, %v2711_v9 }
  0xb9   :  { %2430 = vmatmul.mubr.msk.bf16.gmra.mrb[84].mxu1 %vm127_vm0, %v2711_v9  ;;  %2363 = vmatprep.mubr.msk.bf16.mxu0 %vm127_vm0, %v2713_v10 }
  0xba   :  { %2433 = vmatprep.mubr.msk.bf16.mxu1 %vm127_vm0, %v2713_v10 }
  0xc0   :  { %2364 = vmatmul.mubr.msk.bf16.gmra.mrb[88].mxu0 %vm127_vm0, %v2735_v15 }
  0xc1   :  { %2434 = vmatmul.mubr.msk.bf16.gmra.mrb[88].mxu1 %vm127_vm0, %v2735_v15  ;;  %2367 = vmatprep.mubr.msk.bf16.mxu0 %vm127_vm0, %v2737_v16 }
  0xc2   :  { %2437 = vmatprep.mubr.msk.bf16.mxu1 %vm127_vm0, %v2737_v16 }
  0xc8   :  { %2368 = vmatmul.mubr.msk.bf16.gmra.mrb[92].mxu0 %vm127_vm0, %v2759_v22 }
  0xc9   :  { %2438 = vmatmul.mubr.msk.bf16.gmra.mrb[92].mxu1 %vm127_vm0, %v2759_v22  ;;  %2371 = vmatprep.mubr.msk.bf16.mxu0 %vm127_vm0, %v2761_v23 }
  0xca   :  { %2441 = vmatprep.mubr.msk.bf16.mxu1 %vm127_vm0, %v2761_v23 }
  0xd0   :  { %2372 = vmatmul.mubr.msk.bf16.gmra.mrb[96].mxu0 %vm127_vm0, %v2783_v28 }
  0xd1   :  { %2442 = vmatmul.mubr.msk.bf16.gmra.mrb[96].mxu1 %vm127_vm0, %v2783_v28  ;;  %2375 = vmatprep.mubr.msk.bf16.mxu0 %vm127_vm0, %v2785_v29 }
  0xd2   :  { %2445 = vmatprep.mubr.msk.bf16.mxu1 %vm127_vm0, %v2785_v29 }
  0xd8   :  { %2376 = vmatmul.mubr.msk.bf16.gmra.mrb[100].mxu0 %vm127_vm0, %v2807_v36 }
  0xd9   :  { %2446 = vmatmul.mubr.msk.bf16.gmra.mrb[100].mxu1 %vm127_vm0, %v2807_v36  ;;  %2379 = vmatprep.mubr.msk.bf16.mxu0 %vm127_vm0, %v2809_v37 }
  0xda   :  { %2449 = vmatprep.mubr.msk.bf16.mxu1 %vm127_vm0, %v2809_v37 }
  0xe0   :  { %2380 = vmatmul.mubr.msk.bf16.gmra.mrb[104].mxu0 %vm127_vm0, %v2831_v42 }
  0xe1   :  { %2450 = vmatmul.mubr.msk.bf16.gmra.mrb[104].mxu1 %vm127_vm0, %v2831_v42  ;;  %2383 = vmatprep.mubr.msk.bf16.mxu0 %vm127_vm0, %v2833_v45 }
  0xe2   :  { %2453 = vmatprep.mubr.msk.bf16.mxu1 %vm127_vm0, %v2833_v45 }
  0xe3   :  { %v2201_v31 = vpop.f32.mrb[0].mxu0 }
  0xe4   :  { %v267_v32 = vadd.f32 %v2201_v31, %v3042_v19  ;;  %v2271_v43 = vpop.f32.mrb[0].mxu1  ;;  %v258_v44 = vpop.f32.mrb[1].mxu0 }
  0xe5   :  { %v629_v55 = vadd.f32 %v2271_v43, %v3042_v19  ;;  %v259_v56 = vadd.f32 %v3042_v19, %v258_v44  ;;  %v620_v61 = vpop.f32.mrb[1].mxu1  ;;  %v2202_v62 = vpop.f32.mrb[2].mxu0 }
  0xe6   :  { %v515_v3 = vmax.f32 %v267_v32, 0.0  ;;  %v621_v4 = vadd.f32 %v3042_v19, %v620_v61  ;;  %v270_v9 = vadd.f32 %v2202_v62, %v3042_v19  ;;  %v2272_v10 = vpop.f32.mrb[2].mxu1  ;;  %v261_v15 = vpop.f32.mrb[3].mxu0 }
  0xe7   :  { %v877_v16 = vmax.f32 %v629_v55, 0.0  ;;  %v513_v20 = vmax.f32 %v259_v56, 0.0  ;;  %v632_v21 = vadd.f32 %v2272_v10, %v3042_v19  ;;  %v262_v22 = vadd.f32 %v3042_v19, %v261_v15  ;;  %v623_v23 = vpop.f32.mrb[3].mxu1 }
  0xe8   :  { %v875_v24 = vmax.f32 %v621_v4, 0.0  ;;  %v516_v25 = vmax.f32 %v270_v9, 0.0  ;;  %v624_v26 = vadd.f32 %v3042_v19, %v623_v23  ;;  %2384 = vmatmul.mubr.msk.bf16.gmra.mrb[108].mxu0 %vm127_vm0, %v2855_v50 }
  0xe9   :  { %v3058_v27 = vmax.f32 %v515_v3, %v877_v16  ;;  %v878_v28 = vmax.f32 %v632_v21, 0.0  ;;  %v514_v29 = vmax.f32 %v262_v22, 0.0  ;;  %2454 = vmatmul.mubr.msk.bf16.gmra.mrb[108].mxu1 %vm127_vm0, %v2855_v50  ;;  %2387 = vmatprep.mubr.msk.bf16.mxu0 %vm127_vm0, %v2857_v51 }
  0xea   :  { %v3064_v30 = vmax.f32 %v513_v20, %v875_v24  ;;  %v876_v33 = vmax.f32 %v624_v26, 0.0  ;;  %2457 = vmatprep.mubr.msk.bf16.mxu1 %vm127_vm0, %v2857_v51 }
  0xeb   :  { %v3068_v34 = vmax.f32 %v516_v25, %v878_v28  ;;  %v2205_v35 = vpop.f32.mrb[4].mxu0 }
  0xec   :  { %v3070_v36 = vmax.f32 %v514_v29, %v876_v33  ;;  %v283_v37 = vadd.f32 %v2205_v35, %v3042_v19  ;;  %v2275_v38 = vpop.f32.mrb[4].mxu1  ;;  %v274_v39 = vpop.f32.mrb[5].mxu0 }
  0xed   :  { %v645_v40 = vadd.f32 %v2275_v38, %v3042_v19  ;;  %v275_v41 = vadd.f32 %v3042_v19, %v274_v39  ;;  %v636_v42 = vpop.f32.mrb[5].mxu1  ;;  %v2206_v45 = vpop.f32.mrb[6].mxu0 }
  0xee   :  { %v519_v46 = vmax.f32 %v283_v37, 0.0  ;;  %v637_v47 = vadd.f32 %v3042_v19, %v636_v42  ;;  %v286_v48 = vadd.f32 %v2206_v45, %v3042_v19  ;;  %v2276_v49 = vpop.f32.mrb[6].mxu1  ;;  %v277_v50 = vpop.f32.mrb[7].mxu0 }
  0xef   :  { %v881_v51 = vmax.f32 %v645_v40, 0.0  ;;  %v517_v52 = vmax.f32 %v275_v41, 0.0  ;;  %v648_v53 = vadd.f32 %v2276_v49, %v3042_v19  ;;  %v278_v54 = vadd.f32 %v3042_v19, %v277_v50  ;;  %v639_v57 = vpop.f32.mrb[7].mxu1 }
  0xf0   :  { %v879_v60 = vmax.f32 %v637_v47, 0.0  ;;  %v520_v63 = vmax.f32 %v286_v48, 0.0  ;;  %v640_v0 = vadd.f32 %v3042_v19, %v639_v57  ;;  %2388 = vmatmul.mubr.msk.bf16.gmra.mrb[112].mxu0 %vm127_vm0, %v2879_v58 }
  0xf1   :  { %v3082_v1 = vmax.f32 %v519_v46, %v881_v51  ;;  %v882_v6 = vmax.f32 %v648_v53, 0.0  ;;  %v518_v7 = vmax.f32 %v278_v54, 0.0  ;;  %2458 = vmatmul.mubr.msk.bf16.gmra.mrb[112].mxu1 %vm127_vm0, %v2879_v58  ;;  %2391 = vmatprep.mubr.msk.bf16.mxu0 %vm127_vm0, %v2881_v59 }
  0xf2   :  { %v3088_v8 = vmax.f32 %v517_v52, %v879_v60  ;;  %v880_v11 = vmax.f32 %v640_v0, 0.0  ;;  %2461 = vmatprep.mubr.msk.bf16.mxu1 %vm127_vm0, %v2881_v59 }
  0xf3   :  { %v3092_v14 = vmax.f32 %v520_v63, %v882_v6  ;;  %v2209_v17 = vpop.f32.mrb[8].mxu0 }
  0xf4   :  { %v3094_v31 = vmax.f32 %v518_v7, %v880_v11  ;;  %v299_v32 = vadd.f32 %v2209_v17, %v3042_v19  ;;  %v2279_v43 = vpop.f32.mrb[8].mxu1  ;;  %v290_v44 = vpop.f32.mrb[9].mxu0 }
  0xf5   :  { %v661_v58 = vadd.f32 %v2279_v43, %v3042_v19  ;;  %v291_v55 = vadd.f32 %v3042_v19, %v290_v44  ;;  %v652_v56 = vpop.f32.mrb[9].mxu1  ;;  %v2210_v61 = vpop.f32.mrb[10].mxu0 }
  0xf6   :  { %v523_v62 = vmax.f32 %v299_v32, 0.0  ;;  %v653_v3 = vadd.f32 %v3042_v19, %v652_v56  ;;  %v302_v59 = vadd.f32 %v2210_v61, %v3042_v19  ;;  %v2280_v4 = vpop.f32.mrb[10].mxu1  ;;  %v293_v9 = vpop.f32.mrb[11].mxu0 }
  0xf7   :  { %v885_v10 = vmax.f32 %v661_v58, 0.0  ;;  %v521_v15 = vmax.f32 %v291_v55, 0.0  ;;  %v664_v16 = vadd.f32 %v2280_v4, %v3042_v19  ;;  %v294_v20 = vadd.f32 %v3042_v19, %v293_v9  ;;  %v655_v21 = vpop.f32.mrb[11].mxu1 }
  0xf8   :  { %v883_v22 = vmax.f32 %v653_v3, 0.0  ;;  %v524_v23 = vmax.f32 %v302_v59, 0.0  ;;  %v656_v24 = vadd.f32 %v3042_v19, %v655_v21  ;;  %2392 = vmatmul.mubr.msk.bf16.gmra.mrb[116].mxu0 %vm127_vm0, %v2903_v2 }
  0xf9   :  { %v3106_v25 = vmax.f32 %v523_v62, %v885_v10  ;;  %v886_v26 = vmax.f32 %v664_v16, 0.0  ;;  %v522_v28 = vmax.f32 %v294_v20, 0.0  ;;  %2462 = vmatmul.mubr.msk.bf16.gmra.mrb[116].mxu1 %vm127_vm0, %v2903_v2  ;;  %2395 = vmatprep.mubr.msk.bf16.mxu0 %vm127_vm0, %v2905_v5 }
  0xfa   :  { %v3112_v29 = vmax.f32 %v521_v15, %v883_v22  ;;  %v884_v33 = vmax.f32 %v656_v24, 0.0  ;;  %2465 = vmatprep.mubr.msk.bf16.mxu1 %vm127_vm0, %v2905_v5 }
  0xfb   :  { %v3116_v35 = vmax.f32 %v524_v23, %v886_v26  ;;  %v2213_v37 = vpop.f32.mrb[12].mxu0 }
  0xfc   :  { %v3118_v38 = vmax.f32 %v522_v28, %v884_v33  ;;  %v315_v39 = vadd.f32 %v2213_v37, %v3042_v19  ;;  %v2283_v40 = vpop.f32.mrb[12].mxu1  ;;  %v306_v41 = vpop.f32.mrb[13].mxu0 }
  0xfd   :  { %v677_v2 = vadd.f32 %v2283_v40, %v3042_v19  ;;  %v307_v42 = vadd.f32 %v3042_v19, %v306_v41  ;;  %v668_v45 = vpop.f32.mrb[13].mxu1  ;;  %v2214_v46 = vpop.f32.mrb[14].mxu0 }
  0xfe   :  { %v527_v47 = vmax.f32 %v315_v39, 0.0  ;;  %v669_v48 = vadd.f32 %v3042_v19, %v668_v45  ;;  %v318_v5 = vadd.f32 %v2214_v46, %v3042_v19  ;;  %v2284_v49 = vpop.f32.mrb[14].mxu1  ;;  %v309_v50 = vpop.f32.mrb[15].mxu0 }
  0xff   :  { %v889_v51 = vmax.f32 %v677_v2, 0.0  ;;  %v525_v52 = vmax.f32 %v307_v42, 0.0  ;;  %v680_v53 = vadd.f32 %v2284_v49, %v3042_v19  ;;  %v310_v54 = vadd.f32 %v3042_v19, %v309_v50  ;;  %v671_v57 = vpop.f32.mrb[15].mxu1 }
 0x100   :  { %v887_v60 = vmax.f32 %v669_v48, 0.0  ;;  %v528_v63 = vmax.f32 %v318_v5, 0.0  ;;  %v672_v0 = vadd.f32 %v3042_v19, %v671_v57  ;;  %2396 = vmatmul.mubr.msk.bf16.gmra.mrb[120].mxu0 %vm127_vm0, %v2927_v12 }
 0x101   :  { %v3130_v6 = vmax.f32 %v527_v47, %v889_v51  ;;  %v890_v7 = vmax.f32 %v680_v53, 0.0  ;;  %v526_v11 = vmax.f32 %v310_v54, 0.0  ;;  %2466 = vmatmul.mubr.msk.bf16.gmra.mrb[120].mxu1 %vm127_vm0, %v2927_v12  ;;  %2399 = vmatprep.mubr.msk.bf16.mxu0 %vm127_vm0, %v2929_v13 }
 0x102   :  { %v3136_v17 = vmax.f32 %v525_v52, %v887_v60  ;;  %v888_v32 = vmax.f32 %v672_v0, 0.0  ;;  %2469 = vmatprep.mubr.msk.bf16.mxu1 %vm127_vm0, %v2929_v13 }
 0x103   :  { %v3140_v43 = vmax.f32 %v528_v63, %v890_v7  ;;  %v2217_v44 = vpop.f32.mrb[16].mxu0 }
 0x104   :  { %v3142_v58 = vmax.f32 %v526_v11, %v888_v32  ;;  %v331_v55 = vadd.f32 %v2217_v44, %v3042_v19  ;;  %v2287_v56 = vpop.f32.mrb[16].mxu1  ;;  %v322_v61 = vpop.f32.mrb[17].mxu0 }
 0x105   :  { %v693_v12 = vadd.f32 %v2287_v56, %v3042_v19  ;;  %v323_v62 = vadd.f32 %v3042_v19, %v322_v61  ;;  %v684_v3 = vpop.f32.mrb[17].mxu1  ;;  %v2218_v59 = vpop.f32.mrb[18].mxu0 }
 0x106   :  { %v531_v4 = vmax.f32 %v331_v55, 0.0  ;;  %v685_v9 = vadd.f32 %v3042_v19, %v684_v3  ;;  %v334_v13 = vadd.f32 %v2218_v59, %v3042_v19  ;;  %v2288_v10 = vpop.f32.mrb[18].mxu1  ;;  %v325_v15 = vpop.f32.mrb[19].mxu0 }
 0x107   :  { %v893_v16 = vmax.f32 %v693_v12, 0.0  ;;  %v529_v20 = vmax.f32 %v323_v62, 0.0  ;;  %v696_v21 = vadd.f32 %v2288_v10, %v3042_v19  ;;  %v326_v22 = vadd.f32 %v3042_v19, %v325_v15  ;;  %v687_v23 = vpop.f32.mrb[19].mxu1 }
 0x108   :  { %v891_v24 = vmax.f32 %v685_v9, 0.0  ;;  %v532_v26 = vmax.f32 %v334_v13, 0.0  ;;  %v688_v28 = vadd.f32 %v3042_v19, %v687_v23  ;;  %2400 = vmatmul.mubr.msk.bf16.gmra.mrb[124].mxu0 %vm127_vm0, %v2945_v18 }
 0x109   :  { %v3154_v33 = vmax.f32 %v531_v4, %v893_v16  ;;  %v894_v37 = vmax.f32 %v696_v21, 0.0  ;;  %v530_v39 = vmax.f32 %v326_v22, 0.0  ;;  %2470 = vmatmul.mubr.msk.bf16.gmra.mrb[124].mxu1 %vm127_vm0, %v2945_v18 }
 0x10a   :  { %v3158_v40 = vmax.f32 %v529_v20, %v891_v24  ;;  %v892_v41 = vmax.f32 %v688_v28, 0.0 }
 0x10b   :  { %v3160_v2 = vmax.f32 %v532_v26, %v894_v37  ;;  %v2221_v42 = vpop.f32.mrb[20].mxu0 }
 0x10c   :  { %v3162_v45 = vmax.f32 %v530_v39, %v892_v41  ;;  %v347_v46 = vadd.f32 %v2221_v42, %v3042_v19  ;;  %v2291_v47 = vpop.f32.mrb[20].mxu1  ;;  %v338_v48 = vpop.f32.mrb[21].mxu0 }
 0x10d   :  { %v709_v5 = vadd.f32 %v2291_v47, %v3042_v19  ;;  %v339_v49 = vadd.f32 %v3042_v19, %v338_v48  ;;  %v700_v50 = vpop.f32.mrb[21].mxu1  ;;  %v2222_v51 = vpop.f32.mrb[22].mxu0 }
 0x10e   :  { %v535_v52 = vmax.f32 %v347_v46, 0.0  ;;  %v701_v18 = vadd.f32 %v3042_v19, %v700_v50  ;;  %v350_v53 = vadd.f32 %v2222_v51, %v3042_v19  ;;  %v2292_v54 = vpop.f32.mrb[22].mxu1  ;;  %v341_v57 = vpop.f32.mrb[23].mxu0 }
 0x10f   :  { %v897_v60 = vmax.f32 %v709_v5, 0.0  ;;  %v533_v63 = vmax.f32 %v339_v49, 0.0  ;;  %v712_v0 = vadd.f32 %v2292_v54, %v3042_v19  ;;  %v342_v7 = vadd.f32 %v3042_v19, %v341_v57  ;;  %v703_v11 = vpop.f32.mrb[23].mxu1 }
 0x110   :  { %v895_v32 = vmax.f32 %v701_v18, 0.0  ;;  %v536_v44 = vmax.f32 %v350_v53, 0.0  ;;  %v704_v55 = vadd.f32 %v3042_v19, %v703_v11 }
 0x111   :  { %v3172_v56 = vmax.f32 %v535_v52, %v897_v60  ;;  %v898_v61 = vmax.f32 %v712_v0, 0.0  ;;  %v534_v12 = vmax.f32 %v342_v7, 0.0 }
 0x112   :  { %v3174_v62 = vmax.f32 %v533_v63, %v895_v32  ;;  %v896_v3 = vmax.f32 %v704_v55, 0.0 }
 0x113   :  { %v3176_v59 = vmax.f32 %v536_v44, %v898_v61  ;;  %v2225_v4 = vpop.f32.mrb[24].mxu0 }
 0x114   :  { %v3178_v9 = vmax.f32 %v534_v12, %v896_v3  ;;  %v363_v13 = vadd.f32 %v2225_v4, %v3042_v19  ;;  %v2295_v10 = vpop.f32.mrb[24].mxu1  ;;  %v354_v15 = vpop.f32.mrb[25].mxu0 }
 0x115   :  { %v725_v16 = vadd.f32 %v2295_v10, %v3042_v19  ;;  %v355_v20 = vadd.f32 %v3042_v19, %v354_v15  ;;  %v716_v21 = vpop.f32.mrb[25].mxu1  ;;  %v2226_v22 = vpop.f32.mrb[26].mxu0 }
 0x116   :  { %v539_v23 = vmax.f32 %v363_v13, 0.0  ;;  %v717_v24 = vadd.f32 %v3042_v19, %v716_v21  ;;  %v366_v26 = vadd.f32 %v2226_v22, %v3042_v19  ;;  %v2296_v28 = vpop.f32.mrb[26].mxu1  ;;  %v357_v37 = vpop.f32.mrb[27].mxu0 }
 0x117   :  { %v901_v39 = vmax.f32 %v725_v16, 0.0  ;;  %v537_v41 = vmax.f32 %v355_v20, 0.0  ;;  %v728_v42 = vadd.f32 %v2296_v28, %v3042_v19  ;;  %v358_v46 = vadd.f32 %v3042_v19, %v357_v37  ;;  %v719_v47 = vpop.f32.mrb[27].mxu1 }
 0x118   :  { %v899_v48 = vmax.f32 %v717_v24, 0.0  ;;  %v540_v5 = vmax.f32 %v366_v26, 0.0  ;;  %v720_v49 = vadd.f32 %v3042_v19, %v719_v47 }
 0x119   :  { %v3188_v50 = vmax.f32 %v539_v23, %v901_v39  ;;  %v902_v51 = vmax.f32 %v728_v42, 0.0  ;;  %v538_v52 = vmax.f32 %v358_v46, 0.0 }
 0x11a   :  { %v3190_v18 = vmax.f32 %v537_v41, %v899_v48  ;;  %v900_v53 = vmax.f32 %v720_v49, 0.0 }
 0x11b   :  { %v3192_v54 = vmax.f32 %v540_v5, %v902_v51  ;;  %v2229_v57 = vpop.f32.mrb[28].mxu0 }
 0x11c   :  { %v3194_v60 = vmax.f32 %v538_v52, %v900_v53  ;;  %v379_v63 = vadd.f32 %v2229_v57, %v3042_v19  ;;  %v2299_v0 = vpop.f32.mrb[28].mxu1  ;;  %v370_v7 = vpop.f32.mrb[29].mxu0 }
 0x11d   :  { %v741_v11 = vadd.f32 %v2299_v0, %v3042_v19  ;;  %v371_v32 = vadd.f32 %v3042_v19, %v370_v7  ;;  %v732_v44 = vpop.f32.mrb[29].mxu1  ;;  %v2230_v55 = vpop.f32.mrb[30].mxu0 }
 0x11e   :  { %v543_v61 = vmax.f32 %v379_v63, 0.0  ;;  %v733_v12 = vadd.f32 %v3042_v19, %v732_v44  ;;  %v382_v3 = vadd.f32 %v2230_v55, %v3042_v19  ;;  %v2300_v4 = vpop.f32.mrb[30].mxu1  ;;  %v373_v13 = vpop.f32.mrb[31].mxu0 }
 0x11f   :  { %v905_v10 = vmax.f32 %v741_v11, 0.0  ;;  %v541_v15 = vmax.f32 %v371_v32, 0.0  ;;  %v744_v16 = vadd.f32 %v2300_v4, %v3042_v19  ;;  %v374_v20 = vadd.f32 %v3042_v19, %v373_v13  ;;  %v735_v21 = vpop.f32.mrb[31].mxu1 }
 0x120   :  { %v903_v22 = vmax.f32 %v733_v12, 0.0  ;;  %v544_v23 = vmax.f32 %v382_v3, 0.0  ;;  %v736_v24 = vadd.f32 %v3042_v19, %v735_v21 }
 0x121   :  { %v3204_v26 = vmax.f32 %v543_v61, %v905_v10  ;;  %v906_v28 = vmax.f32 %v744_v16, 0.0  ;;  %v542_v37 = vmax.f32 %v374_v20, 0.0 }
 0x122   :  { %v3206_v39 = vmax.f32 %v541_v15, %v903_v22  ;;  %v904_v41 = vmax.f32 %v736_v24, 0.0 }
 0x123   :  { %v3208_v42 = vmax.f32 %v544_v23, %v906_v28  ;;  %v2233_v46 = vpop.f32.mrb[32].mxu0 }
 0x124   :  { %v3210_v47 = vmax.f32 %v542_v37, %v904_v41  ;;  %v395_v48 = vadd.f32 %v2233_v46, %v3042_v19  ;;  %v2303_v5 = vpop.f32.mrb[32].mxu1  ;;  %v386_v49 = vpop.f32.mrb[33].mxu0 }
 0x125   :  { %v757_v51 = vadd.f32 %v2303_v5, %v3042_v19  ;;  %v387_v52 = vadd.f32 %v3042_v19, %v386_v49  ;;  %v748_v53 = vpop.f32.mrb[33].mxu1  ;;  %v2234_v57 = vpop.f32.mrb[34].mxu0 }
 0x126   :  { %v547_v63 = vmax.f32 %v395_v48, 0.0  ;;  %v749_v0 = vadd.f32 %v3042_v19, %v748_v53  ;;  %v398_v7 = vadd.f32 %v2234_v57, %v3042_v19  ;;  %v2304_v11 = vpop.f32.mrb[34].mxu1  ;;  %v389_v32 = vpop.f32.mrb[35].mxu0 }
 0x127   :  { %v909_v44 = vmax.f32 %v757_v51, 0.0  ;;  %v545_v55 = vmax.f32 %v387_v52, 0.0  ;;  %v760_v61 = vadd.f32 %v2304_v11, %v3042_v19  ;;  %v390_v12 = vadd.f32 %v3042_v19, %v389_v32  ;;  %v751_v3 = vpop.f32.mrb[35].mxu1 }
 0x128   :  { %v907_v4 = vmax.f32 %v749_v0, 0.0  ;;  %v548_v13 = vmax.f32 %v398_v7, 0.0  ;;  %v752_v10 = vadd.f32 %v3042_v19, %v751_v3 }
 0x129   :  { %v3220_v15 = vmax.f32 %v547_v63, %v909_v44  ;;  %v910_v16 = vmax.f32 %v760_v61, 0.0  ;;  %v546_v20 = vmax.f32 %v390_v12, 0.0 }
 0x12a   :  { %v3222_v21 = vmax.f32 %v545_v55, %v907_v4  ;;  %v908_v22 = vmax.f32 %v752_v10, 0.0 }
 0x12b   :  { %v3224_v23 = vmax.f32 %v548_v13, %v910_v16  ;;  %v2237_v24 = vpop.f32.mrb[36].mxu0 }
 0x12c   :  { %v3226_v28 = vmax.f32 %v546_v20, %v908_v22  ;;  %v411_v37 = vadd.f32 %v2237_v24, %v3042_v19  ;;  %v2307_v41 = vpop.f32.mrb[36].mxu1  ;;  %v402_v46 = vpop.f32.mrb[37].mxu0 }
 0x12d   :  { %v773_v48 = vadd.f32 %v2307_v41, %v3042_v19  ;;  %v403_v5 = vadd.f32 %v3042_v19, %v402_v46  ;;  %v764_v49 = vpop.f32.mrb[37].mxu1  ;;  %v2238_v51 = vpop.f32.mrb[38].mxu0 }
 0x12e   :  { %v551_v52 = vmax.f32 %v411_v37, 0.0  ;;  %v765_v53 = vadd.f32 %v3042_v19, %v764_v49  ;;  %v414_v57 = vadd.f32 %v2238_v51, %v3042_v19  ;;  %v2308_v63 = vpop.f32.mrb[38].mxu1  ;;  %v405_v0 = vpop.f32.mrb[39].mxu0 }
 0x12f   :  { %v913_v7 = vmax.f32 %v773_v48, 0.0  ;;  %v549_v11 = vmax.f32 %v403_v5, 0.0  ;;  %v776_v32 = vadd.f32 %v2308_v63, %v3042_v19  ;;  %v406_v44 = vadd.f32 %v3042_v19, %v405_v0  ;;  %v767_v55 = vpop.f32.mrb[39].mxu1 }
 0x130   :  { %v911_v61 = vmax.f32 %v765_v53, 0.0  ;;  %v552_v12 = vmax.f32 %v414_v57, 0.0  ;;  %v768_v3 = vadd.f32 %v3042_v19, %v767_v55 }
 0x131   :  { %v3236_v4 = vmax.f32 %v551_v52, %v913_v7  ;;  %v914_v13 = vmax.f32 %v776_v32, 0.0  ;;  %v550_v10 = vmax.f32 %v406_v44, 0.0 }
 0x132   :  { %v3238_v16 = vmax.f32 %v549_v11, %v911_v61  ;;  %v912_v20 = vmax.f32 %v768_v3, 0.0 }
 0x133   :  { %v3240_v22 = vmax.f32 %v552_v12, %v914_v13  ;;  %v2241_v24 = vpop.f32.mrb[40].mxu0 }
 0x134   :  { %v3242_v37 = vmax.f32 %v550_v10, %v912_v20  ;;  %v427_v41 = vadd.f32 %v2241_v24, %v3042_v19  ;;  %v2311_v46 = vpop.f32.mrb[40].mxu1  ;;  %v418_v48 = vpop.f32.mrb[41].mxu0 }
 0x135   :  { %v789_v5 = vadd.f32 %v2311_v46, %v3042_v19  ;;  %v419_v49 = vadd.f32 %v3042_v19, %v418_v48  ;;  %v780_v51 = vpop.f32.mrb[41].mxu1  ;;  %v2242_v52 = vpop.f32.mrb[42].mxu0 }
 0x136   :  { %v555_v53 = vmax.f32 %v427_v41, 0.0  ;;  %v781_v57 = vadd.f32 %v3042_v19, %v780_v51  ;;  %v430_v63 = vadd.f32 %v2242_v52, %v3042_v19  ;;  %v2312_v0 = vpop.f32.mrb[42].mxu1  ;;  %v421_v7 = vpop.f32.mrb[43].mxu0 }
 0x137   :  { %v917_v11 = vmax.f32 %v789_v5, 0.0  ;;  %v553_v32 = vmax.f32 %v419_v49, 0.0  ;;  %v792_v44 = vadd.f32 %v2312_v0, %v3042_v19  ;;  %v422_v55 = vadd.f32 %v3042_v19, %v421_v7  ;;  %v783_v61 = vpop.f32.mrb[43].mxu1 }
 0x138   :  { %v915_v12 = vmax.f32 %v781_v57, 0.0  ;;  %v556_v3 = vmax.f32 %v430_v63, 0.0  ;;  %v784_v13 = vadd.f32 %v3042_v19, %v783_v61 }
 0x139   :  { %v3252_v10 = vmax.f32 %v555_v53, %v917_v11  ;;  %v918_v20 = vmax.f32 %v792_v44, 0.0  ;;  %v554_v24 = vmax.f32 %v422_v55, 0.0 }
 0x13a   :  { %v3254_v41 = vmax.f32 %v553_v32, %v915_v12  ;;  %v916_v46 = vmax.f32 %v784_v13, 0.0 }
 0x13b   :  { %v3256_v48 = vmax.f32 %v556_v3, %v918_v20  ;;  %v2245_v5 = vpop.f32.mrb[44].mxu0 }
 0x13c   :  { %3798 = vst [vmem:[#allocation2_spill] sm:$0xff] %v3254_v41  ;;  %v3258_v49 = vmax.f32 %v554_v24, %v916_v46  ;;  %v443_v51 = vadd.f32 %v2245_v5, %v3042_v19  ;;  %v2315_v52 = vpop.f32.mrb[44].mxu1  ;;  %v434_v0 = vpop.f32.mrb[45].mxu0 }
 0x13d   :  { %3799 = vst [vmem:[#allocation3_spill] sm:$0xff] %v3256_v48  ;;  %v805_v57 = vadd.f32 %v2315_v52, %v3042_v19  ;;  %v435_v63 = vadd.f32 %v3042_v19, %v434_v0  ;;  %v796_v53 = vpop.f32.mrb[45].mxu1  ;;  %v2246_v7 = vpop.f32.mrb[46].mxu0 }
 0x13e   :  { %3800 = vst [vmem:[#allocation4_spill] sm:$0xff] %v3258_v49  ;;  %v559_v11 = vmax.f32 %v443_v51, 0.0  ;;  %v797_v32 = vadd.f32 %v3042_v19, %v796_v53  ;;  %v446_v44 = vadd.f32 %v2246_v7, %v3042_v19  ;;  %v2316_v55 = vpop.f32.mrb[46].mxu1  ;;  %v437_v61 = vpop.f32.mrb[47].mxu0 }
 0x13f   :  { %v921_v12 = vmax.f32 %v805_v57, 0.0  ;;  %v557_v3 = vmax.f32 %v435_v63, 0.0  ;;  %v808_v13 = vadd.f32 %v2316_v55, %v3042_v19  ;;  %v438_v20 = vadd.f32 %v3042_v19, %v437_v61  ;;  %v799_v24 = vpop.f32.mrb[47].mxu1 }
 0x140   :  { %v919_v46 = vmax.f32 %v797_v32, 0.0  ;;  %v560_v5 = vmax.f32 %v446_v44, 0.0  ;;  %v800_v52 = vadd.f32 %v3042_v19, %v799_v24 }
 0x141   :  { %v3268_v0 = vmax.f32 %v559_v11, %v921_v12  ;;  %v922_v51 = vmax.f32 %v808_v13, 0.0  ;;  %v558_v49 = vmax.f32 %v438_v20, 0.0 }
 0x142   :  { %v3270_v53 = vmax.f32 %v557_v3, %v919_v46  ;;  %v920_v7 = vmax.f32 %v800_v52, 0.0 }
 0x143   :  { %3801 = vst [vmem:[#allocation5_spill] sm:$0xff] %v3268_v0  ;;  %v3272_v48 = vmax.f32 %v560_v5, %v922_v51  ;;  %v2249_v57 = vpop.f32.mrb[48].mxu0 }
 0x144   :  { %3802 = vst [vmem:[#allocation6_spill] sm:$0xff] %v3270_v53  ;;  %v3274_v63 = vmax.f32 %v558_v49, %v920_v7  ;;  %v459_v55 = vadd.f32 %v2249_v57, %v3042_v19  ;;  %v2319_v61 = vpop.f32.mrb[48].mxu1  ;;  %v450_v41 = vpop.f32.mrb[49].mxu0 }
 0x145   :  { %3803 = vst [vmem:[#allocation7_spill] sm:$0xff] %v3272_v48  ;;  %v821_v32 = vadd.f32 %v2319_v61, %v3042_v19  ;;  %v451_v44 = vadd.f32 %v3042_v19, %v450_v41  ;;  %v812_v11 = vpop.f32.mrb[49].mxu1  ;;  %v2250_v12 = vpop.f32.mrb[50].mxu0 }
 0x146   :  { %3804 = vst [vmem:[#allocation8_spill] sm:$0xff] %v3274_v63  ;;  %v563_v13 = vmax.f32 %v459_v55, 0.0  ;;  %v813_v3 = vadd.f32 %v3042_v19, %v812_v11  ;;  %v462_v20 = vadd.f32 %v2250_v12, %v3042_v19  ;;  %v2320_v24 = vpop.f32.mrb[50].mxu1  ;;  %v453_v46 = vpop.f32.mrb[51].mxu0 }
 0x147   :  { %v925_v5 = vmax.f32 %v821_v32, 0.0  ;;  %v561_v49 = vmax.f32 %v451_v44, 0.0  ;;  %v824_v52 = vadd.f32 %v2320_v24, %v3042_v19  ;;  %v454_v51 = vadd.f32 %v3042_v19, %v453_v46  ;;  %v815_v7 = vpop.f32.mrb[51].mxu1 }
 0x148   :  { %v923_v57 = vmax.f32 %v813_v3, 0.0  ;;  %v564_v61 = vmax.f32 %v462_v20, 0.0  ;;  %v816_v41 = vadd.f32 %v3042_v19, %v815_v7 }
 0x149   :  { %v3284_v63 = vmax.f32 %v563_v13, %v925_v5  ;;  %v926_v55 = vmax.f32 %v824_v52, 0.0  ;;  %v562_v48 = vmax.f32 %v454_v51, 0.0 }
 0x14a   :  { %v3286_v11 = vmax.f32 %v561_v49, %v923_v57  ;;  %v924_v12 = vmax.f32 %v816_v41, 0.0 }
 0x14b   :  { %3805 = vst [vmem:[#allocation9_spill] sm:$0xff] %v3284_v63  ;;  %v3288_v53 = vmax.f32 %v564_v61, %v926_v55  ;;  %v2253_v32 = vpop.f32.mrb[52].mxu0 }
 0x14c   :  { %3806 = vst [vmem:[#allocation10_spill] sm:$0xff] %v3286_v11  ;;  %v3290_v44 = vmax.f32 %v562_v48, %v924_v12  ;;  %v475_v24 = vadd.f32 %v2253_v32, %v3042_v19  ;;  %v2323_v46 = vpop.f32.mrb[52].mxu1  ;;  %v466_v0 = vpop.f32.mrb[53].mxu0 }
 0x14d   :  { %3807 = vst [vmem:[#allocation11_spill] sm:$0xff] %v3288_v53  ;;  %v837_v3 = vadd.f32 %v2323_v46, %v3042_v19  ;;  %v467_v20 = vadd.f32 %v3042_v19, %v466_v0  ;;  %v828_v13 = vpop.f32.mrb[53].mxu1  ;;  %v2254_v5 = vpop.f32.mrb[54].mxu0 }
 0x14e   :  { %3808 = vst [vmem:[#allocation12_spill] sm:$0xff] %v3290_v44  ;;  %v567_v52 = vmax.f32 %v475_v24, 0.0  ;;  %v829_v49 = vadd.f32 %v3042_v19, %v828_v13  ;;  %v478_v51 = vadd.f32 %v2254_v5, %v3042_v19  ;;  %v2324_v7 = vpop.f32.mrb[54].mxu1  ;;  %v469_v57 = vpop.f32.mrb[55].mxu0 }
 0x14f   :  { %v929_v61 = vmax.f32 %v837_v3, 0.0  ;;  %v565_v48 = vmax.f32 %v467_v20, 0.0  ;;  %v840_v41 = vadd.f32 %v2324_v7, %v3042_v19  ;;  %v470_v55 = vadd.f32 %v3042_v19, %v469_v57  ;;  %v831_v12 = vpop.f32.mrb[55].mxu1 }
 0x150   :  { %v927_v32 = vmax.f32 %v829_v49, 0.0  ;;  %v568_v46 = vmax.f32 %v478_v51, 0.0  ;;  %v832_v0 = vadd.f32 %v3042_v19, %v831_v12 }
 0x151   :  { %v3300_v44 = vmax.f32 %v567_v52, %v929_v61  ;;  %v930_v24 = vmax.f32 %v840_v41, 0.0  ;;  %v566_v53 = vmax.f32 %v470_v55, 0.0 }
 0x152   :  { %v3302_v13 = vmax.f32 %v565_v48, %v927_v32  ;;  %v928_v5 = vmax.f32 %v832_v0, 0.0 }
 0x153   :  { %3809 = vst [vmem:[#allocation13_spill] sm:$0xff] %v3300_v44  ;;  %v3304_v11 = vmax.f32 %v568_v46, %v930_v24  ;;  %v2257_v3 = vpop.f32.mrb[56].mxu0 }
 0x154   :  { %3810 = vst [vmem:[#allocation14_spill] sm:$0xff] %v3302_v13  ;;  %v3306_v20 = vmax.f32 %v566_v53, %v928_v5  ;;  %v491_v7 = vadd.f32 %v2257_v3, %v3042_v19  ;;  %v2327_v57 = vpop.f32.mrb[56].mxu1  ;;  %v482_v63 = vpop.f32.mrb[57].mxu0 }
 0x155   :  { %3811 = vst [vmem:[#allocation15_spill] sm:$0xff] %v3304_v11  ;;  %v853_v49 = vadd.f32 %v2327_v57, %v3042_v19  ;;  %v483_v51 = vadd.f32 %v3042_v19, %v482_v63  ;;  %v844_v52 = vpop.f32.mrb[57].mxu1  ;;  %v2258_v61 = vpop.f32.mrb[58].mxu0 }
 0x156   :  { %3812 = vst [vmem:[#allocation16_spill] sm:$0xff] %v3306_v20  ;;  %v571_v41 = vmax.f32 %v491_v7, 0.0  ;;  %v845_v48 = vadd.f32 %v3042_v19, %v844_v52  ;;  %v494_v55 = vadd.f32 %v2258_v61, %v3042_v19  ;;  %v2328_v12 = vpop.f32.mrb[58].mxu1  ;;  %v485_v32 = vpop.f32.mrb[59].mxu0 }
 0x157   :  { %v933_v46 = vmax.f32 %v853_v49, 0.0  ;;  %v569_v53 = vmax.f32 %v483_v51, 0.0  ;;  %v856_v0 = vadd.f32 %v2328_v12, %v3042_v19  ;;  %v486_v24 = vadd.f32 %v3042_v19, %v485_v32  ;;  %v847_v5 = vpop.f32.mrb[59].mxu1 }
 0x158   :  { %v931_v3 = vmax.f32 %v845_v48, 0.0  ;;  %v572_v57 = vmax.f32 %v494_v55, 0.0  ;;  %v848_v63 = vadd.f32 %v3042_v19, %v847_v5 }
 0x159   :  { %v3316_v20 = vmax.f32 %v571_v41, %v933_v46  ;;  %v934_v7 = vmax.f32 %v856_v0, 0.0  ;;  %v570_v11 = vmax.f32 %v486_v24, 0.0 }
 0x15a   :  { %v3318_v52 = vmax.f32 %v569_v53, %v931_v3  ;;  %v932_v61 = vmax.f32 %v848_v63, 0.0 }
 0x15b   :  { %3813 = vst [vmem:[#allocation17_spill] sm:$0xff] %v3316_v20  ;;  %v3320_v13 = vmax.f32 %v572_v57, %v934_v7  ;;  %v2261_v49 = vpop.f32.mrb[60].mxu0 }
 0x15c   :  { %3814 = vst [vmem:[#allocation18_spill] sm:$0xff] %v3318_v52  ;;  %v3322_v51 = vmax.f32 %v570_v11, %v932_v61  ;;  %v507_v12 = vadd.f32 %v2261_v49, %v3042_v19  ;;  %v2331_v32 = vpop.f32.mrb[60].mxu1  ;;  %v498_v44 = vpop.f32.mrb[61].mxu0 }
 0x15d   :  { %3815 = vst [vmem:[#allocation19_spill] sm:$0xff] %v3320_v13  ;;  %v869_v48 = vadd.f32 %v2331_v32, %v3042_v19  ;;  %v499_v55 = vadd.f32 %v3042_v19, %v498_v44  ;;  %v860_v41 = vpop.f32.mrb[61].mxu1  ;;  %v2262_v46 = vpop.f32.mrb[62].mxu0 }
 0x15e   :  { %3816 = vst [vmem:[#allocation20_spill] sm:$0xff] %v3322_v51  ;;  %v575_v0 = vmax.f32 %v507_v12, 0.0  ;;  %v861_v53 = vadd.f32 %v3042_v19, %v860_v41  ;;  %v510_v24 = vadd.f32 %v2262_v46, %v3042_v19  ;;  %v2332_v5 = vpop.f32.mrb[62].mxu1  ;;  %v501_v3 = vpop.f32.mrb[63].mxu0 }
 0x15f   :  { %v937_v57 = vmax.f32 %v869_v48, 0.0  ;;  %v573_v11 = vmax.f32 %v499_v55, 0.0  ;;  %v872_v63 = vadd.f32 %v2332_v5, %v3042_v19  ;;  %v502_v7 = vadd.f32 %v3042_v19, %v501_v3  ;;  %v863_v61 = vpop.f32.mrb[63].mxu1 }
 0x160   :  { %v935_v49 = vmax.f32 %v861_v53, 0.0  ;;  %v576_v32 = vmax.f32 %v510_v24, 0.0  ;;  %v864_v44 = vadd.f32 %v3042_v19, %v863_v61 }
 0x161   :  { %v3332_v51 = vmax.f32 %v575_v0, %v937_v57  ;;  %v938_v12 = vmax.f32 %v872_v63, 0.0  ;;  %v574_v13 = vmax.f32 %v502_v7, 0.0 }
 0x162   :  { %v3334_v41 = vmax.f32 %v573_v11, %v935_v49  ;;  %v936_v46 = vmax.f32 %v864_v44, 0.0 }
 0x163   :  { %v3336_v52 = vmax.f32 %v576_v32, %v938_v12  ;;  %v2341_v48 = vpop.f32.mrb[64].mxu0 }
 0x164   :  { %3817 = vst [vmem:[#allocation21_spill] sm:$0xff] %v3334_v41  ;;  %v3338_v55 = vmax.f32 %v574_v13, %v936_v46  ;;  %v1055_v5 = vadd.f32 %v2341_v48, %v3042_v19  ;;  %v2411_v3 = vpop.f32.mrb[64].mxu1  ;;  %v1046_v20 = vpop.f32.mrb[65].mxu0 }
 0x165   :  { %3818 = vst [vmem:[#allocation22_spill] sm:$0xff] %v3336_v52  ;;  %v1481_v53 = vadd.f32 %v2411_v3, %v3042_v19  ;;  %v1047_v24 = vadd.f32 %v3042_v19, %v1046_v20  ;;  %v1472_v0 = vpop.f32.mrb[65].mxu1  ;;  %v2342_v57 = vpop.f32.mrb[66].mxu0 }
 0x166   :  { %3819 = vst [vmem:[#allocation23_spill] sm:$0xff] %v3338_v55  ;;  %v1303_v63 = vmax.f32 %v1055_v5, 0.0  ;;  %v1473_v11 = vadd.f32 %v3042_v19, %v1472_v0  ;;  %v1058_v7 = vadd.f32 %v2342_v57, %v3042_v19  ;;  %v2412_v61 = vpop.f32.mrb[66].mxu1  ;;  %v1049_v49 = vpop.f32.mrb[67].mxu0 }
 0x167   :  { %v1729_v32 = vmax.f32 %v1481_v53, 0.0  ;;  %v1301_v13 = vmax.f32 %v1047_v24, 0.0  ;;  %v1484_v44 = vadd.f32 %v2412_v61, %v3042_v19  ;;  %v1050_v12 = vadd.f32 %v3042_v19, %v1049_v49  ;;  %v1475_v46 = vpop.f32.mrb[67].mxu1 }
 0x168   :  { %v1367_v48 = vmax.f32 %v3058_v27, %v1303_v63  ;;  %v1727_v3 = vmax.f32 %v1473_v11, 0.0  ;;  %v1304_v20 = vmax.f32 %v1058_v7, 0.0  ;;  %v1476_v55 = vadd.f32 %v3042_v19, %v1475_v46 }
 0x169   :  { %v1365_v5 = vmax.f32 %v3064_v30, %v1301_v13  ;;  %v1302_v0 = vmax.f32 %v1050_v12, 0.0  ;;  %v1730_v53 = vmax.f32 %v1484_v44, 0.0  ;;  %v3370_v13 = vld [vmem:[%s3796_s2] ss:$0 sm:$0xff] }
 0x16a   :  { %v1793_v57 = vmax.f32 %v1367_v48, %v1729_v32  ;;  %v1368_v52 = vmax.f32 %v3068_v34, %v1304_v20  ;;  %v1728_v41 = vmax.f32 %v1476_v55, 0.0 }
 0x16b   :  { %v1791_v24 = vmax.f32 %v1365_v5, %v1727_v3  ;;  %v1366_v61 = vmax.f32 %v3070_v36, %v1302_v0  ;;  %v2345_v49 = vpop.f32.mrb[68].mxu0 }
 0x16c   :  { %1858 = vst.msk [vmem:[%s3797_s3 + $0x10] sm:$0xff] %vm1855_vm1, %v1793_v57  ;;  %v1794_v27 = vmax.f32 %v1368_v52, %v1730_v53  ;;  %v1071_v63 = vadd.f32 %v2345_v49, %v3042_v19  ;;  %v2415_v11 = vpop.f32.mrb[68].mxu1  ;;  %v1062_v30 = vpop.f32.mrb[69].mxu0 }
 0x16d   :  { %1856 = vst.msk [vmem:[%s3797_s3] sm:$0xff] %vm1855_vm1, %v1791_v24  ;;  %v1792_v34 = vmax.f32 %v1366_v61, %v1728_v41  ;;  %v1497_v36 = vadd.f32 %v2415_v11, %v3042_v19  ;;  %v1063_v55 = vadd.f32 %v3042_v19, %v1062_v30  ;;  %v1488_v7 = vpop.f32.mrb[69].mxu1  ;;  %v2346_v32 = vpop.f32.mrb[70].mxu0 }
 0x16e   :  { %1859 = vst.msk [vmem:[%s3797_s3 + $0x18] sm:$0xff] %vm1855_vm1, %v1794_v27  ;;  %v1307_v52 = vmax.f32 %v1071_v63, 0.0  ;;  %v1489_v44 = vadd.f32 %v3370_v13, %v1488_v7  ;;  %v1074_v41 = vadd.f32 %v3370_v13, %v2346_v32  ;;  %v2416_v12 = vpop.f32.mrb[70].mxu1  ;;  %v1065_v46 = vpop.f32.mrb[71].mxu0 }
 0x16f   :  { %1857 = vst.msk [vmem:[%s3797_s3 + $0x8] sm:$0xff] %vm1855_vm1, %v1792_v34  ;;  %v1733_v19 = vmax.f32 %v1497_v36, 0.0  ;;  %v1305_v48 = vmax.f32 %v1063_v55, 0.0  ;;  %v1500_v3 = vadd.f32 %v3370_v13, %v2416_v12  ;;  %v1066_v20 = vadd.f32 %v3370_v13, %v1065_v46  ;;  %v1491_v5 = vpop.f32.mrb[71].mxu1 }
 0x170   :  { %v1371_v0 = vmax.f32 %v3082_v1, %v1307_v52  ;;  %v1731_v57 = vmax.f32 %v1489_v44, 0.0  ;;  %v1308_v53 = vmax.f32 %v1074_v41, 0.0  ;;  %v1492_v24 = vadd.f32 %v3370_v13, %v1491_v5 }
 0x171   :  { %v1369_v61 = vmax.f32 %v3088_v8, %v1305_v48  ;;  %v1306_v49 = vmax.f32 %v1066_v20, 0.0  ;;  %v1734_v11 = vmax.f32 %v1500_v3, 0.0 }
 0x172   :  { %v1797_v27 = vmax.f32 %v1371_v0, %v1733_v19  ;;  %v1372_v63 = vmax.f32 %v3092_v14, %v1308_v53  ;;  %v1732_v36 = vmax.f32 %v1492_v24, 0.0 }
 0x173   :  { %v1795_v30 = vmax.f32 %v1369_v61, %v1731_v57  ;;  %v1370_v34 = vmax.f32 %v3094_v31, %v1306_v49  ;;  %v2349_v55 = vpop.f32.mrb[72].mxu0 }
 0x174   :  { %1862 = vst.msk [vmem:[%s3797_s3 + $0x30] sm:$0xff] %vm1855_vm1, %v1797_v27  ;;  %v1798_v1 = vmax.f32 %v1372_v63, %v1734_v11  ;;  %v1087_v7 = vadd.f32 %v3370_v13, %v2349_v55  ;;  %v2419_v32 = vpop.f32.mrb[72].mxu1  ;;  %v1078_v8 = vpop.f32.mrb[73].mxu0 }
 0x175   :  { %1860 = vst.msk [vmem:[%s3797_s3 + $0x20] sm:$0xff] %vm1855_vm1, %v1795_v30  ;;  %v1796_v14 = vmax.f32 %v1370_v34, %v1732_v36  ;;  %v1513_v31 = vadd.f32 %v3370_v13, %v2419_v32  ;;  %v1079_v52 = vadd.f32 %v3370_v13, %v1078_v8  ;;  %v1504_v44 = vpop.f32.mrb[73].mxu1  ;;  %v2350_v41 = vpop.f32.mrb[74].mxu0 }
 0x176   :  { %1863 = vst.msk [vmem:[%s3797_s3 + $0x38] sm:$0xff] %vm1855_vm1, %v1798_v1  ;;  %v1311_v12 = vmax.f32 %v1087_v7, 0.0  ;;  %v1505_v46 = vadd.f32 %v3370_v13, %v1504_v44  ;;  %v1090_v19 = vadd.f32 %v3370_v13, %v2350_v41  ;;  %v2420_v48 = vpop.f32.mrb[74].mxu1  ;;  %v1081_v3 = vpop.f32.mrb[75].mxu0 }
 0x177   :  { %1861 = vst.msk [vmem:[%s3797_s3 + $0x28] sm:$0xff] %vm1855_vm1, %v1796_v14  ;;  %v1737_v20 = vmax.f32 %v1513_v31, 0.0  ;;  %v1309_v5 = vmax.f32 %v1079_v52, 0.0  ;;  %v1516_v0 = vadd.f32 %v3370_v13, %v2420_v48  ;;  %v1082_v57 = vadd.f32 %v3370_v13, %v1081_v3  ;;  %v1507_v53 = vpop.f32.mrb[75].mxu1 }
 0x178   :  { %v1375_v24 = vmax.f32 %v3106_v25, %v1311_v12  ;;  %v1735_v61 = vmax.f32 %v1505_v46, 0.0  ;;  %v1312_v49 = vmax.f32 %v1090_v19, 0.0  ;;  %v1508_v27 = vadd.f32 %v3370_v13, %v1507_v53 }
 0x179   :  { %v1373_v63 = vmax.f32 %v3112_v29, %v1309_v5  ;;  %v1310_v11 = vmax.f32 %v1082_v57, 0.0  ;;  %v1738_v36 = vmax.f32 %v1516_v0, 0.0 }
 0x17a   :  { %v1801_v30 = vmax.f32 %v1375_v24, %v1737_v20  ;;  %v1376_v34 = vmax.f32 %v3116_v35, %v1312_v49  ;;  %v1736_v7 = vmax.f32 %v1508_v27, 0.0 }
 0x17b   :  { %v1799_v55 = vmax.f32 %v1373_v63, %v1735_v61  ;;  %v1374_v1 = vmax.f32 %v3118_v38, %v1310_v11  ;;  %v2353_v32 = vpop.f32.mrb[76].mxu0 }
 0x17c   :  { %1866 = vst.msk [vmem:[%s3797_s3 + $0x50] sm:$0xff] %vm1855_vm1, %v1801_v30  ;;  %v1802_v25 = vmax.f32 %v1376_v34, %v1738_v36  ;;  %v1103_v8 = vadd.f32 %v3370_v13, %v2353_v32  ;;  %v2423_v14 = vpop.f32.mrb[76].mxu1  ;;  %v1094_v29 = vpop.f32.mrb[77].mxu0 }
 0x17d   :  { %1864 = vst.msk [vmem:[%s3797_s3 + $0x40] sm:$0xff] %vm1855_vm1, %v1799_v55  ;;  %v1800_v35 = vmax.f32 %v1374_v1, %v1736_v7  ;;  %v1529_v38 = vadd.f32 %v3370_v13, %v2423_v14  ;;  %v1095_v31 = vadd.f32 %v3370_v13, %v1094_v29  ;;  %v1520_v52 = vpop.f32.mrb[77].mxu1  ;;  %v2354_v44 = vpop.f32.mrb[78].mxu0 }
 0x17e   :  { %1867 = vst.msk [vmem:[%s3797_s3 + $0x58] sm:$0xff] %vm1855_vm1, %v1802_v25  ;;  %v1315_v41 = vmax.f32 %v1103_v8, 0.0  ;;  %v1521_v12 = vadd.f32 %v3370_v13, %v1520_v52  ;;  %v1106_v46 = vadd.f32 %v3370_v13, %v2354_v44  ;;  %v2424_v19 = vpop.f32.mrb[78].mxu1  ;;  %v1097_v48 = vpop.f32.mrb[79].mxu0 }
 0x17f   :  { %1865 = vst.msk [vmem:[%s3797_s3 + $0x48] sm:$0xff] %vm1855_vm1, %v1800_v35  ;;  %v1741_v3 = vmax.f32 %v1529_v38, 0.0  ;;  %v1313_v20 = vmax.f32 %v1095_v31, 0.0  ;;  %v1532_v5 = vadd.f32 %v3370_v13, %v2424_v19  ;;  %v1098_v0 = vadd.f32 %v3370_v13, %v1097_v48  ;;  %v1523_v57 = vpop.f32.mrb[79].mxu1 }
 0x180   :  { %v1379_v53 = vmax.f32 %v3130_v6, %v1315_v41  ;;  %v1739_v24 = vmax.f32 %v1521_v12, 0.0  ;;  %v1316_v61 = vmax.f32 %v1106_v46, 0.0  ;;  %v1524_v49 = vadd.f32 %v3370_v13, %v1523_v57 }
 0x181   :  { %v1377_v27 = vmax.f32 %v3136_v17, %v1313_v20  ;;  %v1314_v63 = vmax.f32 %v1098_v0, 0.0  ;;  %v1742_v34 = vmax.f32 %v1532_v5, 0.0 }
 0x182   :  { %v1805_v11 = vmax.f32 %v1379_v53, %v1741_v3  ;;  %v1380_v30 = vmax.f32 %v3140_v43, %v1316_v61  ;;  %v1740_v1 = vmax.f32 %v1524_v49, 0.0 }
 0x183   :  { %v1803_v36 = vmax.f32 %v1377_v27, %v1739_v24  ;;  %v1378_v55 = vmax.f32 %v3142_v58, %v1314_v63  ;;  %v2357_v7 = vpop.f32.mrb[80].mxu0 }
 0x184   :  { %1870 = vst.msk [vmem:[%s3797_s3 + $0x70] sm:$0xff] %vm1855_vm1, %v1805_v11  ;;  %v1806_v6 = vmax.f32 %v1380_v30, %v1742_v34  ;;  %v1119_v32 = vadd.f32 %v3370_v13, %v2357_v7  ;;  %v2427_v25 = vpop.f32.mrb[80].mxu1  ;;  %v1110_v17 = vpop.f32.mrb[81].mxu0 }
 0x185   :  { %1868 = vst.msk [vmem:[%s3797_s3 + $0x60] sm:$0xff] %vm1855_vm1, %v1803_v36  ;;  %v1804_v43 = vmax.f32 %v1378_v55, %v1740_v1  ;;  %v1545_v58 = vadd.f32 %v3370_v13, %v2427_v25  ;;  %v1111_v8 = vadd.f32 %v3370_v13, %v1110_v17  ;;  %v1536_v14 = vpop.f32.mrb[81].mxu1  ;;  %v2358_v29 = vpop.f32.mrb[82].mxu0 }
 0x186   :  { %1871 = vst.msk [vmem:[%s3797_s3 + $0x78] sm:$0xff] %vm1855_vm1, %v1806_v6  ;;  %v1319_v35 = vmax.f32 %v1119_v32, 0.0  ;;  %v1537_v38 = vadd.f32 %v3370_v13, %v1536_v14  ;;  %v1122_v31 = vadd.f32 %v3370_v13, %v2358_v29  ;;  %v2428_v52 = vpop.f32.mrb[82].mxu1  ;;  %v1113_v44 = vpop.f32.mrb[83].mxu0 }
 0x187   :  { %1869 = vst.msk [vmem:[%s3797_s3 + $0x68] sm:$0xff] %vm1855_vm1, %v1804_v43  ;;  %v1745_v41 = vmax.f32 %v1545_v58, 0.0  ;;  %v1317_v12 = vmax.f32 %v1111_v8, 0.0  ;;  %v1548_v46 = vadd.f32 %v3370_v13, %v2428_v52  ;;  %v1114_v19 = vadd.f32 %v3370_v13, %v1113_v44  ;;  %v1539_v48 = vpop.f32.mrb[83].mxu1 }
 0x188   :  { %v1383_v3 = vmax.f32 %v3154_v33, %v1319_v35  ;;  %v1743_v20 = vmax.f32 %v1537_v38, 0.0  ;;  %v1320_v5 = vmax.f32 %v1122_v31, 0.0  ;;  %v1540_v0 = vadd.f32 %v3370_v13, %v1539_v48 }
 0x189   :  { %v1381_v57 = vmax.f32 %v3158_v40, %v1317_v12  ;;  %v1318_v53 = vmax.f32 %v1114_v19, 0.0  ;;  %v1746_v49 = vmax.f32 %v1548_v46, 0.0 }
 0x18a   :  { %v1809_v24 = vmax.f32 %v1383_v3, %v1745_v41  ;;  %v1384_v61 = vmax.f32 %v3160_v2, %v1320_v5  ;;  %v1744_v11 = vmax.f32 %v1540_v0, 0.0 }
 0x18b   :  { %v1807_v27 = vmax.f32 %v1381_v57, %v1743_v20  ;;  %v1382_v63 = vmax.f32 %v3162_v45, %v1318_v53  ;;  %v2361_v30 = vpop.f32.mrb[84].mxu0 }
 0x18c   :  { %1874 = vst.msk [vmem:[%s3797_s3 + $0x90] sm:$0xff] %vm1855_vm1, %v1809_v24  ;;  %v1810_v33 = vmax.f32 %v1384_v61, %v1746_v49  ;;  %v1135_v34 = vadd.f32 %v3370_v13, %v2361_v30  ;;  %v2431_v36 = vpop.f32.mrb[84].mxu1  ;;  %v1126_v40 = vpop.f32.mrb[85].mxu0 }
 0x18d   :  { %1872 = vst.msk [vmem:[%s3797_s3 + $0x80] sm:$0xff] %vm1855_vm1, %v1807_v27  ;;  %v1808_v2 = vmax.f32 %v1382_v63, %v1744_v11  ;;  %v1561_v45 = vadd.f32 %v3370_v13, %v2431_v36  ;;  %v1127_v55 = vadd.f32 %v3370_v13, %v1126_v40  ;;  %v1552_v1 = vpop.f32.mrb[85].mxu1  ;;  %v2362_v7 = vpop.f32.mrb[86].mxu0 }
 0x18e   :  { %1875 = vst.msk [vmem:[%s3797_s3 + $0x98] sm:$0xff] %vm1855_vm1, %v1810_v33  ;;  %v1323_v6 = vmax.f32 %v1135_v34, 0.0  ;;  %v1553_v32 = vadd.f32 %v3370_v13, %v1552_v1  ;;  %v1138_v25 = vadd.f32 %v3370_v13, %v2362_v7  ;;  %v2432_v17 = vpop.f32.mrb[86].mxu1  ;;  %v1129_v43 = vpop.f32.mrb[87].mxu0 }
 0x18f   :  { %1873 = vst.msk [vmem:[%s3797_s3 + $0x88] sm:$0xff] %vm1855_vm1, %v1808_v2  ;;  %v1749_v58 = vmax.f32 %v1561_v45, 0.0  ;;  %v1321_v8 = vmax.f32 %v1127_v55, 0.0  ;;  %v1564_v14 = vadd.f32 %v3370_v13, %v2432_v17  ;;  %v1130_v29 = vadd.f32 %v3370_v13, %v1129_v43  ;;  %v1555_v35 = vpop.f32.mrb[87].mxu1 }
 0x190   :  { %v1387_v38 = vmax.f32 %v3172_v56, %v1323_v6  ;;  %v1747_v31 = vmax.f32 %v1553_v32, 0.0  ;;  %v1324_v52 = vmax.f32 %v1138_v25, 0.0  ;;  %v1556_v44 = vadd.f32 %v3370_v13, %v1555_v35 }
 0x191   :  { %v1385_v41 = vmax.f32 %v3174_v62, %v1321_v8  ;;  %v1322_v12 = vmax.f32 %v1130_v29, 0.0  ;;  %v1750_v48 = vmax.f32 %v1564_v14, 0.0 }
 0x192   :  { %v1813_v46 = vmax.f32 %v1387_v38, %v1749_v58  ;;  %v1388_v19 = vmax.f32 %v3176_v59, %v1324_v52  ;;  %v1748_v5 = vmax.f32 %v1556_v44, 0.0 }
 0x193   :  { %v1811_v3 = vmax.f32 %v1385_v41, %v1747_v31  ;;  %v1386_v20 = vmax.f32 %v3178_v9, %v1322_v12  ;;  %v2365_v0 = vpop.f32.mrb[88].mxu0 }
 0x194   :  { %1878 = vst.msk [vmem:[%s3797_s3 + $0xb0] sm:$0xff] %vm1855_vm1, %v1813_v46  ;;  %v1814_v56 = vmax.f32 %v1388_v19, %v1750_v48  ;;  %v1151_v57 = vadd.f32 %v3370_v13, %v2365_v0  ;;  %v2435_v53 = vpop.f32.mrb[88].mxu1  ;;  %v1142_v62 = vpop.f32.mrb[89].mxu0 }
 0x195   :  { %1876 = vst.msk [vmem:[%s3797_s3 + $0xa0] sm:$0xff] %vm1855_vm1, %v1811_v3  ;;  %v1812_v59 = vmax.f32 %v1386_v20, %v1748_v5  ;;  %v1577_v9 = vadd.f32 %v3370_v13, %v2435_v53  ;;  %v1143_v24 = vadd.f32 %v3370_v13, %v1142_v62  ;;  %v1568_v61 = vpop.f32.mrb[89].mxu1  ;;  %v2366_v49 = vpop.f32.mrb[90].mxu0 }
 0x196   :  { %1879 = vst.msk [vmem:[%s3797_s3 + $0xb8] sm:$0xff] %vm1855_vm1, %v1814_v56  ;;  %v1327_v27 = vmax.f32 %v1151_v57, 0.0  ;;  %v1569_v63 = vadd.f32 %v3370_v13, %v1568_v61  ;;  %v1154_v11 = vadd.f32 %v3370_v13, %v2366_v49  ;;  %v2436_v30 = vpop.f32.mrb[90].mxu1  ;;  %v1145_v33 = vpop.f32.mrb[91].mxu0 }
 0x197   :  { %1877 = vst.msk [vmem:[%s3797_s3 + $0xa8] sm:$0xff] %vm1855_vm1, %v1812_v59  ;;  %v1753_v34 = vmax.f32 %v1577_v9, 0.0  ;;  %v1325_v36 = vmax.f32 %v1143_v24, 0.0  ;;  %v1580_v40 = vadd.f32 %v3370_v13, %v2436_v30  ;;  %v1146_v2 = vadd.f32 %v3370_v13, %v1145_v33  ;;  %v1571_v45 = vpop.f32.mrb[91].mxu1 }
 0x198   :  { %v1391_v55 = vmax.f32 %v3188_v50, %v1327_v27  ;;  %v1751_v1 = vmax.f32 %v1569_v63, 0.0  ;;  %v1328_v7 = vmax.f32 %v1154_v11, 0.0  ;;  %v1572_v6 = vadd.f32 %v3370_v13, %v1571_v45 }
 0x199   :  { %v1389_v32 = vmax.f32 %v3190_v18, %v1325_v36  ;;  %v1326_v25 = vmax.f32 %v1146_v2, 0.0  ;;  %v1754_v58 = vmax.f32 %v1580_v40, 0.0 }
 0x19a   :  { %v1817_v17 = vmax.f32 %v1391_v55, %v1753_v34  ;;  %v1392_v43 = vmax.f32 %v3192_v54, %v1328_v7  ;;  %v1752_v29 = vmax.f32 %v1572_v6, 0.0 }
 0x19b   :  { %v1815_v8 = vmax.f32 %v1389_v32, %v1751_v1  ;;  %v1390_v14 = vmax.f32 %v3194_v60, %v1326_v25  ;;  %v2369_v35 = vpop.f32.mrb[92].mxu0 }
 0x19c   :  { %1882 = vst.msk [vmem:[%s3797_s3 + $0xd0] sm:$0xff] %vm1855_vm1, %v1817_v17  ;;  %v1818_v50 = vmax.f32 %v1392_v43, %v1754_v58  ;;  %v1167_v38 = vadd.f32 %v3370_v13, %v2369_v35  ;;  %v2439_v31 = vpop.f32.mrb[92].mxu1  ;;  %v1158_v18 = vpop.f32.mrb[93].mxu0 }
 0x19d   :  { %1880 = vst.msk [vmem:[%s3797_s3 + $0xc0] sm:$0xff] %vm1855_vm1, %v1815_v8  ;;  %v1816_v54 = vmax.f32 %v1390_v14, %v1752_v29  ;;  %v1593_v60 = vadd.f32 %v3370_v13, %v2439_v31  ;;  %v1159_v52 = vadd.f32 %v3370_v13, %v1158_v18  ;;  %v1584_v44 = vpop.f32.mrb[93].mxu1  ;;  %v2370_v41 = vpop.f32.mrb[94].mxu0 }
 0x19e   :  { %1883 = vst.msk [vmem:[%s3797_s3 + $0xd8] sm:$0xff] %vm1855_vm1, %v1818_v50  ;;  %v1331_v12 = vmax.f32 %v1167_v38, 0.0  ;;  %v1585_v46 = vadd.f32 %v3370_v13, %v1584_v44  ;;  %v1170_v19 = vadd.f32 %v3370_v13, %v2370_v41  ;;  %v2440_v48 = vpop.f32.mrb[94].mxu1  ;;  %v1161_v3 = vpop.f32.mrb[95].mxu0 }
 0x19f   :  { %1881 = vst.msk [vmem:[%s3797_s3 + $0xc8] sm:$0xff] %vm1855_vm1, %v1816_v54  ;;  %v1757_v20 = vmax.f32 %v1593_v60, 0.0  ;;  %v1329_v5 = vmax.f32 %v1159_v52, 0.0  ;;  %v1596_v0 = vadd.f32 %v3370_v13, %v2440_v48  ;;  %v1162_v56 = vadd.f32 %v3370_v13, %v1161_v3  ;;  %v1587_v57 = vpop.f32.mrb[95].mxu1 }
 0x1a0   :  { %v1395_v53 = vmax.f32 %v3204_v26, %v1331_v12  ;;  %v1755_v62 = vmax.f32 %v1585_v46, 0.0  ;;  %v1332_v59 = vmax.f32 %v1170_v19, 0.0  ;;  %v1588_v9 = vadd.f32 %v3370_v13, %v1587_v57 }
 0x1a1   :  { %v1393_v24 = vmax.f32 %v3206_v39, %v1329_v5  ;;  %v1330_v61 = vmax.f32 %v1162_v56, 0.0  ;;  %v1758_v63 = vmax.f32 %v1596_v0, 0.0 }
 0x1a2   :  { %v1821_v49 = vmax.f32 %v1395_v53, %v1757_v20  ;;  %v1396_v27 = vmax.f32 %v3208_v42, %v1332_v59  ;;  %v1756_v33 = vmax.f32 %v1588_v9, 0.0 }
 0x1a3   :  { %v1819_v11 = vmax.f32 %v1393_v24, %v1755_v62  ;;  %v1394_v30 = vmax.f32 %v3210_v47, %v1330_v61  ;;  %v2373_v34 = vpop.f32.mrb[96].mxu0 }
 0x1a4   :  { %1886 = vst.msk [vmem:[%s3797_s3 + $0xf0] sm:$0xff] %vm1855_vm1, %v1821_v49  ;;  %v1822_v26 = vmax.f32 %v1396_v27, %v1758_v63  ;;  %v1183_v36 = vadd.f32 %v3370_v13, %v2373_v34  ;;  %v2443_v40 = vpop.f32.mrb[96].mxu1  ;;  %v1174_v39 = vpop.f32.mrb[97].mxu0 }
 0x1a5   :  { %1884 = vst.msk [vmem:[%s3797_s3 + $0xe0] sm:$0xff] %vm1855_vm1, %v1819_v11  ;;  %v1820_v42 = vmax.f32 %v1394_v30, %v1756_v33  ;;  %v1609_v47 = vadd.f32 %v3370_v13, %v2443_v40  ;;  %v1175_v2 = vadd.f32 %v3370_v13, %v1174_v39  ;;  %v1600_v45 = vpop.f32.mrb[97].mxu1  ;;  %v2374_v55 = vpop.f32.mrb[98].mxu0 }
 0x1a6   :  { %1887 = vst.msk [vmem:[%s3797_s3 + $0xf8] sm:$0xff] %vm1855_vm1, %v1822_v26  ;;  %v1335_v1 = vmax.f32 %v1183_v36, 0.0  ;;  %v1601_v7 = vadd.f32 %v3370_v13, %v1600_v45  ;;  %v1186_v6 = vadd.f32 %v3370_v13, %v2374_v55  ;;  %v2444_v32 = vpop.f32.mrb[98].mxu1  ;;  %v1177_v25 = vpop.f32.mrb[99].mxu0 }
 0x1a7   :  { %1885 = vst.msk [vmem:[%s3797_s3 + $0xe8] sm:$0xff] %vm1855_vm1, %v1820_v42  ;;  %v1761_v17 = vmax.f32 %v1609_v47, 0.0  ;;  %v1333_v43 = vmax.f32 %v1175_v2, 0.0  ;;  %v1612_v58 = vadd.f32 %v3370_v13, %v2444_v32  ;;  %v1178_v8 = vadd.f32 %v3370_v13, %v1177_v25  ;;  %v1603_v14 = vpop.f32.mrb[99].mxu1 }
 0x1a8   :  { %v1399_v29 = vmax.f32 %v3220_v15, %v1335_v1  ;;  %v1759_v35 = vmax.f32 %v1601_v7, 0.0  ;;  %v1336_v50 = vmax.f32 %v1186_v6, 0.0  ;;  %v1604_v38 = vadd.f32 %v3370_v13, %v1603_v14 }
 0x1a9   :  { %v1397_v31 = vmax.f32 %v3222_v21, %v1333_v43  ;;  %v1334_v18 = vmax.f32 %v1178_v8, 0.0  ;;  %v1762_v52 = vmax.f32 %v1612_v58, 0.0 }
 0x1aa   :  { %v1825_v54 = vmax.f32 %v1399_v29, %v1761_v17  ;;  %v1400_v60 = vmax.f32 %v3224_v23, %v1336_v50  ;;  %v1760_v12 = vmax.f32 %v1604_v38, 0.0 }
 0x1ab   :  { %v1823_v44 = vmax.f32 %v1397_v31, %v1759_v35  ;;  %v1398_v41 = vmax.f32 %v3226_v28, %v1334_v18  ;;  %v2377_v46 = vpop.f32.mrb[100].mxu0 }
 0x1ac   :  { %1890 = vst.msk [vmem:[%s3797_s3 + $0x110] sm:$0xff] %vm1855_vm1, %v1825_v54  ;;  %v1826_v15 = vmax.f32 %v1400_v60, %v1762_v52  ;;  %v1199_v19 = vadd.f32 %v3370_v13, %v2377_v46  ;;  %v2447_v48 = vpop.f32.mrb[100].mxu1  ;;  %v1190_v21 = vpop.f32.mrb[101].mxu0  ;;  %v3820_v60 = vld [vmem:[#allocation2_spill] sm:$0xff] }
 0x1ad   :  { %1888 = vst.msk [vmem:[%s3797_s3 + $0x100] sm:$0xff] %vm1855_vm1, %v1823_v44  ;;  %v1824_v23 = vmax.f32 %v1398_v41, %v1760_v12  ;;  %v1625_v28 = vadd.f32 %v3370_v13, %v2447_v48  ;;  %v1191_v3 = vadd.f32 %v3370_v13, %v1190_v21  ;;  %v1616_v20 = vpop.f32.mrb[101].mxu1  ;;  %v2378_v5 = vpop.f32.mrb[102].mxu0  ;;  %v3821_v12 = vld [vmem:[#allocation3_spill] sm:$0xff]  ;;  %v3822_v48 = vld [vmem:[#allocation4_spill] sm:$0xff] }
 0x1ae   :  { %1891 = vst.msk [vmem:[%s3797_s3 + $0x118] sm:$0xff] %vm1855_vm1, %v1826_v15  ;;  %v1339_v0 = vmax.f32 %v1199_v19, 0.0  ;;  %v1617_v56 = vadd.f32 %v3370_v13, %v1616_v20  ;;  %v1202_v57 = vadd.f32 %v3370_v13, %v2378_v5  ;;  %v2448_v53 = vpop.f32.mrb[102].mxu1  ;;  %v1193_v62 = vpop.f32.mrb[103].mxu0 }
 0x1af   :  { %1889 = vst.msk [vmem:[%s3797_s3 + $0x108] sm:$0xff] %vm1855_vm1, %v1824_v23  ;;  %v1765_v59 = vmax.f32 %v1625_v28, 0.0  ;;  %v1337_v9 = vmax.f32 %v1191_v3, 0.0  ;;  %v1628_v24 = vadd.f32 %v3370_v13, %v2448_v53  ;;  %v1194_v61 = vadd.f32 %v3370_v13, %v1193_v62  ;;  %v1619_v49 = vpop.f32.mrb[103].mxu1 }
 0x1b0   :  { %v1403_v27 = vmax.f32 %v3236_v4, %v1339_v0  ;;  %v1763_v63 = vmax.f32 %v1617_v56, 0.0  ;;  %v1340_v11 = vmax.f32 %v1202_v57, 0.0  ;;  %v1620_v30 = vadd.f32 %v3370_v13, %v1619_v49 }
 0x1b1   :  { %v1401_v33 = vmax.f32 %v3238_v16, %v1337_v9  ;;  %v1338_v34 = vmax.f32 %v1194_v61, 0.0  ;;  %v1766_v40 = vmax.f32 %v1628_v24, 0.0 }
 0x1b2   :  { %v1829_v26 = vmax.f32 %v1403_v27, %v1765_v59  ;;  %v1404_v36 = vmax.f32 %v3240_v22, %v1340_v11  ;;  %v1764_v47 = vmax.f32 %v1620_v30, 0.0 }
 0x1b3   :  { %v1827_v39 = vmax.f32 %v1401_v33, %v1763_v63  ;;  %v1402_v42 = vmax.f32 %v3242_v37, %v1338_v34  ;;  %v2381_v2 = vpop.f32.mrb[104].mxu0  ;;  %v3823_v34 = vld [vmem:[#allocation5_spill] sm:$0xff] }
 0x1b4   :  { %1894 = vst.msk [vmem:[%s3797_s3 + $0x130] sm:$0xff] %vm1855_vm1, %v1829_v26  ;;  %v1830_v4 = vmax.f32 %v1404_v36, %v1766_v40  ;;  %v1215_v45 = vadd.f32 %v3370_v13, %v2381_v2  ;;  %v2451_v55 = vpop.f32.mrb[104].mxu1  ;;  %v1206_v16 = vpop.f32.mrb[105].mxu0 }
 0x1b5   :  { %1892 = vst.msk [vmem:[%s3797_s3 + $0x120] sm:$0xff] %vm1855_vm1, %v1827_v39  ;;  %v1828_v22 = vmax.f32 %v1402_v42, %v1764_v47  ;;  %v1641_v37 = vadd.f32 %v3370_v13, %v2451_v55  ;;  %v1207_v1 = vadd.f32 %v3370_v13, %v1206_v16  ;;  %v1632_v7 = vpop.f32.mrb[105].mxu1  ;;  %v2382_v6 = vpop.f32.mrb[106].mxu0  ;;  %v3824_v42 = vld [vmem:[#allocation6_spill] sm:$0xff] }
 0x1b6   :  { %1895 = vst.msk [vmem:[%s3797_s3 + $0x138] sm:$0xff] %vm1855_vm1, %v1830_v4  ;;  %v1343_v32 = vmax.f32 %v1215_v45, 0.0  ;;  %v1633_v25 = vadd.f32 %v3370_v13, %v1632_v7  ;;  %v1218_v17 = vadd.f32 %v3370_v13, %v2382_v6  ;;  %v2452_v43 = vpop.f32.mrb[106].mxu1  ;;  %v1209_v58 = vpop.f32.mrb[107].mxu0  ;;  %v3825_v45 = vld [vmem:[#allocation7_spill] sm:$0xff] }
 0x1b7   :  { %1893 = vst.msk [vmem:[%s3797_s3 + $0x128] sm:$0xff] %vm1855_vm1, %v1828_v22  ;;  %v1769_v8 = vmax.f32 %v1641_v37, 0.0  ;;  %v1341_v14 = vmax.f32 %v1207_v1, 0.0  ;;  %v1644_v29 = vadd.f32 %v3370_v13, %v2452_v43  ;;  %v1210_v35 = vadd.f32 %v3370_v13, %v1209_v58  ;;  %v1635_v50 = vpop.f32.mrb[107].mxu1  ;;  %v3826_v37 = vld [vmem:[#allocation8_spill] sm:$0xff] }
 0x1b8   :  { %v1407_v38 = vmax.f32 %v3252_v10, %v1343_v32  ;;  %v1767_v31 = vmax.f32 %v1633_v25, 0.0  ;;  %v1344_v18 = vmax.f32 %v1218_v17, 0.0  ;;  %v1636_v54 = vadd.f32 %v3370_v13, %v1635_v50 }
 0x1b9   :  { %v1405_v52 = vmax.f32 %v3820_v60, %v1341_v14  ;;  %v1342_v44 = vmax.f32 %v1210_v35, 0.0  ;;  %v1770_v15 = vmax.f32 %v1644_v29, 0.0 }
 0x1ba   :  { %v1833_v41 = vmax.f32 %v1407_v38, %v1769_v8  ;;  %v1408_v46 = vmax.f32 %v3821_v12, %v1344_v18  ;;  %v1768_v23 = vmax.f32 %v1636_v54, 0.0 }
 0x1bb   :  { %v1831_v19 = vmax.f32 %v1405_v52, %v1767_v31  ;;  %v1406_v21 = vmax.f32 %v3822_v48, %v1342_v44  ;;  %v2385_v28 = vpop.f32.mrb[108].mxu0 }
 0x1bc   :  { %1898 = vst.msk [vmem:[%s3797_s3 + $0x150] sm:$0xff] %vm1855_vm1, %v1833_v41  ;;  %v1834_v10 = vmax.f32 %v1408_v46, %v1770_v15  ;;  %v1231_v3 = vadd.f32 %v3370_v13, %v2385_v28  ;;  %v2455_v20 = vpop.f32.mrb[108].mxu1  ;;  %v1222_v5 = vpop.f32.mrb[109].mxu0  ;;  %v3827_v46 = vld [vmem:[#allocation9_spill] sm:$0xff] }
 0x1bd   :  { %1896 = vst.msk [vmem:[%s3797_s3 + $0x140] sm:$0xff] %vm1855_vm1, %v1831_v19  ;;  %v1832_v0 = vmax.f32 %v1406_v21, %v1768_v23  ;;  %v1657_v56 = vadd.f32 %v3370_v13, %v2455_v20  ;;  %v1223_v57 = vadd.f32 %v3370_v13, %v1222_v5  ;;  %v1648_v53 = vpop.f32.mrb[109].mxu1  ;;  %v2386_v62 = vpop.f32.mrb[110].mxu0  ;;  %v3828_v23 = vld [vmem:[#allocation10_spill] sm:$0xff]  ;;  %v3829_v20 = vld [vmem:[#allocation11_spill] sm:$0xff] }
 0x1be   :  { %1899 = vst.msk [vmem:[%s3797_s3 + $0x158] sm:$0xff] %vm1855_vm1, %v1834_v10  ;;  %v1347_v59 = vmax.f32 %v1231_v3, 0.0  ;;  %v1649_v9 = vadd.f32 %v3370_v13, %v1648_v53  ;;  %v1234_v24 = vadd.f32 %v3370_v13, %v2386_v62  ;;  %v2456_v61 = vpop.f32.mrb[110].mxu1  ;;  %v1225_v49 = vpop.f32.mrb[111].mxu0 }
 0x1bf   :  { %1897 = vst.msk [vmem:[%s3797_s3 + $0x148] sm:$0xff] %vm1855_vm1, %v1832_v0  ;;  %v1773_v27 = vmax.f32 %v1657_v56, 0.0  ;;  %v1345_v63 = vmax.f32 %v1223_v57, 0.0  ;;  %v1660_v11 = vadd.f32 %v3370_v13, %v2456_v61  ;;  %v1226_v30 = vadd.f32 %v3370_v13, %v1225_v49  ;;  %v1651_v33 = vpop.f32.mrb[111].mxu1  ;;  %v3830_v57 = vld [vmem:[#allocation12_spill] sm:$0xff] }
 0x1c0   :  { %v1411_v26 = vmax.f32 %v3823_v34, %v1347_v59  ;;  %v1771_v36 = vmax.f32 %v1649_v9, 0.0  ;;  %v1348_v40 = vmax.f32 %v1234_v24, 0.0  ;;  %v1652_v39 = vadd.f32 %v3370_v13, %v1651_v33 }
 0x1c1   :  { %v1409_v47 = vmax.f32 %v3824_v42, %v1345_v63  ;;  %v1346_v2 = vmax.f32 %v1226_v30, 0.0  ;;  %v1774_v16 = vmax.f32 %v1660_v11, 0.0 }
 0x1c2   :  { %v1837_v4 = vmax.f32 %v1411_v26, %v1773_v27  ;;  %v1412_v55 = vmax.f32 %v3825_v45, %v1348_v40  ;;  %v1772_v7 = vmax.f32 %v1652_v39, 0.0 }
 0x1c3   :  { %v1835_v22 = vmax.f32 %v1409_v47, %v1771_v36  ;;  %v1410_v1 = vmax.f32 %v3826_v37, %v1346_v2  ;;  %v2389_v6 = vpop.f32.mrb[112].mxu0 }
 0x1c4   :  { %1902 = vst.msk [vmem:[%s3797_s3 + $0x170] sm:$0xff] %vm1855_vm1, %v1837_v4  ;;  %v1838_v32 = vmax.f32 %v1412_v55, %v1774_v16  ;;  %v1247_v25 = vadd.f32 %v3370_v13, %v2389_v6  ;;  %v2459_v17 = vpop.f32.mrb[112].mxu1  ;;  %v1238_v43 = vpop.f32.mrb[113].mxu0  ;;  %v3831_v55 = vld [vmem:[#allocation13_spill] sm:$0xff] }
 0x1c5   :  { %1900 = vst.msk [vmem:[%s3797_s3 + $0x160] sm:$0xff] %vm1855_vm1, %v1835_v22  ;;  %v1836_v58 = vmax.f32 %v1410_v1, %v1772_v7  ;;  %v1673_v8 = vadd.f32 %v3370_v13, %v2459_v17  ;;  %v1239_v14 = vadd.f32 %v3370_v13, %v1238_v43  ;;  %v1664_v29 = vpop.f32.mrb[113].mxu1  ;;  %v2390_v35 = vpop.f32.mrb[114].mxu0  ;;  %v3832_v7 = vld [vmem:[#allocation14_spill] sm:$0xff]  ;;  %v3833_v17 = vld [vmem:[#allocation15_spill] sm:$0xff] }
 0x1c6   :  { %1903 = vst.msk [vmem:[%s3797_s3 + $0x178] sm:$0xff] %vm1855_vm1, %v1838_v32  ;;  %v1351_v50 = vmax.f32 %v1247_v25, 0.0  ;;  %v1665_v38 = vadd.f32 %v3370_v13, %v1664_v29  ;;  %v1250_v31 = vadd.f32 %v3370_v13, %v2390_v35  ;;  %v2460_v18 = vpop.f32.mrb[114].mxu1  ;;  %v1241_v54 = vpop.f32.mrb[115].mxu0 }
 0x1c7   :  { %1901 = vst.msk [vmem:[%s3797_s3 + $0x168] sm:$0xff] %vm1855_vm1, %v1836_v58  ;;  %v1777_v60 = vmax.f32 %v1673_v8, 0.0  ;;  %v1349_v52 = vmax.f32 %v1239_v14, 0.0  ;;  %v1676_v44 = vadd.f32 %v3370_v13, %v2460_v18  ;;  %v1242_v41 = vadd.f32 %v3370_v13, %v1241_v54  ;;  %v1667_v12 = vpop.f32.mrb[115].mxu1  ;;  %v3834_v14 = vld [vmem:[#allocation16_spill] sm:$0xff] }
 0x1c8   :  { %v1415_v15 = vmax.f32 %v3827_v46, %v1351_v50  ;;  %v1775_v19 = vmax.f32 %v1665_v38, 0.0  ;;  %v1352_v48 = vmax.f32 %v1250_v31, 0.0  ;;  %v1668_v21 = vadd.f32 %v3370_v13, %v1667_v12 }
 0x1c9   :  { %v1413_v28 = vmax.f32 %v3828_v23, %v1349_v52  ;;  %v1350_v10 = vmax.f32 %v1242_v41, 0.0  ;;  %v1778_v0 = vmax.f32 %v1676_v44, 0.0 }
 0x1ca   :  { %v1841_v3 = vmax.f32 %v1415_v15, %v1777_v60  ;;  %v1416_v5 = vmax.f32 %v3829_v20, %v1352_v48  ;;  %v1776_v62 = vmax.f32 %v1668_v21, 0.0 }
 0x1cb   :  { %v1839_v56 = vmax.f32 %v1413_v28, %v1775_v19  ;;  %v1414_v53 = vmax.f32 %v3830_v57, %v1350_v10  ;;  %v2393_v59 = vpop.f32.mrb[116].mxu0 }
 0x1cc   :  { %1906 = vst.msk [vmem:[%s3797_s3 + $0x190] sm:$0xff] %vm1855_vm1, %v1841_v3  ;;  %v1842_v9 = vmax.f32 %v1416_v5, %v1778_v0  ;;  %v1263_v24 = vadd.f32 %v3370_v13, %v2393_v59  ;;  %v2463_v61 = vpop.f32.mrb[116].mxu1  ;;  %v1254_v49 = vpop.f32.mrb[117].mxu0  ;;  %v3835_v5 = vld [vmem:[#allocation17_spill] sm:$0xff] }
 0x1cd   :  { %1904 = vst.msk [vmem:[%s3797_s3 + $0x180] sm:$0xff] %vm1855_vm1, %v1839_v56  ;;  %v1840_v27 = vmax.f32 %v1414_v53, %v1776_v62  ;;  %v1689_v63 = vadd.f32 %v3370_v13, %v2463_v61  ;;  %v1255_v11 = vadd.f32 %v3370_v13, %v1254_v49  ;;  %v1680_v30 = vpop.f32.mrb[117].mxu1  ;;  %v2394_v33 = vpop.f32.mrb[118].mxu0  ;;  %v3836_v62 = vld [vmem:[#allocation18_spill] sm:$0xff]  ;;  %v3837_v61 = vld [vmem:[#allocation19_spill] sm:$0xff] }
 0x1ce   :  { %1907 = vst.msk [vmem:[%s3797_s3 + $0x198] sm:$0xff] %vm1855_vm1, %v1842_v9  ;;  %v1355_v34 = vmax.f32 %v1263_v24, 0.0  ;;  %v1681_v26 = vadd.f32 %v3370_v13, %v1680_v30  ;;  %v1266_v36 = vadd.f32 %v3370_v13, %v2394_v33  ;;  %v2464_v40 = vpop.f32.mrb[118].mxu1  ;;  %v1257_v39 = vpop.f32.mrb[119].mxu0 }
 0x1cf   :  { %1905 = vst.msk [vmem:[%s3797_s3 + $0x188] sm:$0xff] %vm1855_vm1, %v1840_v27  ;;  %v1781_v42 = vmax.f32 %v1689_v63, 0.0  ;;  %v1353_v47 = vmax.f32 %v1255_v11, 0.0  ;;  %v1692_v2 = vadd.f32 %v3370_v13, %v2464_v40  ;;  %v1258_v4 = vadd.f32 %v3370_v13, %v1257_v39  ;;  %v1683_v45 = vpop.f32.mrb[119].mxu1  ;;  %v3838_v11 = vld [vmem:[#allocation20_spill] sm:$0xff] }
 0x1d0   :  { %v1419_v16 = vmax.f32 %v3831_v55, %v1355_v34  ;;  %v1779_v22 = vmax.f32 %v1681_v26, 0.0  ;;  %v1356_v37 = vmax.f32 %v1266_v36, 0.0  ;;  %v1684_v1 = vadd.f32 %v3370_v13, %v1683_v45 }
 0x1d1   :  { %v1417_v6 = vmax.f32 %v3832_v7, %v1353_v47  ;;  %v1354_v32 = vmax.f32 %v1258_v4, 0.0  ;;  %v1782_v58 = vmax.f32 %v1692_v2, 0.0 }
 0x1d2   :  { %v1845_v25 = vmax.f32 %v1419_v16, %v1781_v42  ;;  %v1420_v43 = vmax.f32 %v3833_v17, %v1356_v37  ;;  %v1780_v35 = vmax.f32 %v1684_v1, 0.0 }
 0x1d3   :  { %v1843_v8 = vmax.f32 %v1417_v6, %v1779_v22  ;;  %v1418_v29 = vmax.f32 %v3834_v14, %v1354_v32  ;;  %v2397_v50 = vpop.f32.mrb[120].mxu0 }
 0x1d4   :  { %1910 = vst.msk [vmem:[%s3797_s3 + $0x1b0] sm:$0xff] %vm1855_vm1, %v1845_v25  ;;  %v1846_v38 = vmax.f32 %v1420_v43, %v1782_v58  ;;  %v1279_v31 = vadd.f32 %v3370_v13, %v2397_v50  ;;  %v2467_v18 = vpop.f32.mrb[120].mxu1  ;;  %v1270_v54 = vpop.f32.mrb[121].mxu0  ;;  %v2474_v25 = vld [vmem:[%s3796_s2] ss:$0 sm:$0xff] }
 0x1d5   :  { %1908 = vst.msk [vmem:[%s3797_s3 + $0x1a0] sm:$0xff] %vm1855_vm1, %v1843_v8  ;;  %v1844_v60 = vmax.f32 %v1418_v29, %v1780_v35  ;;  %v1705_v52 = vadd.f32 %v3370_v13, %v2467_v18  ;;  %v1271_v44 = vadd.f32 %v3370_v13, %v1270_v54  ;;  %v1696_v41 = vpop.f32.mrb[121].mxu1  ;;  %v2398_v12 = vpop.f32.mrb[122].mxu0  ;;  %v3839_v35 = vld [vmem:[#allocation21_spill] sm:$0xff]  ;;  %v3840_v18 = vld [vmem:[#allocation22_spill] sm:$0xff] }
 0x1d6   :  { %1911 = vst.msk [vmem:[%s3797_s3 + $0x1b8] sm:$0xff] %vm1855_vm1, %v1846_v38  ;;  %v1359_v46 = vmax.f32 %v1279_v31, 0.0  ;;  %v1697_v15 = vadd.f32 %v3370_v13, %v1696_v41  ;;  %v1282_v19 = vadd.f32 %v3370_v13, %v2398_v12  ;;  %v2468_v48 = vpop.f32.mrb[122].mxu1  ;;  %v1273_v21 = vpop.f32.mrb[123].mxu0 }
 0x1d7   :  { %1909 = vst.msk [vmem:[%s3797_s3 + $0x1a8] sm:$0xff] %vm1855_vm1, %v1844_v60  ;;  %v1785_v23 = vmax.f32 %v1705_v52, 0.0  ;;  %v1357_v28 = vmax.f32 %v1271_v44, 0.0  ;;  %v1708_v10 = vadd.f32 %v3370_v13, %v2468_v48  ;;  %v1274_v3 = vadd.f32 %v3370_v13, %v1273_v21  ;;  %v1699_v20 = vpop.f32.mrb[123].mxu1 }
 0x1d8   :  { %v1423_v0 = vmax.f32 %v3835_v5, %v1359_v46  ;;  %v1783_v56 = vmax.f32 %v1697_v15, 0.0  ;;  %v1360_v57 = vmax.f32 %v1282_v19, 0.0  ;;  %v1700_v53 = vadd.f32 %v3370_v13, %v1699_v20 }
 0x1d9   :  { %v1421_v59 = vmax.f32 %v3836_v62, %v1357_v28  ;;  %v1358_v9 = vmax.f32 %v1274_v3, 0.0  ;;  %v1786_v27 = vmax.f32 %v1708_v10, 0.0 }
 0x1da   :  { %v1849_v24 = vmax.f32 %v1423_v0, %v1785_v23  ;;  %v1424_v49 = vmax.f32 %v3837_v61, %v1360_v57  ;;  %v1784_v33 = vmax.f32 %v1700_v53, 0.0 }
 0x1db   :  { %v1847_v63 = vmax.f32 %v1421_v59, %v1783_v56  ;;  %v1422_v30 = vmax.f32 %v3838_v11, %v1358_v9  ;;  %v2401_v34 = vpop.f32.mrb[124].mxu0 }
 0x1dc   :  { %1914 = vst.msk [vmem:[%s3797_s3 + $0x1d0] sm:$0xff] %vm1855_vm1, %v1849_v24  ;;  %v1850_v26 = vmax.f32 %v1424_v49, %v1786_v27  ;;  %v1295_v36 = vadd.f32 %v3370_v13, %v2401_v34  ;;  %v2471_v40 = vpop.f32.mrb[124].mxu1  ;;  %v1286_v39 = vpop.f32.mrb[125].mxu0 }
 0x1dd   :  { %1912 = vst.msk [vmem:[%s3797_s3 + $0x1c0] sm:$0xff] %vm1855_vm1, %v1847_v63  ;;  %v1848_v42 = vmax.f32 %v1422_v30, %v1784_v33  ;;  %v1721_v47 = vadd.f32 %v3370_v13, %v2471_v40  ;;  %v1287_v2 = vadd.f32 %v3370_v13, %v1286_v39  ;;  %v1712_v4 = vpop.f32.mrb[125].mxu1  ;;  %v2402_v45 = vpop.f32.mrb[126].mxu0 }
 0x1de   :  { %1915 = vst.msk [vmem:[%s3797_s3 + $0x1d8] sm:$0xff] %vm1855_vm1, %v1850_v26  ;;  %v1363_v55 = vmax.f32 %v1295_v36, 0.0  ;;  %v1713_v16 = vadd.f32 %v3370_v13, %v1712_v4  ;;  %v1298_v22 = vadd.f32 %v3370_v13, %v2402_v45  ;;  %v2472_v37 = vpop.f32.mrb[126].mxu1  ;;  %v1289_v1 = vpop.f32.mrb[127].mxu0 }
 0x1df   :  { %1913 = vst.msk [vmem:[%s3797_s3 + $0x1c8] sm:$0xff] %vm1855_vm1, %v1848_v42  ;;  %v1789_v7 = vmax.f32 %v1721_v47, 0.0  ;;  %v1361_v6 = vmax.f32 %v1287_v2, 0.0  ;;  %v1724_v32 = vadd.f32 %v3370_v13, %v2472_v37  ;;  %v1290_v17 = vadd.f32 %v2474_v25, %v1289_v1  ;;  %v1715_v43 = vpop.f32.mrb[127].mxu1  ;;  %v3841_v13 = vld [vmem:[#allocation23_spill] sm:$0xff] }
 0x1e0   :  { %v1427_v58 = vmax.f32 %v3332_v51, %v1363_v55  ;;  %v1787_v8 = vmax.f32 %v1713_v16, 0.0  ;;  %v1364_v14 = vmax.f32 %v1298_v22, 0.0  ;;  %v1716_v29 = vadd.f32 %v2474_v25, %v1715_v43 }
 0x1e1   :  { %v1425_v50 = vmax.f32 %v3839_v35, %v1361_v6  ;;  %v1362_v38 = vmax.f32 %v1290_v17, 0.0  ;;  %v1790_v60 = vmax.f32 %v1724_v32, 0.0 }
 0x1e2   :  { %v1853_v31 = vmax.f32 %v1427_v58, %v1789_v7  ;;  %v1428_v54 = vmax.f32 %v3840_v18, %v1364_v14  ;;  %v1788_v41 = vmax.f32 %v1716_v29, 0.0 }
 0x1e3   :  { %v1851_v52 = vmax.f32 %v1425_v50, %v1787_v8  ;;  %v1426_v44 = vmax.f32 %v3841_v13, %v1362_v38 }
 0x1e4   :  { %1918 = vst.msk [vmem:[%s3797_s3 + $0x1f0] sm:$0xff] %vm1855_vm1, %v1853_v31  ;;  %v1854_v51 = vmax.f32 %v1428_v54, %v1790_v60 }
 0x1e5   :  { %1916 = vst.msk [vmem:[%s3797_s3 + $0x1e0] sm:$0xff] %vm1855_vm1, %v1851_v52  ;;  %v1852_v12 = vmax.f32 %v1426_v44, %v1788_v41 }
 0x1e6   :  { %1919 = vst.msk [vmem:[%s3797_s3 + $0x1f8] sm:$0xff] %vm1855_vm1, %v1854_v51 }
 0x1e7   :  { %1917 = vst.msk [vmem:[%s3797_s3 + $0x1e8] sm:$0xff] %vm1855_vm1, %v1852_v12 }

// kernel: vpt_forward.7
= control target key start
LH: loop header
LB: loop body
LE: loop exit
PB: predicated region body
PF: predicated region fallthrough
CT: control target
= control target key end

     0   :  { %vm58_vm0 = vcmask 523264   ;;  %vm619_vm1 = vcmask 64512   ;;  %s1212_s1 = inlined_call_operand.vmem [shape: f32[256,8], index: 1, kind: input, shape index: {}]   ;;  %s1213_s0 = inlined_call_operand.vmem [shape: f32[128,64], index: 0, kind: input, shape index: {}]   ;;  %s1214_s2 = inlined_call_operand.vmem [shape: f32[1,8], index: 2, kind: input, shape index: {}]   ;;  %s1215_s3 = inlined_call_operand.vmem [shape: f32[128,8], index: 3, kind: output, shape index: {}]  }
   0x1   :  { %v40_v0 = vld [vmem:[%s1212_s1] sm:$0xff]  ;;  %v41_v1 = vld [vmem:[%s1212_s1 + $0x8] sm:$0xff]  ;;  %v42_v5 = vld [vmem:[%s1212_s1 + $0x10] sm:$0xff] }
   0x2   :  { %v196_v2 = vld [vmem:[%s1212_s1 + $0x40] sm:$0xff]  ;;  %v48_v3 = vpack.c.bf16 %v41_v1, %v40_v0  ;;  %v197_v4 = vld [vmem:[%s1212_s1 + $0x48] sm:$0xff]  ;;  %v43_v6 = vld [vmem:[%s1212_s1 + $0x18] sm:$0xff] }
   0x3   :  { %v204_v7 = vpack.c.bf16 %v197_v4, %v196_v2  ;;  %v49_v8 = vpack.c.bf16 %v43_v6, %v42_v5  ;;  %v198_v9 = vld [vmem:[%s1212_s1 + $0x50] sm:$0xff]  ;;  %v199_v10 = vld [vmem:[%s1212_s1 + $0x58] sm:$0xff]  ;;  %v44_v11 = vld [vmem:[%s1212_s1 + $0x20] sm:$0xff] }
   0x4   :  { %721 = vmatprep.subr.bf16.mxu0 %v48_v3  ;;  %v205_v12 = vpack.c.bf16 %v199_v10, %v198_v9  ;;  %v45_v13 = vld [vmem:[%s1212_s1 + $0x28] sm:$0xff]  ;;  %v200_v14 = vld [vmem:[%s1212_s1 + $0x60] sm:$0xff]  ;;  %v46_v20 = vld [vmem:[%s1212_s1 + $0x30] sm:$0xff] }
   0x5   :  { %v201_v15 = vld [vmem:[%s1212_s1 + $0x68] sm:$0xff]  ;;  %745 = vmatprep.subr.bf16.mxu1 %v204_v7  ;;  %722 = vmatpush3.bf16.msra.mxu0 %v48_v3  ;;  %v50_v16 = vpack.c.bf16 %v45_v13, %v44_v11  ;;  %v15_v17 = vld [vmem:[%s1213_s0] sm:$0xff]  ;;  %v47_v21 = vld [vmem:[%s1212_s1 + $0x38] sm:$0xff] }
   0x6   :  { %746 = vmatpush3.bf16.msra.mxu1 %v204_v7  ;;  %723 = vmatprep.subr.bf16.mxu0 %v49_v8  ;;  %v16_v18 = vld [vmem:[%s1213_s0 + $0x8] sm:$0xff]  ;;  %v206_v19 = vpack.c.bf16 %v201_v15, %v200_v14  ;;  %v202_v23 = vld [vmem:[%s1212_s1 + $0x70] sm:$0xff]  ;;  %v203_v24 = vld [vmem:[%s1212_s1 + $0x78] sm:$0xff]  ;;  %v51_v25 = vpack.c.bf16 %v47_v21, %v46_v20 }
   0x7   :  { %747 = vmatprep.subr.bf16.mxu1 %v205_v12  ;;  %v885_v22 = vpack.c.bf16 %v16_v18, %v15_v17  ;;  %v207_v26 = vpack.c.bf16 %v203_v24, %v202_v23  ;;  %v337_v27 = vld [vmem:[%s1212_s1 + $0x80] sm:$0xff]  ;;  %v338_v28 = vld [vmem:[%s1212_s1 + $0x88] sm:$0xff]  ;;  %v17_v31 = vld [vmem:[%s1213_s0 + $0x10] sm:$0xff] }
   0x8   :  { %v478_v29 = vld [vmem:[%s1212_s1 + $0xc0] sm:$0xff]  ;;  %v479_v30 = vld [vmem:[%s1212_s1 + $0xc8] sm:$0xff]  ;;  %v18_v32 = vld [vmem:[%s1213_s0 + $0x18] sm:$0xff]  ;;  %v345_v33 = vpack.c.bf16 %v338_v28, %v337_v27 }
   0x9   :  { %724 = vmatpush3.bf16.msra.mxu0 %v49_v8  ;;  %729 = vmatprep.mubr.msk.bf16.mxu0 %vm58_vm0, %v885_v22  ;;  %v486_v34 = vpack.c.bf16 %v479_v30, %v478_v29  ;;  %v19_v35 = vld [vmem:[%s1213_s0 + $0x20] sm:$0xff]  ;;  %v20_v36 = vld [vmem:[%s1213_s0 + $0x28] sm:$0xff]  ;;  %v921_v37 = vpack.c.bf16 %v18_v32, %v17_v31  ;;  %v339_v38 = vld [vmem:[%s1212_s1 + $0x90] sm:$0xff] }
   0xa   :  { %748 = vmatpush3.bf16.msra.mxu1 %v205_v12  ;;  %725 = vmatprep.subr.bf16.mxu0 %v50_v16  ;;  %v340_v39 = vld [vmem:[%s1212_s1 + $0x98] sm:$0xff]  ;;  %v480_v40 = vld [vmem:[%s1212_s1 + $0xd0] sm:$0xff]  ;;  %v935_v42 = vpack.c.bf16 %v20_v36, %v19_v35  ;;  %v341_v44 = vld [vmem:[%s1212_s1 + $0xa0] sm:$0xff] }
   0xb   :  { %749 = vmatprep.subr.bf16.mxu1 %v206_v19  ;;  %753 = vmatprep.mubr.msk.bf16.mxu1 %vm58_vm0, %v885_v22  ;;  %v481_v41 = vld [vmem:[%s1212_s1 + $0xd8] sm:$0xff]  ;;  %v346_v43 = vpack.c.bf16 %v340_v39, %v339_v38  ;;  %v342_v45 = vld [vmem:[%s1212_s1 + $0xa8] sm:$0xff]  ;;  %v482_v47 = vld [vmem:[%s1212_s1 + $0xe0] sm:$0xff] }
   0xc   :  { %v487_v46 = vpack.c.bf16 %v481_v41, %v480_v40  ;;  %v483_v48 = vld [vmem:[%s1212_s1 + $0xe8] sm:$0xff]  ;;  %v21_v49 = vld [vmem:[%s1213_s0 + $0x30] sm:$0xff]  ;;  %v22_v50 = vld [vmem:[%s1213_s0 + $0x38] sm:$0xff]  ;;  %v347_v53 = vpack.c.bf16 %v342_v45, %v341_v44 }
   0xd   :  { %726 = vmatpush3.bf16.msra.mxu0 %v50_v16  ;;  %v23_v51 = vld [vmem:[%s1213_s0 + $0x40] sm:$0xff]  ;;  %v24_v52 = vld [vmem:[%s1213_s0 + $0x48] sm:$0xff]  ;;  %v488_v54 = vpack.c.bf16 %v483_v48, %v482_v47  ;;  %v34_v55 = vpack.c.bf16 %v22_v50, %v21_v49  ;;  %v343_v56 = vld [vmem:[%s1212_s1 + $0xb0] sm:$0xff] }
   0xe   :  { %750 = vmatpush3.bf16.msra.mxu1 %v206_v19  ;;  %727 = vmatprep.subr.bf16.mxu0 %v51_v25  ;;  %v344_v57 = vld [vmem:[%s1212_s1 + $0xb8] sm:$0xff]  ;;  %v35_v58 = vpack.c.bf16 %v24_v52, %v23_v51  ;;  %v484_v59 = vld [vmem:[%s1212_s1 + $0xf0] sm:$0xff]  ;;  %v27_v1 = vld [vmem:[%s1213_s0 + $0x60] sm:$0xff] }
   0xf   :  { %751 = vmatprep.subr.bf16.mxu1 %v207_v26  ;;  %v485_v60 = vld [vmem:[%s1212_s1 + $0xf8] sm:$0xff]  ;;  %v348_v61 = vpack.c.bf16 %v344_v57, %v343_v56  ;;  %v25_v63 = vld [vmem:[%s1213_s0 + $0x50] sm:$0xff]  ;;  %v28_v2 = vld [vmem:[%s1213_s0 + $0x68] sm:$0xff] }
  0x10   :  { %v489_v62 = vpack.c.bf16 %v485_v60, %v484_v59  ;;  %v26_v0 = vld [vmem:[%s1213_s0 + $0x58] sm:$0xff]  ;;  %v37_v4 = vpack.c.bf16 %v28_v2, %v27_v1  ;;  %v29_v5 = vld [vmem:[%s1213_s0 + $0x70] sm:$0xff]  ;;  %v1034_v8 = vld [vmem:[%s1214_s2] ss:$0 sm:$0xff] }
  0x11   :  { %728 = vmatpush3.bf16.msra.mxu0 %v51_v25  ;;  %v36_v3 = vpack.c.bf16 %v26_v0, %v25_v63  ;;  %v30_v6 = vld [vmem:[%s1213_s0 + $0x78] sm:$0xff] }
  0x12   :  { %752 = vmatpush3.bf16.msra.mxu1 %v207_v26  ;;  %769 = vmatprep.subr.bf16.mxu0 %v345_v33  ;;  %v38_v7 = vpack.c.bf16 %v30_v6, %v29_v5 }
  0x13   :  { %793 = vmatprep.subr.bf16.mxu1 %v486_v34 }
  0x14   :  { %730 = vmatmul.mubr.msk.bf16.vlgmr.msra.gmra.mrb[0].mxu0 %vm58_vm0, %v921_v37 }
  0x15   :  { %754 = vmatmul.mubr.msk.bf16.vlgmr.msra.gmra.mrb[0].mxu1 %vm58_vm0, %v921_v37  ;;  %770 = vmatpush3.bf16.msra.mxu0 %v345_v33 }
  0x16   :  { %794 = vmatpush3.bf16.msra.mxu1 %v486_v34  ;;  %733 = vmatprep.mubr.msk.bf16.mxu0 %vm58_vm0, %v935_v42 }
  0x17   :  { %757 = vmatprep.mubr.msk.bf16.mxu1 %vm58_vm0, %v935_v42  ;;  %771 = vmatprep.subr.bf16.mxu0 %v346_v43 }
  0x18   :  { %795 = vmatprep.subr.bf16.mxu1 %v487_v46 }
  0x19   :  { %772 = vmatpush3.bf16.msra.mxu0 %v346_v43 }
  0x1a   :  { %796 = vmatpush3.bf16.msra.mxu1 %v487_v46  ;;  %773 = vmatprep.subr.bf16.mxu0 %v347_v53 }
  0x1b   :  { %797 = vmatprep.subr.bf16.mxu1 %v488_v54 }
  0x1c   :  { %734 = vmatmul.mubr.msk.bf16.gmra.mrb[4].mxu0 %vm58_vm0, %v34_v55 }
  0x1d   :  { %758 = vmatmul.mubr.msk.bf16.gmra.mrb[4].mxu1 %vm58_vm0, %v34_v55  ;;  %737 = vmatprep.mubr.msk.bf16.mxu0 %vm58_vm0, %v35_v58 }
  0x1e   :  { %761 = vmatprep.mubr.msk.bf16.mxu1 %vm58_vm0, %v35_v58  ;;  %774 = vmatpush3.bf16.msra.mxu0 %v347_v53 }
  0x1f   :  { %798 = vmatpush3.bf16.msra.mxu1 %v488_v54  ;;  %775 = vmatprep.subr.bf16.mxu0 %v348_v61 }
  0x20   :  { %799 = vmatprep.subr.bf16.mxu1 %v489_v62 }
  0x22   :  { %776 = vmatpush3.bf16.msra.mxu0 %v348_v61 }
  0x23   :  { %800 = vmatpush3.bf16.msra.mxu1 %v489_v62 }
  0x24   :  { %738 = vmatmul.mubr.msk.bf16.gmra.mrb[8].mxu0 %vm58_vm0, %v36_v3 }
  0x25   :  { %762 = vmatmul.mubr.msk.bf16.gmra.mrb[8].mxu1 %vm58_vm0, %v36_v3  ;;  %741 = vmatprep.mubr.msk.bf16.mxu0 %vm58_vm0, %v37_v4 }
  0x26   :  { %765 = vmatprep.mubr.msk.bf16.mxu1 %vm58_vm0, %v37_v4 }
  0x2c   :  { %742 = vmatmul.mubr.msk.bf16.gmra.mrb[12].mxu0 %vm58_vm0, %v38_v7 }
  0x2d   :  { %766 = vmatmul.mubr.msk.bf16.gmra.mrb[12].mxu1 %vm58_vm0, %v38_v7  ;;  %777 = vmatprep.mubr.msk.bf16.mxu0 %vm58_vm0, %v885_v22 }
  0x2e   :  { %801 = vmatprep.mubr.msk.bf16.mxu1 %vm58_vm0, %v885_v22 }
  0x34   :  { %778 = vmatmul.mubr.msk.bf16.vlgmr.msra.gmra.mrb[16].mxu0 %vm58_vm0, %v921_v37 }
  0x35   :  { %802 = vmatmul.mubr.msk.bf16.vlgmr.msra.gmra.mrb[16].mxu1 %vm58_vm0, %v921_v37  ;;  %781 = vmatprep.mubr.msk.bf16.mxu0 %vm58_vm0, %v935_v42 }
  0x36   :  { %805 = vmatprep.mubr.msk.bf16.mxu1 %vm58_vm0, %v935_v42 }
  0x3c   :  { %782 = vmatmul.mubr.msk.bf16.gmra.mrb[20].mxu0 %vm58_vm0, %v34_v55 }
  0x3d   :  { %806 = vmatmul.mubr.msk.bf16.gmra.mrb[20].mxu1 %vm58_vm0, %v34_v55  ;;  %785 = vmatprep.mubr.msk.bf16.mxu0 %vm58_vm0, %v35_v58 }
  0x3e   :  { %809 = vmatprep.mubr.msk.bf16.mxu1 %vm58_vm0, %v35_v58 }
  0x44   :  { %786 = vmatmul.mubr.msk.bf16.gmra.mrb[24].mxu0 %vm58_vm0, %v36_v3 }
  0x45   :  { %810 = vmatmul.mubr.msk.bf16.gmra.mrb[24].mxu1 %vm58_vm0, %v36_v3  ;;  %789 = vmatprep.mubr.msk.bf16.mxu0 %vm58_vm0, %v37_v4 }
  0x46   :  { %813 = vmatprep.mubr.msk.bf16.mxu1 %vm58_vm0, %v37_v4 }
  0x4c   :  { %790 = vmatmul.mubr.msk.bf16.gmra.mrb[28].mxu0 %vm58_vm0, %v38_v7 }
  0x4d   :  { %814 = vmatmul.mubr.msk.bf16.gmra.mrb[28].mxu1 %vm58_vm0, %v38_v7 }
  0xe7   :  { %v731_v9 = vpop.f32.mrb[0].mxu0 }
  0xe8   :  { %v126_v10 = vadd.f32 %v731_v9, %v1034_v8  ;;  %v755_v11 = vpop.f32.mrb[0].mxu1  ;;  %v117_v12 = vpop.f32.mrb[1].mxu0 }
  0xe9   :  { %v251_v13 = vadd.f32 %v755_v11, %v1034_v8  ;;  %v118_v14 = vadd.f32 %v1034_v8, %v117_v12  ;;  %v242_v15 = vpop.f32.mrb[1].mxu1  ;;  %v732_v16 = vpop.f32.mrb[2].mxu0 }
  0xea   :  { %v182_v17 = vmax.f32 %v126_v10, 0.0  ;;  %v243_v18 = vadd.f32 %v1034_v8, %v242_v15  ;;  %v129_v19 = vadd.f32 %v732_v16, %v1034_v8  ;;  %v756_v20 = vpop.f32.mrb[2].mxu1  ;;  %v120_v21 = vpop.f32.mrb[3].mxu0 }
  0xeb   :  { %v307_v22 = vmax.f32 %v251_v13, 0.0  ;;  %v180_v23 = vmax.f32 %v118_v14, 0.0  ;;  %v254_v24 = vadd.f32 %v756_v20, %v1034_v8  ;;  %v121_v25 = vadd.f32 %v1034_v8, %v120_v21  ;;  %v245_v26 = vpop.f32.mrb[3].mxu1 }
  0xec   :  { %v305_v27 = vmax.f32 %v243_v18, 0.0  ;;  %v183_v28 = vmax.f32 %v129_v19, 0.0  ;;  %v246_v29 = vadd.f32 %v1034_v8, %v245_v26 }
  0xed   :  { %v1044_v30 = vmax.f32 %v182_v17, %v307_v22  ;;  %v308_v31 = vmax.f32 %v254_v24, 0.0  ;;  %v181_v32 = vmax.f32 %v121_v25, 0.0 }
  0xee   :  { %v1046_v33 = vmax.f32 %v180_v23, %v305_v27  ;;  %v306_v34 = vmax.f32 %v246_v29, 0.0 }
  0xef   :  { %v1048_v35 = vmax.f32 %v183_v28, %v308_v31  ;;  %v735_v36 = vpop.f32.mrb[4].mxu0 }
  0xf0   :  { %v1050_v37 = vmax.f32 %v181_v32, %v306_v34  ;;  %v142_v38 = vadd.f32 %v735_v36, %v1034_v8  ;;  %v759_v39 = vpop.f32.mrb[4].mxu1  ;;  %v133_v40 = vpop.f32.mrb[5].mxu0 }
  0xf1   :  { %v267_v41 = vadd.f32 %v759_v39, %v1034_v8  ;;  %v134_v42 = vadd.f32 %v1034_v8, %v133_v40  ;;  %v258_v43 = vpop.f32.mrb[5].mxu1  ;;  %v736_v44 = vpop.f32.mrb[6].mxu0 }
  0xf2   :  { %v186_v45 = vmax.f32 %v142_v38, 0.0  ;;  %v259_v46 = vadd.f32 %v1034_v8, %v258_v43  ;;  %v145_v47 = vadd.f32 %v736_v44, %v1034_v8  ;;  %v760_v48 = vpop.f32.mrb[6].mxu1  ;;  %v136_v49 = vpop.f32.mrb[7].mxu0 }
  0xf3   :  { %v311_v50 = vmax.f32 %v267_v41, 0.0  ;;  %v184_v51 = vmax.f32 %v134_v42, 0.0  ;;  %v270_v52 = vadd.f32 %v760_v48, %v1034_v8  ;;  %v137_v53 = vadd.f32 %v1034_v8, %v136_v49  ;;  %v261_v54 = vpop.f32.mrb[7].mxu1 }
  0xf4   :  { %v309_v55 = vmax.f32 %v259_v46, 0.0  ;;  %v187_v56 = vmax.f32 %v145_v47, 0.0  ;;  %v262_v57 = vadd.f32 %v1034_v8, %v261_v54 }
  0xf5   :  { %v1060_v58 = vmax.f32 %v186_v45, %v311_v50  ;;  %v312_v59 = vmax.f32 %v270_v52, 0.0  ;;  %v185_v60 = vmax.f32 %v137_v53, 0.0 }
  0xf6   :  { %v1062_v61 = vmax.f32 %v184_v51, %v309_v55  ;;  %v310_v62 = vmax.f32 %v262_v57, 0.0 }
  0xf7   :  { %v1064_v63 = vmax.f32 %v187_v56, %v312_v59  ;;  %v739_v0 = vpop.f32.mrb[8].mxu0 }
  0xf8   :  { %v1066_v1 = vmax.f32 %v185_v60, %v310_v62  ;;  %v158_v2 = vadd.f32 %v739_v0, %v1034_v8  ;;  %v763_v3 = vpop.f32.mrb[8].mxu1  ;;  %v149_v4 = vpop.f32.mrb[9].mxu0 }
  0xf9   :  { %v283_v5 = vadd.f32 %v763_v3, %v1034_v8  ;;  %v150_v6 = vadd.f32 %v1034_v8, %v149_v4  ;;  %v274_v7 = vpop.f32.mrb[9].mxu1  ;;  %v740_v9 = vpop.f32.mrb[10].mxu0 }
  0xfa   :  { %v190_v10 = vmax.f32 %v158_v2, 0.0  ;;  %v275_v11 = vadd.f32 %v1034_v8, %v274_v7  ;;  %v161_v12 = vadd.f32 %v740_v9, %v1034_v8  ;;  %v764_v13 = vpop.f32.mrb[10].mxu1  ;;  %v152_v14 = vpop.f32.mrb[11].mxu0 }
  0xfb   :  { %v315_v15 = vmax.f32 %v283_v5, 0.0  ;;  %v188_v16 = vmax.f32 %v150_v6, 0.0  ;;  %v286_v17 = vadd.f32 %v764_v13, %v1034_v8  ;;  %v153_v18 = vadd.f32 %v1034_v8, %v152_v14  ;;  %v277_v19 = vpop.f32.mrb[11].mxu1 }
  0xfc   :  { %v313_v20 = vmax.f32 %v275_v11, 0.0  ;;  %v191_v21 = vmax.f32 %v161_v12, 0.0  ;;  %v278_v22 = vadd.f32 %v1034_v8, %v277_v19 }
  0xfd   :  { %v1076_v23 = vmax.f32 %v190_v10, %v315_v15  ;;  %v316_v24 = vmax.f32 %v286_v17, 0.0  ;;  %v189_v25 = vmax.f32 %v153_v18, 0.0 }
  0xfe   :  { %v1078_v26 = vmax.f32 %v188_v16, %v313_v20  ;;  %v314_v27 = vmax.f32 %v278_v22, 0.0 }
  0xff   :  { %v1080_v28 = vmax.f32 %v191_v21, %v316_v24  ;;  %v743_v29 = vpop.f32.mrb[12].mxu0 }
 0x100   :  { %v1082_v31 = vmax.f32 %v189_v25, %v314_v27  ;;  %v174_v32 = vadd.f32 %v743_v29, %v1034_v8  ;;  %v767_v34 = vpop.f32.mrb[12].mxu1  ;;  %v165_v36 = vpop.f32.mrb[13].mxu0 }
 0x101   :  { %v299_v38 = vadd.f32 %v767_v34, %v1034_v8  ;;  %v166_v39 = vadd.f32 %v1034_v8, %v165_v36  ;;  %v290_v40 = vpop.f32.mrb[13].mxu1  ;;  %v744_v41 = vpop.f32.mrb[14].mxu0 }
 0x102   :  { %v194_v42 = vmax.f32 %v174_v32, 0.0  ;;  %v291_v43 = vadd.f32 %v1034_v8, %v290_v40  ;;  %v177_v44 = vadd.f32 %v744_v41, %v1034_v8  ;;  %v768_v45 = vpop.f32.mrb[14].mxu1  ;;  %v168_v46 = vpop.f32.mrb[15].mxu0 }
 0x103   :  { %v319_v47 = vmax.f32 %v299_v38, 0.0  ;;  %v192_v48 = vmax.f32 %v166_v39, 0.0  ;;  %v302_v49 = vadd.f32 %v768_v45, %v1034_v8  ;;  %v169_v50 = vadd.f32 %v1034_v8, %v168_v46  ;;  %v293_v51 = vpop.f32.mrb[15].mxu1 }
 0x104   :  { %v317_v52 = vmax.f32 %v291_v43, 0.0  ;;  %v195_v53 = vmax.f32 %v177_v44, 0.0  ;;  %v294_v54 = vadd.f32 %v1034_v8, %v293_v51 }
 0x105   :  { %v1092_v55 = vmax.f32 %v194_v42, %v319_v47  ;;  %v320_v56 = vmax.f32 %v302_v49, 0.0  ;;  %v193_v57 = vmax.f32 %v169_v50, 0.0 }
 0x106   :  { %v1094_v59 = vmax.f32 %v192_v48, %v317_v52  ;;  %v318_v60 = vmax.f32 %v294_v54, 0.0 }
 0x107   :  { %v1096_v62 = vmax.f32 %v195_v53, %v320_v56  ;;  %v779_v0 = vpop.f32.mrb[16].mxu0 }
 0x108   :  { %v1098_v2 = vmax.f32 %v193_v57, %v318_v60  ;;  %v392_v3 = vadd.f32 %v779_v0, %v1034_v8  ;;  %v803_v4 = vpop.f32.mrb[16].mxu1  ;;  %v383_v5 = vpop.f32.mrb[17].mxu0 }
 0x109   :  { %v533_v6 = vadd.f32 %v803_v4, %v1034_v8  ;;  %v384_v7 = vadd.f32 %v1034_v8, %v383_v5  ;;  %v524_v9 = vpop.f32.mrb[17].mxu1  ;;  %v780_v10 = vpop.f32.mrb[18].mxu0 }
 0x10a   :  { %v448_v11 = vmax.f32 %v392_v3, 0.0  ;;  %v525_v12 = vadd.f32 %v1034_v8, %v524_v9  ;;  %v395_v13 = vadd.f32 %v780_v10, %v1034_v8  ;;  %v804_v14 = vpop.f32.mrb[18].mxu1  ;;  %v386_v15 = vpop.f32.mrb[19].mxu0 }
 0x10b   :  { %v589_v16 = vmax.f32 %v533_v6, 0.0  ;;  %v446_v17 = vmax.f32 %v384_v7, 0.0  ;;  %v536_v18 = vadd.f32 %v804_v14, %v1034_v8  ;;  %v387_v19 = vadd.f32 %v1034_v8, %v386_v15  ;;  %v527_v20 = vpop.f32.mrb[19].mxu1 }
 0x10c   :  { %v464_v21 = vmax.f32 %v1044_v30, %v448_v11  ;;  %v587_v22 = vmax.f32 %v525_v12, 0.0  ;;  %v449_v24 = vmax.f32 %v395_v13, 0.0  ;;  %v528_v25 = vadd.f32 %v1034_v8, %v527_v20 }
 0x10d   :  { %v462_v27 = vmax.f32 %v1046_v33, %v446_v17  ;;  %v447_v29 = vmax.f32 %v387_v19, 0.0  ;;  %v590_v36 = vmax.f32 %v536_v18, 0.0 }
 0x10e   :  { %v605_v32 = vmax.f32 %v464_v21, %v589_v16  ;;  %v465_v34 = vmax.f32 %v1048_v35, %v449_v24  ;;  %v588_v40 = vmax.f32 %v528_v25, 0.0 }
 0x10f   :  { %v603_v38 = vmax.f32 %v462_v27, %v587_v22  ;;  %v463_v39 = vmax.f32 %v1050_v37, %v447_v29  ;;  %v783_v41 = vpop.f32.mrb[20].mxu0 }
 0x110   :  { %622 = vst.msk [vmem:[%s1215_s3 + $0x10] sm:$0xff] %vm619_vm1, %v605_v32  ;;  %v606_v30 = vmax.f32 %v465_v34, %v590_v36  ;;  %v408_v42 = vadd.f32 %v783_v41, %v1034_v8  ;;  %v807_v43 = vpop.f32.mrb[20].mxu1  ;;  %v399_v33 = vpop.f32.mrb[21].mxu0 }
 0x111   :  { %620 = vst.msk [vmem:[%s1215_s3] sm:$0xff] %vm619_vm1, %v603_v38  ;;  %v604_v35 = vmax.f32 %v463_v39, %v588_v40  ;;  %v549_v37 = vadd.f32 %v807_v43, %v1034_v8  ;;  %v400_v44 = vadd.f32 %v1034_v8, %v399_v33  ;;  %v540_v45 = vpop.f32.mrb[21].mxu1  ;;  %v784_v46 = vpop.f32.mrb[22].mxu0 }
 0x112   :  { %623 = vst.msk [vmem:[%s1215_s3 + $0x18] sm:$0xff] %vm619_vm1, %v606_v30  ;;  %v452_v47 = vmax.f32 %v408_v42, 0.0  ;;  %v541_v48 = vadd.f32 %v1034_v8, %v540_v45  ;;  %v411_v49 = vadd.f32 %v784_v46, %v1034_v8  ;;  %v808_v50 = vpop.f32.mrb[22].mxu1  ;;  %v402_v51 = vpop.f32.mrb[23].mxu0 }
 0x113   :  { %621 = vst.msk [vmem:[%s1215_s3 + $0x8] sm:$0xff] %vm619_vm1, %v604_v35  ;;  %v593_v52 = vmax.f32 %v549_v37, 0.0  ;;  %v450_v53 = vmax.f32 %v400_v44, 0.0  ;;  %v552_v54 = vadd.f32 %v808_v50, %v1034_v8  ;;  %v403_v56 = vadd.f32 %v1034_v8, %v402_v51  ;;  %v543_v57 = vpop.f32.mrb[23].mxu1 }
 0x114   :  { %v468_v60 = vmax.f32 %v1060_v58, %v452_v47  ;;  %v591_v0 = vmax.f32 %v541_v48, 0.0  ;;  %v453_v3 = vmax.f32 %v411_v49, 0.0  ;;  %v544_v4 = vadd.f32 %v1034_v8, %v543_v57 }
 0x115   :  { %v466_v5 = vmax.f32 %v1062_v61, %v450_v53  ;;  %v451_v6 = vmax.f32 %v403_v56, 0.0  ;;  %v594_v10 = vmax.f32 %v552_v54, 0.0 }
 0x116   :  { %v609_v7 = vmax.f32 %v468_v60, %v593_v52  ;;  %v469_v9 = vmax.f32 %v1064_v63, %v453_v3  ;;  %v592_v13 = vmax.f32 %v544_v4, 0.0 }
 0x117   :  { %v607_v11 = vmax.f32 %v466_v5, %v591_v0  ;;  %v467_v12 = vmax.f32 %v1066_v1, %v451_v6  ;;  %v787_v14 = vpop.f32.mrb[24].mxu0 }
 0x118   :  { %626 = vst.msk [vmem:[%s1215_s3 + $0x30] sm:$0xff] %vm619_vm1, %v609_v7  ;;  %v610_v58 = vmax.f32 %v469_v9, %v594_v10  ;;  %v424_v15 = vadd.f32 %v787_v14, %v1034_v8  ;;  %v811_v16 = vpop.f32.mrb[24].mxu1  ;;  %v415_v61 = vpop.f32.mrb[25].mxu0 }
 0x119   :  { %624 = vst.msk [vmem:[%s1215_s3 + $0x20] sm:$0xff] %vm619_vm1, %v607_v11  ;;  %v608_v63 = vmax.f32 %v467_v12, %v592_v13  ;;  %v565_v1 = vadd.f32 %v811_v16, %v1034_v8  ;;  %v416_v17 = vadd.f32 %v1034_v8, %v415_v61  ;;  %v556_v18 = vpop.f32.mrb[25].mxu1  ;;  %v788_v19 = vpop.f32.mrb[26].mxu0 }
 0x11a   :  { %627 = vst.msk [vmem:[%s1215_s3 + $0x38] sm:$0xff] %vm619_vm1, %v610_v58  ;;  %v456_v20 = vmax.f32 %v424_v15, 0.0  ;;  %v557_v21 = vadd.f32 %v1034_v8, %v556_v18  ;;  %v427_v22 = vadd.f32 %v788_v19, %v1034_v8  ;;  %v812_v24 = vpop.f32.mrb[26].mxu1  ;;  %v418_v25 = vpop.f32.mrb[27].mxu0 }
 0x11b   :  { %625 = vst.msk [vmem:[%s1215_s3 + $0x28] sm:$0xff] %vm619_vm1, %v608_v63  ;;  %v597_v27 = vmax.f32 %v565_v1, 0.0  ;;  %v454_v29 = vmax.f32 %v416_v17, 0.0  ;;  %v568_v32 = vadd.f32 %v812_v24, %v1034_v8  ;;  %v419_v34 = vadd.f32 %v1034_v8, %v418_v25  ;;  %v559_v36 = vpop.f32.mrb[27].mxu1 }
 0x11c   :  { %v472_v38 = vmax.f32 %v1076_v23, %v456_v20  ;;  %v595_v39 = vmax.f32 %v557_v21, 0.0  ;;  %v457_v40 = vmax.f32 %v427_v22, 0.0  ;;  %v560_v41 = vadd.f32 %v1034_v8, %v559_v36 }
 0x11d   :  { %v470_v30 = vmax.f32 %v1078_v26, %v454_v29  ;;  %v455_v42 = vmax.f32 %v419_v34, 0.0  ;;  %v598_v35 = vmax.f32 %v568_v32, 0.0 }
 0x11e   :  { %v613_v43 = vmax.f32 %v472_v38, %v597_v27  ;;  %v473_v33 = vmax.f32 %v1080_v28, %v457_v40  ;;  %v596_v45 = vmax.f32 %v560_v41, 0.0 }
 0x11f   :  { %v611_v37 = vmax.f32 %v470_v30, %v595_v39  ;;  %v471_v44 = vmax.f32 %v1082_v31, %v455_v42  ;;  %v791_v46 = vpop.f32.mrb[28].mxu0 }
 0x120   :  { %630 = vst.msk [vmem:[%s1215_s3 + $0x50] sm:$0xff] %vm619_vm1, %v613_v43  ;;  %v614_v23 = vmax.f32 %v473_v33, %v598_v35  ;;  %v440_v47 = vadd.f32 %v791_v46, %v1034_v8  ;;  %v815_v48 = vpop.f32.mrb[28].mxu1  ;;  %v431_v26 = vpop.f32.mrb[29].mxu0 }
 0x121   :  { %628 = vst.msk [vmem:[%s1215_s3 + $0x40] sm:$0xff] %vm619_vm1, %v611_v37  ;;  %v612_v28 = vmax.f32 %v471_v44, %v596_v45  ;;  %v581_v31 = vadd.f32 %v815_v48, %v1034_v8  ;;  %v432_v49 = vadd.f32 %v1034_v8, %v431_v26  ;;  %v572_v50 = vpop.f32.mrb[29].mxu1  ;;  %v792_v51 = vpop.f32.mrb[30].mxu0 }
 0x122   :  { %631 = vst.msk [vmem:[%s1215_s3 + $0x58] sm:$0xff] %vm619_vm1, %v614_v23  ;;  %v460_v52 = vmax.f32 %v440_v47, 0.0  ;;  %v573_v53 = vadd.f32 %v1034_v8, %v572_v50  ;;  %v443_v54 = vadd.f32 %v792_v51, %v1034_v8  ;;  %v816_v56 = vpop.f32.mrb[30].mxu1  ;;  %v434_v57 = vpop.f32.mrb[31].mxu0 }
 0x123   :  { %629 = vst.msk [vmem:[%s1215_s3 + $0x48] sm:$0xff] %vm619_vm1, %v612_v28  ;;  %v601_v60 = vmax.f32 %v581_v31, 0.0  ;;  %v458_v0 = vmax.f32 %v432_v49, 0.0  ;;  %v584_v3 = vadd.f32 %v816_v56, %v1034_v8  ;;  %v435_v4 = vadd.f32 %v1034_v8, %v434_v57  ;;  %v575_v5 = vpop.f32.mrb[31].mxu1 }
 0x124   :  { %v476_v6 = vmax.f32 %v1092_v55, %v460_v52  ;;  %v599_v7 = vmax.f32 %v573_v53, 0.0  ;;  %v461_v9 = vmax.f32 %v443_v54, 0.0  ;;  %v576_v10 = vadd.f32 %v1034_v8, %v575_v5 }
 0x125   :  { %v474_v11 = vmax.f32 %v1094_v59, %v458_v0  ;;  %v459_v12 = vmax.f32 %v435_v4, 0.0  ;;  %v602_v58 = vmax.f32 %v584_v3, 0.0 }
 0x126   :  { %v617_v13 = vmax.f32 %v476_v6, %v601_v60  ;;  %v477_v14 = vmax.f32 %v1096_v62, %v461_v9  ;;  %v600_v61 = vmax.f32 %v576_v10, 0.0 }
 0x127   :  { %v615_v15 = vmax.f32 %v474_v11, %v599_v7  ;;  %v475_v16 = vmax.f32 %v1098_v2, %v459_v12 }
 0x128   :  { %634 = vst.msk [vmem:[%s1215_s3 + $0x70] sm:$0xff] %vm619_vm1, %v617_v13  ;;  %v618_v55 = vmax.f32 %v477_v14, %v602_v58 }
 0x129   :  { %632 = vst.msk [vmem:[%s1215_s3 + $0x60] sm:$0xff] %vm619_vm1, %v615_v15  ;;  %v616_v8 = vmax.f32 %v475_v16, %v600_v61 }
 0x12a   :  { %635 = vst.msk [vmem:[%s1215_s3 + $0x78] sm:$0xff] %vm619_vm1, %v618_v55 }
 0x12b   :  { %633 = vst.msk [vmem:[%s1215_s3 + $0x68] sm:$0xff] %vm619_vm1, %v616_v8 }

// kernel: vpt_forward.8
= control target key start
LH: loop header
LB: loop body
LE: loop exit
PB: predicated region body
PF: predicated region fallthrough
CT: control target
= control target key end

     0   :  { %vm348_vm0 = vcmask 64512   ;;  %s729_s1 = inlined_call_operand.vmem [shape: f32[512,8], index: 1, kind: input, shape index: {}]   ;;  %s730_s0 = inlined_call_operand.vmem [shape: f32[32,128], index: 0, kind: input, shape index: {}]   ;;  %s731_s2 = inlined_call_operand.vmem [shape: f32[1,8], index: 2, kind: input, shape index: {}]   ;;  %s732_s3 = inlined_call_operand.vmem [shape: f32[32,8], index: 3, kind: output, shape index: {}]  }
   0x1   :  { %v22_v0 = vld [vmem:[%s729_s1] sm:$0xff]  ;;  %v23_v1 = vld [vmem:[%s729_s1 + $0x8] sm:$0xff]  ;;  %v24_v5 = vld [vmem:[%s729_s1 + $0x10] sm:$0xff] }
   0x2   :  { %v105_v2 = vld [vmem:[%s729_s1 + $0x80] sm:$0xff]  ;;  %v38_v3 = vpack.c.bf16 %v23_v1, %v22_v0  ;;  %v106_v4 = vld [vmem:[%s729_s1 + $0x88] sm:$0xff]  ;;  %v25_v6 = vld [vmem:[%s729_s1 + $0x18] sm:$0xff] }
   0x3   :  { %v121_v7 = vpack.c.bf16 %v106_v4, %v105_v2  ;;  %v39_v8 = vpack.c.bf16 %v25_v6, %v24_v5  ;;  %v107_v9 = vld [vmem:[%s729_s1 + $0x90] sm:$0xff]  ;;  %v108_v10 = vld [vmem:[%s729_s1 + $0x98] sm:$0xff]  ;;  %v26_v11 = vld [vmem:[%s729_s1 + $0x20] sm:$0xff] }
   0x4   :  { %398 = vmatprep.subr.bf16.mxu0 %v38_v3  ;;  %v122_v12 = vpack.c.bf16 %v108_v10, %v107_v9  ;;  %v27_v13 = vld [vmem:[%s729_s1 + $0x28] sm:$0xff]  ;;  %v109_v14 = vld [vmem:[%s729_s1 + $0xa0] sm:$0xff]  ;;  %v28_v18 = vld [vmem:[%s729_s1 + $0x30] sm:$0xff] }
   0x5   :  { %v110_v15 = vld [vmem:[%s729_s1 + $0xa8] sm:$0xff]  ;;  %418 = vmatprep.subr.bf16.mxu1 %v121_v7  ;;  %399 = vmatpush3.bf16.msra.mxu0 %v38_v3  ;;  %v40_v16 = vpack.c.bf16 %v27_v13, %v26_v11  ;;  %v29_v19 = vld [vmem:[%s729_s1 + $0x38] sm:$0xff]  ;;  %v111_v20 = vld [vmem:[%s729_s1 + $0xb0] sm:$0xff] }
   0x6   :  { %419 = vmatpush3.bf16.msra.mxu1 %v121_v7  ;;  %400 = vmatprep.subr.bf16.mxu0 %v39_v8  ;;  %v123_v17 = vpack.c.bf16 %v110_v15, %v109_v14  ;;  %v112_v21 = vld [vmem:[%s729_s1 + $0xb8] sm:$0xff]  ;;  %v41_v22 = vpack.c.bf16 %v29_v19, %v28_v18  ;;  %v30_v24 = vld [vmem:[%s729_s1 + $0x40] sm:$0xff]  ;;  %v31_v25 = vld [vmem:[%s729_s1 + $0x48] sm:$0xff] }
   0x7   :  { %420 = vmatprep.subr.bf16.mxu1 %v122_v12  ;;  %v124_v23 = vpack.c.bf16 %v112_v21, %v111_v20  ;;  %v15_v26 = vld [vmem:[%s730_s0] sm:$0xff]  ;;  %v114_v28 = vld [vmem:[%s729_s1 + $0xc8] sm:$0xff]  ;;  %v42_v31 = vpack.c.bf16 %v31_v25, %v30_v24  ;;  %v32_v33 = vld [vmem:[%s729_s1 + $0x50] sm:$0xff] }
   0x8   :  { %v113_v27 = vld [vmem:[%s729_s1 + $0xc0] sm:$0xff]  ;;  %v16_v29 = vld [vmem:[%s730_s0 + $0x8] sm:$0xff]  ;;  %v33_v34 = vld [vmem:[%s729_s1 + $0x58] sm:$0xff] }
   0x9   :  { %401 = vmatpush3.bf16.msra.mxu0 %v39_v8  ;;  %v564_v30 = vpack.c.bf16 %v16_v29, %v15_v26  ;;  %v125_v32 = vpack.c.bf16 %v114_v28, %v113_v27  ;;  %v115_v35 = vld [vmem:[%s729_s1 + $0xd0] sm:$0xff]  ;;  %v116_v36 = vld [vmem:[%s729_s1 + $0xd8] sm:$0xff]  ;;  %v43_v37 = vpack.c.bf16 %v33_v34, %v32_v33  ;;  %v34_v39 = vld [vmem:[%s729_s1 + $0x60] sm:$0xff] }
   0xa   :  { %421 = vmatpush3.bf16.msra.mxu1 %v122_v12  ;;  %402 = vmatprep.subr.bf16.mxu0 %v40_v16  ;;  %v126_v38 = vpack.c.bf16 %v116_v36, %v115_v35  ;;  %v35_v40 = vld [vmem:[%s729_s1 + $0x68] sm:$0xff]  ;;  %v117_v41 = vld [vmem:[%s729_s1 + $0xe0] sm:$0xff]  ;;  %v36_v45 = vld [vmem:[%s729_s1 + $0x70] sm:$0xff] }
   0xb   :  { %422 = vmatprep.subr.bf16.mxu1 %v123_v17  ;;  %414 = vmatprep.mubr.bf16.mxu0 %v564_v30  ;;  %v118_v42 = vld [vmem:[%s729_s1 + $0xe8] sm:$0xff]  ;;  %v44_v43 = vpack.c.bf16 %v35_v40, %v34_v39  ;;  %v37_v46 = vld [vmem:[%s729_s1 + $0x78] sm:$0xff]  ;;  %v119_v47 = vld [vmem:[%s729_s1 + $0xf0] sm:$0xff] }
   0xc   :  { %434 = vmatprep.mubr.bf16.mxu1 %v564_v30  ;;  %v127_v44 = vpack.c.bf16 %v118_v42, %v117_v41  ;;  %v120_v48 = vld [vmem:[%s729_s1 + $0xf8] sm:$0xff]  ;;  %v45_v49 = vpack.c.bf16 %v37_v46, %v36_v45  ;;  %v186_v51 = vld [vmem:[%s729_s1 + $0x100] sm:$0xff]  ;;  %v187_v52 = vld [vmem:[%s729_s1 + $0x108] sm:$0xff] }
   0xd   :  { %403 = vmatpush3.bf16.msra.mxu0 %v40_v16  ;;  %v128_v50 = vpack.c.bf16 %v120_v48, %v119_v47  ;;  %v267_v53 = vld [vmem:[%s729_s1 + $0x180] sm:$0xff]  ;;  %v268_v54 = vld [vmem:[%s729_s1 + $0x188] sm:$0xff]  ;;  %v17_v55 = vld [vmem:[%s730_s0 + $0x10] sm:$0xff]  ;;  %v202_v57 = vpack.c.bf16 %v187_v52, %v186_v51 }
   0xe   :  { %423 = vmatpush3.bf16.msra.mxu1 %v123_v17  ;;  %404 = vmatprep.subr.bf16.mxu0 %v41_v22  ;;  %v18_v56 = vld [vmem:[%s730_s0 + $0x18] sm:$0xff]  ;;  %v283_v58 = vpack.c.bf16 %v268_v54, %v267_v53  ;;  %v188_v59 = vld [vmem:[%s729_s1 + $0x110] sm:$0xff]  ;;  %v190_v2 = vld [vmem:[%s729_s1 + $0x120] sm:$0xff] }
   0xf   :  { %424 = vmatprep.subr.bf16.mxu1 %v124_v23  ;;  %v189_v60 = vld [vmem:[%s729_s1 + $0x118] sm:$0xff]  ;;  %v628_v61 = vpack.c.bf16 %v18_v56, %v17_v55  ;;  %v269_v62 = vld [vmem:[%s729_s1 + $0x190] sm:$0xff]  ;;  %v191_v3 = vld [vmem:[%s729_s1 + $0x128] sm:$0xff] }
  0x10   :  { %v270_v63 = vld [vmem:[%s729_s1 + $0x198] sm:$0xff]  ;;  %v203_v0 = vpack.c.bf16 %v189_v60, %v188_v59  ;;  %v271_v4 = vld [vmem:[%s729_s1 + $0x1a0] sm:$0xff]  ;;  %v272_v5 = vld [vmem:[%s729_s1 + $0x1a8] sm:$0xff]  ;;  %v204_v6 = vpack.c.bf16 %v191_v3, %v190_v2 }
  0x11   :  { %405 = vmatpush3.bf16.msra.mxu0 %v41_v22  ;;  %v284_v1 = vpack.c.bf16 %v270_v63, %v269_v62  ;;  %v285_v7 = vpack.c.bf16 %v272_v5, %v271_v4  ;;  %v192_v8 = vld [vmem:[%s729_s1 + $0x130] sm:$0xff]  ;;  %v193_v9 = vld [vmem:[%s729_s1 + $0x138] sm:$0xff]  ;;  %v194_v14 = vld [vmem:[%s729_s1 + $0x140] sm:$0xff] }
  0x12   :  { %425 = vmatpush3.bf16.msra.mxu1 %v124_v23  ;;  %406 = vmatprep.subr.bf16.mxu0 %v42_v31  ;;  %v273_v10 = vld [vmem:[%s729_s1 + $0x1b0] sm:$0xff]  ;;  %v274_v11 = vld [vmem:[%s729_s1 + $0x1b8] sm:$0xff]  ;;  %v205_v12 = vpack.c.bf16 %v193_v9, %v192_v8  ;;  %v195_v15 = vld [vmem:[%s729_s1 + $0x148] sm:$0xff] }
  0x13   :  { %426 = vmatprep.subr.bf16.mxu1 %v125_v32  ;;  %v286_v13 = vpack.c.bf16 %v274_v11, %v273_v10  ;;  %v275_v16 = vld [vmem:[%s729_s1 + $0x1c0] sm:$0xff]  ;;  %v276_v17 = vld [vmem:[%s729_s1 + $0x1c8] sm:$0xff]  ;;  %v206_v18 = vpack.c.bf16 %v195_v15, %v194_v14  ;;  %v196_v20 = vld [vmem:[%s729_s1 + $0x150] sm:$0xff] }
  0x14   :  { %v287_v19 = vpack.c.bf16 %v276_v17, %v275_v16  ;;  %v197_v21 = vld [vmem:[%s729_s1 + $0x158] sm:$0xff]  ;;  %v277_v22 = vld [vmem:[%s729_s1 + $0x1d0] sm:$0xff]  ;;  %v198_v26 = vld [vmem:[%s729_s1 + $0x160] sm:$0xff] }
  0x15   :  { %407 = vmatpush3.bf16.msra.mxu0 %v42_v31  ;;  %v278_v23 = vld [vmem:[%s729_s1 + $0x1d8] sm:$0xff]  ;;  %v207_v24 = vpack.c.bf16 %v197_v21, %v196_v20  ;;  %v199_v27 = vld [vmem:[%s729_s1 + $0x168] sm:$0xff]  ;;  %v279_v28 = vld [vmem:[%s729_s1 + $0x1e0] sm:$0xff] }
  0x16   :  { %427 = vmatpush3.bf16.msra.mxu1 %v125_v32  ;;  %408 = vmatprep.subr.bf16.mxu0 %v43_v37  ;;  %v288_v25 = vpack.c.bf16 %v278_v23, %v277_v22  ;;  %v280_v29 = vld [vmem:[%s729_s1 + $0x1e8] sm:$0xff]  ;;  %v200_v32 = vld [vmem:[%s729_s1 + $0x170] sm:$0xff]  ;;  %v201_v33 = vld [vmem:[%s729_s1 + $0x178] sm:$0xff] }
  0x17   :  { %428 = vmatprep.subr.bf16.mxu1 %v126_v38  ;;  %v289_v31 = vpack.c.bf16 %v280_v29, %v279_v28  ;;  %v281_v34 = vld [vmem:[%s729_s1 + $0x1f0] sm:$0xff]  ;;  %v282_v35 = vld [vmem:[%s729_s1 + $0x1f8] sm:$0xff]  ;;  %v209_v36 = vpack.c.bf16 %v201_v33, %v200_v32 }
  0x19   :  { %409 = vmatpush3.bf16.msra.mxu0 %v43_v37  ;;  %v290_v37 = vpack.c.bf16 %v282_v35, %v281_v34 }
  0x1a   :  { %429 = vmatpush3.bf16.msra.mxu1 %v126_v38  ;;  %410 = vmatprep.subr.bf16.mxu0 %v44_v43  ;;  %v357_v38 = vld [vmem:[%s731_s2] ss:$0 sm:$0xff] }
  0x1b   :  { %430 = vmatprep.subr.bf16.mxu1 %v127_v44 }
  0x1d   :  { %411 = vmatpush3.bf16.msra.mxu0 %v44_v43 }
  0x1e   :  { %431 = vmatpush3.bf16.msra.mxu1 %v127_v44  ;;  %412 = vmatprep.subr.bf16.mxu0 %v45_v49 }
  0x1f   :  { %432 = vmatprep.subr.bf16.mxu1 %v128_v50 }
  0x21   :  { %413 = vmatpush3.bf16.msra.mxu0 %v45_v49 }
  0x22   :  { %433 = vmatpush3.bf16.msra.mxu1 %v128_v50  ;;  %438 = vmatprep.subr.bf16.mxu0 %v202_v57 }
  0x23   :  { %458 = vmatprep.subr.bf16.mxu1 %v283_v58 }
  0x24   :  { %415 = vmatmul.mubr.bf16.vlgmr.msra.gmra.mrb[0].mxu0 %v628_v61 }
  0x25   :  { %435 = vmatmul.mubr.bf16.vlgmr.msra.gmra.mrb[0].mxu1 %v628_v61  ;;  %439 = vmatpush3.bf16.msra.mxu0 %v202_v57 }
  0x26   :  { %459 = vmatpush3.bf16.msra.mxu1 %v283_v58  ;;  %440 = vmatprep.subr.bf16.mxu0 %v203_v0 }
  0x27   :  { %460 = vmatprep.subr.bf16.mxu1 %v284_v1  ;;  %454 = vmatprep.mubr.bf16.mxu0 %v564_v30 }
  0x28   :  { %474 = vmatprep.mubr.bf16.mxu1 %v564_v30  ;;  %v208_v30 = vpack.c.bf16 %v199_v27, %v198_v26 }
  0x29   :  { %441 = vmatpush3.bf16.msra.mxu0 %v203_v0 }
  0x2a   :  { %461 = vmatpush3.bf16.msra.mxu1 %v284_v1  ;;  %442 = vmatprep.subr.bf16.mxu0 %v204_v6 }
  0x2b   :  { %462 = vmatprep.subr.bf16.mxu1 %v285_v7 }
  0x2d   :  { %443 = vmatpush3.bf16.msra.mxu0 %v204_v6 }
  0x2e   :  { %463 = vmatpush3.bf16.msra.mxu1 %v285_v7  ;;  %444 = vmatprep.subr.bf16.mxu0 %v205_v12 }
  0x2f   :  { %464 = vmatprep.subr.bf16.mxu1 %v286_v13 }
  0x31   :  { %445 = vmatpush3.bf16.msra.mxu0 %v205_v12 }
  0x32   :  { %465 = vmatpush3.bf16.msra.mxu1 %v286_v13  ;;  %446 = vmatprep.subr.bf16.mxu0 %v206_v18 }
  0x33   :  { %466 = vmatprep.subr.bf16.mxu1 %v287_v19 }
  0x35   :  { %447 = vmatpush3.bf16.msra.mxu0 %v206_v18 }
  0x36   :  { %467 = vmatpush3.bf16.msra.mxu1 %v287_v19  ;;  %448 = vmatprep.subr.bf16.mxu0 %v207_v24 }
  0x37   :  { %468 = vmatprep.subr.bf16.mxu1 %v288_v25 }
  0x39   :  { %449 = vmatpush3.bf16.msra.mxu0 %v207_v24 }
  0x3a   :  { %469 = vmatpush3.bf16.msra.mxu1 %v288_v25  ;;  %450 = vmatprep.subr.bf16.mxu0 %v208_v30 }
  0x3b   :  { %470 = vmatprep.subr.bf16.mxu1 %v289_v31 }
  0x3d   :  { %451 = vmatpush3.bf16.msra.mxu0 %v208_v30 }
  0x3e   :  { %471 = vmatpush3.bf16.msra.mxu1 %v289_v31  ;;  %452 = vmatprep.subr.bf16.mxu0 %v209_v36 }
  0x3f   :  { %472 = vmatprep.subr.bf16.mxu1 %v290_v37 }
  0x41   :  { %453 = vmatpush3.bf16.msra.mxu0 %v209_v36 }
  0x42   :  { %473 = vmatpush3.bf16.msra.mxu1 %v290_v37 }
  0x44   :  { %455 = vmatmul.mubr.bf16.vlgmr.msra.gmra.mrb[4].mxu0 %v628_v61 }
  0x45   :  { %475 = vmatmul.mubr.bf16.vlgmr.msra.gmra.mrb[4].mxu1 %v628_v61 }
  0xf7   :  { %v416_v39 = vpop.f32.mrb[0].mxu0 }
  0xf8   :  { %v95_v40 = vadd.f32 %v416_v39, %v357_v38  ;;  %v436_v41 = vpop.f32.mrb[0].mxu1  ;;  %v86_v42 = vpop.f32.mrb[1].mxu0 }
  0xf9   :  { %v172_v43 = vadd.f32 %v436_v41, %v357_v38  ;;  %v87_v44 = vadd.f32 %v357_v38, %v86_v42  ;;  %v163_v45 = vpop.f32.mrb[1].mxu1  ;;  %v417_v46 = vpop.f32.mrb[2].mxu0 }
  0xfa   :  { %v103_v47 = vmax.f32 %v95_v40, 0.0  ;;  %v164_v48 = vadd.f32 %v357_v38, %v163_v45  ;;  %v98_v49 = vadd.f32 %v417_v46, %v357_v38  ;;  %v437_v50 = vpop.f32.mrb[2].mxu1  ;;  %v89_v51 = vpop.f32.mrb[3].mxu0 }
  0xfb   :  { %v180_v52 = vmax.f32 %v172_v43, 0.0  ;;  %v101_v53 = vmax.f32 %v87_v44, 0.0  ;;  %v175_v54 = vadd.f32 %v437_v50, %v357_v38  ;;  %v90_v55 = vadd.f32 %v357_v38, %v89_v51  ;;  %v166_v56 = vpop.f32.mrb[3].mxu1 }
  0xfc   :  { %v178_v57 = vmax.f32 %v164_v48, 0.0  ;;  %v104_v58 = vmax.f32 %v98_v49, 0.0  ;;  %v167_v59 = vadd.f32 %v357_v38, %v166_v56 }
  0xfd   :  { %v184_v60 = vmax.f32 %v103_v47, %v180_v52  ;;  %v181_v61 = vmax.f32 %v175_v54, 0.0  ;;  %v102_v62 = vmax.f32 %v90_v55, 0.0 }
  0xfe   :  { %v182_v63 = vmax.f32 %v101_v53, %v178_v57  ;;  %v179_v0 = vmax.f32 %v167_v59, 0.0 }
  0xff   :  { %v185_v1 = vmax.f32 %v104_v58, %v181_v61 }
 0x100   :  { %v183_v2 = vmax.f32 %v102_v62, %v179_v0 }
 0x117   :  { %v456_v3 = vpop.f32.mrb[4].mxu0 }
 0x118   :  { %v253_v4 = vadd.f32 %v456_v3, %v357_v38  ;;  %v476_v5 = vpop.f32.mrb[4].mxu1  ;;  %v244_v6 = vpop.f32.mrb[5].mxu0 }
 0x119   :  { %v334_v7 = vadd.f32 %v476_v5, %v357_v38  ;;  %v245_v8 = vadd.f32 %v357_v38, %v244_v6  ;;  %v325_v9 = vpop.f32.mrb[5].mxu1  ;;  %v457_v10 = vpop.f32.mrb[6].mxu0 }
 0x11a   :  { %v261_v11 = vmax.f32 %v253_v4, 0.0  ;;  %v326_v12 = vadd.f32 %v357_v38, %v325_v9  ;;  %v256_v13 = vadd.f32 %v457_v10, %v357_v38  ;;  %v477_v14 = vpop.f32.mrb[6].mxu1  ;;  %v247_v15 = vpop.f32.mrb[7].mxu0 }
 0x11b   :  { %v342_v16 = vmax.f32 %v334_v7, 0.0  ;;  %v259_v17 = vmax.f32 %v245_v8, 0.0  ;;  %v337_v18 = vadd.f32 %v477_v14, %v357_v38  ;;  %v248_v19 = vadd.f32 %v357_v38, %v247_v15  ;;  %v328_v20 = vpop.f32.mrb[7].mxu1 }
 0x11c   :  { %v265_v21 = vmax.f32 %v184_v60, %v261_v11  ;;  %v340_v22 = vmax.f32 %v326_v12, 0.0  ;;  %v262_v23 = vmax.f32 %v256_v13, 0.0  ;;  %v329_v24 = vadd.f32 %v357_v38, %v328_v20 }
 0x11d   :  { %v263_v25 = vmax.f32 %v182_v63, %v259_v17  ;;  %v260_v26 = vmax.f32 %v248_v19, 0.0  ;;  %v343_v29 = vmax.f32 %v337_v18, 0.0 }
 0x11e   :  { %v346_v27 = vmax.f32 %v265_v21, %v342_v16  ;;  %v266_v28 = vmax.f32 %v185_v1, %v262_v23  ;;  %v341_v32 = vmax.f32 %v329_v24, 0.0 }
 0x11f   :  { %v344_v30 = vmax.f32 %v263_v25, %v340_v22  ;;  %v264_v31 = vmax.f32 %v183_v2, %v260_v26 }
 0x120   :  { %351 = vst.msk [vmem:[%s732_s3 + $0x10] sm:$0xff] %vm348_vm0, %v346_v27  ;;  %v347_v33 = vmax.f32 %v266_v28, %v343_v29 }
 0x121   :  { %349 = vst.msk [vmem:[%s732_s3] sm:$0xff] %vm348_vm0, %v344_v30  ;;  %v345_v34 = vmax.f32 %v264_v31, %v341_v32 }
 0x122   :  { %352 = vst.msk [vmem:[%s732_s3 + $0x18] sm:$0xff] %vm348_vm0, %v347_v33 }
 0x123   :  { %350 = vst.msk [vmem:[%s732_s3 + $0x8] sm:$0xff] %vm348_vm0, %v345_v34 }

// kernel: vpt_forward.9
= control target key start
LH: loop header
LB: loop body
LE: loop exit
PB: predicated region body
PF: predicated region fallthrough
CT: control target
= control target key end

     0   :  { %s2722_s0 = inlined_call_operand.vmem [shape: f32[8,32], index: 0, kind: input, shape index: {}]   ;;  %s2723_s1 = inlined_call_operand.vmem [shape: f32[32,16], index: 1, kind: input, shape index: {}]   ;;  %s2724_s2 = inlined_call_operand.vmem [shape: f32[1,16], index: 2, kind: input, shape index: {}]   ;;  %s2725_s3 = inlined_call_operand.vmem [shape: f32[16,32], index: 3, kind: input, shape index: {}]   ;;  %s2726_s4 = inlined_call_operand.vmem [shape: f32[1,32], index: 4, kind: input, shape index: {}]   ;;  %s2727_s5 = inlined_call_operand.vmem [shape: f32[8,32], index: 5, kind: input, shape index: {}]   ;;  %s2728_s6 = inlined_call_operand.vmem [shape: f32[32,96], index: 6, kind: input, shape index: {}]   ;;  %s2729_s7 = inlined_call_operand.vmem [shape: f32[1,96], index: 7, kind: input, shape index: {}]   ;;  %s2730_s8 = inlined_call_operand.vmem [shape: f32[32,32], index: 8, kind: input, shape index: {}]   ;;  %s2731_s9 = inlined_call_operand.vmem [shape: f32[1,32], index: 9, kind: input, shape index: {}]   ;;  %s2732_s10 = inlined_call_operand.vmem [shape: f32[32,32], index: 10, kind: input, shape index: {}]   ;;  %s2733_s11 = inlined_call_operand.vmem [shape: f32[1,32], index: 11, kind: input, shape index: {}]   ;;  %s2734_s12 = inlined_call_operand.vmem [shape: f32[32,32], index: 12, kind: input, shape index: {}]   ;;  %s2735_s13 = inlined_call_operand.vmem [shape: f32[1,32], index: 13, kind: input, shape index: {}]   ;;  %s2736_s14 = inlined_call_operand.vmem [shape: f32[1,32], index: 14, kind: input, shape index: {}]   ;;  %s2737_s15 = inlined_call_operand.vmem [shape: f32[1,32], index: 15, kind: input, shape index: {}]   ;;  %s2738_s16 = inlined_call_operand.vmem [shape: f32[32,8], index: 16, kind: input, shape index: {}]   ;;  %s2739_s17 = inlined_call_operand.vmem [shape: f32[1,8], index: 17, kind: input, shape index: {}]   ;;  %s2740_s18 = inlined_call_operand.hbm [shape: f32[8,8], index: 18, kind: output, shape index: {}]  }
   0x1   :  { %2742 = sst [smem:[#allocation7_spill]] %s2722_s0 }
   0x2   :  { %2743 = sst [smem:[#allocation8_spill]] %s2723_s1 }
   0x3   :  { %2744 = sst [smem:[#allocation9_spill]] %s2724_s2 }
   0x4   :  { %s2745_s29 = sld [smem:[#allocation8_spill]]  ;;  %v2262_v3 = vmov 0.0   ;;  %vm2263_vm0 = vmmov 0  }
   0x5   :  { %2045 = vmatprep.subr.bf16.mxu0 %v2262_v3  ;;  %2049 = vmatprep.mubr.msk.bf16.mxu0 %vm2263_vm0, %v2262_v3 }
   0x6   :  { %2053 = vmatprep.subr.bf16.mxu1 %v2262_v3  ;;  %2055 = vmatprep.mubr.msk.bf16.mxu1 %vm2263_vm0, %v2262_v3 }
   0xa   :  { %v63_v0 = vld [vmem:[%s2745_s29] sm:$0xff]  ;;  %v64_v1 = vld [vmem:[%s2745_s29 + $0x8] sm:$0xff]  ;;  %v65_v2 = vld [vmem:[%s2745_s29 + $0x10] sm:$0xff] }
   0xb   :  { %v67_v4 = vpack.c.bf16 %v64_v1, %v63_v0  ;;  %v66_v5 = vld [vmem:[%s2745_s29 + $0x18] sm:$0xff] }
   0xc   :  { %23 = vsyncpa [#allocation5], 0  ;;  %v68_v6 = vpack.c.bf16 %v66_v5, %v65_v2  ;;  %s2746_s23 = sld [smem:[#allocation7_spill]]  ;;  %vm76_vm1 = vcmask 261120   ;;  %v122_v9 = vld [vmem:[%s2725_s3] sm:$0xff]  ;;  %v123_v10 = vld [vmem:[%s2725_s3 + $0x8] sm:$0xff] }
   0xd   :  { %2046 = vmatpush3.bf16.msra.mxu0 %v67_v4  ;;  %v124_v11 = vpack.c.bf16 %v123_v10, %v122_v9  ;;  %s2747_s30 = sld [smem:[#allocation9_spill]]  ;;  %vm132_vm2 = vcmask 130048   ;;  %v1947_v20 = vld [vmem:[%s2726_s4] ss:$0 sm:$0xff]  ;;  %v194_v35 = vld [vmem:[%s2728_s6 + $0x8] sm:$0xff]  ;;  %v195_v36 = vld [vmem:[%s2728_s6 + $0x10] sm:$0xff] }
   0xe   :  { %2047 = vmatprep.subr.bf16.mxu0 %v2262_v3  ;;  %v176_v22 = vld [vmem:[%s2727_s5] sm:$0xff]  ;;  %v196_v38 = vld [vmem:[%s2728_s6 + $0x18] sm:$0xff]  ;;  %vm249_vm3 = vcmask 785408   ;;  %s2264_s26 = smov 120   ;;  %s2265_s27 = smov 96   ;;  %vm259_vm4 = vcmask 64512  }
   0xf   :  { %2054 = vmatpush3.bf16.msra.mxu1 %v124_v11  ;;  %v193_v34 = vld [vmem:[%s2728_s6] sm:$0xff]  ;;  %v198_v39 = vpack.c.bf16 %v196_v38, %v195_v36  ;;  %s2267_s28 = smov 112   ;;  %s2268_s29 = smov 80   ;;  %vm355_vm5 = vcmask 1043456   ;;  %vm337_vm7 = vcmask 27648   ;;  %vm351_vm8 = vcmask 31744  }
  0x10   :  { %2059 = vmatprep.subr.bf16.mxu1 %v2262_v3  ;;  %v197_v37 = vpack.c.bf16 %v194_v35, %v193_v34  ;;  %v1949_v46 = vld [vmem:[%s2729_s7] ss:$0 sm:$0xff]  ;;  %s2266_s7 = smov 88   ;;  %s2270_s3 = smov 72   ;;  %vm428_vm9 = vcmask 60416   ;;  %vm604_vm10 = vcmask 126016  }
  0x11   :  { %2048 = vmatpush3.bf16.msra.mxu0 %v68_v6  ;;  %s2271_s0 = smov 64   ;;  %s2272_s19 = smov 48   ;;  %vm780_vm11 = vcmask 191616   ;;  %vm956_vm12 = vcmask 257216  }
  0x12   :  { %v61_v7 = vld [vmem:[%s2746_s23] sm:$0xff]  ;;  %2067 = vmatprep.subr.mxu0 %v2262_v3  ;;  %s2273_s1 = smov 56   ;;  %s2274_s4 = smov 40  }
  0x13   :  { %v62_v8 = vpack.c.bf16 %v61_v7, %v61_v7  ;;  %v1945_v12 = vld [vmem:[%s2747_s30] ss:$0 sm:$0xff]  ;;  %s2269_s30 = smov 104   ;;  %s2275_s5 = smov 8  }
  0x14   :  { %s2276_s20 = smov 16   ;;  %s2277_s21 = smov 24  }
  0x15   :  { %2050 = vmatmul.mubr.msk.bf16.vlgmr.msra.gmra.mrb[0].mxu0 %vm76_vm1, %v62_v8 }
  0x16   :  { %2069 = vmatprep.mubr.msk.f32.mxu0 %vm2263_vm0, %v2262_v3 }
  0xe8   :  { %v114_v13 = vpop.f32.mrb[0].mxu0 }
  0xe9   :  { %v115_v14 = vadd.f32 %v1945_v12, %v114_v13  ;;  %v2051_v15 = vpop.f32.mrb[1].mxu0  ;;  %v251_v12 = vlaneseq }
  0xea   :  { %v117_v16 = vpop.f32.mrb[2].mxu0 }
  0xeb   :  { %v120_v17 = vmax.f32 %v115_v14, 0.0  ;;  %v2052_v18 = vpop.f32.mrb[3].mxu0  ;;  %v252_v13 = vshrl.u32 %v251_v12, 7  ;;  %v254_v14 = vand.u32 127, %v251_v12 }
  0xed   :  { %v121_v19 = vpack.c.bf16 %v120_v17, %v120_v17  ;;  %vm2515_vm6 = vcmp.gt.s32.totalorder %v254_v14, %v252_v13 }
  0xef   :  { %2056 = vmatmul.mubr.msk.bf16.vlgmr.msra.gmra.mrb[0].mxu1 %vm132_vm2, %v121_v19 }
  0xf0   :  { %2063 = vmatprep.mubr.msk.bf16.mxu1 %vm2263_vm0, %v2262_v3  ;;  %2060 = vmatpush3.bf16.msra.mxu1 %v197_v37 }
  0xf1   :  { %2061 = vmatprep.subr.bf16.mxu1 %v2262_v3 }
  0xf4   :  { %2062 = vmatpush3.bf16.msra.mxu1 %v198_v39 }
  0xf5   :  { %2077 = vmatprep.subr.mxu1 %v2262_v3 }
 0x1c2   :  { %v170_v21 = vpop.f32.mrb[0].mxu1 }
 0x1c3   :  { %v171_v23 = vadd.f32 %v1947_v20, %v170_v21  ;;  %v2057_v24 = vpop.f32.mrb[1].mxu1 }
 0x1c4   :  { %v173_v25 = vpop.f32.mrb[2].mxu1 }
 0x1c5   :  { %v2418_v26 = vadd.f32 %v176_v22, %v171_v23  ;;  %v2058_v27 = vpop.f32.mrb[3].mxu1 }
 0x1c7   :  { %v178_v28 = vsel %vm76_vm1, %v2418_v26, 0.0 }
 0x1c8   :  { %179 = vadd.xlane.f32.xlu0 %v178_v28 }
 0x255   :  { %v180_v29 = vpop.xlane.xlu0 %179 }
 0x256   :  { %v182_v30 = vmul.f32 0.03125, %v180_v29 }
 0x258   :  { %v183_v31 = vsub.f32 %v2418_v26, %v182_v30 }
 0x25a   :  { %v184_v32 = vmul.f32 %v183_v31, %v183_v31 }
 0x25c   :  { %v185_v33 = vsel %vm76_vm1, %v184_v32, 0.0 }
 0x25d   :  { %186 = vadd.xlane.f32.xlu0 %v185_v33 }
 0x2ea   :  { %v187_v40 = vpop.xlane.xlu0 %186 }
 0x2eb   :  { %v188_v41 = vmul.f32 0.03125, %v187_v40 }
 0x2ed   :  { %v189_v42 = vadd.f32 1e-05, %v188_v41 }
 0x2ef   :  { %2196 = vrsqrt.f32 %v189_v42 }
 0x2f9   :  { %v2197_v43 = vpop.eup %2196 }
 0x2fa   :  { %v191_v44 = vmul.f32 %v2197_v43, %v183_v31 }
 0x2fc   :  { %v192_v45 = vpack.c.bf16 %v191_v44, %v191_v44 }
 0x2fe   :  { %2064 = vmatmul.mubr.msk.bf16.vlgmr.msra.gmra.mrb[4].mxu1 %vm76_vm1, %v192_v45 }
 0x2ff   :  { %2079 = vmatprep.mubr.msk.f32.mxu1 %vm2263_vm0, %v2262_v3 }
 0x3d1   :  { %v243_v47 = vpop.f32.mrb[4].mxu1 }
 0x3d2   :  { %v244_v48 = vadd.f32 %v1949_v46, %v243_v47  ;;  %v2065_v49 = vpop.f32.mrb[5].mxu1 }
 0x3d3   :  { %v246_v50 = vpop.f32.mrb[6].mxu1 }
 0x3d4   :  { %250 = vst.msk [vmem:[#allocation2] sm:$0xff] %vm249_vm3, %v244_v48  ;;  %v2066_v51 = vpop.f32.mrb[7].mxu1 }
 0x3db   :  { %v2444_v52 = vld [vmem:[#allocation2] sm:$0xf]  ;;  %v2447_v54 = vld [vmem:[#allocation2 + $0x4] sm:$0xf] }
 0x3dc   :  { %v255_v53 = vld [vmem:[#allocation2] sm:$0xf]  ;;  %432 = vrot.lane.b32.xlu0 %v2444_v52, %s2264_s26  ;;  %v2451_v55 = vld [vmem:[#allocation2 + $0x4] sm:$0xf] }
 0x3dd   :  { %257 = vrot.lane.b32.xlu1 %v255_v53, %s2265_s27  ;;  %v2453_v56 = vld [vmem:[#allocation2] sm:$0xf]  ;;  %v2457_v57 = vld [vmem:[#allocation2 + $0x4] sm:$0xf] }
 0x3de   :  { %v2461_v58 = vld [vmem:[#allocation2] sm:$0xf]  ;;  %v2465_v59 = vld [vmem:[#allocation2 + $0x4] sm:$0xf] }
 0x3e0   :  { %1129 = vrot.lane.b32.xlu0 %v2447_v54, %s2264_s26 }
 0x3e1   :  { %434 = vrot.lane.b32.xlu1 %v2444_v52, %s2266_s7 }
 0x3e4   :  { %1304 = vrot.lane.b32.xlu0 %v2451_v55, %s2267_s28 }
 0x3e5   :  { %610 = vrot.lane.b32.xlu1 %v2453_v56, %s2268_s29 }
 0x3e8   :  { %1479 = vrot.lane.b32.xlu0 %v2457_v57, %s2269_s30 }
 0x3e9   :  { %608 = vrot.lane.b32.xlu1 %v2453_v56, %s2267_s28 }
 0x3ed   :  { %786 = vrot.lane.b32.xlu1 %v2461_v58, %s2270_s3 }
 0x3f1   :  { %784 = vrot.lane.b32.xlu1 %v2461_v58, %s2269_s30 }
 0x3f5   :  { %960 = vrot.lane.b32.xlu1 %v2465_v59, %s2265_s27 }
 0x3f9   :  { %1131 = vrot.lane.b32.xlu1 %v2447_v54, %s2266_s7 }
 0x3fd   :  { %1306 = vrot.lane.b32.xlu1 %v2451_v55, %s2268_s29 }
 0x401   :  { %1481 = vrot.lane.b32.xlu1 %v2457_v57, %s2270_s3 }
 0x405   :  { %349 = vrot.lane.b32.xlu1 %v255_v53, %s2271_s0 }
 0x44e   :  { %v433_v62 = vpop.permute.xlu0 %432 }
 0x44f   :  { %v258_v60 = vpop.permute.xlu1 %257 }
 0x450   :  { %2068 = vmatpush3.xpose.msk.msra.mxu0 %vm259_vm4, %v258_v60 }
 0x451   :  { %2072 = vmatprep.subr.mxu0 %v2262_v3 }
 0x452   :  { %v1130_v5 = vpop.permute.xlu0 %1129 }
 0x453   :  { %2070 = vmatmul.mubr.msk.f32.vlgmr.msra.gmra.mrb[4].mxu0 %vm259_vm4, %v255_v53  ;;  %v435_v61 = vpop.permute.xlu1 %434 }
 0x454   :  { %2078 = vmatpush3.xpose.msk.msra.mxu1 %vm259_vm4, %v435_v61  ;;  %2074 = vmatprep.mubr.msk.f32.mxu0 %vm2263_vm0, %v2262_v3 }
 0x455   :  { %2087 = vmatprep.subr.mxu1 %v2262_v3 }
 0x456   :  { %v1305_v8 = vpop.permute.xlu0 %1304 }
 0x457   :  { %2080 = vmatmul.mubr.msk.f32.vlgmr.msra.gmra.mrb[8].mxu1 %vm259_vm4, %v433_v62  ;;  %v611_v63 = vpop.permute.xlu1 %610 }
 0x458   :  { %2088 = vmatpush3.xpose.msk.msra.mxu1 %vm259_vm4, %v611_v63  ;;  %2089 = vmatprep.mubr.msk.f32.mxu1 %vm2263_vm0, %v2262_v3 }
 0x459   :  { %2097 = vmatprep.subr.mxu1 %v2262_v3 }
 0x45a   :  { %v1480_v10 = vpop.permute.xlu0 %1479 }
 0x45b   :  { %v609_v0 = vpop.permute.xlu1 %608 }
 0x45c   :  { %2090 = vmatmul.mubr.msk.f32.vlgmr.msra.gmra.mrb[10].mxu1 %vm259_vm4, %v609_v0 }
 0x45d   :  { %2099 = vmatprep.mubr.msk.f32.mxu1 %vm2263_vm0, %v2262_v3 }
 0x45f   :  { %v787_v1 = vpop.permute.xlu1 %786 }
 0x460   :  { %2098 = vmatpush3.xpose.msk.msra.mxu1 %vm259_vm4, %v787_v1 }
 0x461   :  { %2107 = vmatprep.subr.mxu1 %v2262_v3 }
 0x463   :  { %v785_v2 = vpop.permute.xlu1 %784 }
 0x464   :  { %2100 = vmatmul.mubr.msk.f32.vlgmr.msra.gmra.mrb[12].mxu1 %vm259_vm4, %v785_v2 }
 0x465   :  { %2109 = vmatprep.mubr.msk.f32.mxu1 %vm2263_vm0, %v2262_v3 }
 0x467   :  { %v961_v4 = vpop.permute.xlu1 %960 }
 0x468   :  { %2108 = vmatpush3.xpose.msk.msra.mxu1 %vm259_vm4, %v961_v4 }
 0x469   :  { %2117 = vmatprep.subr.mxu1 %v2262_v3 }
 0x46b   :  { %2110 = vmatmul.mubr.msk.f32.vlgmr.msra.gmra.mrb[14].mxu1 %vm259_vm4, %v2465_v59  ;;  %v1132_v6 = vpop.permute.xlu1 %1131 }
 0x46c   :  { %2118 = vmatpush3.xpose.msk.msra.mxu1 %vm259_vm4, %v1132_v6  ;;  %2119 = vmatprep.mubr.msk.f32.mxu1 %vm2263_vm0, %v2262_v3 }
 0x46d   :  { %2127 = vmatprep.subr.mxu1 %v2262_v3 }
 0x46f   :  { %2120 = vmatmul.mubr.msk.f32.vlgmr.msra.gmra.mrb[16].mxu1 %vm259_vm4, %v1130_v5  ;;  %v1307_v7 = vpop.permute.xlu1 %1306 }
 0x470   :  { %2128 = vmatpush3.xpose.msk.msra.mxu1 %vm259_vm4, %v1307_v7  ;;  %2129 = vmatprep.mubr.msk.f32.mxu1 %vm2263_vm0, %v2262_v3 }
 0x471   :  { %2137 = vmatprep.subr.mxu1 %v2262_v3 }
 0x473   :  { %2130 = vmatmul.mubr.msk.f32.vlgmr.msra.gmra.mrb[18].mxu1 %vm259_vm4, %v1305_v8  ;;  %v1482_v9 = vpop.permute.xlu1 %1481 }
 0x474   :  { %2138 = vmatpush3.xpose.msk.msra.mxu1 %vm259_vm4, %v1482_v9  ;;  %2139 = vmatprep.mubr.msk.f32.mxu1 %vm2263_vm0, %v2262_v3 }
 0x475   :  { %2147 = vmatprep.subr.bf16.mxu1 %v2262_v3 }
 0x477   :  { %2140 = vmatmul.mubr.msk.f32.vlgmr.msra.gmra.mrb[20].mxu1 %vm259_vm4, %v1480_v10  ;;  %v350_v11 = vpop.permute.xlu1 %349 }
 0x478   :  { %2073 = vmatpush3.msk.msra.mxu0 %vm355_vm5, %v350_v11  ;;  %2151 = vmatprep.mubr.msk.bf16.mxu1 %vm2263_vm0, %v2262_v3 }
 0x479   :  { %2082 = vmatprep.subr.mxu0 %v2262_v3 }
 0x526   :  { %v330_v15 = vpop.f32.mrb[4].mxu0 }
 0x527   :  { %v334_v17 = vmul.f32 0.35355338, %v330_v15  ;;  %v2071_v18 = vpop.f32.mrb[5].mxu0 }
 0x529   :  { %v336_v19 = vsel %vm2515_vm6, -inf, %v334_v17 }
 0x52a   :  { %v506_v20 = vpop.f32.mrb[8].mxu1  ;;  %v338_v21 = vsel %vm337_vm7, %v336_v19, -inf }
 0x52b   :  { %v510_v22 = vmul.f32 0.35355338, %v506_v20  ;;  %v2081_v23 = vpop.f32.mrb[9].mxu1  ;;  %339 = vmax.xlane.f32.xlu1 %v338_v21 }
 0x52d   :  { %v511_v24 = vsel %vm2515_vm6, -inf, %v510_v22 }
 0x52e   :  { %v512_v25 = vsel %vm337_vm7, %v511_v24, -inf }
 0x52f   :  { %513 = vmax.xlane.f32.xlu0 %v512_v25  ;;  %v682_v27 = vpop.f32.mrb[10].mxu1 }
 0x530   :  { %v686_v28 = vmul.f32 0.35355338, %v682_v27  ;;  %v2091_v29 = vpop.f32.mrb[11].mxu1 }
 0x532   :  { %v687_v30 = vsel %vm2515_vm6, -inf, %v686_v28 }
 0x533   :  { %v688_v31 = vsel %vm337_vm7, %v687_v30, -inf }
 0x534   :  { %689 = vmax.xlane.f32.xlu0 %v688_v31 }
 0x537   :  { %v858_v32 = vpop.f32.mrb[12].mxu1 }
 0x538   :  { %v862_v33 = vmul.f32 0.35355338, %v858_v32  ;;  %v2101_v34 = vpop.f32.mrb[13].mxu1 }
 0x53a   :  { %v863_v35 = vsel %vm2515_vm6, -inf, %v862_v33 }
 0x53b   :  { %v864_v36 = vsel %vm337_vm7, %v863_v35, -inf }
 0x53c   :  { %865 = vmax.xlane.f32.xlu1 %v864_v36 }
 0x53e   :  { %v1032_v37 = vpop.f32.mrb[14].mxu1 }
 0x53f   :  { %v1036_v38 = vmul.f32 0.35355338, %v1032_v37  ;;  %v2111_v39 = vpop.f32.mrb[15].mxu1 }
 0x541   :  { %v1037_v40 = vsel %vm2515_vm6, -inf, %v1036_v38 }
 0x542   :  { %v1203_v41 = vpop.f32.mrb[16].mxu1  ;;  %v1038_v42 = vsel %vm337_vm7, %v1037_v40, -inf }
 0x543   :  { %v1207_v43 = vmul.f32 0.35355338, %v1203_v41  ;;  %1039 = vmax.xlane.f32.xlu0 %v1038_v42  ;;  %v2121_v44 = vpop.f32.mrb[17].mxu1 }
 0x545   :  { %v1208_v45 = vsel %vm2515_vm6, -inf, %v1207_v43 }
 0x546   :  { %v1378_v46 = vpop.f32.mrb[18].mxu1  ;;  %v1209_v47 = vsel %vm337_vm7, %v1208_v45, -inf }
 0x547   :  { %v1382_v48 = vmul.f32 0.35355338, %v1378_v46  ;;  %v2131_v49 = vpop.f32.mrb[19].mxu1  ;;  %1210 = vmax.xlane.f32.xlu1 %v1209_v47 }
 0x549   :  { %v1383_v50 = vsel %vm2515_vm6, -inf, %v1382_v48 }
 0x54a   :  { %v1553_v51 = vpop.f32.mrb[20].mxu1  ;;  %v1384_v53 = vsel %vm337_vm7, %v1383_v50, -inf }
 0x54b   :  { %v1557_v60 = vmul.f32 0.35355338, %v1553_v51  ;;  %1385 = vmax.xlane.f32.xlu0 %v1384_v53  ;;  %v2141_v61 = vpop.f32.mrb[21].mxu1 }
 0x54d   :  { %v2542_v62 = vsel %vm2515_vm6, -inf, %v1557_v60 }
 0x54e   :  { %v1559_v63 = vsel %vm337_vm7, %v2542_v62, -inf }
 0x558   :  { %699 = vrot.lane.b32.xlu1 %v2453_v56, %s2272_s19 }
 0x561   :  { %523 = vrot.lane.b32.xlu0 %v2444_v52, %s2273_s1 }
 0x57c   :  { %1560 = vmax.xlane.f32.xlu1 %v1559_v63 }
 0x58d   :  { %875 = vrot.lane.b32.xlu1 %v2461_v58, %s2274_s4 }
 0x5b8   :  { %v340_v0 = vpop.xlane.xlu1 %339 }
 0x5b9   :  { %v341_v1 = vsub.f32 %v336_v19, %v340_v0 }
 0x5bb   :  { %v342_v2 = vmul.f32 1.442695, %v341_v1 }
 0x5bc   :  { %v514_v4 = vpop.xlane.xlu0 %513 }
 0x5bd   :  { %2198 = vpow2.f32 %v342_v2  ;;  %v515_v5 = vsub.f32 %v511_v24, %v514_v4 }
 0x5bf   :  { %v516_v6 = vmul.f32 1.442695, %v515_v5 }
 0x5c1   :  { %2200 = vpow2.f32 %v516_v6  ;;  %v690_v56 = vpop.xlane.xlu0 %689 }
 0x5c2   :  { %v691_v7 = vsub.f32 %v687_v30, %v690_v56 }
 0x5c4   :  { %v692_v8 = vmul.f32 1.442695, %v691_v7 }
 0x5c6   :  { %2202 = vpow2.f32 %v692_v8 }
 0x5c7   :  { %v2199_v52 = vpop.eup %2198 }
 0x5c8   :  { %v344_v9 = vsel %vm337_vm7, %v2199_v52, 0.0 }
 0x5c9   :  { %345 = vadd.xlane.f32.xlu0 %v344_v9  ;;  %v866_v13 = vpop.xlane.xlu1 %865 }
 0x5ca   :  { %v867_v14 = vsub.f32 %v863_v35, %v866_v13 }
 0x5cb   :  { %v2201_v10 = vpop.eup %2200 }
 0x5cc   :  { %v518_v11 = vsel %vm337_vm7, %v2201_v10, 0.0  ;;  %v868_v17 = vmul.f32 1.442695, %v867_v14 }
 0x5cd   :  { %519 = vadd.xlane.f32.xlu1 %v518_v11 }
 0x5ce   :  { %2204 = vpow2.f32 %v868_v17 }
 0x5d0   :  { %v2553_v58 = vpop.eup %2202  ;;  %v1040_v16 = vpop.xlane.xlu0 %1039 }
 0x5d1   :  { %v694_v12 = vsel %vm337_vm7, %v2553_v58, 0.0  ;;  %v1041_v19 = vsub.f32 %v1037_v40, %v1040_v16 }
 0x5d2   :  { %695 = vadd.xlane.f32.xlu0 %v694_v12 }
 0x5d3   :  { %v1042_v22 = vmul.f32 1.442695, %v1041_v19  ;;  %v1654_v19 = vld [vmem:[%s2730_s8] sm:$0xff] }
 0x5d4   :  { %v1211_v15 = vpop.xlane.xlu1 %1210 }
 0x5d5   :  { %v1212_v18 = vsub.f32 %v1208_v45, %v1211_v15 }
 0x5d7   :  { %v1213_v21 = vmul.f32 1.442695, %v1212_v18 }
 0x5d8   :  { %v1386_v20 = vpop.xlane.xlu0 %1385  ;;  %v2205_v25 = vpop.eup %2204 }
 0x5d9   :  { %v1387_v23 = vsub.f32 %v1383_v50, %v1386_v20  ;;  %2206 = vpow2.f32 %v1213_v21  ;;  %v700_v28 = vpop.permute.xlu1 %699  ;;  %v1655_v20 = vld [vmem:[%s2730_s8 + $0x8] sm:$0xff]  ;;  %v1656_v21 = vld [vmem:[%s2730_s8 + $0x10] sm:$0xff] }
 0x5da   :  { %2208 = vpow2.f32 %v1042_v22 }
 0x5db   :  { %v1388_v24 = vmul.f32 1.442695, %v1387_v23  ;;  %v1658_v23 = vpack.c.bf16 %v1655_v20, %v1654_v19 }
 0x5dc   :  { %v524_v38 = vpop.permute.xlu0 %523 }
 0x5dd   :  { %2210 = vpow2.f32 %v1388_v24  ;;  %v1657_v24 = vld [vmem:[%s2730_s8 + $0x18] sm:$0xff]  ;;  %2148 = vmatpush3.bf16.msra.mxu1 %v1658_v23 }
 0x5de   :  { %1049 = vrot.lane.b32.xlu1 %v2465_v59, %s2271_s0  ;;  %v870_v59 = vsel %vm337_vm7, %v2205_v25, 0.0  ;;  %2149 = vmatprep.subr.bf16.mxu1 %v2262_v3 }
 0x5e8   :  { %1220 = vrot.lane.b32.xlu0 %v2447_v54, %s2273_s1  ;;  %v2561_v54 = vpop.eup %2206 }
 0x5e9   :  { %v2209_v27 = vpop.eup %2208  ;;  %v1215_v29 = vsel %vm337_vm7, %v2561_v54, 0.0 }
 0x5ea   :  { %v1044_v30 = vsel %vm337_vm7, %v2209_v27, 0.0  ;;  %v2566_v31 = vpop.eup %2210 }
 0x5eb   :  { %v1390_v34 = vsel %vm337_vm7, %v2566_v31, 0.0 }
 0x602   :  { %871 = vadd.xlane.f32.xlu1 %v870_v59  ;;  %v1659_v59 = vpack.c.bf16 %v1657_v24, %v1656_v21 }
 0x604   :  { %2150 = vmatpush3.bf16.msra.mxu1 %v1659_v59 }
 0x605   :  { %2163 = vmatprep.subr.bf16.mxu1 %v2262_v3 }
 0x606   :  { %1216 = vadd.xlane.f32.xlu1 %v1215_v29 }
 0x607   :  { %1045 = vadd.xlane.f32.xlu0 %v1044_v30 }
 0x609   :  { %v1561_v32 = vpop.xlane.xlu1 %1560 }
 0x60a   :  { %v1562_v33 = vsub.f32 %v2542_v62, %v1561_v32 }
 0x60b   :  { %1391 = vadd.xlane.f32.xlu0 %v1390_v34 }
 0x60c   :  { %v1563_v35 = vmul.f32 1.442695, %v1562_v33 }
 0x60d   :  { %v876_v39 = vpop.permute.xlu1 %875 }
 0x60e   :  { %2212 = vpow2.f32 %v1563_v35 }
 0x617   :  { %1395 = vrot.lane.b32.xlu1 %v2451_v55, %s2272_s19 }
 0x618   :  { %v2573_v36 = vpop.eup %2212 }
 0x619   :  { %v1565_v37 = vsel %vm337_vm7, %v2573_v36, 0.0 }
 0x61a   :  { %1566 = vadd.xlane.f32.xlu0 %v1565_v37 }
 0x630   :  { %1570 = vrot.lane.b32.xlu0 %v2457_v57, %s2274_s4 }
 0x656   :  { %v346_v40 = vpop.xlane.xlu0 %345 }
 0x657   :  { %2214 = vrcp.f32 %v346_v40 }
 0x65a   :  { %v520_v41 = vpop.xlane.xlu1 %519 }
 0x65b   :  { %2216 = vrcp.f32 %v520_v41 }
 0x65e   :  { %v1050_v47 = vpop.permute.xlu1 %1049 }
 0x65f   :  { %v696_v42 = vpop.xlane.xlu0 %695 }
 0x660   :  { %2218 = vrcp.f32 %v696_v42 }
 0x661   :  { %v2215_v43 = vpop.eup %2214 }
 0x662   :  { %v348_v55 = vmul.f32 %v2215_v43, %v2199_v52 }
 0x663   :  { %v1221_v49 = vpop.permute.xlu0 %1220 }
 0x664   :  { %2075 = vmatmul.mubr.msk.f32.vlgmr.msra.gmra.mrb[6].mxu0 %vm351_vm8, %v348_v55 }
 0x665   :  { %v2217_v44 = vpop.eup %2216  ;;  %2083 = vmatpush3.msk.msra.mxu0 %vm355_vm5, %v524_v38  ;;  %2084 = vmatprep.mubr.msk.f32.mxu0 %vm2263_vm0, %v2262_v3 }
 0x666   :  { %v522_v57 = vmul.f32 %v2217_v44, %v2201_v10  ;;  %2092 = vmatprep.subr.mxu0 %v2262_v3 }
 0x668   :  { %2085 = vmatmul.mubr.msk.f32.vlgmr.msra.gmra.mrb[8].mxu0 %vm351_vm8, %v522_v57 }
 0x669   :  { %2093 = vmatpush3.msk.msra.mxu0 %vm355_vm5, %v700_v28  ;;  %2094 = vmatprep.mubr.msk.f32.mxu0 %vm2263_vm0, %v2262_v3 }
 0x66a   :  { %v2219_v45 = vpop.eup %2218  ;;  %2102 = vmatprep.subr.mxu0 %v2262_v3 }
 0x66b   :  { %v698_v46 = vmul.f32 %v2219_v45, %v2553_v58 }
 0x66d   :  { %2095 = vmatmul.mubr.msk.f32.vlgmr.msra.gmra.mrb[10].mxu0 %vm351_vm8, %v698_v46  ;;  %v1985_v46 = vld [vmem:[%s2736_s14] ss:$0 sm:$0xff]  ;;  %s2278_s14 = smov [#allocation4]  }
 0x66e   :  { %2103 = vmatpush3.msk.msra.mxu0 %vm355_vm5, %v876_v39  ;;  %2104 = vmatprep.mubr.msk.f32.mxu0 %vm2263_vm0, %v2262_v3  ;;  %s1937_s19 = sshll.u32 %s2278_s14, 4  ;;  %s1938_s19 = int_to_ptr.vmem [resolvable:$true] %s1937_s19 }
 0x66f   :  { %2112 = vmatprep.subr.mxu0 %v2262_v3  ;;  %p2243_p1 = scmp.lt.s32.totalorder %s1938_s19, %s1938_s19 }
 0x68f   :  { %v872_v48 = vpop.xlane.xlu1 %871 }
 0x690   :  { %2220 = vrcp.f32 %v872_v48 }
 0x693   :  { %v1217_v50 = vpop.xlane.xlu1 %1216 }
 0x694   :  { %v1046_v51 = vpop.xlane.xlu0 %1045 }
 0x695   :  { %2222 = vrcp.f32 %v1046_v51 }
 0x696   :  { %2224 = vrcp.f32 %v1217_v50 }
 0x697   :  { %v1396_v4 = vpop.permute.xlu1 %1395 }
 0x698   :  { %v1392_v53 = vpop.xlane.xlu0 %1391 }
 0x699   :  { %2226 = vrcp.f32 %v1392_v53  ;;  %v1735_v53 = vld [vmem:[%s2732_s10] sm:$0xff] }
 0x69a   :  { %v2221_v60 = vpop.eup %2220 }
 0x69b   :  { %v874_v61 = vmul.f32 %v2221_v60, %v2205_v25  ;;  %v1736_v60 = vld [vmem:[%s2732_s10 + $0x8] sm:$0xff] }
 0x69d   :  { %2105 = vmatmul.mubr.msk.f32.vlgmr.msra.gmra.mrb[12].mxu0 %vm351_vm8, %v874_v61  ;;  %v1739_v61 = vpack.c.bf16 %v1736_v60, %v1735_v53 }
 0x69e   :  { %2113 = vmatpush3.msk.msra.mxu0 %vm355_vm5, %v1050_v47  ;;  %2114 = vmatprep.mubr.msk.f32.mxu0 %vm2263_vm0, %v2262_v3 }
 0x69f   :  { %v2223_v62 = vpop.eup %2222  ;;  %2122 = vmatprep.subr.mxu0 %v2262_v3 }
 0x6a0   :  { %v1048_v63 = vmul.f32 %v2223_v62, %v2209_v27  ;;  %v2225_v0 = vpop.eup %2224  ;;  %v1738_v62 = vld [vmem:[%s2732_s10 + $0x18] sm:$0xff] }
 0x6a1   :  { %v1219_v1 = vmul.f32 %v2225_v0, %v2561_v54 }
 0x6a2   :  { %2115 = vmatmul.mubr.msk.f32.vlgmr.msra.gmra.mrb[14].mxu0 %vm351_vm8, %v1048_v63 }
 0x6a3   :  { %2123 = vmatpush3.msk.msra.mxu0 %vm355_vm5, %v1221_v49  ;;  %2124 = vmatprep.mubr.msk.f32.mxu0 %vm2263_vm0, %v2262_v3  ;;  %v2227_v2 = vpop.eup %2226 }
 0x6a4   :  { %2132 = vmatprep.subr.mxu0 %v2262_v3  ;;  %v1394_v6 = vmul.f32 %v2227_v2, %v2566_v31 }
 0x6a6   :  { %2125 = vmatmul.mubr.msk.f32.vlgmr.msra.gmra.mrb[16].mxu0 %vm351_vm8, %v1219_v1 }
 0x6a7   :  { %2133 = vmatpush3.msk.msra.mxu0 %vm355_vm5, %v1396_v4  ;;  %v1567_v5 = vpop.xlane.xlu0 %1566  ;;  %2134 = vmatprep.mubr.msk.f32.mxu0 %vm2263_vm0, %v2262_v3 }
 0x6a8   :  { %2228 = vrcp.f32 %v1567_v5  ;;  %2142 = vmatprep.subr.mxu0 %v2262_v3 }
 0x6aa   :  { %2135 = vmatmul.mubr.msk.f32.vlgmr.msra.gmra.mrb[18].mxu0 %vm351_vm8, %v1394_v6  ;;  %v1793_v6 = vld [vmem:[%s2734_s12] sm:$0xff] }
 0x6ab   :  { %v1571_v56 = vpop.permute.xlu0 %1570  ;;  %2144 = vmatprep.mubr.msk.f32.mxu0 %vm2263_vm0, %v2262_v3 }
 0x6ac   :  { %2143 = vmatpush3.msk.msra.mxu0 %vm355_vm5, %v1571_v56  ;;  %v1794_v56 = vld [vmem:[%s2734_s12 + $0x8] sm:$0xff] }
 0x6ad   :  { %2155 = vmatprep.subr.bf16.mxu0 %v2262_v3 }
 0x6b2   :  { %v2229_v7 = vpop.eup %2228 }
 0x6b3   :  { %v1569_v8 = vmul.f32 %v2229_v7, %v2573_v36  ;;  %v1983_v36 = vld [vmem:[%s2731_s9] ss:$0 sm:$0xff]  ;;  %v1797_v7 = vpack.c.bf16 %v1794_v56, %v1793_v6 }
 0x6b5   :  { %2145 = vmatmul.mubr.msk.f32.vlgmr.msra.gmra.mrb[20].mxu0 %vm351_vm8, %v1569_v8  ;;  %v1795_v8 = vld [vmem:[%s2734_s12 + $0x10] sm:$0xff] }
 0x6b6   :  { %2159 = vmatprep.mubr.msk.bf16.mxu0 %vm2263_vm0, %v2262_v3  ;;  %2156 = vmatpush3.bf16.msra.mxu0 %v1739_v61 }
 0x6b7   :  { %2157 = vmatprep.subr.bf16.mxu0 %v2262_v3 }
 0x737   :  { %v424_v52 = vpop.f32.mrb[6].mxu0 }
 0x738   :  { %429 = vst.msk [vmem:[#allocation3] sm:$0xf] %vm428_vm9, %v424_v52  ;;  %v2076_v9 = vpop.f32.mrb[7].mxu0  ;;  %v1796_v52 = vld [vmem:[%s2734_s12 + $0x18] sm:$0xff] }
 0x739   :  { %v1798_v9 = vpack.c.bf16 %v1796_v52, %v1795_v8 }
 0x73b   :  { %v596_v10 = vpop.f32.mrb[8].mxu0 }
 0x73c   :  { %601 = vrot.lane.b32.xlu1 %v596_v10, %s2275_s5  ;;  %v2086_v11 = vpop.f32.mrb[9].mxu0  ;;  %v1986_v10 = vld [vmem:[%s2733_s11] ss:$0 sm:$0xff] }
 0x740   :  { %v772_v58 = vpop.f32.mrb[10].mxu0 }
 0x741   :  { %777 = vrot.lane.b32.xlu1 %v772_v58, %s2276_s20  ;;  %v2096_v12 = vpop.f32.mrb[11].mxu0 }
 0x770   :  { %v948_v13 = vpop.f32.mrb[12].mxu0 }
 0x771   :  { %953 = vrot.lane.b32.xlu1 %v948_v13, %s2277_s21  ;;  %v2106_v14 = vpop.f32.mrb[13].mxu0 }
 0x775   :  { %v1122_v15 = vpop.f32.mrb[14].mxu0 }
 0x776   :  { %1126 = vst.msk [vmem:[#allocation3 + $0x4] sm:$0xf] %vm428_vm9, %v1122_v15  ;;  %v2116_v16 = vpop.f32.mrb[15].mxu0 }
 0x779   :  { %v1293_v17 = vpop.f32.mrb[16].mxu0 }
 0x77a   :  { %1298 = vrot.lane.b32.xlu0 %v1293_v17, %s2275_s5  ;;  %v2126_v18 = vpop.f32.mrb[17].mxu0  ;;  %v1988_v17 = vld [vmem:[%s2735_s13] ss:$0 sm:$0xff] }
 0x77d   :  { %v1468_v22 = vpop.f32.mrb[18].mxu0 }
 0x77e   :  { %1473 = vrot.lane.b32.xlu0 %v1468_v22, %s2276_s20  ;;  %v2136_v25 = vpop.f32.mrb[19].mxu0 }
 0x788   :  { %v1643_v54 = vpop.f32.mrb[20].mxu0 }
 0x789   :  { %1648 = vrot.lane.b32.xlu0 %v1643_v54, %s2277_s21  ;;  %v2146_v27 = vpop.f32.mrb[21].mxu0 }
 0x7ae   :  { %v602_v28 = vpop.permute.xlu1 %601 }
 0x7af   :  { %605 = vst.msk [vmem:[#allocation3] sm:$0xf] %vm604_vm10, %v602_v28  ;;  %v1990_v28 = vld [vmem:[%s2737_s15] ss:$0 sm:$0xff] }
 0x7b3   :  { %v778_v29 = vpop.permute.xlu1 %777 }
 0x7b4   :  { %781 = vst.msk [vmem:[#allocation3] sm:$0xf] %vm780_vm11, %v778_v29 }
 0x7e3   :  { %v954_v30 = vpop.permute.xlu1 %953 }
 0x7e4   :  { %957 = vst.msk [vmem:[#allocation3] sm:$0xf] %vm956_vm12, %v954_v30 }
 0x7ec   :  { %v1299_v31 = vpop.permute.xlu0 %1298 }
 0x7ed   :  { %1301 = vst.msk [vmem:[#allocation3 + $0x4] sm:$0xf] %vm604_vm10, %v1299_v31 }
 0x7f0   :  { %v1474_v32 = vpop.permute.xlu0 %1473 }
 0x7f1   :  { %1476 = vst.msk [vmem:[#allocation3 + $0x4] sm:$0xf] %vm780_vm11, %v1474_v32 }
 0x7fb   :  { %v1649_v33 = vpop.permute.xlu0 %1648 }
 0x7fc   :  { %1651 = vst.msk [vmem:[#allocation3 + $0x4] sm:$0xf] %vm956_vm12, %v1649_v33 }
 0x803   :  { %v1652_v34 = vld [vmem:[#allocation3] sm:$0xff] }
 0x804   :  { %v1653_v35 = vpack.c.bf16 %v1652_v34, %v1652_v34  ;;  %v1874_v34 = vld [vmem:[%s2738_s16] sm:$0xff] }
 0x806   :  { %2152 = vmatmul.mubr.msk.bf16.vlgmr.msra.gmra.mrb[24].mxu1 %vm76_vm1, %v1653_v35  ;;  %v1875_v35 = vld [vmem:[%s2738_s16 + $0x8] sm:$0xff] }
 0x807   :  { %2167 = vmatprep.mubr.msk.bf16.mxu1 %vm2263_vm0, %v2262_v3  ;;  %2164 = vmatpush3.bf16.msra.mxu1 %v1797_v7 }
 0x808   :  { %2165 = vmatprep.subr.bf16.mxu1 %v2262_v3 }
 0x80b   :  { %2166 = vmatpush3.bf16.msra.mxu1 %v1798_v9 }
 0x8d9   :  { %v1704_v37 = vpop.f32.mrb[24].mxu1 }
 0x8da   :  { %v1705_v38 = vadd.f32 %v1983_v36, %v1704_v37  ;;  %v2153_v39 = vpop.f32.mrb[25].mxu1  ;;  %v1878_v36 = vpack.c.bf16 %v1875_v35, %v1874_v34  ;;  %v1876_v37 = vld [vmem:[%s2738_s16 + $0x10] sm:$0xff] }
 0x8db   :  { %v1707_v40 = vpop.f32.mrb[26].mxu1 }
 0x8dc   :  { %v2154_v41 = vpop.f32.mrb[27].mxu1  ;;  %v1710_v42 = vmul.f32 %v1705_v38, %v1705_v38 }
 0x8de   :  { %v1711_v43 = vsel %vm76_vm1, %v1710_v42, 0.0 }
 0x8df   :  { %1712 = vadd.xlane.f32.xlu1 %v1711_v43 }
 0x96c   :  { %v1713_v55 = vpop.xlane.xlu1 %1712 }
 0x96d   :  { %v1714_v44 = vadd.f32 1e-12, %v1713_v55 }
 0x96f   :  { %2230 = vrsqrt.f32 %v1714_v44 }
 0x979   :  { %v2231_v57 = vpop.eup %2230 }
 0x97a   :  { %v1716_v45 = vmul.f32 %v2231_v57, %v1705_v38  ;;  %v1877_v38 = vld [vmem:[%s2738_s16 + $0x18] sm:$0xff]  ;;  %s2238_s16 = scalar_lea.vmem %s1938_s19, 128 }
 0x97b   :  { %v1879_v39 = vpack.c.bf16 %v1877_v38, %v1876_v37  ;;  %p2239_p0 = scmp.ne.s32.totalorder %s1938_s19, %s2238_s16  ;;  %p2244_p2 = scmp.lt.s32.totalorder %s2238_s16, %s2238_s16 }
 0x97c   :  { %v1718_v47 = vsub.f32 %v1716_v45, %v2418_v26 }
 0x97d   :  { %p2245_p3 = por %p2244_p2, %p2243_p1 }
 0x97e   :  { %v1725_v48 = vmul.f32 %v1985_v46, %v1718_v47 }
 0x97f   :  { %p2246_p4 = pnand %p2245_p3, %p2239_p0 }
 0x980   :  { %v1726_v49 = vadd.f32 %v1725_v48, %v2418_v26  ;;  %v1737_v26 = vld [vmem:[%s2732_s10 + $0x10] sm:$0xff] }
 0x981   :  { %v1740_v63 = vpack.c.bf16 %v1738_v62, %v1737_v26 }
 0x982   :  { %v1727_v50 = vmul.f32 %v1726_v49, %v1726_v49 }
 0x983   :  { %2158 = vmatpush3.bf16.msra.mxu0 %v1740_v63 }
 0x984   :  { %v1728_v51 = vsel %vm76_vm1, %v1727_v50, 0.0  ;;  %2171 = vmatprep.subr.bf16.mxu0 %v2262_v3 }
 0x985   :  { %1729 = vadd.xlane.f32.xlu0 %v1728_v51 }
 0xa12   :  { %v1730_v0 = vpop.xlane.xlu0 %1729 }
 0xa13   :  { %v1731_v1 = vadd.f32 1e-12, %v1730_v0 }
 0xa15   :  { %2232 = vrsqrt.f32 %v1731_v1 }
 0xa1f   :  { %v2233_v2 = vpop.eup %2232 }
 0xa20   :  { %v1733_v4 = vmul.f32 %v2233_v2, %v1726_v49 }
 0xa22   :  { %v1734_v5 = vpack.c.bf16 %v1733_v4, %v1733_v4 }
 0xa24   :  { %2160 = vmatmul.mubr.msk.bf16.vlgmr.msra.gmra.mrb[24].mxu0 %vm76_vm1, %v1734_v5 }
 0xa25   :  { %2175 = vmatprep.mubr.msk.bf16.mxu0 %vm2263_vm0, %v2262_v3  ;;  %2172 = vmatpush3.bf16.msra.mxu0 %v1878_v36 }
 0xa26   :  { %2173 = vmatprep.subr.bf16.mxu0 %v2262_v3  ;;  %v1991_v3 = vld [vmem:[%s2739_s17] ss:$0 sm:$0xff] }
 0xa29   :  { %2174 = vmatpush3.bf16.msra.mxu0 %v1879_v39 }
 0xaf7   :  { %v1785_v11 = vpop.f32.mrb[24].mxu0 }
 0xaf8   :  { %v1786_v58 = vadd.f32 %v1986_v10, %v1785_v11  ;;  %v2161_v12 = vpop.f32.mrb[25].mxu0 }
 0xaf9   :  { %v1788_v13 = vpop.f32.mrb[26].mxu0 }
 0xafa   :  { %v1791_v14 = vmax.f32 %v1786_v58, 0.0  ;;  %v2162_v15 = vpop.f32.mrb[27].mxu0 }
 0xafc   :  { %v1792_v16 = vpack.c.bf16 %v1791_v14, %v1791_v14 }
 0xafe   :  { %2168 = vmatmul.mubr.msk.bf16.vlgmr.msra.gmra.mrb[28].mxu1 %vm76_vm1, %v1792_v16 }
 0xbd1   :  { %v1843_v18 = vpop.f32.mrb[28].mxu1 }
 0xbd2   :  { %v1844_v19 = vadd.f32 %v1988_v17, %v1843_v18  ;;  %v2169_v20 = vpop.f32.mrb[29].mxu1 }
 0xbd3   :  { %v1846_v21 = vpop.f32.mrb[30].mxu1 }
 0xbd4   :  { %v2170_v22 = vpop.f32.mrb[31].mxu1  ;;  %v1849_v23 = vmul.f32 %v1844_v19, %v1844_v19 }
 0xbd6   :  { %v1850_v24 = vsel %vm76_vm1, %v1849_v23, 0.0 }
 0xbd7   :  { %1851 = vadd.xlane.f32.xlu0 %v1850_v24 }
 0xc64   :  { %v1852_v25 = vpop.xlane.xlu0 %1851 }
 0xc65   :  { %v1853_v59 = vadd.f32 1e-12, %v1852_v25 }
 0xc67   :  { %2234 = vrsqrt.f32 %v1853_v59 }
 0xc71   :  { %v2235_v54 = vpop.eup %2234 }
 0xc72   :  { %v1855_v27 = vmul.f32 %v2235_v54, %v1844_v19 }
 0xc74   :  { %v1857_v29 = vsub.f32 %v1855_v27, %v1733_v4 }
 0xc76   :  { %v1864_v30 = vmul.f32 %v1990_v28, %v1857_v29 }
 0xc78   :  { %v1865_v31 = vadd.f32 %v1864_v30, %v1733_v4 }
 0xc7a   :  { %v1866_v32 = vmul.f32 %v1865_v31, %v1865_v31 }
 0xc7c   :  { %v1867_v33 = vsel %vm76_vm1, %v1866_v32, 0.0 }
 0xc7d   :  { %1868 = vadd.xlane.f32.xlu1 %v1867_v33 }
 0xd0a   :  { %v1869_v40 = vpop.xlane.xlu1 %1868 }
 0xd0b   :  { %v1870_v41 = vadd.f32 1e-12, %v1869_v40 }
 0xd0d   :  { %2236 = vrsqrt.f32 %v1870_v41 }
 0xd17   :  { %v2237_v42 = vpop.eup %2236 }
 0xd18   :  { %v1872_v43 = vmul.f32 %v2237_v42, %v1865_v31 }
 0xd1a   :  { %v1873_v55 = vpack.c.bf16 %v1872_v43, %v1872_v43 }
 0xd1c   :  { %2176 = vmatmul.mubr.msk.bf16.vlgmr.msra.gmra.mrb[28].mxu0 %vm76_vm1, %v1873_v55 }
 0xdef   :  { %v1924_v44 = vpop.f32.mrb[28].mxu0 }
 0xdf0   :  { %v1925_v57 = vadd.f32 %v1991_v3, %v1924_v44  ;;  %v2177_v45 = vpop.f32.mrb[29].mxu0 }
 0xdf1   :  { %v1927_v46 = vpop.f32.mrb[30].mxu0 }
 0xdf2   :  { %1930 = vst.msk [vmem:[#allocation4] sm:$0xff] %vm259_vm4, %v1925_v57  ;;  %v2178_v47 = vpop.f32.mrb[31].mxu0 }
 0xdf3   :  { %2249 = shalt.err (!%p2246_p4)
}
 0xdf4   :  { %s2250_s17 = scalar_lea.hbm %s2740_s18, 128 }
 0xdf5   :  { %p2251_p5 = scmp.ne.s32.totalorder %s2740_s18, %s2250_s17  ;;  %p2254_p6 = scmp.lt.u32.totalorder %s2250_s17, %s2740_s18 }
 0xdf7   :  { %p2256_p7 = pnand %p2254_p6, %p2251_p5 }
 0xdf9   :  { %2259 = shalt.err (!%p2256_p7)
}
 0xdfa   :  { %1940 = dma.vmem_to_hbm [thread:$0]  %s1938_s19, 128, %s2740_s18, [#allocation5]  }
 0xdfb   :  { %2260 = dma.done.wait [#allocation5], 128  }
 0xdfc   :  { %2261 = vsyncadd [#allocation5], 4294967168 }
 0xdfd   :  { %1944 = vsyncpa [#allocation5], 1 }

</bundles_post_ra>
